<compile_context>
chip_gen: v5e
topology: v5e:2x2
jax: 0.10.0
libtpu: 0.0.40
codegen_flags: <defaults>
</compile_context>

<pallas_src>
import functools
import math

import jax
import jax.numpy as jnp
from jax import lax
from jax.experimental import pallas as pl
from jax.experimental.pallas import tpu as pltpu

LN_EPS = 1e-6
MASK_FILL = -1e9


def _layer_norm(r, gamma, beta):
    # MCAN-style LayerNorm: gamma * (x - mean) / (std + eps) + beta, unbiased std.
    # TODO(synk): if the target model used nn.LayerNorm instead of MCAN's custom
    #             LayerNorm, switch to (x - mean) * rsqrt(var_biased + eps).
    mean = jnp.mean(r, axis=-1, keepdims=True)
    d = r - mean
    var = jnp.sum(d * d, axis=-1, keepdims=True) / (r.shape[-1] - 1)
    return gamma * d / (jnp.sqrt(var) + LN_EPS) + beta


# --------------------------------------------------------------------------- #
# Fused kernel: whole SGSGA block, one grid step, everything VMEM-resident.
# --------------------------------------------------------------------------- #
def sgsga_kernel(x_ref, y_ref, xb_ref, yb_ref,
                 wq_ref, wk_ref, wv_ref, wm_ref,
                 bq_ref, bk_ref, bv_ref, bm_ref,
                 w1_ref, b1_ref, w2_ref, b2_ref,
                 gamma_ref, beta_ref,
                 xo_ref, yo_ref,
                 *, num_heads, batch, sx, sy):
    hid = x_ref.shape[-1]
    dh = hid // num_heads
    scale = 1.0 / math.sqrt(dh)
    f32 = jnp.float32
    mm = wq_ref.dtype            # bf16 weights — MXU in bf16, accumulate in f32

    def dot(a, w):
        return jnp.dot(a.astype(mm), w, preferred_element_type=f32)

    def mhatt_ln(idx, ln_idx, q_in, kv_in, kbias_ref, sq, skv):
        # q_in: (batch*sq, H) f32 (also the residual); kv_in: (batch*skv, H) f32.
        wq, wk, wv, wm = wq_ref[idx], wk_ref[idx], wv_ref[idx], wm_ref[idx]
        # Batched projections over all rows: K=32 contractions (no per-batch dots).
        qp = dot(q_in, wq) + bq_ref[idx]
        kp = dot(kv_in, wk) + bk_ref[idx]
        vp = dot(kv_in, wv) + bv_ref[idx]

        ctx_batches = []
        for b in range(batch):                       # static unroll (batch is tiny)
            qb = qp[b * sq:(b + 1) * sq, :]
            kb = kp[b * skv:(b + 1) * skv, :]
            vb = vp[b * skv:(b + 1) * skv, :]
            kbias = kbias_ref[b]                     # (1, skv) additive -1e9 mask
            ctx_heads = []
            for h in range(num_heads):               # static unroll
                lo = h * dh
                s = lax.dot_general(
                    qb[:, lo:lo + dh].astype(mm), kb[:, lo:lo + dh].astype(mm),
                    (((1,), (1,)), ((), ())),
                    preferred_element_type=f32) * scale
                s = s + kbias                        # hoisted mask (broadcast add)
                s = s - jnp.max(s, axis=-1, keepdims=True)
                p = jnp.exp(s)
                p = p * pl.reciprocal(jnp.sum(p, axis=-1, keepdims=True), approx=True)
                # TODO(synk): attention dropout omitted (eval-mode identity).
                ctx_heads.append(
                    jnp.dot(p.astype(mm), vb[:, lo:lo + dh].astype(mm),
                            preferred_element_type=f32))           # (sq, dh)
            ctx_batches.append(jnp.concatenate(ctx_heads, axis=-1))  # (sq, H)
        ctx = jnp.concatenate(ctx_batches, axis=0)                   # (batch*sq, H)
        # Single K=32 merge dot (replaces 4 per-head K=8 dots + accumulate adds).
        atted = dot(ctx, wm) + bm_ref[idx]
        # TODO(synk): dropout1..4 omitted (eval-mode identity).
        return _layer_norm(q_in + atted, gamma_ref[ln_idx], beta_ref[ln_idx])

    def ffn_ln(idx, ln_idx, a_in):
        h = dot(a_in, w1_ref[idx]) + b1_ref[idx]
        h = jnp.maximum(h, 0.0)
        # TODO(synk): MLP dropout + dropout5/6 omitted (eval-mode identity).
        o = dot(h, w2_ref[idx]) + b2_ref[idx]
        return _layer_norm(a_in + o, gamma_ref[ln_idx], beta_ref[ln_idx])

    x_in = x_ref[...]            # (B*SX, H) f32
    y_in = y_ref[...]            # (B*SY, H) f32

    x1 = mhatt_ln(0, 0, x_in, x_in, xb_ref, sx, sx)   # self-attn x
    y1 = mhatt_ln(1, 1, y_in, y_in, yb_ref, sy, sy)   # self-attn y
    x2 = mhatt_ln(2, 2, x1, y1, yb_ref, sx, sy)       # cross: q=x1, k/v=y1
    y2 = mhatt_ln(3, 3, y1, x1, xb_ref, sy, sx)       # cross: q=y1, k/v=x1

    xo_ref[...] = ffn_ln(0, 4, x2).astype(xo_ref.dtype)
    yo_ref[...] = ffn_ln(1, 5, y2).astype(yo_ref.dtype)


# --------------------------------------------------------------------------- #
# Wrappers
# --------------------------------------------------------------------------- #
def prepare_params(params):
    """One-time packing: stack per-module weights, cast matmul weights to bf16."""
    att = [params["mhatt%d" % i] for i in range(1, 5)]
    ffn = [params["ffn%d" % i] for i in range(1, 3)]
    lns = [params["norm%d" % i] for i in range(1, 7)]
    H = att[0]["wq"].shape[0]
    F = ffn[0]["w1"].shape[1]
    bf = jnp.bfloat16
    return {
        "wq": jnp.stack([a["wq"] for a in att]).astype(bf),        # (4,H,H)
        "wk": jnp.stack([a["wk"] for a in att]).astype(bf),
        "wv": jnp.stack([a["wv"] for a in att]).astype(bf),
        "wm": jnp.stack([a["wm"] for a in att]).astype(bf),
        "bq": jnp.stack([a["bq"].reshape(1, H) for a in att]),     # (4,1,H) f32
        "bk": jnp.stack([a["bk"].reshape(1, H) for a in att]),
        "bv": jnp.stack([a["bv"].reshape(1, H) for a in att]),
        "bm": jnp.stack([a["bm"].reshape(1, H) for a in att]),
        "w1": jnp.stack([f["w1"] for f in ffn]).astype(bf),        # (2,H,F)
        "b1": jnp.stack([f["b1"].reshape(1, F) for f in ffn]),     # (2,1,F)
        "w2": jnp.stack([f["w2"] for f in ffn]).astype(bf),        # (2,F,H)
        "b2": jnp.stack([f["b2"].reshape(1, H) for f in ffn]),     # (2,1,H)
        "gamma": jnp.stack([l["gamma"].reshape(1, H) for l in lns]),  # (6,1,H)
        "beta": jnp.stack([l["beta"].reshape(1, H) for l in lns]),
    }


def sgsga_forward(pp, x, y, x_mask, y_mask, *, num_heads):
    """Fused SGSGA forward.  x:(B,SX,H), y:(B,SY,H); masks (B,S) bool (True=masked)."""
    B, SX, H = x.shape
    By, SY, Hy = y.shape
    assert B == By and H == Hy and H % num_heads == 0
    F = pp["w1"].shape[-1]
    dh = H // num_heads

    x2d = x.reshape(B * SX, H).astype(jnp.float32)
    y2d = y.reshape(B * SY, H).astype(jnp.float32)
    # Additive key-padding bias computed once (hoisted out of the kernel loops).
    xbias = jnp.where(x_mask, MASK_FILL, 0.0).astype(jnp.float32).reshape(B, 1, SX)
    ybias = jnp.where(y_mask, MASK_FILL, 0.0).astype(jnp.float32).reshape(B, 1, SY)

    rows_x, rows_y = B * SX, B * SY

    # Cost estimate (advisory).
    cfg = [(rows_x, rows_x, SX, SX), (rows_y, rows_y, SY, SY),
           (rows_x, rows_y, SX, SY), (rows_y, rows_x, SY, SX)]
    flops, trans = 0, 0
    for rq, rkv, sq, skv in cfg:
        flops += 2 * H * H * (2 * rq + 2 * rkv)        # q + merge, k + v projections
        flops += 4 * B * num_heads * sq * skv * dh     # scores + context
        trans += B * num_heads * sq * skv              # softmax exps
    flops += 4 * H * F * (rows_x + rows_y)             # the two FFNs
    weight_bytes = (2 * (16 * H * H + 4 * H * F)
                    + 4 * (16 * H + 2 * (F + H) + 12 * H))
    act_bytes = 4 * 2 * (rows_x + rows_y) * H + 4 * B * (SX + SY)
    cost = pl.CostEstimate(flops=int(flops), transcendentals=int(trans),
                           bytes_accessed=int(weight_bytes + act_bytes))

    # Whole block is a single resident step: guard against silently outgrowing
    # the smallest default scoped VMEM (v5e: 16 MiB).
    assert weight_bytes + 6 * act_bytes < 12 * 2 ** 20, (
        "fused SGSGA kernel assumes small, fully VMEM-resident shapes")

    def spec(shape):
        nd = len(shape)
        return pl.BlockSpec(shape, lambda i, nd=nd: (0,) * nd)

    operands = (x2d, y2d, xbias, ybias,
                pp["wq"], pp["wk"], pp["wv"], pp["wm"],
                pp["bq"], pp["bk"], pp["bv"], pp["bm"],
                pp["w1"], pp["b1"], pp["w2"], pp["b2"],
                pp["gamma"], pp["beta"])

    xo, yo = pl.pallas_call(
        functools.partial(sgsga_kernel, num_heads=num_heads, batch=B, sx=SX, sy=SY),
        out_shape=(jax.ShapeDtypeStruct((rows_x, H), x.dtype),
                   jax.ShapeDtypeStruct((rows_y, H), y.dtype)),
        grid_spec=pltpu.PrefetchScalarGridSpec(
            num_scalar_prefetch=0,
            grid=(1,),
            in_specs=[spec(o.shape) for o in operands],
            out_specs=[spec((rows_x, H)), spec((rows_y, H))],
        ),
        compiler_params=pltpu.CompilerParams(dimension_semantics=("arbitrary",)),
        cost_estimate=cost,
    )(*operands)
    return xo.reshape(B, SX, H), yo.reshape(B, SY, H)


# --------------------------------------------------------------------------- #
# Pure-JAX f32 reference (mirrors the PyTorch module in eval mode)
# --------------------------------------------------------------------------- #
def _mhatt_ref(att_p, ln_p, v, k, q, mask, num_heads):
    B, Sq, H = q.shape
    Skv = k.shape[1]
    dh = H // num_heads

    def heads(t, w, b, S):
        return (t @ w + b).reshape(B, S, num_heads, dh).transpose(0, 2, 1, 3)

    qh = heads(q, att_p["wq"], att_p["bq"], Sq)
    kh = heads(k, att_p["wk"], att_p["bk"], Skv)
    vh = heads(v, att_p["wv"], att_p["bv"], Skv)
    scores = (qh @ kh.transpose(0, 1, 3, 2)) / math.sqrt(dh)
    scores = jnp.where(mask[:, None, None, :], MASK_FILL, scores)
    att = jax.nn.softmax(scores, axis=-1)
    ctx = (att @ vh).transpose(0, 2, 1, 3).reshape(B, Sq, H)
    out = ctx @ att_p["wm"] + att_p["bm"]
    return _layer_norm(q + out, ln_p["gamma"], ln_p["beta"])


def _ffn_ref(ffn_p, ln_p, x):
    h = jnp.maximum(x @ ffn_p["w1"] + ffn_p["b1"], 0.0)
    y = h @ ffn_p["w2"] + ffn_p["b2"]
    return _layer_norm(x + y, ln_p["gamma"], ln_p["beta"])


def sgsga_reference(params, x, y, x_mask, y_mask, *, num_heads):
    x = _mhatt_ref(params["mhatt1"], params["norm1"], x, x, x, x_mask, num_heads)
    y = _mhatt_ref(params["mhatt2"], params["norm2"], y, y, y, y_mask, num_heads)
    x_ = _mhatt_ref(params["mhatt3"], params["norm3"], y, y, x, y_mask, num_heads)
    y_ = _mhatt_ref(params["mhatt4"], params["norm4"], x, x, y, x_mask, num_heads)
    x_ = _ffn_ref(params["ffn1"], params["norm5"], x_)
    y_ = _ffn_ref(params["ffn2"], params["norm6"], y_)
    return x_, y_


# --------------------------------------------------------------------------- #
# Parameter init (nn.Linear-style uniform fan-in init)
# --------------------------------------------------------------------------- #
def _init_linear(key, fan_in, fan_out):
    kw, kb = jax.random.split(key)
    bound = 1.0 / math.sqrt(fan_in)
    w = jax.random.uniform(kw, (fan_in, fan_out), jnp.float32, -bound, bound)
    b = jax.random.uniform(kb, (fan_out,), jnp.float32, -bound, bound)
    return w, b


def _init_mhatt(key, hidden):
    p = {}
    for name, kk in zip(("q", "k", "v", "m"), jax.random.split(key, 4)):
        w, b = _init_linear(kk, hidden, hidden)
        p["w" + name], p["b" + name] = w, b
    return p


def _init_ffn(key, hidden, ff):
    k1, k2 = jax.random.split(key)
    w1, b1 = _init_linear(k1, hidden, ff)
    w2, b2 = _init_linear(k2, ff, hidden)
    return {"w1": w1, "b1": b1, "w2": w2, "b2": b2}


def _init_norm(key, hidden):
    kg, kb = jax.random.split(key)
    return {"gamma": 1.0 + 0.1 * jax.random.normal(kg, (hidden,), jnp.float32),
            "beta": 0.1 * jax.random.normal(kb, (hidden,), jnp.float32)}


if __name__ == "__main__":
    # Config analogous to __C: HIDDEN_SIZE=32, MULTI_HEAD=4 (HIDDEN_SIZE_HEAD=8),
    # FF_SIZE=64, DROPOUT_R=0.1 (eval mode -> dropout is identity).
    HIDDEN_SIZE, FF_SIZE, MULTI_HEAD = 32, 64, 4
    B, SX, SY = 2, 8, 16

    root = jax.random.PRNGKey(0)
    kx, ky, kp = jax.random.split(root, 3)
    x = jax.random.normal(kx, (B, SX, HIDDEN_SIZE), jnp.float32)
    y = jax.random.normal(ky, (B, SY, HIDDEN_SIZE), jnp.float32)

    # Key-padding masks (True = masked position), as MCAN builds them.
    x_mask = jnp.zeros((B, SX), jnp.bool_).at[1, SX - 2:].set(True)
    y_mask = jnp.zeros((B, SY), jnp.bool_).at[0, SY - 3:].set(True)

    keys = jax.random.split(kp, 12)
    params = {
        "mhatt1": _init_mhatt(keys[0], HIDDEN_SIZE),
        "mhatt2": _init_mhatt(keys[1], HIDDEN_SIZE),
        "mhatt3": _init_mhatt(keys[2], HIDDEN_SIZE),
        "mhatt4": _init_mhatt(keys[3], HIDDEN_SIZE),
        "ffn1": _init_ffn(keys[4], HIDDEN_SIZE, FF_SIZE),
        "ffn2": _init_ffn(keys[5], HIDDEN_SIZE, FF_SIZE),
        "norm1": _init_norm(keys[6], HIDDEN_SIZE),
        "norm2": _init_norm(keys[7], HIDDEN_SIZE),
        "norm3": _init_norm(keys[8], HIDDEN_SIZE),
        "norm4": _init_norm(keys[9], HIDDEN_SIZE),
        "norm5": _init_norm(keys[10], HIDDEN_SIZE),
        "norm6": _init_norm(keys[11], HIDDEN_SIZE),
    }

    prepared = prepare_params(params)   # one-time bf16 cast + stacking

    x_out, y_out = sgsga_forward(prepared, x, y, x_mask, y_mask,
                                 num_heads=MULTI_HEAD)
    jax.block_until_ready((x_out, y_out))

    x_ref, y_ref = sgsga_reference(params, x, y, x_mask, y_mask,
                                   num_heads=MULTI_HEAD)

    assert x_out.shape == (B, SX, HIDDEN_SIZE) and y_out.shape == (B, SY, HIDDEN_SIZE)
    # bf16 MXU inputs + approx softmax reciprocal -> compare to the f32 reference
    # with a bf16-appropriate tolerance.
    dx = float(jnp.max(jnp.abs(x_out - x_ref)))
    dy = float(jnp.max(jnp.abs(y_out - y_ref)))
    assert dx < 5e-2 and dy < 5e-2, f"mismatch vs reference: dx={dx} dy={dy}"

    print("KERNEL_OK")
</pallas_src>

<mosaic_0001>
module attributes {stable_mosaic.version = 11 : i64} {
  func.func @sgsga_kernel(%arg0: i32, %arg1: memref<16x32xf32, #tpu.memory_space<vmem>>, %arg2: memref<32x32xf32, #tpu.memory_space<vmem>>, %arg3: memref<2x1x8xf32, #tpu.memory_space<vmem>>, %arg4: memref<2x1x16xf32, #tpu.memory_space<vmem>>, %arg5: memref<4x32x32xbf16, #tpu.memory_space<vmem>>, %arg6: memref<4x32x32xbf16, #tpu.memory_space<vmem>>, %arg7: memref<4x32x32xbf16, #tpu.memory_space<vmem>>, %arg8: memref<4x32x32xbf16, #tpu.memory_space<vmem>>, %arg9: memref<4x1x32xf32, #tpu.memory_space<vmem>>, %arg10: memref<4x1x32xf32, #tpu.memory_space<vmem>>, %arg11: memref<4x1x32xf32, #tpu.memory_space<vmem>>, %arg12: memref<4x1x32xf32, #tpu.memory_space<vmem>>, %arg13: memref<2x32x64xbf16, #tpu.memory_space<vmem>>, %arg14: memref<2x1x64xf32, #tpu.memory_space<vmem>>, %arg15: memref<2x64x32xbf16, #tpu.memory_space<vmem>>, %arg16: memref<2x1x32xf32, #tpu.memory_space<vmem>>, %arg17: memref<6x1x32xf32, #tpu.memory_space<vmem>>, %arg18: memref<6x1x32xf32, #tpu.memory_space<vmem>>, %arg19: memref<16x32xf32, #tpu.memory_space<vmem>>, %arg20: memref<32x32xf32, #tpu.memory_space<vmem>>) attributes {dimension_semantics = [#tpu.dimension_semantics<arbitrary>], iteration_bounds = array<i64: 1>, scalar_prefetch = 0 : i64, scratch_operands = 0 : i64, tpu.core_type = #tpu.core_type<tc>, window_params = [{pipeline_mode = #tpu.pipeline_mode<synchronous>, transform_indices = @transform_0, window_bounds = array<i64: 16, 32>}, {pipeline_mode = #tpu.pipeline_mode<synchronous>, transform_indices = @transform_1, window_bounds = array<i64: 32, 32>}, {pipeline_mode = #tpu.pipeline_mode<synchronous>, transform_indices = @transform_2, window_bounds = array<i64: 2, 1, 8>}, {pipeline_mode = #tpu.pipeline_mode<synchronous>, transform_indices = @transform_3, window_bounds = array<i64: 2, 1, 16>}, {pipeline_mode = #tpu.pipeline_mode<synchronous>, transform_indices = @transform_4, window_bounds = array<i64: 4, 32, 32>}, {pipeline_mode = #tpu.pipeline_mode<synchronous>, transform_indices = @transform_5, window_bounds = array<i64: 4, 32, 32>}, {pipeline_mode = #tpu.pipeline_mode<synchronous>, transform_indices = @transform_6, window_bounds = array<i64: 4, 32, 32>}, {pipeline_mode = #tpu.pipeline_mode<synchronous>, transform_indices = @transform_7, window_bounds = array<i64: 4, 32, 32>}, {pipeline_mode = #tpu.pipeline_mode<synchronous>, transform_indices = @transform_8, window_bounds = array<i64: 4, 1, 32>}, {pipeline_mode = #tpu.pipeline_mode<synchronous>, transform_indices = @transform_9, window_bounds = array<i64: 4, 1, 32>}, {pipeline_mode = #tpu.pipeline_mode<synchronous>, transform_indices = @transform_10, window_bounds = array<i64: 4, 1, 32>}, {pipeline_mode = #tpu.pipeline_mode<synchronous>, transform_indices = @transform_11, window_bounds = array<i64: 4, 1, 32>}, {pipeline_mode = #tpu.pipeline_mode<synchronous>, transform_indices = @transform_12, window_bounds = array<i64: 2, 32, 64>}, {pipeline_mode = #tpu.pipeline_mode<synchronous>, transform_indices = @transform_13, window_bounds = array<i64: 2, 1, 64>}, {pipeline_mode = #tpu.pipeline_mode<synchronous>, transform_indices = @transform_14, window_bounds = array<i64: 2, 64, 32>}, {pipeline_mode = #tpu.pipeline_mode<synchronous>, transform_indices = @transform_15, window_bounds = array<i64: 2, 1, 32>}, {pipeline_mode = #tpu.pipeline_mode<synchronous>, transform_indices = @transform_16, window_bounds = array<i64: 6, 1, 32>}, {pipeline_mode = #tpu.pipeline_mode<synchronous>, transform_indices = @transform_17, window_bounds = array<i64: 6, 1, 32>}, {pipeline_mode = #tpu.pipeline_mode<synchronous>, transform_indices = @transform_18, window_bounds = array<i64: 16, 32>}, {pipeline_mode = #tpu.pipeline_mode<synchronous>, transform_indices = @transform_19, window_bounds = array<i64: 32, 32>}]} {
    %c0 = arith.constant 0 : index
    %c0_0 = arith.constant 0 : index
    %0 = vector.load %arg1[%c0, %c0_0] : memref<16x32xf32, #tpu.memory_space<vmem>>, vector<16x32xf32>
    %c0_1 = arith.constant 0 : index
    %c0_2 = arith.constant 0 : index
    %1 = vector.load %arg2[%c0_1, %c0_2] : memref<32x32xf32, #tpu.memory_space<vmem>>, vector<32x32xf32>
    %c0_3 = arith.constant 0 : index
    %c0_4 = arith.constant 0 : index
    %c0_5 = arith.constant 0 : index
    %2 = vector.load %arg5[%c0_3, %c0_4, %c0_5] : memref<4x32x32xbf16, #tpu.memory_space<vmem>>, vector<1x32x32xbf16>
    %3 = vector.shape_cast %2 : vector<1x32x32xbf16> to vector<32x32xbf16>
    %c0_6 = arith.constant 0 : index
    %c0_7 = arith.constant 0 : index
    %c0_8 = arith.constant 0 : index
    %4 = vector.load %arg6[%c0_6, %c0_7, %c0_8] : memref<4x32x32xbf16, #tpu.memory_space<vmem>>, vector<1x32x32xbf16>
    %5 = vector.shape_cast %4 : vector<1x32x32xbf16> to vector<32x32xbf16>
    %c0_9 = arith.constant 0 : index
    %c0_10 = arith.constant 0 : index
    %c0_11 = arith.constant 0 : index
    %6 = vector.load %arg7[%c0_9, %c0_10, %c0_11] : memref<4x32x32xbf16, #tpu.memory_space<vmem>>, vector<1x32x32xbf16>
    %7 = vector.shape_cast %6 : vector<1x32x32xbf16> to vector<32x32xbf16>
    %c0_12 = arith.constant 0 : index
    %c0_13 = arith.constant 0 : index
    %c0_14 = arith.constant 0 : index
    %8 = vector.load %arg8[%c0_12, %c0_13, %c0_14] : memref<4x32x32xbf16, #tpu.memory_space<vmem>>, vector<1x32x32xbf16>
    %9 = vector.shape_cast %8 : vector<1x32x32xbf16> to vector<32x32xbf16>
    %10 = arith.truncf %0 : vector<16x32xf32> to vector<16x32xbf16>
    %cst = arith.constant dense<0.000000e+00> : vector<16x32xf32>
    %11 = tpu.matmul %10, %3, %cst {dimension_numbers = #tpu.dot_dimension_numbers<[1], [0], [0], [1], [0, 0, 1, 1], [], []>} : vector<16x32xbf16>, vector<32x32xbf16>, vector<16x32xf32> -> vector<16x32xf32>
    %c0_15 = arith.constant 0 : index
    %c0_16 = arith.constant 0 : index
    %c0_17 = arith.constant 0 : index
    %12 = vector.load %arg9[%c0_15, %c0_16, %c0_17] : memref<4x1x32xf32, #tpu.memory_space<vmem>>, vector<1x1x32xf32>
    %13 = vector.shape_cast %12 : vector<1x1x32xf32> to vector<1x32xf32>
    %14 = vector.broadcast %13 : vector<1x32xf32> to vector<16x32xf32>
    %15 = arith.addf %11, %14 : vector<16x32xf32>
    %16 = arith.truncf %0 : vector<16x32xf32> to vector<16x32xbf16>
    %cst_18 = arith.constant dense<0.000000e+00> : vector<16x32xf32>
    %17 = tpu.matmul %16, %5, %cst_18 {dimension_numbers = #tpu.dot_dimension_numbers<[1], [0], [0], [1], [0, 0, 1, 1], [], []>} : vector<16x32xbf16>, vector<32x32xbf16>, vector<16x32xf32> -> vector<16x32xf32>
    %c0_19 = arith.constant 0 : index
    %c0_20 = arith.constant 0 : index
    %c0_21 = arith.constant 0 : index
    %18 = vector.load %arg10[%c0_19, %c0_20, %c0_21] : memref<4x1x32xf32, #tpu.memory_space<vmem>>, vector<1x1x32xf32>
    %19 = vector.shape_cast %18 : vector<1x1x32xf32> to vector<1x32xf32>
    %20 = vector.broadcast %19 : vector<1x32xf32> to vector<16x32xf32>
    %21 = arith.addf %17, %20 : vector<16x32xf32>
    %22 = arith.truncf %0 : vector<16x32xf32> to vector<16x32xbf16>
    %cst_22 = arith.constant dense<0.000000e+00> : vector<16x32xf32>
    %23 = tpu.matmul %22, %7, %cst_22 {dimension_numbers = #tpu.dot_dimension_numbers<[1], [0], [0], [1], [0, 0, 1, 1], [], []>} : vector<16x32xbf16>, vector<32x32xbf16>, vector<16x32xf32> -> vector<16x32xf32>
    %c0_23 = arith.constant 0 : index
    %c0_24 = arith.constant 0 : index
    %c0_25 = arith.constant 0 : index
    %24 = vector.load %arg11[%c0_23, %c0_24, %c0_25] : memref<4x1x32xf32, #tpu.memory_space<vmem>>, vector<1x1x32xf32>
    %25 = vector.shape_cast %24 : vector<1x1x32xf32> to vector<1x32xf32>
    %26 = vector.broadcast %25 : vector<1x32xf32> to vector<16x32xf32>
    %27 = arith.addf %23, %26 : vector<16x32xf32>
    %28 = vector.extract_strided_slice %15 {offsets = [0, 0], sizes = [8, 32], strides = [1, 1]} : vector<16x32xf32> to vector<8x32xf32>
    %29 = vector.extract_strided_slice %21 {offsets = [0, 0], sizes = [8, 32], strides = [1, 1]} : vector<16x32xf32> to vector<8x32xf32>
    %30 = vector.extract_strided_slice %27 {offsets = [0, 0], sizes = [8, 32], strides = [1, 1]} : vector<16x32xf32> to vector<8x32xf32>
    %c0_26 = arith.constant 0 : index
    %c0_27 = arith.constant 0 : index
    %c0_28 = arith.constant 0 : index
    %31 = vector.load %arg3[%c0_26, %c0_27, %c0_28] : memref<2x1x8xf32, #tpu.memory_space<vmem>>, vector<1x1x8xf32>
    %32 = vector.shape_cast %31 : vector<1x1x8xf32> to vector<1x8xf32>
    %33 = vector.extract_strided_slice %28 {offsets = [0, 0], sizes = [8, 8], strides = [1, 1]} : vector<8x32xf32> to vector<8x8xf32>
    %34 = arith.truncf %33 : vector<8x8xf32> to vector<8x8xbf16>
    %35 = vector.extract_strided_slice %29 {offsets = [0, 0], sizes = [8, 8], strides = [1, 1]} : vector<8x32xf32> to vector<8x8xf32>
    %36 = arith.truncf %35 : vector<8x8xf32> to vector<8x8xbf16>
    %cst_29 = arith.constant dense<0.000000e+00> : vector<8x8xf32>
    %37 = tpu.matmul %34, %36, %cst_29 {dimension_numbers = #tpu.dot_dimension_numbers<[1], [1], [0], [0], [0, 0, 1, 0], [], []>} : vector<8x8xbf16>, vector<8x8xbf16>, vector<8x8xf32> -> vector<8x8xf32>
    %cst_30 = arith.constant 0.353553385 : f32
    %38 = vector.broadcast %cst_30 : f32 to vector<8x8xf32>
    %39 = arith.mulf %37, %38 : vector<8x8xf32>
    %40 = vector.broadcast %32 : vector<1x8xf32> to vector<8x8xf32>
    %41 = arith.addf %39, %40 : vector<8x8xf32>
    %cst_31 = arith.constant dense<0xFF800000> : vector<8xf32>
    %42 = vector.multi_reduction <maximumf>, %41, %cst_31 [1] : vector<8x8xf32> to vector<8xf32>
    %43 = vector.shape_cast %42 : vector<8xf32> to vector<8x1xf32>
    %44 = vector.broadcast %43 : vector<8x1xf32> to vector<8x8xf32>
    %45 = arith.subf %41, %44 : vector<8x8xf32>
    %46 = math.exp %45 : vector<8x8xf32>
    %cst_32 = arith.constant dense<0.000000e+00> : vector<8xf32>
    %47 = vector.multi_reduction <add>, %46, %cst_32 [1] : vector<8x8xf32> to vector<8xf32>
    %48 = vector.shape_cast %47 : vector<8xf32> to vector<8x1xf32>
    %49 = tpu.reciprocal %48 {approx = true} : vector<8x1xf32> -> vector<8x1xf32>
    %50 = vector.broadcast %49 : vector<8x1xf32> to vector<8x8xf32>
    %51 = arith.mulf %46, %50 : vector<8x8xf32>
    %52 = arith.truncf %51 : vector<8x8xf32> to vector<8x8xbf16>
    %53 = vector.extract_strided_slice %30 {offsets = [0, 0], sizes = [8, 8], strides = [1, 1]} : vector<8x32xf32> to vector<8x8xf32>
    %54 = arith.truncf %53 : vector<8x8xf32> to vector<8x8xbf16>
    %cst_33 = arith.constant dense<0.000000e+00> : vector<8x8xf32>
    %55 = tpu.matmul %52, %54, %cst_33 {dimension_numbers = #tpu.dot_dimension_numbers<[1], [0], [0], [1], [0, 0, 1, 1], [], []>} : vector<8x8xbf16>, vector<8x8xbf16>, vector<8x8xf32> -> vector<8x8xf32>
    %56 = vector.extract_strided_slice %28 {offsets = [0, 8], sizes = [8, 8], strides = [1, 1]} : vector<8x32xf32> to vector<8x8xf32>
    %57 = arith.truncf %56 : vector<8x8xf32> to vector<8x8xbf16>
    %58 = vector.extract_strided_slice %29 {offsets = [0, 8], sizes = [8, 8], strides = [1, 1]} : vector<8x32xf32> to vector<8x8xf32>
    %59 = arith.truncf %58 : vector<8x8xf32> to vector<8x8xbf16>
    %cst_34 = arith.constant dense<0.000000e+00> : vector<8x8xf32>
    %60 = tpu.matmul %57, %59, %cst_34 {dimension_numbers = #tpu.dot_dimension_numbers<[1], [1], [0], [0], [0, 0, 1, 0], [], []>} : vector<8x8xbf16>, vector<8x8xbf16>, vector<8x8xf32> -> vector<8x8xf32>
    %cst_35 = arith.constant 0.353553385 : f32
    %61 = vector.broadcast %cst_35 : f32 to vector<8x8xf32>
    %62 = arith.mulf %60, %61 : vector<8x8xf32>
    %63 = vector.broadcast %32 : vector<1x8xf32> to vector<8x8xf32>
    %64 = arith.addf %62, %63 : vector<8x8xf32>
    %cst_36 = arith.constant dense<0xFF800000> : vector<8xf32>
    %65 = vector.multi_reduction <maximumf>, %64, %cst_36 [1] : vector<8x8xf32> to vector<8xf32>
    %66 = vector.shape_cast %65 : vector<8xf32> to vector<8x1xf32>
    %67 = vector.broadcast %66 : vector<8x1xf32> to vector<8x8xf32>
    %68 = arith.subf %64, %67 : vector<8x8xf32>
    %69 = math.exp %68 : vector<8x8xf32>
    %cst_37 = arith.constant dense<0.000000e+00> : vector<8xf32>
    %70 = vector.multi_reduction <add>, %69, %cst_37 [1] : vector<8x8xf32> to vector<8xf32>
    %71 = vector.shape_cast %70 : vector<8xf32> to vector<8x1xf32>
    %72 = tpu.reciprocal %71 {approx = true} : vector<8x1xf32> -> vector<8x1xf32>
    %73 = vector.broadcast %72 : vector<8x1xf32> to vector<8x8xf32>
    %74 = arith.mulf %69, %73 : vector<8x8xf32>
    %75 = arith.truncf %74 : vector<8x8xf32> to vector<8x8xbf16>
    %76 = vector.extract_strided_slice %30 {offsets = [0, 8], sizes = [8, 8], strides = [1, 1]} : vector<8x32xf32> to vector<8x8xf32>
    %77 = arith.truncf %76 : vector<8x8xf32> to vector<8x8xbf16>
    %cst_38 = arith.constant dense<0.000000e+00> : vector<8x8xf32>
    %78 = tpu.matmul %75, %77, %cst_38 {dimension_numbers = #tpu.dot_dimension_numbers<[1], [0], [0], [1], [0, 0, 1, 1], [], []>} : vector<8x8xbf16>, vector<8x8xbf16>, vector<8x8xf32> -> vector<8x8xf32>
    %79 = vector.extract_strided_slice %28 {offsets = [0, 16], sizes = [8, 8], strides = [1, 1]} : vector<8x32xf32> to vector<8x8xf32>
    %80 = arith.truncf %79 : vector<8x8xf32> to vector<8x8xbf16>
    %81 = vector.extract_strided_slice %29 {offsets = [0, 16], sizes = [8, 8], strides = [1, 1]} : vector<8x32xf32> to vector<8x8xf32>
    %82 = arith.truncf %81 : vector<8x8xf32> to vector<8x8xbf16>
    %cst_39 = arith.constant dense<0.000000e+00> : vector<8x8xf32>
    %83 = tpu.matmul %80, %82, %cst_39 {dimension_numbers = #tpu.dot_dimension_numbers<[1], [1], [0], [0], [0, 0, 1, 0], [], []>} : vector<8x8xbf16>, vector<8x8xbf16>, vector<8x8xf32> -> vector<8x8xf32>
    %cst_40 = arith.constant 0.353553385 : f32
    %84 = vector.broadcast %cst_40 : f32 to vector<8x8xf32>
    %85 = arith.mulf %83, %84 : vector<8x8xf32>
    %86 = vector.broadcast %32 : vector<1x8xf32> to vector<8x8xf32>
    %87 = arith.addf %85, %86 : vector<8x8xf32>
    %cst_41 = arith.constant dense<0xFF800000> : vector<8xf32>
    %88 = vector.multi_reduction <maximumf>, %87, %cst_41 [1] : vector<8x8xf32> to vector<8xf32>
    %89 = vector.shape_cast %88 : vector<8xf32> to vector<8x1xf32>
    %90 = vector.broadcast %89 : vector<8x1xf32> to vector<8x8xf32>
    %91 = arith.subf %87, %90 : vector<8x8xf32>
    %92 = math.exp %91 : vector<8x8xf32>
    %cst_42 = arith.constant dense<0.000000e+00> : vector<8xf32>
    %93 = vector.multi_reduction <add>, %92, %cst_42 [1] : vector<8x8xf32> to vector<8xf32>
    %94 = vector.shape_cast %93 : vector<8xf32> to vector<8x1xf32>
    %95 = tpu.reciprocal %94 {approx = true} : vector<8x1xf32> -> vector<8x1xf32>
    %96 = vector.broadcast %95 : vector<8x1xf32> to vector<8x8xf32>
    %97 = arith.mulf %92, %96 : vector<8x8xf32>
    %98 = arith.truncf %97 : vector<8x8xf32> to vector<8x8xbf16>
    %99 = vector.extract_strided_slice %30 {offsets = [0, 16], sizes = [8, 8], strides = [1, 1]} : vector<8x32xf32> to vector<8x8xf32>
    %100 = arith.truncf %99 : vector<8x8xf32> to vector<8x8xbf16>
    %cst_43 = arith.constant dense<0.000000e+00> : vector<8x8xf32>
    %101 = tpu.matmul %98, %100, %cst_43 {dimension_numbers = #tpu.dot_dimension_numbers<[1], [0], [0], [1], [0, 0, 1, 1], [], []>} : vector<8x8xbf16>, vector<8x8xbf16>, vector<8x8xf32> -> vector<8x8xf32>
    %102 = vector.extract_strided_slice %28 {offsets = [0, 24], sizes = [8, 8], strides = [1, 1]} : vector<8x32xf32> to vector<8x8xf32>
    %103 = arith.truncf %102 : vector<8x8xf32> to vector<8x8xbf16>
    %104 = vector.extract_strided_slice %29 {offsets = [0, 24], sizes = [8, 8], strides = [1, 1]} : vector<8x32xf32> to vector<8x8xf32>
    %105 = arith.truncf %104 : vector<8x8xf32> to vector<8x8xbf16>
    %cst_44 = arith.constant dense<0.000000e+00> : vector<8x8xf32>
    %106 = tpu.matmul %103, %105, %cst_44 {dimension_numbers = #tpu.dot_dimension_numbers<[1], [1], [0], [0], [0, 0, 1, 0], [], []>} : vector<8x8xbf16>, vector<8x8xbf16>, vector<8x8xf32> -> vector<8x8xf32>
    %cst_45 = arith.constant 0.353553385 : f32
    %107 = vector.broadcast %cst_45 : f32 to vector<8x8xf32>
    %108 = arith.mulf %106, %107 : vector<8x8xf32>
    %109 = vector.broadcast %32 : vector<1x8xf32> to vector<8x8xf32>
    %110 = arith.addf %108, %109 : vector<8x8xf32>
    %cst_46 = arith.constant dense<0xFF800000> : vector<8xf32>
    %111 = vector.multi_reduction <maximumf>, %110, %cst_46 [1] : vector<8x8xf32> to vector<8xf32>
    %112 = vector.shape_cast %111 : vector<8xf32> to vector<8x1xf32>
    %113 = vector.broadcast %112 : vector<8x1xf32> to vector<8x8xf32>
    %114 = arith.subf %110, %113 : vector<8x8xf32>
    %115 = math.exp %114 : vector<8x8xf32>
    %cst_47 = arith.constant dense<0.000000e+00> : vector<8xf32>
    %116 = vector.multi_reduction <add>, %115, %cst_47 [1] : vector<8x8xf32> to vector<8xf32>
    %117 = vector.shape_cast %116 : vector<8xf32> to vector<8x1xf32>
    %118 = tpu.reciprocal %117 {approx = true} : vector<8x1xf32> -> vector<8x1xf32>
    %119 = vector.broadcast %118 : vector<8x1xf32> to vector<8x8xf32>
    %120 = arith.mulf %115, %119 : vector<8x8xf32>
    %121 = arith.truncf %120 : vector<8x8xf32> to vector<8x8xbf16>
    %122 = vector.extract_strided_slice %30 {offsets = [0, 24], sizes = [8, 8], strides = [1, 1]} : vector<8x32xf32> to vector<8x8xf32>
    %123 = arith.truncf %122 : vector<8x8xf32> to vector<8x8xbf16>
    %cst_48 = arith.constant dense<0.000000e+00> : vector<8x8xf32>
    %124 = tpu.matmul %121, %123, %cst_48 {dimension_numbers = #tpu.dot_dimension_numbers<[1], [0], [0], [1], [0, 0, 1, 1], [], []>} : vector<8x8xbf16>, vector<8x8xbf16>, vector<8x8xf32> -> vector<8x8xf32>
    %125 = tpu.concatenate %55, %78, %101, %124 in 1 : vector<8x8xf32>, vector<8x8xf32>, vector<8x8xf32>, vector<8x8xf32> -> vector<8x32xf32>
    %126 = vector.extract_strided_slice %15 {offsets = [8, 0], sizes = [8, 32], strides = [1, 1]} : vector<16x32xf32> to vector<8x32xf32>
    %127 = vector.extract_strided_slice %21 {offsets = [8, 0], sizes = [8, 32], strides = [1, 1]} : vector<16x32xf32> to vector<8x32xf32>
    %128 = vector.extract_strided_slice %27 {offsets = [8, 0], sizes = [8, 32], strides = [1, 1]} : vector<16x32xf32> to vector<8x32xf32>
    %c1 = arith.constant 1 : index
    %c0_49 = arith.constant 0 : index
    %c0_50 = arith.constant 0 : index
    %129 = vector.load %arg3[%c1, %c0_49, %c0_50] : memref<2x1x8xf32, #tpu.memory_space<vmem>>, vector<1x1x8xf32>
    %130 = vector.shape_cast %129 : vector<1x1x8xf32> to vector<1x8xf32>
    %131 = vector.extract_strided_slice %126 {offsets = [0, 0], sizes = [8, 8], strides = [1, 1]} : vector<8x32xf32> to vector<8x8xf32>
    %132 = arith.truncf %131 : vector<8x8xf32> to vector<8x8xbf16>
    %133 = vector.extract_strided_slice %127 {offsets = [0, 0], sizes = [8, 8], strides = [1, 1]} : vector<8x32xf32> to vector<8x8xf32>
    %134 = arith.truncf %133 : vector<8x8xf32> to vector<8x8xbf16>
    %cst_51 = arith.constant dense<0.000000e+00> : vector<8x8xf32>
    %135 = tpu.matmul %132, %134, %cst_51 {dimension_numbers = #tpu.dot_dimension_numbers<[1], [1], [0], [0], [0, 0, 1, 0], [], []>} : vector<8x8xbf16>, vector<8x8xbf16>, vector<8x8xf32> -> vector<8x8xf32>
    %cst_52 = arith.constant 0.353553385 : f32
    %136 = vector.broadcast %cst_52 : f32 to vector<8x8xf32>
    %137 = arith.mulf %135, %136 : vector<8x8xf32>
    %138 = vector.broadcast %130 : vector<1x8xf32> to vector<8x8xf32>
    %139 = arith.addf %137, %138 : vector<8x8xf32>
    %cst_53 = arith.constant dense<0xFF800000> : vector<8xf32>
    %140 = vector.multi_reduction <maximumf>, %139, %cst_53 [1] : vector<8x8xf32> to vector<8xf32>
    %141 = vector.shape_cast %140 : vector<8xf32> to vector<8x1xf32>
    %142 = vector.broadcast %141 : vector<8x1xf32> to vector<8x8xf32>
    %143 = arith.subf %139, %142 : vector<8x8xf32>
    %144 = math.exp %143 : vector<8x8xf32>
    %cst_54 = arith.constant dense<0.000000e+00> : vector<8xf32>
    %145 = vector.multi_reduction <add>, %144, %cst_54 [1] : vector<8x8xf32> to vector<8xf32>
    %146 = vector.shape_cast %145 : vector<8xf32> to vector<8x1xf32>
    %147 = tpu.reciprocal %146 {approx = true} : vector<8x1xf32> -> vector<8x1xf32>
    %148 = vector.broadcast %147 : vector<8x1xf32> to vector<8x8xf32>
    %149 = arith.mulf %144, %148 : vector<8x8xf32>
    %150 = arith.truncf %149 : vector<8x8xf32> to vector<8x8xbf16>
    %151 = vector.extract_strided_slice %128 {offsets = [0, 0], sizes = [8, 8], strides = [1, 1]} : vector<8x32xf32> to vector<8x8xf32>
    %152 = arith.truncf %151 : vector<8x8xf32> to vector<8x8xbf16>
    %cst_55 = arith.constant dense<0.000000e+00> : vector<8x8xf32>
    %153 = tpu.matmul %150, %152, %cst_55 {dimension_numbers = #tpu.dot_dimension_numbers<[1], [0], [0], [1], [0, 0, 1, 1], [], []>} : vector<8x8xbf16>, vector<8x8xbf16>, vector<8x8xf32> -> vector<8x8xf32>
    %154 = vector.extract_strided_slice %126 {offsets = [0, 8], sizes = [8, 8], strides = [1, 1]} : vector<8x32xf32> to vector<8x8xf32>
    %155 = arith.truncf %154 : vector<8x8xf32> to vector<8x8xbf16>
    %156 = vector.extract_strided_slice %127 {offsets = [0, 8], sizes = [8, 8], strides = [1, 1]} : vector<8x32xf32> to vector<8x8xf32>
    %157 = arith.truncf %156 : vector<8x8xf32> to vector<8x8xbf16>
    %cst_56 = arith.constant dense<0.000000e+00> : vector<8x8xf32>
    %158 = tpu.matmul %155, %157, %cst_56 {dimension_numbers = #tpu.dot_dimension_numbers<[1], [1], [0], [0], [0, 0, 1, 0], [], []>} : vector<8x8xbf16>, vector<8x8xbf16>, vector<8x8xf32> -> vector<8x8xf32>
    %cst_57 = arith.constant 0.353553385 : f32
    %159 = vector.broadcast %cst_57 : f32 to vector<8x8xf32>
    %160 = arith.mulf %158, %159 : vector<8x8xf32>
    %161 = vector.broadcast %130 : vector<1x8xf32> to vector<8x8xf32>
    %162 = arith.addf %160, %161 : vector<8x8xf32>
    %cst_58 = arith.constant dense<0xFF800000> : vector<8xf32>
    %163 = vector.multi_reduction <maximumf>, %162, %cst_58 [1] : vector<8x8xf32> to vector<8xf32>
    %164 = vector.shape_cast %163 : vector<8xf32> to vector<8x1xf32>
    %165 = vector.broadcast %164 : vector<8x1xf32> to vector<8x8xf32>
    %166 = arith.subf %162, %165 : vector<8x8xf32>
    %167 = math.exp %166 : vector<8x8xf32>
    %cst_59 = arith.constant dense<0.000000e+00> : vector<8xf32>
    %168 = vector.multi_reduction <add>, %167, %cst_59 [1] : vector<8x8xf32> to vector<8xf32>
    %169 = vector.shape_cast %168 : vector<8xf32> to vector<8x1xf32>
    %170 = tpu.reciprocal %169 {approx = true} : vector<8x1xf32> -> vector<8x1xf32>
    %171 = vector.broadcast %170 : vector<8x1xf32> to vector<8x8xf32>
    %172 = arith.mulf %167, %171 : vector<8x8xf32>
    %173 = arith.truncf %172 : vector<8x8xf32> to vector<8x8xbf16>
    %174 = vector.extract_strided_slice %128 {offsets = [0, 8], sizes = [8, 8], strides = [1, 1]} : vector<8x32xf32> to vector<8x8xf32>
    %175 = arith.truncf %174 : vector<8x8xf32> to vector<8x8xbf16>
    %cst_60 = arith.constant dense<0.000000e+00> : vector<8x8xf32>
    %176 = tpu.matmul %173, %175, %cst_60 {dimension_numbers = #tpu.dot_dimension_numbers<[1], [0], [0], [1], [0, 0, 1, 1], [], []>} : vector<8x8xbf16>, vector<8x8xbf16>, vector<8x8xf32> -> vector<8x8xf32>
    %177 = vector.extract_strided_slice %126 {offsets = [0, 16], sizes = [8, 8], strides = [1, 1]} : vector<8x32xf32> to vector<8x8xf32>
    %178 = arith.truncf %177 : vector<8x8xf32> to vector<8x8xbf16>
    %179 = vector.extract_strided_slice %127 {offsets = [0, 16], sizes = [8, 8], strides = [1, 1]} : vector<8x32xf32> to vector<8x8xf32>
    %180 = arith.truncf %179 : vector<8x8xf32> to vector<8x8xbf16>
    %cst_61 = arith.constant dense<0.000000e+00> : vector<8x8xf32>
    %181 = tpu.matmul %178, %180, %cst_61 {dimension_numbers = #tpu.dot_dimension_numbers<[1], [1], [0], [0], [0, 0, 1, 0], [], []>} : vector<8x8xbf16>, vector<8x8xbf16>, vector<8x8xf32> -> vector<8x8xf32>
    %cst_62 = arith.constant 0.353553385 : f32
    %182 = vector.broadcast %cst_62 : f32 to vector<8x8xf32>
    %183 = arith.mulf %181, %182 : vector<8x8xf32>
    %184 = vector.broadcast %130 : vector<1x8xf32> to vector<8x8xf32>
    %185 = arith.addf %183, %184 : vector<8x8xf32>
    %cst_63 = arith.constant dense<0xFF800000> : vector<8xf32>
    %186 = vector.multi_reduction <maximumf>, %185, %cst_63 [1] : vector<8x8xf32> to vector<8xf32>
    %187 = vector.shape_cast %186 : vector<8xf32> to vector<8x1xf32>
    %188 = vector.broadcast %187 : vector<8x1xf32> to vector<8x8xf32>
    %189 = arith.subf %185, %188 : vector<8x8xf32>
    %190 = math.exp %189 : vector<8x8xf32>
    %cst_64 = arith.constant dense<0.000000e+00> : vector<8xf32>
    %191 = vector.multi_reduction <add>, %190, %cst_64 [1] : vector<8x8xf32> to vector<8xf32>
    %192 = vector.shape_cast %191 : vector<8xf32> to vector<8x1xf32>
    %193 = tpu.reciprocal %192 {approx = true} : vector<8x1xf32> -> vector<8x1xf32>
    %194 = vector.broadcast %193 : vector<8x1xf32> to vector<8x8xf32>
    %195 = arith.mulf %190, %194 : vector<8x8xf32>
    %196 = arith.truncf %195 : vector<8x8xf32> to vector<8x8xbf16>
    %197 = vector.extract_strided_slice %128 {offsets = [0, 16], sizes = [8, 8], strides = [1, 1]} : vector<8x32xf32> to vector<8x8xf32>
    %198 = arith.truncf %197 : vector<8x8xf32> to vector<8x8xbf16>
    %cst_65 = arith.constant dense<0.000000e+00> : vector<8x8xf32>
    %199 = tpu.matmul %196, %198, %cst_65 {dimension_numbers = #tpu.dot_dimension_numbers<[1], [0], [0], [1], [0, 0, 1, 1], [], []>} : vector<8x8xbf16>, vector<8x8xbf16>, vector<8x8xf32> -> vector<8x8xf32>
    %200 = vector.extract_strided_slice %126 {offsets = [0, 24], sizes = [8, 8], strides = [1, 1]} : vector<8x32xf32> to vector<8x8xf32>
    %201 = arith.truncf %200 : vector<8x8xf32> to vector<8x8xbf16>
    %202 = vector.extract_strided_slice %127 {offsets = [0, 24], sizes = [8, 8], strides = [1, 1]} : vector<8x32xf32> to vector<8x8xf32>
    %203 = arith.truncf %202 : vector<8x8xf32> to vector<8x8xbf16>
    %cst_66 = arith.constant dense<0.000000e+00> : vector<8x8xf32>
    %204 = tpu.matmul %201, %203, %cst_66 {dimension_numbers = #tpu.dot_dimension_numbers<[1], [1], [0], [0], [0, 0, 1, 0], [], []>} : vector<8x8xbf16>, vector<8x8xbf16>, vector<8x8xf32> -> vector<8x8xf32>
    %cst_67 = arith.constant 0.353553385 : f32
    %205 = vector.broadcast %cst_67 : f32 to vector<8x8xf32>
    %206 = arith.mulf %204, %205 : vector<8x8xf32>
    %207 = vector.broadcast %130 : vector<1x8xf32> to vector<8x8xf32>
    %208 = arith.addf %206, %207 : vector<8x8xf32>
    %cst_68 = arith.constant dense<0xFF800000> : vector<8xf32>
    %209 = vector.multi_reduction <maximumf>, %208, %cst_68 [1] : vector<8x8xf32> to vector<8xf32>
    %210 = vector.shape_cast %209 : vector<8xf32> to vector<8x1xf32>
    %211 = vector.broadcast %210 : vector<8x1xf32> to vector<8x8xf32>
    %212 = arith.subf %208, %211 : vector<8x8xf32>
    %213 = math.exp %212 : vector<8x8xf32>
    %cst_69 = arith.constant dense<0.000000e+00> : vector<8xf32>
    %214 = vector.multi_reduction <add>, %213, %cst_69 [1] : vector<8x8xf32> to vector<8xf32>
    %215 = vector.shape_cast %214 : vector<8xf32> to vector<8x1xf32>
    %216 = tpu.reciprocal %215 {approx = true} : vector<8x1xf32> -> vector<8x1xf32>
    %217 = vector.broadcast %216 : vector<8x1xf32> to vector<8x8xf32>
    %218 = arith.mulf %213, %217 : vector<8x8xf32>
    %219 = arith.truncf %218 : vector<8x8xf32> to vector<8x8xbf16>
    %220 = vector.extract_strided_slice %128 {offsets = [0, 24], sizes = [8, 8], strides = [1, 1]} : vector<8x32xf32> to vector<8x8xf32>
    %221 = arith.truncf %220 : vector<8x8xf32> to vector<8x8xbf16>
    %cst_70 = arith.constant dense<0.000000e+00> : vector<8x8xf32>
    %222 = tpu.matmul %219, %221, %cst_70 {dimension_numbers = #tpu.dot_dimension_numbers<[1], [0], [0], [1], [0, 0, 1, 1], [], []>} : vector<8x8xbf16>, vector<8x8xbf16>, vector<8x8xf32> -> vector<8x8xf32>
    %223 = tpu.concatenate %153, %176, %199, %222 in 1 : vector<8x8xf32>, vector<8x8xf32>, vector<8x8xf32>, vector<8x8xf32> -> vector<8x32xf32>
    %224 = tpu.concatenate %125, %223 in 0 : vector<8x32xf32>, vector<8x32xf32> -> vector<16x32xf32>
    %225 = arith.truncf %224 : vector<16x32xf32> to vector<16x32xbf16>
    %cst_71 = arith.constant dense<0.000000e+00> : vector<16x32xf32>
    %226 = tpu.matmul %225, %9, %cst_71 {dimension_numbers = #tpu.dot_dimension_numbers<[1], [0], [0], [1], [0, 0, 1, 1], [], []>} : vector<16x32xbf16>, vector<32x32xbf16>, vector<16x32xf32> -> vector<16x32xf32>
    %c0_72 = arith.constant 0 : index
    %c0_73 = arith.constant 0 : index
    %c0_74 = arith.constant 0 : index
    %227 = vector.load %arg12[%c0_72, %c0_73, %c0_74] : memref<4x1x32xf32, #tpu.memory_space<vmem>>, vector<1x1x32xf32>
    %228 = vector.shape_cast %227 : vector<1x1x32xf32> to vector<1x32xf32>
    %229 = vector.broadcast %228 : vector<1x32xf32> to vector<16x32xf32>
    %230 = arith.addf %226, %229 : vector<16x32xf32>
    %231 = arith.addf %0, %230 : vector<16x32xf32>
    %c0_75 = arith.constant 0 : index
    %c0_76 = arith.constant 0 : index
    %c0_77 = arith.constant 0 : index
    %232 = vector.load %arg17[%c0_75, %c0_76, %c0_77] : memref<6x1x32xf32, #tpu.memory_space<vmem>>, vector<1x1x32xf32>
    %233 = vector.shape_cast %232 : vector<1x1x32xf32> to vector<1x32xf32>
    %c0_78 = arith.constant 0 : index
    %c0_79 = arith.constant 0 : index
    %c0_80 = arith.constant 0 : index
    %234 = vector.load %arg18[%c0_78, %c0_79, %c0_80] : memref<6x1x32xf32, #tpu.memory_space<vmem>>, vector<1x1x32xf32>
    %235 = vector.shape_cast %234 : vector<1x1x32xf32> to vector<1x32xf32>
    %cst_81 = arith.constant dense<0.000000e+00> : vector<16xf32>
    %236 = vector.multi_reduction <add>, %231, %cst_81 [1] : vector<16x32xf32> to vector<16xf32>
    %237 = vector.shape_cast %236 : vector<16xf32> to vector<16x1xf32>
    %cst_82 = arith.constant 3.200000e+01 : f32
    %238 = vector.broadcast %cst_82 : f32 to vector<16x1xf32>
    %239 = arith.divf %237, %238 : vector<16x1xf32>
    %240 = vector.broadcast %239 : vector<16x1xf32> to vector<16x32xf32>
    %241 = arith.subf %231, %240 : vector<16x32xf32>
    %242 = arith.mulf %241, %241 : vector<16x32xf32>
    %cst_83 = arith.constant dense<0.000000e+00> : vector<16xf32>
    %243 = vector.multi_reduction <add>, %242, %cst_83 [1] : vector<16x32xf32> to vector<16xf32>
    %244 = vector.shape_cast %243 : vector<16xf32> to vector<16x1xf32>
    %cst_84 = arith.constant 3.100000e+01 : f32
    %245 = vector.broadcast %cst_84 : f32 to vector<16x1xf32>
    %246 = arith.divf %244, %245 : vector<16x1xf32>
    %247 = vector.broadcast %233 : vector<1x32xf32> to vector<16x32xf32>
    %248 = arith.mulf %247, %241 : vector<16x32xf32>
    %249 = math.sqrt %246 : vector<16x1xf32>
    %cst_85 = arith.constant 9.99999997E-7 : f32
    %250 = vector.broadcast %cst_85 : f32 to vector<16x1xf32>
    %251 = arith.addf %249, %250 : vector<16x1xf32>
    %252 = vector.broadcast %251 : vector<16x1xf32> to vector<16x32xf32>
    %253 = arith.divf %248, %252 : vector<16x32xf32>
    %254 = vector.broadcast %235 : vector<1x32xf32> to vector<16x32xf32>
    %255 = arith.addf %253, %254 : vector<16x32xf32>
    %c1_86 = arith.constant 1 : index
    %c0_87 = arith.constant 0 : index
    %c0_88 = arith.constant 0 : index
    %256 = vector.load %arg5[%c1_86, %c0_87, %c0_88] : memref<4x32x32xbf16, #tpu.memory_space<vmem>>, vector<1x32x32xbf16>
    %257 = vector.shape_cast %256 : vector<1x32x32xbf16> to vector<32x32xbf16>
    %c1_89 = arith.constant 1 : index
    %c0_90 = arith.constant 0 : index
    %c0_91 = arith.constant 0 : index
    %258 = vector.load %arg6[%c1_89, %c0_90, %c0_91] : memref<4x32x32xbf16, #tpu.memory_space<vmem>>, vector<1x32x32xbf16>
    %259 = vector.shape_cast %258 : vector<1x32x32xbf16> to vector<32x32xbf16>
    %c1_92 = arith.constant 1 : index
    %c0_93 = arith.constant 0 : index
    %c0_94 = arith.constant 0 : index
    %260 = vector.load %arg7[%c1_92, %c0_93, %c0_94] : memref<4x32x32xbf16, #tpu.memory_space<vmem>>, vector<1x32x32xbf16>
    %261 = vector.shape_cast %260 : vector<1x32x32xbf16> to vector<32x32xbf16>
    %c1_95 = arith.constant 1 : index
    %c0_96 = arith.constant 0 : index
    %c0_97 = arith.constant 0 : index
    %262 = vector.load %arg8[%c1_95, %c0_96, %c0_97] : memref<4x32x32xbf16, #tpu.memory_space<vmem>>, vector<1x32x32xbf16>
    %263 = vector.shape_cast %262 : vector<1x32x32xbf16> to vector<32x32xbf16>
    %264 = arith.truncf %1 : vector<32x32xf32> to vector<32x32xbf16>
    %cst_98 = arith.constant dense<0.000000e+00> : vector<32x32xf32>
    %265 = tpu.matmul %264, %257, %cst_98 {dimension_numbers = #tpu.dot_dimension_numbers<[1], [0], [0], [1], [0, 0, 1, 1], [], []>} : vector<32x32xbf16>, vector<32x32xbf16>, vector<32x32xf32> -> vector<32x32xf32>
    %c1_99 = arith.constant 1 : index
    %c0_100 = arith.constant 0 : index
    %c0_101 = arith.constant 0 : index
    %266 = vector.load %arg9[%c1_99, %c0_100, %c0_101] : memref<4x1x32xf32, #tpu.memory_space<vmem>>, vector<1x1x32xf32>
    %267 = vector.shape_cast %266 : vector<1x1x32xf32> to vector<1x32xf32>
    %268 = vector.broadcast %267 : vector<1x32xf32> to vector<32x32xf32>
    %269 = arith.addf %265, %268 : vector<32x32xf32>
    %270 = arith.truncf %1 : vector<32x32xf32> to vector<32x32xbf16>
    %cst_102 = arith.constant dense<0.000000e+00> : vector<32x32xf32>
    %271 = tpu.matmul %270, %259, %cst_102 {dimension_numbers = #tpu.dot_dimension_numbers<[1], [0], [0], [1], [0, 0, 1, 1], [], []>} : vector<32x32xbf16>, vector<32x32xbf16>, vector<32x32xf32> -> vector<32x32xf32>
    %c1_103 = arith.constant 1 : index
    %c0_104 = arith.constant 0 : index
    %c0_105 = arith.constant 0 : index
    %272 = vector.load %arg10[%c1_103, %c0_104, %c0_105] : memref<4x1x32xf32, #tpu.memory_space<vmem>>, vector<1x1x32xf32>
    %273 = vector.shape_cast %272 : vector<1x1x32xf32> to vector<1x32xf32>
    %274 = vector.broadcast %273 : vector<1x32xf32> to vector<32x32xf32>
    %275 = arith.addf %271, %274 : vector<32x32xf32>
    %276 = arith.truncf %1 : vector<32x32xf32> to vector<32x32xbf16>
    %cst_106 = arith.constant dense<0.000000e+00> : vector<32x32xf32>
    %277 = tpu.matmul %276, %261, %cst_106 {dimension_numbers = #tpu.dot_dimension_numbers<[1], [0], [0], [1], [0, 0, 1, 1], [], []>} : vector<32x32xbf16>, vector<32x32xbf16>, vector<32x32xf32> -> vector<32x32xf32>
    %c1_107 = arith.constant 1 : index
    %c0_108 = arith.constant 0 : index
    %c0_109 = arith.constant 0 : index
    %278 = vector.load %arg11[%c1_107, %c0_108, %c0_109] : memref<4x1x32xf32, #tpu.memory_space<vmem>>, vector<1x1x32xf32>
    %279 = vector.shape_cast %278 : vector<1x1x32xf32> to vector<1x32xf32>
    %280 = vector.broadcast %279 : vector<1x32xf32> to vector<32x32xf32>
    %281 = arith.addf %277, %280 : vector<32x32xf32>
    %282 = vector.extract_strided_slice %269 {offsets = [0, 0], sizes = [16, 32], strides = [1, 1]} : vector<32x32xf32> to vector<16x32xf32>
    %283 = vector.extract_strided_slice %275 {offsets = [0, 0], sizes = [16, 32], strides = [1, 1]} : vector<32x32xf32> to vector<16x32xf32>
    %284 = vector.extract_strided_slice %281 {offsets = [0, 0], sizes = [16, 32], strides = [1, 1]} : vector<32x32xf32> to vector<16x32xf32>
    %c0_110 = arith.constant 0 : index
    %c0_111 = arith.constant 0 : index
    %c0_112 = arith.constant 0 : index
    %285 = vector.load %arg4[%c0_110, %c0_111, %c0_112] : memref<2x1x16xf32, #tpu.memory_space<vmem>>, vector<1x1x16xf32>
    %286 = vector.shape_cast %285 : vector<1x1x16xf32> to vector<1x16xf32>
    %287 = vector.extract_strided_slice %282 {offsets = [0, 0], sizes = [16, 8], strides = [1, 1]} : vector<16x32xf32> to vector<16x8xf32>
    %288 = arith.truncf %287 : vector<16x8xf32> to vector<16x8xbf16>
    %289 = vector.extract_strided_slice %283 {offsets = [0, 0], sizes = [16, 8], strides = [1, 1]} : vector<16x32xf32> to vector<16x8xf32>
    %290 = arith.truncf %289 : vector<16x8xf32> to vector<16x8xbf16>
    %cst_113 = arith.constant dense<0.000000e+00> : vector<16x16xf32>
    %291 = tpu.matmul %288, %290, %cst_113 {dimension_numbers = #tpu.dot_dimension_numbers<[1], [1], [0], [0], [0, 0, 1, 0], [], []>} : vector<16x8xbf16>, vector<16x8xbf16>, vector<16x16xf32> -> vector<16x16xf32>
    %cst_114 = arith.constant 0.353553385 : f32
    %292 = vector.broadcast %cst_114 : f32 to vector<16x16xf32>
    %293 = arith.mulf %291, %292 : vector<16x16xf32>
    %294 = vector.broadcast %286 : vector<1x16xf32> to vector<16x16xf32>
    %295 = arith.addf %293, %294 : vector<16x16xf32>
    %cst_115 = arith.constant dense<0xFF800000> : vector<16xf32>
    %296 = vector.multi_reduction <maximumf>, %295, %cst_115 [1] : vector<16x16xf32> to vector<16xf32>
    %297 = vector.shape_cast %296 : vector<16xf32> to vector<16x1xf32>
    %298 = vector.broadcast %297 : vector<16x1xf32> to vector<16x16xf32>
    %299 = arith.subf %295, %298 : vector<16x16xf32>
    %300 = math.exp %299 : vector<16x16xf32>
    %cst_116 = arith.constant dense<0.000000e+00> : vector<16xf32>
    %301 = vector.multi_reduction <add>, %300, %cst_116 [1] : vector<16x16xf32> to vector<16xf32>
    %302 = vector.shape_cast %301 : vector<16xf32> to vector<16x1xf32>
    %303 = tpu.reciprocal %302 {approx = true} : vector<16x1xf32> -> vector<16x1xf32>
    %304 = vector.broadcast %303 : vector<16x1xf32> to vector<16x16xf32>
    %305 = arith.mulf %300, %304 : vector<16x16xf32>
    %306 = arith.truncf %305 : vector<16x16xf32> to vector<16x16xbf16>
    %307 = vector.extract_strided_slice %284 {offsets = [0, 0], sizes = [16, 8], strides = [1, 1]} : vector<16x32xf32> to vector<16x8xf32>
    %308 = arith.truncf %307 : vector<16x8xf32> to vector<16x8xbf16>
    %cst_117 = arith.constant dense<0.000000e+00> : vector<16x8xf32>
    %309 = tpu.matmul %306, %308, %cst_117 {dimension_numbers = #tpu.dot_dimension_numbers<[1], [0], [0], [1], [0, 0, 1, 1], [], []>} : vector<16x16xbf16>, vector<16x8xbf16>, vector<16x8xf32> -> vector<16x8xf32>
    %310 = vector.extract_strided_slice %282 {offsets = [0, 8], sizes = [16, 8], strides = [1, 1]} : vector<16x32xf32> to vector<16x8xf32>
    %311 = arith.truncf %310 : vector<16x8xf32> to vector<16x8xbf16>
    %312 = vector.extract_strided_slice %283 {offsets = [0, 8], sizes = [16, 8], strides = [1, 1]} : vector<16x32xf32> to vector<16x8xf32>
    %313 = arith.truncf %312 : vector<16x8xf32> to vector<16x8xbf16>
    %cst_118 = arith.constant dense<0.000000e+00> : vector<16x16xf32>
    %314 = tpu.matmul %311, %313, %cst_118 {dimension_numbers = #tpu.dot_dimension_numbers<[1], [1], [0], [0], [0, 0, 1, 0], [], []>} : vector<16x8xbf16>, vector<16x8xbf16>, vector<16x16xf32> -> vector<16x16xf32>
    %cst_119 = arith.constant 0.353553385 : f32
    %315 = vector.broadcast %cst_119 : f32 to vector<16x16xf32>
    %316 = arith.mulf %314, %315 : vector<16x16xf32>
    %317 = vector.broadcast %286 : vector<1x16xf32> to vector<16x16xf32>
    %318 = arith.addf %316, %317 : vector<16x16xf32>
    %cst_120 = arith.constant dense<0xFF800000> : vector<16xf32>
    %319 = vector.multi_reduction <maximumf>, %318, %cst_120 [1] : vector<16x16xf32> to vector<16xf32>
    %320 = vector.shape_cast %319 : vector<16xf32> to vector<16x1xf32>
    %321 = vector.broadcast %320 : vector<16x1xf32> to vector<16x16xf32>
    %322 = arith.subf %318, %321 : vector<16x16xf32>
    %323 = math.exp %322 : vector<16x16xf32>
    %cst_121 = arith.constant dense<0.000000e+00> : vector<16xf32>
    %324 = vector.multi_reduction <add>, %323, %cst_121 [1] : vector<16x16xf32> to vector<16xf32>
    %325 = vector.shape_cast %324 : vector<16xf32> to vector<16x1xf32>
    %326 = tpu.reciprocal %325 {approx = true} : vector<16x1xf32> -> vector<16x1xf32>
    %327 = vector.broadcast %326 : vector<16x1xf32> to vector<16x16xf32>
    %328 = arith.mulf %323, %327 : vector<16x16xf32>
    %329 = arith.truncf %328 : vector<16x16xf32> to vector<16x16xbf16>
    %330 = vector.extract_strided_slice %284 {offsets = [0, 8], sizes = [16, 8], strides = [1, 1]} : vector<16x32xf32> to vector<16x8xf32>
    %331 = arith.truncf %330 : vector<16x8xf32> to vector<16x8xbf16>
    %cst_122 = arith.constant dense<0.000000e+00> : vector<16x8xf32>
    %332 = tpu.matmul %329, %331, %cst_122 {dimension_numbers = #tpu.dot_dimension_numbers<[1], [0], [0], [1], [0, 0, 1, 1], [], []>} : vector<16x16xbf16>, vector<16x8xbf16>, vector<16x8xf32> -> vector<16x8xf32>
    %333 = vector.extract_strided_slice %282 {offsets = [0, 16], sizes = [16, 8], strides = [1, 1]} : vector<16x32xf32> to vector<16x8xf32>
    %334 = arith.truncf %333 : vector<16x8xf32> to vector<16x8xbf16>
    %335 = vector.extract_strided_slice %283 {offsets = [0, 16], sizes = [16, 8], strides = [1, 1]} : vector<16x32xf32> to vector<16x8xf32>
    %336 = arith.truncf %335 : vector<16x8xf32> to vector<16x8xbf16>
    %cst_123 = arith.constant dense<0.000000e+00> : vector<16x16xf32>
    %337 = tpu.matmul %334, %336, %cst_123 {dimension_numbers = #tpu.dot_dimension_numbers<[1], [1], [0], [0], [0, 0, 1, 0], [], []>} : vector<16x8xbf16>, vector<16x8xbf16>, vector<16x16xf32> -> vector<16x16xf32>
    %cst_124 = arith.constant 0.353553385 : f32
    %338 = vector.broadcast %cst_124 : f32 to vector<16x16xf32>
    %339 = arith.mulf %337, %338 : vector<16x16xf32>
    %340 = vector.broadcast %286 : vector<1x16xf32> to vector<16x16xf32>
    %341 = arith.addf %339, %340 : vector<16x16xf32>
    %cst_125 = arith.constant dense<0xFF800000> : vector<16xf32>
    %342 = vector.multi_reduction <maximumf>, %341, %cst_125 [1] : vector<16x16xf32> to vector<16xf32>
    %343 = vector.shape_cast %342 : vector<16xf32> to vector<16x1xf32>
    %344 = vector.broadcast %343 : vector<16x1xf32> to vector<16x16xf32>
    %345 = arith.subf %341, %344 : vector<16x16xf32>
    %346 = math.exp %345 : vector<16x16xf32>
    %cst_126 = arith.constant dense<0.000000e+00> : vector<16xf32>
    %347 = vector.multi_reduction <add>, %346, %cst_126 [1] : vector<16x16xf32> to vector<16xf32>
    %348 = vector.shape_cast %347 : vector<16xf32> to vector<16x1xf32>
    %349 = tpu.reciprocal %348 {approx = true} : vector<16x1xf32> -> vector<16x1xf32>
    %350 = vector.broadcast %349 : vector<16x1xf32> to vector<16x16xf32>
    %351 = arith.mulf %346, %350 : vector<16x16xf32>
    %352 = arith.truncf %351 : vector<16x16xf32> to vector<16x16xbf16>
    %353 = vector.extract_strided_slice %284 {offsets = [0, 16], sizes = [16, 8], strides = [1, 1]} : vector<16x32xf32> to vector<16x8xf32>
    %354 = arith.truncf %353 : vector<16x8xf32> to vector<16x8xbf16>
    %cst_127 = arith.constant dense<0.000000e+00> : vector<16x8xf32>
    %355 = tpu.matmul %352, %354, %cst_127 {dimension_numbers = #tpu.dot_dimension_numbers<[1], [0], [0], [1], [0, 0, 1, 1], [], []>} : vector<16x16xbf16>, vector<16x8xbf16>, vector<16x8xf32> -> vector<16x8xf32>
    %356 = vector.extract_strided_slice %282 {offsets = [0, 24], sizes = [16, 8], strides = [1, 1]} : vector<16x32xf32> to vector<16x8xf32>
    %357 = arith.truncf %356 : vector<16x8xf32> to vector<16x8xbf16>
    %358 = vector.extract_strided_slice %283 {offsets = [0, 24], sizes = [16, 8], strides = [1, 1]} : vector<16x32xf32> to vector<16x8xf32>
    %359 = arith.truncf %358 : vector<16x8xf32> to vector<16x8xbf16>
    %cst_128 = arith.constant dense<0.000000e+00> : vector<16x16xf32>
    %360 = tpu.matmul %357, %359, %cst_128 {dimension_numbers = #tpu.dot_dimension_numbers<[1], [1], [0], [0], [0, 0, 1, 0], [], []>} : vector<16x8xbf16>, vector<16x8xbf16>, vector<16x16xf32> -> vector<16x16xf32>
    %cst_129 = arith.constant 0.353553385 : f32
    %361 = vector.broadcast %cst_129 : f32 to vector<16x16xf32>
    %362 = arith.mulf %360, %361 : vector<16x16xf32>
    %363 = vector.broadcast %286 : vector<1x16xf32> to vector<16x16xf32>
    %364 = arith.addf %362, %363 : vector<16x16xf32>
    %cst_130 = arith.constant dense<0xFF800000> : vector<16xf32>
    %365 = vector.multi_reduction <maximumf>, %364, %cst_130 [1] : vector<16x16xf32> to vector<16xf32>
    %366 = vector.shape_cast %365 : vector<16xf32> to vector<16x1xf32>
    %367 = vector.broadcast %366 : vector<16x1xf32> to vector<16x16xf32>
    %368 = arith.subf %364, %367 : vector<16x16xf32>
    %369 = math.exp %368 : vector<16x16xf32>
    %cst_131 = arith.constant dense<0.000000e+00> : vector<16xf32>
    %370 = vector.multi_reduction <add>, %369, %cst_131 [1] : vector<16x16xf32> to vector<16xf32>
    %371 = vector.shape_cast %370 : vector<16xf32> to vector<16x1xf32>
    %372 = tpu.reciprocal %371 {approx = true} : vector<16x1xf32> -> vector<16x1xf32>
    %373 = vector.broadcast %372 : vector<16x1xf32> to vector<16x16xf32>
    %374 = arith.mulf %369, %373 : vector<16x16xf32>
    %375 = arith.truncf %374 : vector<16x16xf32> to vector<16x16xbf16>
    %376 = vector.extract_strided_slice %284 {offsets = [0, 24], sizes = [16, 8], strides = [1, 1]} : vector<16x32xf32> to vector<16x8xf32>
    %377 = arith.truncf %376 : vector<16x8xf32> to vector<16x8xbf16>
    %cst_132 = arith.constant dense<0.000000e+00> : vector<16x8xf32>
    %378 = tpu.matmul %375, %377, %cst_132 {dimension_numbers = #tpu.dot_dimension_numbers<[1], [0], [0], [1], [0, 0, 1, 1], [], []>} : vector<16x16xbf16>, vector<16x8xbf16>, vector<16x8xf32> -> vector<16x8xf32>
    %379 = tpu.concatenate %309, %332, %355, %378 in 1 : vector<16x8xf32>, vector<16x8xf32>, vector<16x8xf32>, vector<16x8xf32> -> vector<16x32xf32>
    %380 = vector.extract_strided_slice %269 {offsets = [16, 0], sizes = [16, 32], strides = [1, 1]} : vector<32x32xf32> to vector<16x32xf32>
    %381 = vector.extract_strided_slice %275 {offsets = [16, 0], sizes = [16, 32], strides = [1, 1]} : vector<32x32xf32> to vector<16x32xf32>
    %382 = vector.extract_strided_slice %281 {offsets = [16, 0], sizes = [16, 32], strides = [1, 1]} : vector<32x32xf32> to vector<16x32xf32>
    %c1_133 = arith.constant 1 : index
    %c0_134 = arith.constant 0 : index
    %c0_135 = arith.constant 0 : index
    %383 = vector.load %arg4[%c1_133, %c0_134, %c0_135] : memref<2x1x16xf32, #tpu.memory_space<vmem>>, vector<1x1x16xf32>
    %384 = vector.shape_cast %383 : vector<1x1x16xf32> to vector<1x16xf32>
    %385 = vector.extract_strided_slice %380 {offsets = [0, 0], sizes = [16, 8], strides = [1, 1]} : vector<16x32xf32> to vector<16x8xf32>
    %386 = arith.truncf %385 : vector<16x8xf32> to vector<16x8xbf16>
    %387 = vector.extract_strided_slice %381 {offsets = [0, 0], sizes = [16, 8], strides = [1, 1]} : vector<16x32xf32> to vector<16x8xf32>
    %388 = arith.truncf %387 : vector<16x8xf32> to vector<16x8xbf16>
    %cst_136 = arith.constant dense<0.000000e+00> : vector<16x16xf32>
    %389 = tpu.matmul %386, %388, %cst_136 {dimension_numbers = #tpu.dot_dimension_numbers<[1], [1], [0], [0], [0, 0, 1, 0], [], []>} : vector<16x8xbf16>, vector<16x8xbf16>, vector<16x16xf32> -> vector<16x16xf32>
    %cst_137 = arith.constant 0.353553385 : f32
    %390 = vector.broadcast %cst_137 : f32 to vector<16x16xf32>
    %391 = arith.mulf %389, %390 : vector<16x16xf32>
    %392 = vector.broadcast %384 : vector<1x16xf32> to vector<16x16xf32>
    %393 = arith.addf %391, %392 : vector<16x16xf32>
    %cst_138 = arith.constant dense<0xFF800000> : vector<16xf32>
    %394 = vector.multi_reduction <maximumf>, %393, %cst_138 [1] : vector<16x16xf32> to vector<16xf32>
    %395 = vector.shape_cast %394 : vector<16xf32> to vector<16x1xf32>
    %396 = vector.broadcast %395 : vector<16x1xf32> to vector<16x16xf32>
    %397 = arith.subf %393, %396 : vector<16x16xf32>
    %398 = math.exp %397 : vector<16x16xf32>
    %cst_139 = arith.constant dense<0.000000e+00> : vector<16xf32>
    %399 = vector.multi_reduction <add>, %398, %cst_139 [1] : vector<16x16xf32> to vector<16xf32>
    %400 = vector.shape_cast %399 : vector<16xf32> to vector<16x1xf32>
    %401 = tpu.reciprocal %400 {approx = true} : vector<16x1xf32> -> vector<16x1xf32>
    %402 = vector.broadcast %401 : vector<16x1xf32> to vector<16x16xf32>
    %403 = arith.mulf %398, %402 : vector<16x16xf32>
    %404 = arith.truncf %403 : vector<16x16xf32> to vector<16x16xbf16>
    %405 = vector.extract_strided_slice %382 {offsets = [0, 0], sizes = [16, 8], strides = [1, 1]} : vector<16x32xf32> to vector<16x8xf32>
    %406 = arith.truncf %405 : vector<16x8xf32> to vector<16x8xbf16>
    %cst_140 = arith.constant dense<0.000000e+00> : vector<16x8xf32>
    %407 = tpu.matmul %404, %406, %cst_140 {dimension_numbers = #tpu.dot_dimension_numbers<[1], [0], [0], [1], [0, 0, 1, 1], [], []>} : vector<16x16xbf16>, vector<16x8xbf16>, vector<16x8xf32> -> vector<16x8xf32>
    %408 = vector.extract_strided_slice %380 {offsets = [0, 8], sizes = [16, 8], strides = [1, 1]} : vector<16x32xf32> to vector<16x8xf32>
    %409 = arith.truncf %408 : vector<16x8xf32> to vector<16x8xbf16>
    %410 = vector.extract_strided_slice %381 {offsets = [0, 8], sizes = [16, 8], strides = [1, 1]} : vector<16x32xf32> to vector<16x8xf32>
    %411 = arith.truncf %410 : vector<16x8xf32> to vector<16x8xbf16>
    %cst_141 = arith.constant dense<0.000000e+00> : vector<16x16xf32>
    %412 = tpu.matmul %409, %411, %cst_141 {dimension_numbers = #tpu.dot_dimension_numbers<[1], [1], [0], [0], [0, 0, 1, 0], [], []>} : vector<16x8xbf16>, vector<16x8xbf16>, vector<16x16xf32> -> vector<16x16xf32>
    %cst_142 = arith.constant 0.353553385 : f32
    %413 = vector.broadcast %cst_142 : f32 to vector<16x16xf32>
    %414 = arith.mulf %412, %413 : vector<16x16xf32>
    %415 = vector.broadcast %384 : vector<1x16xf32> to vector<16x16xf32>
    %416 = arith.addf %414, %415 : vector<16x16xf32>
    %cst_143 = arith.constant dense<0xFF800000> : vector<16xf32>
    %417 = vector.multi_reduction <maximumf>, %416, %cst_143 [1] : vector<16x16xf32> to vector<16xf32>
    %418 = vector.shape_cast %417 : vector<16xf32> to vector<16x1xf32>
    %419 = vector.broadcast %418 : vector<16x1xf32> to vector<16x16xf32>
    %420 = arith.subf %416, %419 : vector<16x16xf32>
    %421 = math.exp %420 : vector<16x16xf32>
    %cst_144 = arith.constant dense<0.000000e+00> : vector<16xf32>
    %422 = vector.multi_reduction <add>, %421, %cst_144 [1] : vector<16x16xf32> to vector<16xf32>
    %423 = vector.shape_cast %422 : vector<16xf32> to vector<16x1xf32>
    %424 = tpu.reciprocal %423 {approx = true} : vector<16x1xf32> -> vector<16x1xf32>
    %425 = vector.broadcast %424 : vector<16x1xf32> to vector<16x16xf32>
    %426 = arith.mulf %421, %425 : vector<16x16xf32>
    %427 = arith.truncf %426 : vector<16x16xf32> to vector<16x16xbf16>
    %428 = vector.extract_strided_slice %382 {offsets = [0, 8], sizes = [16, 8], strides = [1, 1]} : vector<16x32xf32> to vector<16x8xf32>
    %429 = arith.truncf %428 : vector<16x8xf32> to vector<16x8xbf16>
    %cst_145 = arith.constant dense<0.000000e+00> : vector<16x8xf32>
    %430 = tpu.matmul %427, %429, %cst_145 {dimension_numbers = #tpu.dot_dimension_numbers<[1], [0], [0], [1], [0, 0, 1, 1], [], []>} : vector<16x16xbf16>, vector<16x8xbf16>, vector<16x8xf32> -> vector<16x8xf32>
    %431 = vector.extract_strided_slice %380 {offsets = [0, 16], sizes = [16, 8], strides = [1, 1]} : vector<16x32xf32> to vector<16x8xf32>
    %432 = arith.truncf %431 : vector<16x8xf32> to vector<16x8xbf16>
    %433 = vector.extract_strided_slice %381 {offsets = [0, 16], sizes = [16, 8], strides = [1, 1]} : vector<16x32xf32> to vector<16x8xf32>
    %434 = arith.truncf %433 : vector<16x8xf32> to vector<16x8xbf16>
    %cst_146 = arith.constant dense<0.000000e+00> : vector<16x16xf32>
    %435 = tpu.matmul %432, %434, %cst_146 {dimension_numbers = #tpu.dot_dimension_numbers<[1], [1], [0], [0], [0, 0, 1, 0], [], []>} : vector<16x8xbf16>, vector<16x8xbf16>, vector<16x16xf32> -> vector<16x16xf32>
    %cst_147 = arith.constant 0.353553385 : f32
    %436 = vector.broadcast %cst_147 : f32 to vector<16x16xf32>
    %437 = arith.mulf %435, %436 : vector<16x16xf32>
    %438 = vector.broadcast %384 : vector<1x16xf32> to vector<16x16xf32>
    %439 = arith.addf %437, %438 : vector<16x16xf32>
    %cst_148 = arith.constant dense<0xFF800000> : vector<16xf32>
    %440 = vector.multi_reduction <maximumf>, %439, %cst_148 [1] : vector<16x16xf32> to vector<16xf32>
    %441 = vector.shape_cast %440 : vector<16xf32> to vector<16x1xf32>
    %442 = vector.broadcast %441 : vector<16x1xf32> to vector<16x16xf32>
    %443 = arith.subf %439, %442 : vector<16x16xf32>
    %444 = math.exp %443 : vector<16x16xf32>
    %cst_149 = arith.constant dense<0.000000e+00> : vector<16xf32>
    %445 = vector.multi_reduction <add>, %444, %cst_149 [1] : vector<16x16xf32> to vector<16xf32>
    %446 = vector.shape_cast %445 : vector<16xf32> to vector<16x1xf32>
    %447 = tpu.reciprocal %446 {approx = true} : vector<16x1xf32> -> vector<16x1xf32>
    %448 = vector.broadcast %447 : vector<16x1xf32> to vector<16x16xf32>
    %449 = arith.mulf %444, %448 : vector<16x16xf32>
    %450 = arith.truncf %449 : vector<16x16xf32> to vector<16x16xbf16>
    %451 = vector.extract_strided_slice %382 {offsets = [0, 16], sizes = [16, 8], strides = [1, 1]} : vector<16x32xf32> to vector<16x8xf32>
    %452 = arith.truncf %451 : vector<16x8xf32> to vector<16x8xbf16>
    %cst_150 = arith.constant dense<0.000000e+00> : vector<16x8xf32>
    %453 = tpu.matmul %450, %452, %cst_150 {dimension_numbers = #tpu.dot_dimension_numbers<[1], [0], [0], [1], [0, 0, 1, 1], [], []>} : vector<16x16xbf16>, vector<16x8xbf16>, vector<16x8xf32> -> vector<16x8xf32>
    %454 = vector.extract_strided_slice %380 {offsets = [0, 24], sizes = [16, 8], strides = [1, 1]} : vector<16x32xf32> to vector<16x8xf32>
    %455 = arith.truncf %454 : vector<16x8xf32> to vector<16x8xbf16>
    %456 = vector.extract_strided_slice %381 {offsets = [0, 24], sizes = [16, 8], strides = [1, 1]} : vector<16x32xf32> to vector<16x8xf32>
    %457 = arith.truncf %456 : vector<16x8xf32> to vector<16x8xbf16>
    %cst_151 = arith.constant dense<0.000000e+00> : vector<16x16xf32>
    %458 = tpu.matmul %455, %457, %cst_151 {dimension_numbers = #tpu.dot_dimension_numbers<[1], [1], [0], [0], [0, 0, 1, 0], [], []>} : vector<16x8xbf16>, vector<16x8xbf16>, vector<16x16xf32> -> vector<16x16xf32>
    %cst_152 = arith.constant 0.353553385 : f32
    %459 = vector.broadcast %cst_152 : f32 to vector<16x16xf32>
    %460 = arith.mulf %458, %459 : vector<16x16xf32>
    %461 = vector.broadcast %384 : vector<1x16xf32> to vector<16x16xf32>
    %462 = arith.addf %460, %461 : vector<16x16xf32>
    %cst_153 = arith.constant dense<0xFF800000> : vector<16xf32>
    %463 = vector.multi_reduction <maximumf>, %462, %cst_153 [1] : vector<16x16xf32> to vector<16xf32>
    %464 = vector.shape_cast %463 : vector<16xf32> to vector<16x1xf32>
    %465 = vector.broadcast %464 : vector<16x1xf32> to vector<16x16xf32>
    %466 = arith.subf %462, %465 : vector<16x16xf32>
    %467 = math.exp %466 : vector<16x16xf32>
    %cst_154 = arith.constant dense<0.000000e+00> : vector<16xf32>
    %468 = vector.multi_reduction <add>, %467, %cst_154 [1] : vector<16x16xf32> to vector<16xf32>
    %469 = vector.shape_cast %468 : vector<16xf32> to vector<16x1xf32>
    %470 = tpu.reciprocal %469 {approx = true} : vector<16x1xf32> -> vector<16x1xf32>
    %471 = vector.broadcast %470 : vector<16x1xf32> to vector<16x16xf32>
    %472 = arith.mulf %467, %471 : vector<16x16xf32>
    %473 = arith.truncf %472 : vector<16x16xf32> to vector<16x16xbf16>
    %474 = vector.extract_strided_slice %382 {offsets = [0, 24], sizes = [16, 8], strides = [1, 1]} : vector<16x32xf32> to vector<16x8xf32>
    %475 = arith.truncf %474 : vector<16x8xf32> to vector<16x8xbf16>
    %cst_155 = arith.constant dense<0.000000e+00> : vector<16x8xf32>
    %476 = tpu.matmul %473, %475, %cst_155 {dimension_numbers = #tpu.dot_dimension_numbers<[1], [0], [0], [1], [0, 0, 1, 1], [], []>} : vector<16x16xbf16>, vector<16x8xbf16>, vector<16x8xf32> -> vector<16x8xf32>
    %477 = tpu.concatenate %407, %430, %453, %476 in 1 : vector<16x8xf32>, vector<16x8xf32>, vector<16x8xf32>, vector<16x8xf32> -> vector<16x32xf32>
    %478 = tpu.concatenate %379, %477 in 0 : vector<16x32xf32>, vector<16x32xf32> -> vector<32x32xf32>
    %479 = arith.truncf %478 : vector<32x32xf32> to vector<32x32xbf16>
    %cst_156 = arith.constant dense<0.000000e+00> : vector<32x32xf32>
    %480 = tpu.matmul %479, %263, %cst_156 {dimension_numbers = #tpu.dot_dimension_numbers<[1], [0], [0], [1], [0, 0, 1, 1], [], []>} : vector<32x32xbf16>, vector<32x32xbf16>, vector<32x32xf32> -> vector<32x32xf32>
    %c1_157 = arith.constant 1 : index
    %c0_158 = arith.constant 0 : index
    %c0_159 = arith.constant 0 : index
    %481 = vector.load %arg12[%c1_157, %c0_158, %c0_159] : memref<4x1x32xf32, #tpu.memory_space<vmem>>, vector<1x1x32xf32>
    %482 = vector.shape_cast %481 : vector<1x1x32xf32> to vector<1x32xf32>
    %483 = vector.broadcast %482 : vector<1x32xf32> to vector<32x32xf32>
    %484 = arith.addf %480, %483 : vector<32x32xf32>
    %485 = arith.addf %1, %484 : vector<32x32xf32>
    %c1_160 = arith.constant 1 : index
    %c0_161 = arith.constant 0 : index
    %c0_162 = arith.constant 0 : index
    %486 = vector.load %arg17[%c1_160, %c0_161, %c0_162] : memref<6x1x32xf32, #tpu.memory_space<vmem>>, vector<1x1x32xf32>
    %487 = vector.shape_cast %486 : vector<1x1x32xf32> to vector<1x32xf32>
    %c1_163 = arith.constant 1 : index
    %c0_164 = arith.constant 0 : index
    %c0_165 = arith.constant 0 : index
    %488 = vector.load %arg18[%c1_163, %c0_164, %c0_165] : memref<6x1x32xf32, #tpu.memory_space<vmem>>, vector<1x1x32xf32>
    %489 = vector.shape_cast %488 : vector<1x1x32xf32> to vector<1x32xf32>
    %cst_166 = arith.constant dense<0.000000e+00> : vector<32xf32>
    %490 = vector.multi_reduction <add>, %485, %cst_166 [1] : vector<32x32xf32> to vector<32xf32>
    %491 = vector.shape_cast %490 : vector<32xf32> to vector<32x1xf32>
    %cst_167 = arith.constant 3.200000e+01 : f32
    %492 = vector.broadcast %cst_167 : f32 to vector<32x1xf32>
    %493 = arith.divf %491, %492 : vector<32x1xf32>
    %494 = vector.broadcast %493 : vector<32x1xf32> to vector<32x32xf32>
    %495 = arith.subf %485, %494 : vector<32x32xf32>
    %496 = arith.mulf %495, %495 : vector<32x32xf32>
    %cst_168 = arith.constant dense<0.000000e+00> : vector<32xf32>
    %497 = vector.multi_reduction <add>, %496, %cst_168 [1] : vector<32x32xf32> to vector<32xf32>
    %498 = vector.shape_cast %497 : vector<32xf32> to vector<32x1xf32>
    %cst_169 = arith.constant 3.100000e+01 : f32
    %499 = vector.broadcast %cst_169 : f32 to vector<32x1xf32>
    %500 = arith.divf %498, %499 : vector<32x1xf32>
    %501 = vector.broadcast %487 : vector<1x32xf32> to vector<32x32xf32>
    %502 = arith.mulf %501, %495 : vector<32x32xf32>
    %503 = math.sqrt %500 : vector<32x1xf32>
    %cst_170 = arith.constant 9.99999997E-7 : f32
    %504 = vector.broadcast %cst_170 : f32 to vector<32x1xf32>
    %505 = arith.addf %503, %504 : vector<32x1xf32>
    %506 = vector.broadcast %505 : vector<32x1xf32> to vector<32x32xf32>
    %507 = arith.divf %502, %506 : vector<32x32xf32>
    %508 = vector.broadcast %489 : vector<1x32xf32> to vector<32x32xf32>
    %509 = arith.addf %507, %508 : vector<32x32xf32>
    %c2 = arith.constant 2 : index
    %c0_171 = arith.constant 0 : index
    %c0_172 = arith.constant 0 : index
    %510 = vector.load %arg5[%c2, %c0_171, %c0_172] : memref<4x32x32xbf16, #tpu.memory_space<vmem>>, vector<1x32x32xbf16>
    %511 = vector.shape_cast %510 : vector<1x32x32xbf16> to vector<32x32xbf16>
    %c2_173 = arith.constant 2 : index
    %c0_174 = arith.constant 0 : index
    %c0_175 = arith.constant 0 : index
    %512 = vector.load %arg6[%c2_173, %c0_174, %c0_175] : memref<4x32x32xbf16, #tpu.memory_space<vmem>>, vector<1x32x32xbf16>
    %513 = vector.shape_cast %512 : vector<1x32x32xbf16> to vector<32x32xbf16>
    %c2_176 = arith.constant 2 : index
    %c0_177 = arith.constant 0 : index
    %c0_178 = arith.constant 0 : index
    %514 = vector.load %arg7[%c2_176, %c0_177, %c0_178] : memref<4x32x32xbf16, #tpu.memory_space<vmem>>, vector<1x32x32xbf16>
    %515 = vector.shape_cast %514 : vector<1x32x32xbf16> to vector<32x32xbf16>
    %c2_179 = arith.constant 2 : index
    %c0_180 = arith.constant 0 : index
    %c0_181 = arith.constant 0 : index
    %516 = vector.load %arg8[%c2_179, %c0_180, %c0_181] : memref<4x32x32xbf16, #tpu.memory_space<vmem>>, vector<1x32x32xbf16>
    %517 = vector.shape_cast %516 : vector<1x32x32xbf16> to vector<32x32xbf16>
    %518 = arith.truncf %255 : vector<16x32xf32> to vector<16x32xbf16>
    %cst_182 = arith.constant dense<0.000000e+00> : vector<16x32xf32>
    %519 = tpu.matmul %518, %511, %cst_182 {dimension_numbers = #tpu.dot_dimension_numbers<[1], [0], [0], [1], [0, 0, 1, 1], [], []>} : vector<16x32xbf16>, vector<32x32xbf16>, vector<16x32xf32> -> vector<16x32xf32>
    %c2_183 = arith.constant 2 : index
    %c0_184 = arith.constant 0 : index
    %c0_185 = arith.constant 0 : index
    %520 = vector.load %arg9[%c2_183, %c0_184, %c0_185] : memref<4x1x32xf32, #tpu.memory_space<vmem>>, vector<1x1x32xf32>
    %521 = vector.shape_cast %520 : vector<1x1x32xf32> to vector<1x32xf32>
    %522 = vector.broadcast %521 : vector<1x32xf32> to vector<16x32xf32>
    %523 = arith.addf %519, %522 : vector<16x32xf32>
    %524 = arith.truncf %509 : vector<32x32xf32> to vector<32x32xbf16>
    %cst_186 = arith.constant dense<0.000000e+00> : vector<32x32xf32>
    %525 = tpu.matmul %524, %513, %cst_186 {dimension_numbers = #tpu.dot_dimension_numbers<[1], [0], [0], [1], [0, 0, 1, 1], [], []>} : vector<32x32xbf16>, vector<32x32xbf16>, vector<32x32xf32> -> vector<32x32xf32>
    %c2_187 = arith.constant 2 : index
    %c0_188 = arith.constant 0 : index
    %c0_189 = arith.constant 0 : index
    %526 = vector.load %arg10[%c2_187, %c0_188, %c0_189] : memref<4x1x32xf32, #tpu.memory_space<vmem>>, vector<1x1x32xf32>
    %527 = vector.shape_cast %526 : vector<1x1x32xf32> to vector<1x32xf32>
    %528 = vector.broadcast %527 : vector<1x32xf32> to vector<32x32xf32>
    %529 = arith.addf %525, %528 : vector<32x32xf32>
    %530 = arith.truncf %509 : vector<32x32xf32> to vector<32x32xbf16>
    %cst_190 = arith.constant dense<0.000000e+00> : vector<32x32xf32>
    %531 = tpu.matmul %530, %515, %cst_190 {dimension_numbers = #tpu.dot_dimension_numbers<[1], [0], [0], [1], [0, 0, 1, 1], [], []>} : vector<32x32xbf16>, vector<32x32xbf16>, vector<32x32xf32> -> vector<32x32xf32>
    %c2_191 = arith.constant 2 : index
    %c0_192 = arith.constant 0 : index
    %c0_193 = arith.constant 0 : index
    %532 = vector.load %arg11[%c2_191, %c0_192, %c0_193] : memref<4x1x32xf32, #tpu.memory_space<vmem>>, vector<1x1x32xf32>
    %533 = vector.shape_cast %532 : vector<1x1x32xf32> to vector<1x32xf32>
    %534 = vector.broadcast %533 : vector<1x32xf32> to vector<32x32xf32>
    %535 = arith.addf %531, %534 : vector<32x32xf32>
    %536 = vector.extract_strided_slice %523 {offsets = [0, 0], sizes = [8, 32], strides = [1, 1]} : vector<16x32xf32> to vector<8x32xf32>
    %537 = vector.extract_strided_slice %529 {offsets = [0, 0], sizes = [16, 32], strides = [1, 1]} : vector<32x32xf32> to vector<16x32xf32>
    %538 = vector.extract_strided_slice %535 {offsets = [0, 0], sizes = [16, 32], strides = [1, 1]} : vector<32x32xf32> to vector<16x32xf32>
    %c0_194 = arith.constant 0 : index
    %c0_195 = arith.constant 0 : index
    %c0_196 = arith.constant 0 : index
    %539 = vector.load %arg4[%c0_194, %c0_195, %c0_196] : memref<2x1x16xf32, #tpu.memory_space<vmem>>, vector<1x1x16xf32>
    %540 = vector.shape_cast %539 : vector<1x1x16xf32> to vector<1x16xf32>
    %541 = vector.extract_strided_slice %536 {offsets = [0, 0], sizes = [8, 8], strides = [1, 1]} : vector<8x32xf32> to vector<8x8xf32>
    %542 = arith.truncf %541 : vector<8x8xf32> to vector<8x8xbf16>
    %543 = vector.extract_strided_slice %537 {offsets = [0, 0], sizes = [16, 8], strides = [1, 1]} : vector<16x32xf32> to vector<16x8xf32>
    %544 = arith.truncf %543 : vector<16x8xf32> to vector<16x8xbf16>
    %cst_197 = arith.constant dense<0.000000e+00> : vector<8x16xf32>
    %545 = tpu.matmul %542, %544, %cst_197 {dimension_numbers = #tpu.dot_dimension_numbers<[1], [1], [0], [0], [0, 0, 1, 0], [], []>} : vector<8x8xbf16>, vector<16x8xbf16>, vector<8x16xf32> -> vector<8x16xf32>
    %cst_198 = arith.constant 0.353553385 : f32
    %546 = vector.broadcast %cst_198 : f32 to vector<8x16xf32>
    %547 = arith.mulf %545, %546 : vector<8x16xf32>
    %548 = vector.broadcast %540 : vector<1x16xf32> to vector<8x16xf32>
    %549 = arith.addf %547, %548 : vector<8x16xf32>
    %cst_199 = arith.constant dense<0xFF800000> : vector<8xf32>
    %550 = vector.multi_reduction <maximumf>, %549, %cst_199 [1] : vector<8x16xf32> to vector<8xf32>
    %551 = vector.shape_cast %550 : vector<8xf32> to vector<8x1xf32>
    %552 = vector.broadcast %551 : vector<8x1xf32> to vector<8x16xf32>
    %553 = arith.subf %549, %552 : vector<8x16xf32>
    %554 = math.exp %553 : vector<8x16xf32>
    %cst_200 = arith.constant dense<0.000000e+00> : vector<8xf32>
    %555 = vector.multi_reduction <add>, %554, %cst_200 [1] : vector<8x16xf32> to vector<8xf32>
    %556 = vector.shape_cast %555 : vector<8xf32> to vector<8x1xf32>
    %557 = tpu.reciprocal %556 {approx = true} : vector<8x1xf32> -> vector<8x1xf32>
    %558 = vector.broadcast %557 : vector<8x1xf32> to vector<8x16xf32>
    %559 = arith.mulf %554, %558 : vector<8x16xf32>
    %560 = arith.truncf %559 : vector<8x16xf32> to vector<8x16xbf16>
    %561 = vector.extract_strided_slice %538 {offsets = [0, 0], sizes = [16, 8], strides = [1, 1]} : vector<16x32xf32> to vector<16x8xf32>
    %562 = arith.truncf %561 : vector<16x8xf32> to vector<16x8xbf16>
    %cst_201 = arith.constant dense<0.000000e+00> : vector<8x8xf32>
    %563 = tpu.matmul %560, %562, %cst_201 {dimension_numbers = #tpu.dot_dimension_numbers<[1], [0], [0], [1], [0, 0, 1, 1], [], []>} : vector<8x16xbf16>, vector<16x8xbf16>, vector<8x8xf32> -> vector<8x8xf32>
    %564 = vector.extract_strided_slice %536 {offsets = [0, 8], sizes = [8, 8], strides = [1, 1]} : vector<8x32xf32> to vector<8x8xf32>
    %565 = arith.truncf %564 : vector<8x8xf32> to vector<8x8xbf16>
    %566 = vector.extract_strided_slice %537 {offsets = [0, 8], sizes = [16, 8], strides = [1, 1]} : vector<16x32xf32> to vector<16x8xf32>
    %567 = arith.truncf %566 : vector<16x8xf32> to vector<16x8xbf16>
    %cst_202 = arith.constant dense<0.000000e+00> : vector<8x16xf32>
    %568 = tpu.matmul %565, %567, %cst_202 {dimension_numbers = #tpu.dot_dimension_numbers<[1], [1], [0], [0], [0, 0, 1, 0], [], []>} : vector<8x8xbf16>, vector<16x8xbf16>, vector<8x16xf32> -> vector<8x16xf32>
    %cst_203 = arith.constant 0.353553385 : f32
    %569 = vector.broadcast %cst_203 : f32 to vector<8x16xf32>
    %570 = arith.mulf %568, %569 : vector<8x16xf32>
    %571 = vector.broadcast %540 : vector<1x16xf32> to vector<8x16xf32>
    %572 = arith.addf %570, %571 : vector<8x16xf32>
    %cst_204 = arith.constant dense<0xFF800000> : vector<8xf32>
    %573 = vector.multi_reduction <maximumf>, %572, %cst_204 [1] : vector<8x16xf32> to vector<8xf32>
    %574 = vector.shape_cast %573 : vector<8xf32> to vector<8x1xf32>
    %575 = vector.broadcast %574 : vector<8x1xf32> to vector<8x16xf32>
    %576 = arith.subf %572, %575 : vector<8x16xf32>
    %577 = math.exp %576 : vector<8x16xf32>
    %cst_205 = arith.constant dense<0.000000e+00> : vector<8xf32>
    %578 = vector.multi_reduction <add>, %577, %cst_205 [1] : vector<8x16xf32> to vector<8xf32>
    %579 = vector.shape_cast %578 : vector<8xf32> to vector<8x1xf32>
    %580 = tpu.reciprocal %579 {approx = true} : vector<8x1xf32> -> vector<8x1xf32>
    %581 = vector.broadcast %580 : vector<8x1xf32> to vector<8x16xf32>
    %582 = arith.mulf %577, %581 : vector<8x16xf32>
    %583 = arith.truncf %582 : vector<8x16xf32> to vector<8x16xbf16>
    %584 = vector.extract_strided_slice %538 {offsets = [0, 8], sizes = [16, 8], strides = [1, 1]} : vector<16x32xf32> to vector<16x8xf32>
    %585 = arith.truncf %584 : vector<16x8xf32> to vector<16x8xbf16>
    %cst_206 = arith.constant dense<0.000000e+00> : vector<8x8xf32>
    %586 = tpu.matmul %583, %585, %cst_206 {dimension_numbers = #tpu.dot_dimension_numbers<[1], [0], [0], [1], [0, 0, 1, 1], [], []>} : vector<8x16xbf16>, vector<16x8xbf16>, vector<8x8xf32> -> vector<8x8xf32>
    %587 = vector.extract_strided_slice %536 {offsets = [0, 16], sizes = [8, 8], strides = [1, 1]} : vector<8x32xf32> to vector<8x8xf32>
    %588 = arith.truncf %587 : vector<8x8xf32> to vector<8x8xbf16>
    %589 = vector.extract_strided_slice %537 {offsets = [0, 16], sizes = [16, 8], strides = [1, 1]} : vector<16x32xf32> to vector<16x8xf32>
    %590 = arith.truncf %589 : vector<16x8xf32> to vector<16x8xbf16>
    %cst_207 = arith.constant dense<0.000000e+00> : vector<8x16xf32>
    %591 = tpu.matmul %588, %590, %cst_207 {dimension_numbers = #tpu.dot_dimension_numbers<[1], [1], [0], [0], [0, 0, 1, 0], [], []>} : vector<8x8xbf16>, vector<16x8xbf16>, vector<8x16xf32> -> vector<8x16xf32>
    %cst_208 = arith.constant 0.353553385 : f32
    %592 = vector.broadcast %cst_208 : f32 to vector<8x16xf32>
    %593 = arith.mulf %591, %592 : vector<8x16xf32>
    %594 = vector.broadcast %540 : vector<1x16xf32> to vector<8x16xf32>
    %595 = arith.addf %593, %594 : vector<8x16xf32>
    %cst_209 = arith.constant dense<0xFF800000> : vector<8xf32>
    %596 = vector.multi_reduction <maximumf>, %595, %cst_209 [1] : vector<8x16xf32> to vector<8xf32>
    %597 = vector.shape_cast %596 : vector<8xf32> to vector<8x1xf32>
    %598 = vector.broadcast %597 : vector<8x1xf32> to vector<8x16xf32>
    %599 = arith.subf %595, %598 : vector<8x16xf32>
    %600 = math.exp %599 : vector<8x16xf32>
    %cst_210 = arith.constant dense<0.000000e+00> : vector<8xf32>
    %601 = vector.multi_reduction <add>, %600, %cst_210 [1] : vector<8x16xf32> to vector<8xf32>
    %602 = vector.shape_cast %601 : vector<8xf32> to vector<8x1xf32>
    %603 = tpu.reciprocal %602 {approx = true} : vector<8x1xf32> -> vector<8x1xf32>
    %604 = vector.broadcast %603 : vector<8x1xf32> to vector<8x16xf32>
    %605 = arith.mulf %600, %604 : vector<8x16xf32>
    %606 = arith.truncf %605 : vector<8x16xf32> to vector<8x16xbf16>
    %607 = vector.extract_strided_slice %538 {offsets = [0, 16], sizes = [16, 8], strides = [1, 1]} : vector<16x32xf32> to vector<16x8xf32>
    %608 = arith.truncf %607 : vector<16x8xf32> to vector<16x8xbf16>
    %cst_211 = arith.constant dense<0.000000e+00> : vector<8x8xf32>
    %609 = tpu.matmul %606, %608, %cst_211 {dimension_numbers = #tpu.dot_dimension_numbers<[1], [0], [0], [1], [0, 0, 1, 1], [], []>} : vector<8x16xbf16>, vector<16x8xbf16>, vector<8x8xf32> -> vector<8x8xf32>
    %610 = vector.extract_strided_slice %536 {offsets = [0, 24], sizes = [8, 8], strides = [1, 1]} : vector<8x32xf32> to vector<8x8xf32>
    %611 = arith.truncf %610 : vector<8x8xf32> to vector<8x8xbf16>
    %612 = vector.extract_strided_slice %537 {offsets = [0, 24], sizes = [16, 8], strides = [1, 1]} : vector<16x32xf32> to vector<16x8xf32>
    %613 = arith.truncf %612 : vector<16x8xf32> to vector<16x8xbf16>
    %cst_212 = arith.constant dense<0.000000e+00> : vector<8x16xf32>
    %614 = tpu.matmul %611, %613, %cst_212 {dimension_numbers = #tpu.dot_dimension_numbers<[1], [1], [0], [0], [0, 0, 1, 0], [], []>} : vector<8x8xbf16>, vector<16x8xbf16>, vector<8x16xf32> -> vector<8x16xf32>
    %cst_213 = arith.constant 0.353553385 : f32
    %615 = vector.broadcast %cst_213 : f32 to vector<8x16xf32>
    %616 = arith.mulf %614, %615 : vector<8x16xf32>
    %617 = vector.broadcast %540 : vector<1x16xf32> to vector<8x16xf32>
    %618 = arith.addf %616, %617 : vector<8x16xf32>
    %cst_214 = arith.constant dense<0xFF800000> : vector<8xf32>
    %619 = vector.multi_reduction <maximumf>, %618, %cst_214 [1] : vector<8x16xf32> to vector<8xf32>
    %620 = vector.shape_cast %619 : vector<8xf32> to vector<8x1xf32>
    %621 = vector.broadcast %620 : vector<8x1xf32> to vector<8x16xf32>
    %622 = arith.subf %618, %621 : vector<8x16xf32>
    %623 = math.exp %622 : vector<8x16xf32>
    %cst_215 = arith.constant dense<0.000000e+00> : vector<8xf32>
    %624 = vector.multi_reduction <add>, %623, %cst_215 [1] : vector<8x16xf32> to vector<8xf32>
    %625 = vector.shape_cast %624 : vector<8xf32> to vector<8x1xf32>
    %626 = tpu.reciprocal %625 {approx = true} : vector<8x1xf32> -> vector<8x1xf32>
    %627 = vector.broadcast %626 : vector<8x1xf32> to vector<8x16xf32>
    %628 = arith.mulf %623, %627 : vector<8x16xf32>
    %629 = arith.truncf %628 : vector<8x16xf32> to vector<8x16xbf16>
    %630 = vector.extract_strided_slice %538 {offsets = [0, 24], sizes = [16, 8], strides = [1, 1]} : vector<16x32xf32> to vector<16x8xf32>
    %631 = arith.truncf %630 : vector<16x8xf32> to vector<16x8xbf16>
    %cst_216 = arith.constant dense<0.000000e+00> : vector<8x8xf32>
    %632 = tpu.matmul %629, %631, %cst_216 {dimension_numbers = #tpu.dot_dimension_numbers<[1], [0], [0], [1], [0, 0, 1, 1], [], []>} : vector<8x16xbf16>, vector<16x8xbf16>, vector<8x8xf32> -> vector<8x8xf32>
    %633 = tpu.concatenate %563, %586, %609, %632 in 1 : vector<8x8xf32>, vector<8x8xf32>, vector<8x8xf32>, vector<8x8xf32> -> vector<8x32xf32>
    %634 = vector.extract_strided_slice %523 {offsets = [8, 0], sizes = [8, 32], strides = [1, 1]} : vector<16x32xf32> to vector<8x32xf32>
    %635 = vector.extract_strided_slice %529 {offsets = [16, 0], sizes = [16, 32], strides = [1, 1]} : vector<32x32xf32> to vector<16x32xf32>
    %636 = vector.extract_strided_slice %535 {offsets = [16, 0], sizes = [16, 32], strides = [1, 1]} : vector<32x32xf32> to vector<16x32xf32>
    %c1_217 = arith.constant 1 : index
    %c0_218 = arith.constant 0 : index
    %c0_219 = arith.constant 0 : index
    %637 = vector.load %arg4[%c1_217, %c0_218, %c0_219] : memref<2x1x16xf32, #tpu.memory_space<vmem>>, vector<1x1x16xf32>
    %638 = vector.shape_cast %637 : vector<1x1x16xf32> to vector<1x16xf32>
    %639 = vector.extract_strided_slice %634 {offsets = [0, 0], sizes = [8, 8], strides = [1, 1]} : vector<8x32xf32> to vector<8x8xf32>
    %640 = arith.truncf %639 : vector<8x8xf32> to vector<8x8xbf16>
    %641 = vector.extract_strided_slice %635 {offsets = [0, 0], sizes = [16, 8], strides = [1, 1]} : vector<16x32xf32> to vector<16x8xf32>
    %642 = arith.truncf %641 : vector<16x8xf32> to vector<16x8xbf16>
    %cst_220 = arith.constant dense<0.000000e+00> : vector<8x16xf32>
    %643 = tpu.matmul %640, %642, %cst_220 {dimension_numbers = #tpu.dot_dimension_numbers<[1], [1], [0], [0], [0, 0, 1, 0], [], []>} : vector<8x8xbf16>, vector<16x8xbf16>, vector<8x16xf32> -> vector<8x16xf32>
    %cst_221 = arith.constant 0.353553385 : f32
    %644 = vector.broadcast %cst_221 : f32 to vector<8x16xf32>
    %645 = arith.mulf %643, %644 : vector<8x16xf32>
    %646 = vector.broadcast %638 : vector<1x16xf32> to vector<8x16xf32>
    %647 = arith.addf %645, %646 : vector<8x16xf32>
    %cst_222 = arith.constant dense<0xFF800000> : vector<8xf32>
    %648 = vector.multi_reduction <maximumf>, %647, %cst_222 [1] : vector<8x16xf32> to vector<8xf32>
    %649 = vector.shape_cast %648 : vector<8xf32> to vector<8x1xf32>
    %650 = vector.broadcast %649 : vector<8x1xf32> to vector<8x16xf32>
    %651 = arith.subf %647, %650 : vector<8x16xf32>
    %652 = math.exp %651 : vector<8x16xf32>
    %cst_223 = arith.constant dense<0.000000e+00> : vector<8xf32>
    %653 = vector.multi_reduction <add>, %652, %cst_223 [1] : vector<8x16xf32> to vector<8xf32>
    %654 = vector.shape_cast %653 : vector<8xf32> to vector<8x1xf32>
    %655 = tpu.reciprocal %654 {approx = true} : vector<8x1xf32> -> vector<8x1xf32>
    %656 = vector.broadcast %655 : vector<8x1xf32> to vector<8x16xf32>
    %657 = arith.mulf %652, %656 : vector<8x16xf32>
    %658 = arith.truncf %657 : vector<8x16xf32> to vector<8x16xbf16>
    %659 = vector.extract_strided_slice %636 {offsets = [0, 0], sizes = [16, 8], strides = [1, 1]} : vector<16x32xf32> to vector<16x8xf32>
    %660 = arith.truncf %659 : vector<16x8xf32> to vector<16x8xbf16>
    %cst_224 = arith.constant dense<0.000000e+00> : vector<8x8xf32>
    %661 = tpu.matmul %658, %660, %cst_224 {dimension_numbers = #tpu.dot_dimension_numbers<[1], [0], [0], [1], [0, 0, 1, 1], [], []>} : vector<8x16xbf16>, vector<16x8xbf16>, vector<8x8xf32> -> vector<8x8xf32>
    %662 = vector.extract_strided_slice %634 {offsets = [0, 8], sizes = [8, 8], strides = [1, 1]} : vector<8x32xf32> to vector<8x8xf32>
    %663 = arith.truncf %662 : vector<8x8xf32> to vector<8x8xbf16>
    %664 = vector.extract_strided_slice %635 {offsets = [0, 8], sizes = [16, 8], strides = [1, 1]} : vector<16x32xf32> to vector<16x8xf32>
    %665 = arith.truncf %664 : vector<16x8xf32> to vector<16x8xbf16>
    %cst_225 = arith.constant dense<0.000000e+00> : vector<8x16xf32>
    %666 = tpu.matmul %663, %665, %cst_225 {dimension_numbers = #tpu.dot_dimension_numbers<[1], [1], [0], [0], [0, 0, 1, 0], [], []>} : vector<8x8xbf16>, vector<16x8xbf16>, vector<8x16xf32> -> vector<8x16xf32>
    %cst_226 = arith.constant 0.353553385 : f32
    %667 = vector.broadcast %cst_226 : f32 to vector<8x16xf32>
    %668 = arith.mulf %666, %667 : vector<8x16xf32>
    %669 = vector.broadcast %638 : vector<1x16xf32> to vector<8x16xf32>
    %670 = arith.addf %668, %669 : vector<8x16xf32>
    %cst_227 = arith.constant dense<0xFF800000> : vector<8xf32>
    %671 = vector.multi_reduction <maximumf>, %670, %cst_227 [1] : vector<8x16xf32> to vector<8xf32>
    %672 = vector.shape_cast %671 : vector<8xf32> to vector<8x1xf32>
    %673 = vector.broadcast %672 : vector<8x1xf32> to vector<8x16xf32>
    %674 = arith.subf %670, %673 : vector<8x16xf32>
    %675 = math.exp %674 : vector<8x16xf32>
    %cst_228 = arith.constant dense<0.000000e+00> : vector<8xf32>
    %676 = vector.multi_reduction <add>, %675, %cst_228 [1] : vector<8x16xf32> to vector<8xf32>
    %677 = vector.shape_cast %676 : vector<8xf32> to vector<8x1xf32>
    %678 = tpu.reciprocal %677 {approx = true} : vector<8x1xf32> -> vector<8x1xf32>
    %679 = vector.broadcast %678 : vector<8x1xf32> to vector<8x16xf32>
    %680 = arith.mulf %675, %679 : vector<8x16xf32>
    %681 = arith.truncf %680 : vector<8x16xf32> to vector<8x16xbf16>
    %682 = vector.extract_strided_slice %636 {offsets = [0, 8], sizes = [16, 8], strides = [1, 1]} : vector<16x32xf32> to vector<16x8xf32>
    %683 = arith.truncf %682 : vector<16x8xf32> to vector<16x8xbf16>
    %cst_229 = arith.constant dense<0.000000e+00> : vector<8x8xf32>
    %684 = tpu.matmul %681, %683, %cst_229 {dimension_numbers = #tpu.dot_dimension_numbers<[1], [0], [0], [1], [0, 0, 1, 1], [], []>} : vector<8x16xbf16>, vector<16x8xbf16>, vector<8x8xf32> -> vector<8x8xf32>
    %685 = vector.extract_strided_slice %634 {offsets = [0, 16], sizes = [8, 8], strides = [1, 1]} : vector<8x32xf32> to vector<8x8xf32>
    %686 = arith.truncf %685 : vector<8x8xf32> to vector<8x8xbf16>
    %687 = vector.extract_strided_slice %635 {offsets = [0, 16], sizes = [16, 8], strides = [1, 1]} : vector<16x32xf32> to vector<16x8xf32>
    %688 = arith.truncf %687 : vector<16x8xf32> to vector<16x8xbf16>
    %cst_230 = arith.constant dense<0.000000e+00> : vector<8x16xf32>
    %689 = tpu.matmul %686, %688, %cst_230 {dimension_numbers = #tpu.dot_dimension_numbers<[1], [1], [0], [0], [0, 0, 1, 0], [], []>} : vector<8x8xbf16>, vector<16x8xbf16>, vector<8x16xf32> -> vector<8x16xf32>
    %cst_231 = arith.constant 0.353553385 : f32
    %690 = vector.broadcast %cst_231 : f32 to vector<8x16xf32>
    %691 = arith.mulf %689, %690 : vector<8x16xf32>
    %692 = vector.broadcast %638 : vector<1x16xf32> to vector<8x16xf32>
    %693 = arith.addf %691, %692 : vector<8x16xf32>
    %cst_232 = arith.constant dense<0xFF800000> : vector<8xf32>
    %694 = vector.multi_reduction <maximumf>, %693, %cst_232 [1] : vector<8x16xf32> to vector<8xf32>
    %695 = vector.shape_cast %694 : vector<8xf32> to vector<8x1xf32>
    %696 = vector.broadcast %695 : vector<8x1xf32> to vector<8x16xf32>
    %697 = arith.subf %693, %696 : vector<8x16xf32>
    %698 = math.exp %697 : vector<8x16xf32>
    %cst_233 = arith.constant dense<0.000000e+00> : vector<8xf32>
    %699 = vector.multi_reduction <add>, %698, %cst_233 [1] : vector<8x16xf32> to vector<8xf32>
    %700 = vector.shape_cast %699 : vector<8xf32> to vector<8x1xf32>
    %701 = tpu.reciprocal %700 {approx = true} : vector<8x1xf32> -> vector<8x1xf32>
    %702 = vector.broadcast %701 : vector<8x1xf32> to vector<8x16xf32>
    %703 = arith.mulf %698, %702 : vector<8x16xf32>
    %704 = arith.truncf %703 : vector<8x16xf32> to vector<8x16xbf16>
    %705 = vector.extract_strided_slice %636 {offsets = [0, 16], sizes = [16, 8], strides = [1, 1]} : vector<16x32xf32> to vector<16x8xf32>
    %706 = arith.truncf %705 : vector<16x8xf32> to vector<16x8xbf16>
    %cst_234 = arith.constant dense<0.000000e+00> : vector<8x8xf32>
    %707 = tpu.matmul %704, %706, %cst_234 {dimension_numbers = #tpu.dot_dimension_numbers<[1], [0], [0], [1], [0, 0, 1, 1], [], []>} : vector<8x16xbf16>, vector<16x8xbf16>, vector<8x8xf32> -> vector<8x8xf32>
    %708 = vector.extract_strided_slice %634 {offsets = [0, 24], sizes = [8, 8], strides = [1, 1]} : vector<8x32xf32> to vector<8x8xf32>
    %709 = arith.truncf %708 : vector<8x8xf32> to vector<8x8xbf16>
    %710 = vector.extract_strided_slice %635 {offsets = [0, 24], sizes = [16, 8], strides = [1, 1]} : vector<16x32xf32> to vector<16x8xf32>
    %711 = arith.truncf %710 : vector<16x8xf32> to vector<16x8xbf16>
    %cst_235 = arith.constant dense<0.000000e+00> : vector<8x16xf32>
    %712 = tpu.matmul %709, %711, %cst_235 {dimension_numbers = #tpu.dot_dimension_numbers<[1], [1], [0], [0], [0, 0, 1, 0], [], []>} : vector<8x8xbf16>, vector<16x8xbf16>, vector<8x16xf32> -> vector<8x16xf32>
    %cst_236 = arith.constant 0.353553385 : f32
    %713 = vector.broadcast %cst_236 : f32 to vector<8x16xf32>
    %714 = arith.mulf %712, %713 : vector<8x16xf32>
    %715 = vector.broadcast %638 : vector<1x16xf32> to vector<8x16xf32>
    %716 = arith.addf %714, %715 : vector<8x16xf32>
    %cst_237 = arith.constant dense<0xFF800000> : vector<8xf32>
    %717 = vector.multi_reduction <maximumf>, %716, %cst_237 [1] : vector<8x16xf32> to vector<8xf32>
    %718 = vector.shape_cast %717 : vector<8xf32> to vector<8x1xf32>
    %719 = vector.broadcast %718 : vector<8x1xf32> to vector<8x16xf32>
    %720 = arith.subf %716, %719 : vector<8x16xf32>
    %721 = math.exp %720 : vector<8x16xf32>
    %cst_238 = arith.constant dense<0.000000e+00> : vector<8xf32>
    %722 = vector.multi_reduction <add>, %721, %cst_238 [1] : vector<8x16xf32> to vector<8xf32>
    %723 = vector.shape_cast %722 : vector<8xf32> to vector<8x1xf32>
    %724 = tpu.reciprocal %723 {approx = true} : vector<8x1xf32> -> vector<8x1xf32>
    %725 = vector.broadcast %724 : vector<8x1xf32> to vector<8x16xf32>
    %726 = arith.mulf %721, %725 : vector<8x16xf32>
    %727 = arith.truncf %726 : vector<8x16xf32> to vector<8x16xbf16>
    %728 = vector.extract_strided_slice %636 {offsets = [0, 24], sizes = [16, 8], strides = [1, 1]} : vector<16x32xf32> to vector<16x8xf32>
    %729 = arith.truncf %728 : vector<16x8xf32> to vector<16x8xbf16>
    %cst_239 = arith.constant dense<0.000000e+00> : vector<8x8xf32>
    %730 = tpu.matmul %727, %729, %cst_239 {dimension_numbers = #tpu.dot_dimension_numbers<[1], [0], [0], [1], [0, 0, 1, 1], [], []>} : vector<8x16xbf16>, vector<16x8xbf16>, vector<8x8xf32> -> vector<8x8xf32>
    %731 = tpu.concatenate %661, %684, %707, %730 in 1 : vector<8x8xf32>, vector<8x8xf32>, vector<8x8xf32>, vector<8x8xf32> -> vector<8x32xf32>
    %732 = tpu.concatenate %633, %731 in 0 : vector<8x32xf32>, vector<8x32xf32> -> vector<16x32xf32>
    %733 = arith.truncf %732 : vector<16x32xf32> to vector<16x32xbf16>
    %cst_240 = arith.constant dense<0.000000e+00> : vector<16x32xf32>
    %734 = tpu.matmul %733, %517, %cst_240 {dimension_numbers = #tpu.dot_dimension_numbers<[1], [0], [0], [1], [0, 0, 1, 1], [], []>} : vector<16x32xbf16>, vector<32x32xbf16>, vector<16x32xf32> -> vector<16x32xf32>
    %c2_241 = arith.constant 2 : index
    %c0_242 = arith.constant 0 : index
    %c0_243 = arith.constant 0 : index
    %735 = vector.load %arg12[%c2_241, %c0_242, %c0_243] : memref<4x1x32xf32, #tpu.memory_space<vmem>>, vector<1x1x32xf32>
    %736 = vector.shape_cast %735 : vector<1x1x32xf32> to vector<1x32xf32>
    %737 = vector.broadcast %736 : vector<1x32xf32> to vector<16x32xf32>
    %738 = arith.addf %734, %737 : vector<16x32xf32>
    %739 = arith.addf %255, %738 : vector<16x32xf32>
    %c2_244 = arith.constant 2 : index
    %c0_245 = arith.constant 0 : index
    %c0_246 = arith.constant 0 : index
    %740 = vector.load %arg17[%c2_244, %c0_245, %c0_246] : memref<6x1x32xf32, #tpu.memory_space<vmem>>, vector<1x1x32xf32>
    %741 = vector.shape_cast %740 : vector<1x1x32xf32> to vector<1x32xf32>
    %c2_247 = arith.constant 2 : index
    %c0_248 = arith.constant 0 : index
    %c0_249 = arith.constant 0 : index
    %742 = vector.load %arg18[%c2_247, %c0_248, %c0_249] : memref<6x1x32xf32, #tpu.memory_space<vmem>>, vector<1x1x32xf32>
    %743 = vector.shape_cast %742 : vector<1x1x32xf32> to vector<1x32xf32>
    %cst_250 = arith.constant dense<0.000000e+00> : vector<16xf32>
    %744 = vector.multi_reduction <add>, %739, %cst_250 [1] : vector<16x32xf32> to vector<16xf32>
    %745 = vector.shape_cast %744 : vector<16xf32> to vector<16x1xf32>
    %cst_251 = arith.constant 3.200000e+01 : f32
    %746 = vector.broadcast %cst_251 : f32 to vector<16x1xf32>
    %747 = arith.divf %745, %746 : vector<16x1xf32>
    %748 = vector.broadcast %747 : vector<16x1xf32> to vector<16x32xf32>
    %749 = arith.subf %739, %748 : vector<16x32xf32>
    %750 = arith.mulf %749, %749 : vector<16x32xf32>
    %cst_252 = arith.constant dense<0.000000e+00> : vector<16xf32>
    %751 = vector.multi_reduction <add>, %750, %cst_252 [1] : vector<16x32xf32> to vector<16xf32>
    %752 = vector.shape_cast %751 : vector<16xf32> to vector<16x1xf32>
    %cst_253 = arith.constant 3.100000e+01 : f32
    %753 = vector.broadcast %cst_253 : f32 to vector<16x1xf32>
    %754 = arith.divf %752, %753 : vector<16x1xf32>
    %755 = vector.broadcast %741 : vector<1x32xf32> to vector<16x32xf32>
    %756 = arith.mulf %755, %749 : vector<16x32xf32>
    %757 = math.sqrt %754 : vector<16x1xf32>
    %cst_254 = arith.constant 9.99999997E-7 : f32
    %758 = vector.broadcast %cst_254 : f32 to vector<16x1xf32>
    %759 = arith.addf %757, %758 : vector<16x1xf32>
    %760 = vector.broadcast %759 : vector<16x1xf32> to vector<16x32xf32>
    %761 = arith.divf %756, %760 : vector<16x32xf32>
    %762 = vector.broadcast %743 : vector<1x32xf32> to vector<16x32xf32>
    %763 = arith.addf %761, %762 : vector<16x32xf32>
    %c3 = arith.constant 3 : index
    %c0_255 = arith.constant 0 : index
    %c0_256 = arith.constant 0 : index
    %764 = vector.load %arg5[%c3, %c0_255, %c0_256] : memref<4x32x32xbf16, #tpu.memory_space<vmem>>, vector<1x32x32xbf16>
    %765 = vector.shape_cast %764 : vector<1x32x32xbf16> to vector<32x32xbf16>
    %c3_257 = arith.constant 3 : index
    %c0_258 = arith.constant 0 : index
    %c0_259 = arith.constant 0 : index
    %766 = vector.load %arg6[%c3_257, %c0_258, %c0_259] : memref<4x32x32xbf16, #tpu.memory_space<vmem>>, vector<1x32x32xbf16>
    %767 = vector.shape_cast %766 : vector<1x32x32xbf16> to vector<32x32xbf16>
    %c3_260 = arith.constant 3 : index
    %c0_261 = arith.constant 0 : index
    %c0_262 = arith.constant 0 : index
    %768 = vector.load %arg7[%c3_260, %c0_261, %c0_262] : memref<4x32x32xbf16, #tpu.memory_space<vmem>>, vector<1x32x32xbf16>
    %769 = vector.shape_cast %768 : vector<1x32x32xbf16> to vector<32x32xbf16>
    %c3_263 = arith.constant 3 : index
    %c0_264 = arith.constant 0 : index
    %c0_265 = arith.constant 0 : index
    %770 = vector.load %arg8[%c3_263, %c0_264, %c0_265] : memref<4x32x32xbf16, #tpu.memory_space<vmem>>, vector<1x32x32xbf16>
    %771 = vector.shape_cast %770 : vector<1x32x32xbf16> to vector<32x32xbf16>
    %772 = arith.truncf %509 : vector<32x32xf32> to vector<32x32xbf16>
    %cst_266 = arith.constant dense<0.000000e+00> : vector<32x32xf32>
    %773 = tpu.matmul %772, %765, %cst_266 {dimension_numbers = #tpu.dot_dimension_numbers<[1], [0], [0], [1], [0, 0, 1, 1], [], []>} : vector<32x32xbf16>, vector<32x32xbf16>, vector<32x32xf32> -> vector<32x32xf32>
    %c3_267 = arith.constant 3 : index
    %c0_268 = arith.constant 0 : index
    %c0_269 = arith.constant 0 : index
    %774 = vector.load %arg9[%c3_267, %c0_268, %c0_269] : memref<4x1x32xf32, #tpu.memory_space<vmem>>, vector<1x1x32xf32>
    %775 = vector.shape_cast %774 : vector<1x1x32xf32> to vector<1x32xf32>
    %776 = vector.broadcast %775 : vector<1x32xf32> to vector<32x32xf32>
    %777 = arith.addf %773, %776 : vector<32x32xf32>
    %778 = arith.truncf %255 : vector<16x32xf32> to vector<16x32xbf16>
    %cst_270 = arith.constant dense<0.000000e+00> : vector<16x32xf32>
    %779 = tpu.matmul %778, %767, %cst_270 {dimension_numbers = #tpu.dot_dimension_numbers<[1], [0], [0], [1], [0, 0, 1, 1], [], []>} : vector<16x32xbf16>, vector<32x32xbf16>, vector<16x32xf32> -> vector<16x32xf32>
    %c3_271 = arith.constant 3 : index
    %c0_272 = arith.constant 0 : index
    %c0_273 = arith.constant 0 : index
    %780 = vector.load %arg10[%c3_271, %c0_272, %c0_273] : memref<4x1x32xf32, #tpu.memory_space<vmem>>, vector<1x1x32xf32>
    %781 = vector.shape_cast %780 : vector<1x1x32xf32> to vector<1x32xf32>
    %782 = vector.broadcast %781 : vector<1x32xf32> to vector<16x32xf32>
    %783 = arith.addf %779, %782 : vector<16x32xf32>
    %784 = arith.truncf %255 : vector<16x32xf32> to vector<16x32xbf16>
    %cst_274 = arith.constant dense<0.000000e+00> : vector<16x32xf32>
    %785 = tpu.matmul %784, %769, %cst_274 {dimension_numbers = #tpu.dot_dimension_numbers<[1], [0], [0], [1], [0, 0, 1, 1], [], []>} : vector<16x32xbf16>, vector<32x32xbf16>, vector<16x32xf32> -> vector<16x32xf32>
    %c3_275 = arith.constant 3 : index
    %c0_276 = arith.constant 0 : index
    %c0_277 = arith.constant 0 : index
    %786 = vector.load %arg11[%c3_275, %c0_276, %c0_277] : memref<4x1x32xf32, #tpu.memory_space<vmem>>, vector<1x1x32xf32>
    %787 = vector.shape_cast %786 : vector<1x1x32xf32> to vector<1x32xf32>
    %788 = vector.broadcast %787 : vector<1x32xf32> to vector<16x32xf32>
    %789 = arith.addf %785, %788 : vector<16x32xf32>
    %790 = vector.extract_strided_slice %777 {offsets = [0, 0], sizes = [16, 32], strides = [1, 1]} : vector<32x32xf32> to vector<16x32xf32>
    %791 = vector.extract_strided_slice %783 {offsets = [0, 0], sizes = [8, 32], strides = [1, 1]} : vector<16x32xf32> to vector<8x32xf32>
    %792 = vector.extract_strided_slice %789 {offsets = [0, 0], sizes = [8, 32], strides = [1, 1]} : vector<16x32xf32> to vector<8x32xf32>
    %c0_278 = arith.constant 0 : index
    %c0_279 = arith.constant 0 : index
    %c0_280 = arith.constant 0 : index
    %793 = vector.load %arg3[%c0_278, %c0_279, %c0_280] : memref<2x1x8xf32, #tpu.memory_space<vmem>>, vector<1x1x8xf32>
    %794 = vector.shape_cast %793 : vector<1x1x8xf32> to vector<1x8xf32>
    %795 = vector.extract_strided_slice %790 {offsets = [0, 0], sizes = [16, 8], strides = [1, 1]} : vector<16x32xf32> to vector<16x8xf32>
    %796 = arith.truncf %795 : vector<16x8xf32> to vector<16x8xbf16>
    %797 = vector.extract_strided_slice %791 {offsets = [0, 0], sizes = [8, 8], strides = [1, 1]} : vector<8x32xf32> to vector<8x8xf32>
    %798 = arith.truncf %797 : vector<8x8xf32> to vector<8x8xbf16>
    %cst_281 = arith.constant dense<0.000000e+00> : vector<16x8xf32>
    %799 = tpu.matmul %796, %798, %cst_281 {dimension_numbers = #tpu.dot_dimension_numbers<[1], [1], [0], [0], [0, 0, 1, 0], [], []>} : vector<16x8xbf16>, vector<8x8xbf16>, vector<16x8xf32> -> vector<16x8xf32>
    %cst_282 = arith.constant 0.353553385 : f32
    %800 = vector.broadcast %cst_282 : f32 to vector<16x8xf32>
    %801 = arith.mulf %799, %800 : vector<16x8xf32>
    %802 = vector.broadcast %794 : vector<1x8xf32> to vector<16x8xf32>
    %803 = arith.addf %801, %802 : vector<16x8xf32>
    %cst_283 = arith.constant dense<0xFF800000> : vector<16xf32>
    %804 = vector.multi_reduction <maximumf>, %803, %cst_283 [1] : vector<16x8xf32> to vector<16xf32>
    %805 = vector.shape_cast %804 : vector<16xf32> to vector<16x1xf32>
    %806 = vector.broadcast %805 : vector<16x1xf32> to vector<16x8xf32>
    %807 = arith.subf %803, %806 : vector<16x8xf32>
    %808 = math.exp %807 : vector<16x8xf32>
    %cst_284 = arith.constant dense<0.000000e+00> : vector<16xf32>
    %809 = vector.multi_reduction <add>, %808, %cst_284 [1] : vector<16x8xf32> to vector<16xf32>
    %810 = vector.shape_cast %809 : vector<16xf32> to vector<16x1xf32>
    %811 = tpu.reciprocal %810 {approx = true} : vector<16x1xf32> -> vector<16x1xf32>
    %812 = vector.broadcast %811 : vector<16x1xf32> to vector<16x8xf32>
    %813 = arith.mulf %808, %812 : vector<16x8xf32>
    %814 = arith.truncf %813 : vector<16x8xf32> to vector<16x8xbf16>
    %815 = vector.extract_strided_slice %792 {offsets = [0, 0], sizes = [8, 8], strides = [1, 1]} : vector<8x32xf32> to vector<8x8xf32>
    %816 = arith.truncf %815 : vector<8x8xf32> to vector<8x8xbf16>
    %cst_285 = arith.constant dense<0.000000e+00> : vector<16x8xf32>
    %817 = tpu.matmul %814, %816, %cst_285 {dimension_numbers = #tpu.dot_dimension_numbers<[1], [0], [0], [1], [0, 0, 1, 1], [], []>} : vector<16x8xbf16>, vector<8x8xbf16>, vector<16x8xf32> -> vector<16x8xf32>
    %818 = vector.extract_strided_slice %790 {offsets = [0, 8], sizes = [16, 8], strides = [1, 1]} : vector<16x32xf32> to vector<16x8xf32>
    %819 = arith.truncf %818 : vector<16x8xf32> to vector<16x8xbf16>
    %820 = vector.extract_strided_slice %791 {offsets = [0, 8], sizes = [8, 8], strides = [1, 1]} : vector<8x32xf32> to vector<8x8xf32>
    %821 = arith.truncf %820 : vector<8x8xf32> to vector<8x8xbf16>
    %cst_286 = arith.constant dense<0.000000e+00> : vector<16x8xf32>
    %822 = tpu.matmul %819, %821, %cst_286 {dimension_numbers = #tpu.dot_dimension_numbers<[1], [1], [0], [0], [0, 0, 1, 0], [], []>} : vector<16x8xbf16>, vector<8x8xbf16>, vector<16x8xf32> -> vector<16x8xf32>
    %cst_287 = arith.constant 0.353553385 : f32
    %823 = vector.broadcast %cst_287 : f32 to vector<16x8xf32>
    %824 = arith.mulf %822, %823 : vector<16x8xf32>
    %825 = vector.broadcast %794 : vector<1x8xf32> to vector<16x8xf32>
    %826 = arith.addf %824, %825 : vector<16x8xf32>
    %cst_288 = arith.constant dense<0xFF800000> : vector<16xf32>
    %827 = vector.multi_reduction <maximumf>, %826, %cst_288 [1] : vector<16x8xf32> to vector<16xf32>
    %828 = vector.shape_cast %827 : vector<16xf32> to vector<16x1xf32>
    %829 = vector.broadcast %828 : vector<16x1xf32> to vector<16x8xf32>
    %830 = arith.subf %826, %829 : vector<16x8xf32>
    %831 = math.exp %830 : vector<16x8xf32>
    %cst_289 = arith.constant dense<0.000000e+00> : vector<16xf32>
    %832 = vector.multi_reduction <add>, %831, %cst_289 [1] : vector<16x8xf32> to vector<16xf32>
    %833 = vector.shape_cast %832 : vector<16xf32> to vector<16x1xf32>
    %834 = tpu.reciprocal %833 {approx = true} : vector<16x1xf32> -> vector<16x1xf32>
    %835 = vector.broadcast %834 : vector<16x1xf32> to vector<16x8xf32>
    %836 = arith.mulf %831, %835 : vector<16x8xf32>
    %837 = arith.truncf %836 : vector<16x8xf32> to vector<16x8xbf16>
    %838 = vector.extract_strided_slice %792 {offsets = [0, 8], sizes = [8, 8], strides = [1, 1]} : vector<8x32xf32> to vector<8x8xf32>
    %839 = arith.truncf %838 : vector<8x8xf32> to vector<8x8xbf16>
    %cst_290 = arith.constant dense<0.000000e+00> : vector<16x8xf32>
    %840 = tpu.matmul %837, %839, %cst_290 {dimension_numbers = #tpu.dot_dimension_numbers<[1], [0], [0], [1], [0, 0, 1, 1], [], []>} : vector<16x8xbf16>, vector<8x8xbf16>, vector<16x8xf32> -> vector<16x8xf32>
    %841 = vector.extract_strided_slice %790 {offsets = [0, 16], sizes = [16, 8], strides = [1, 1]} : vector<16x32xf32> to vector<16x8xf32>
    %842 = arith.truncf %841 : vector<16x8xf32> to vector<16x8xbf16>
    %843 = vector.extract_strided_slice %791 {offsets = [0, 16], sizes = [8, 8], strides = [1, 1]} : vector<8x32xf32> to vector<8x8xf32>
    %844 = arith.truncf %843 : vector<8x8xf32> to vector<8x8xbf16>
    %cst_291 = arith.constant dense<0.000000e+00> : vector<16x8xf32>
    %845 = tpu.matmul %842, %844, %cst_291 {dimension_numbers = #tpu.dot_dimension_numbers<[1], [1], [0], [0], [0, 0, 1, 0], [], []>} : vector<16x8xbf16>, vector<8x8xbf16>, vector<16x8xf32> -> vector<16x8xf32>
    %cst_292 = arith.constant 0.353553385 : f32
    %846 = vector.broadcast %cst_292 : f32 to vector<16x8xf32>
    %847 = arith.mulf %845, %846 : vector<16x8xf32>
    %848 = vector.broadcast %794 : vector<1x8xf32> to vector<16x8xf32>
    %849 = arith.addf %847, %848 : vector<16x8xf32>
    %cst_293 = arith.constant dense<0xFF800000> : vector<16xf32>
    %850 = vector.multi_reduction <maximumf>, %849, %cst_293 [1] : vector<16x8xf32> to vector<16xf32>
    %851 = vector.shape_cast %850 : vector<16xf32> to vector<16x1xf32>
    %852 = vector.broadcast %851 : vector<16x1xf32> to vector<16x8xf32>
    %853 = arith.subf %849, %852 : vector<16x8xf32>
    %854 = math.exp %853 : vector<16x8xf32>
    %cst_294 = arith.constant dense<0.000000e+00> : vector<16xf32>
    %855 = vector.multi_reduction <add>, %854, %cst_294 [1] : vector<16x8xf32> to vector<16xf32>
    %856 = vector.shape_cast %855 : vector<16xf32> to vector<16x1xf32>
    %857 = tpu.reciprocal %856 {approx = true} : vector<16x1xf32> -> vector<16x1xf32>
    %858 = vector.broadcast %857 : vector<16x1xf32> to vector<16x8xf32>
    %859 = arith.mulf %854, %858 : vector<16x8xf32>
    %860 = arith.truncf %859 : vector<16x8xf32> to vector<16x8xbf16>
    %861 = vector.extract_strided_slice %792 {offsets = [0, 16], sizes = [8, 8], strides = [1, 1]} : vector<8x32xf32> to vector<8x8xf32>
    %862 = arith.truncf %861 : vector<8x8xf32> to vector<8x8xbf16>
    %cst_295 = arith.constant dense<0.000000e+00> : vector<16x8xf32>
    %863 = tpu.matmul %860, %862, %cst_295 {dimension_numbers = #tpu.dot_dimension_numbers<[1], [0], [0], [1], [0, 0, 1, 1], [], []>} : vector<16x8xbf16>, vector<8x8xbf16>, vector<16x8xf32> -> vector<16x8xf32>
    %864 = vector.extract_strided_slice %790 {offsets = [0, 24], sizes = [16, 8], strides = [1, 1]} : vector<16x32xf32> to vector<16x8xf32>
    %865 = arith.truncf %864 : vector<16x8xf32> to vector<16x8xbf16>
    %866 = vector.extract_strided_slice %791 {offsets = [0, 24], sizes = [8, 8], strides = [1, 1]} : vector<8x32xf32> to vector<8x8xf32>
    %867 = arith.truncf %866 : vector<8x8xf32> to vector<8x8xbf16>
    %cst_296 = arith.constant dense<0.000000e+00> : vector<16x8xf32>
    %868 = tpu.matmul %865, %867, %cst_296 {dimension_numbers = #tpu.dot_dimension_numbers<[1], [1], [0], [0], [0, 0, 1, 0], [], []>} : vector<16x8xbf16>, vector<8x8xbf16>, vector<16x8xf32> -> vector<16x8xf32>
    %cst_297 = arith.constant 0.353553385 : f32
    %869 = vector.broadcast %cst_297 : f32 to vector<16x8xf32>
    %870 = arith.mulf %868, %869 : vector<16x8xf32>
    %871 = vector.broadcast %794 : vector<1x8xf32> to vector<16x8xf32>
    %872 = arith.addf %870, %871 : vector<16x8xf32>
    %cst_298 = arith.constant dense<0xFF800000> : vector<16xf32>
    %873 = vector.multi_reduction <maximumf>, %872, %cst_298 [1] : vector<16x8xf32> to vector<16xf32>
    %874 = vector.shape_cast %873 : vector<16xf32> to vector<16x1xf32>
    %875 = vector.broadcast %874 : vector<16x1xf32> to vector<16x8xf32>
    %876 = arith.subf %872, %875 : vector<16x8xf32>
    %877 = math.exp %876 : vector<16x8xf32>
    %cst_299 = arith.constant dense<0.000000e+00> : vector<16xf32>
    %878 = vector.multi_reduction <add>, %877, %cst_299 [1] : vector<16x8xf32> to vector<16xf32>
    %879 = vector.shape_cast %878 : vector<16xf32> to vector<16x1xf32>
    %880 = tpu.reciprocal %879 {approx = true} : vector<16x1xf32> -> vector<16x1xf32>
    %881 = vector.broadcast %880 : vector<16x1xf32> to vector<16x8xf32>
    %882 = arith.mulf %877, %881 : vector<16x8xf32>
    %883 = arith.truncf %882 : vector<16x8xf32> to vector<16x8xbf16>
    %884 = vector.extract_strided_slice %792 {offsets = [0, 24], sizes = [8, 8], strides = [1, 1]} : vector<8x32xf32> to vector<8x8xf32>
    %885 = arith.truncf %884 : vector<8x8xf32> to vector<8x8xbf16>
    %cst_300 = arith.constant dense<0.000000e+00> : vector<16x8xf32>
    %886 = tpu.matmul %883, %885, %cst_300 {dimension_numbers = #tpu.dot_dimension_numbers<[1], [0], [0], [1], [0, 0, 1, 1], [], []>} : vector<16x8xbf16>, vector<8x8xbf16>, vector<16x8xf32> -> vector<16x8xf32>
    %887 = tpu.concatenate %817, %840, %863, %886 in 1 : vector<16x8xf32>, vector<16x8xf32>, vector<16x8xf32>, vector<16x8xf32> -> vector<16x32xf32>
    %888 = vector.extract_strided_slice %777 {offsets = [16, 0], sizes = [16, 32], strides = [1, 1]} : vector<32x32xf32> to vector<16x32xf32>
    %889 = vector.extract_strided_slice %783 {offsets = [8, 0], sizes = [8, 32], strides = [1, 1]} : vector<16x32xf32> to vector<8x32xf32>
    %890 = vector.extract_strided_slice %789 {offsets = [8, 0], sizes = [8, 32], strides = [1, 1]} : vector<16x32xf32> to vector<8x32xf32>
    %c1_301 = arith.constant 1 : index
    %c0_302 = arith.constant 0 : index
    %c0_303 = arith.constant 0 : index
    %891 = vector.load %arg3[%c1_301, %c0_302, %c0_303] : memref<2x1x8xf32, #tpu.memory_space<vmem>>, vector<1x1x8xf32>
    %892 = vector.shape_cast %891 : vector<1x1x8xf32> to vector<1x8xf32>
    %893 = vector.extract_strided_slice %888 {offsets = [0, 0], sizes = [16, 8], strides = [1, 1]} : vector<16x32xf32> to vector<16x8xf32>
    %894 = arith.truncf %893 : vector<16x8xf32> to vector<16x8xbf16>
    %895 = vector.extract_strided_slice %889 {offsets = [0, 0], sizes = [8, 8], strides = [1, 1]} : vector<8x32xf32> to vector<8x8xf32>
    %896 = arith.truncf %895 : vector<8x8xf32> to vector<8x8xbf16>
    %cst_304 = arith.constant dense<0.000000e+00> : vector<16x8xf32>
    %897 = tpu.matmul %894, %896, %cst_304 {dimension_numbers = #tpu.dot_dimension_numbers<[1], [1], [0], [0], [0, 0, 1, 0], [], []>} : vector<16x8xbf16>, vector<8x8xbf16>, vector<16x8xf32> -> vector<16x8xf32>
    %cst_305 = arith.constant 0.353553385 : f32
    %898 = vector.broadcast %cst_305 : f32 to vector<16x8xf32>
    %899 = arith.mulf %897, %898 : vector<16x8xf32>
    %900 = vector.broadcast %892 : vector<1x8xf32> to vector<16x8xf32>
    %901 = arith.addf %899, %900 : vector<16x8xf32>
    %cst_306 = arith.constant dense<0xFF800000> : vector<16xf32>
    %902 = vector.multi_reduction <maximumf>, %901, %cst_306 [1] : vector<16x8xf32> to vector<16xf32>
    %903 = vector.shape_cast %902 : vector<16xf32> to vector<16x1xf32>
    %904 = vector.broadcast %903 : vector<16x1xf32> to vector<16x8xf32>
    %905 = arith.subf %901, %904 : vector<16x8xf32>
    %906 = math.exp %905 : vector<16x8xf32>
    %cst_307 = arith.constant dense<0.000000e+00> : vector<16xf32>
    %907 = vector.multi_reduction <add>, %906, %cst_307 [1] : vector<16x8xf32> to vector<16xf32>
    %908 = vector.shape_cast %907 : vector<16xf32> to vector<16x1xf32>
    %909 = tpu.reciprocal %908 {approx = true} : vector<16x1xf32> -> vector<16x1xf32>
    %910 = vector.broadcast %909 : vector<16x1xf32> to vector<16x8xf32>
    %911 = arith.mulf %906, %910 : vector<16x8xf32>
    %912 = arith.truncf %911 : vector<16x8xf32> to vector<16x8xbf16>
    %913 = vector.extract_strided_slice %890 {offsets = [0, 0], sizes = [8, 8], strides = [1, 1]} : vector<8x32xf32> to vector<8x8xf32>
    %914 = arith.truncf %913 : vector<8x8xf32> to vector<8x8xbf16>
    %cst_308 = arith.constant dense<0.000000e+00> : vector<16x8xf32>
    %915 = tpu.matmul %912, %914, %cst_308 {dimension_numbers = #tpu.dot_dimension_numbers<[1], [0], [0], [1], [0, 0, 1, 1], [], []>} : vector<16x8xbf16>, vector<8x8xbf16>, vector<16x8xf32> -> vector<16x8xf32>
    %916 = vector.extract_strided_slice %888 {offsets = [0, 8], sizes = [16, 8], strides = [1, 1]} : vector<16x32xf32> to vector<16x8xf32>
    %917 = arith.truncf %916 : vector<16x8xf32> to vector<16x8xbf16>
    %918 = vector.extract_strided_slice %889 {offsets = [0, 8], sizes = [8, 8], strides = [1, 1]} : vector<8x32xf32> to vector<8x8xf32>
    %919 = arith.truncf %918 : vector<8x8xf32> to vector<8x8xbf16>
    %cst_309 = arith.constant dense<0.000000e+00> : vector<16x8xf32>
    %920 = tpu.matmul %917, %919, %cst_309 {dimension_numbers = #tpu.dot_dimension_numbers<[1], [1], [0], [0], [0, 0, 1, 0], [], []>} : vector<16x8xbf16>, vector<8x8xbf16>, vector<16x8xf32> -> vector<16x8xf32>
    %cst_310 = arith.constant 0.353553385 : f32
    %921 = vector.broadcast %cst_310 : f32 to vector<16x8xf32>
    %922 = arith.mulf %920, %921 : vector<16x8xf32>
    %923 = vector.broadcast %892 : vector<1x8xf32> to vector<16x8xf32>
    %924 = arith.addf %922, %923 : vector<16x8xf32>
    %cst_311 = arith.constant dense<0xFF800000> : vector<16xf32>
    %925 = vector.multi_reduction <maximumf>, %924, %cst_311 [1] : vector<16x8xf32> to vector<16xf32>
    %926 = vector.shape_cast %925 : vector<16xf32> to vector<16x1xf32>
    %927 = vector.broadcast %926 : vector<16x1xf32> to vector<16x8xf32>
    %928 = arith.subf %924, %927 : vector<16x8xf32>
    %929 = math.exp %928 : vector<16x8xf32>
    %cst_312 = arith.constant dense<0.000000e+00> : vector<16xf32>
    %930 = vector.multi_reduction <add>, %929, %cst_312 [1] : vector<16x8xf32> to vector<16xf32>
    %931 = vector.shape_cast %930 : vector<16xf32> to vector<16x1xf32>
    %932 = tpu.reciprocal %931 {approx = true} : vector<16x1xf32> -> vector<16x1xf32>
    %933 = vector.broadcast %932 : vector<16x1xf32> to vector<16x8xf32>
    %934 = arith.mulf %929, %933 : vector<16x8xf32>
    %935 = arith.truncf %934 : vector<16x8xf32> to vector<16x8xbf16>
    %936 = vector.extract_strided_slice %890 {offsets = [0, 8], sizes = [8, 8], strides = [1, 1]} : vector<8x32xf32> to vector<8x8xf32>
    %937 = arith.truncf %936 : vector<8x8xf32> to vector<8x8xbf16>
    %cst_313 = arith.constant dense<0.000000e+00> : vector<16x8xf32>
    %938 = tpu.matmul %935, %937, %cst_313 {dimension_numbers = #tpu.dot_dimension_numbers<[1], [0], [0], [1], [0, 0, 1, 1], [], []>} : vector<16x8xbf16>, vector<8x8xbf16>, vector<16x8xf32> -> vector<16x8xf32>
    %939 = vector.extract_strided_slice %888 {offsets = [0, 16], sizes = [16, 8], strides = [1, 1]} : vector<16x32xf32> to vector<16x8xf32>
    %940 = arith.truncf %939 : vector<16x8xf32> to vector<16x8xbf16>
    %941 = vector.extract_strided_slice %889 {offsets = [0, 16], sizes = [8, 8], strides = [1, 1]} : vector<8x32xf32> to vector<8x8xf32>
    %942 = arith.truncf %941 : vector<8x8xf32> to vector<8x8xbf16>
    %cst_314 = arith.constant dense<0.000000e+00> : vector<16x8xf32>
    %943 = tpu.matmul %940, %942, %cst_314 {dimension_numbers = #tpu.dot_dimension_numbers<[1], [1], [0], [0], [0, 0, 1, 0], [], []>} : vector<16x8xbf16>, vector<8x8xbf16>, vector<16x8xf32> -> vector<16x8xf32>
    %cst_315 = arith.constant 0.353553385 : f32
    %944 = vector.broadcast %cst_315 : f32 to vector<16x8xf32>
    %945 = arith.mulf %943, %944 : vector<16x8xf32>
    %946 = vector.broadcast %892 : vector<1x8xf32> to vector<16x8xf32>
    %947 = arith.addf %945, %946 : vector<16x8xf32>
    %cst_316 = arith.constant dense<0xFF800000> : vector<16xf32>
    %948 = vector.multi_reduction <maximumf>, %947, %cst_316 [1] : vector<16x8xf32> to vector<16xf32>
    %949 = vector.shape_cast %948 : vector<16xf32> to vector<16x1xf32>
    %950 = vector.broadcast %949 : vector<16x1xf32> to vector<16x8xf32>
    %951 = arith.subf %947, %950 : vector<16x8xf32>
    %952 = math.exp %951 : vector<16x8xf32>
    %cst_317 = arith.constant dense<0.000000e+00> : vector<16xf32>
    %953 = vector.multi_reduction <add>, %952, %cst_317 [1] : vector<16x8xf32> to vector<16xf32>
    %954 = vector.shape_cast %953 : vector<16xf32> to vector<16x1xf32>
    %955 = tpu.reciprocal %954 {approx = true} : vector<16x1xf32> -> vector<16x1xf32>
    %956 = vector.broadcast %955 : vector<16x1xf32> to vector<16x8xf32>
    %957 = arith.mulf %952, %956 : vector<16x8xf32>
    %958 = arith.truncf %957 : vector<16x8xf32> to vector<16x8xbf16>
    %959 = vector.extract_strided_slice %890 {offsets = [0, 16], sizes = [8, 8], strides = [1, 1]} : vector<8x32xf32> to vector<8x8xf32>
    %960 = arith.truncf %959 : vector<8x8xf32> to vector<8x8xbf16>
    %cst_318 = arith.constant dense<0.000000e+00> : vector<16x8xf32>
    %961 = tpu.matmul %958, %960, %cst_318 {dimension_numbers = #tpu.dot_dimension_numbers<[1], [0], [0], [1], [0, 0, 1, 1], [], []>} : vector<16x8xbf16>, vector<8x8xbf16>, vector<16x8xf32> -> vector<16x8xf32>
    %962 = vector.extract_strided_slice %888 {offsets = [0, 24], sizes = [16, 8], strides = [1, 1]} : vector<16x32xf32> to vector<16x8xf32>
    %963 = arith.truncf %962 : vector<16x8xf32> to vector<16x8xbf16>
    %964 = vector.extract_strided_slice %889 {offsets = [0, 24], sizes = [8, 8], strides = [1, 1]} : vector<8x32xf32> to vector<8x8xf32>
    %965 = arith.truncf %964 : vector<8x8xf32> to vector<8x8xbf16>
    %cst_319 = arith.constant dense<0.000000e+00> : vector<16x8xf32>
    %966 = tpu.matmul %963, %965, %cst_319 {dimension_numbers = #tpu.dot_dimension_numbers<[1], [1], [0], [0], [0, 0, 1, 0], [], []>} : vector<16x8xbf16>, vector<8x8xbf16>, vector<16x8xf32> -> vector<16x8xf32>
    %cst_320 = arith.constant 0.353553385 : f32
    %967 = vector.broadcast %cst_320 : f32 to vector<16x8xf32>
    %968 = arith.mulf %966, %967 : vector<16x8xf32>
    %969 = vector.broadcast %892 : vector<1x8xf32> to vector<16x8xf32>
    %970 = arith.addf %968, %969 : vector<16x8xf32>
    %cst_321 = arith.constant dense<0xFF800000> : vector<16xf32>
    %971 = vector.multi_reduction <maximumf>, %970, %cst_321 [1] : vector<16x8xf32> to vector<16xf32>
    %972 = vector.shape_cast %971 : vector<16xf32> to vector<16x1xf32>
    %973 = vector.broadcast %972 : vector<16x1xf32> to vector<16x8xf32>
    %974 = arith.subf %970, %973 : vector<16x8xf32>
    %975 = math.exp %974 : vector<16x8xf32>
    %cst_322 = arith.constant dense<0.000000e+00> : vector<16xf32>
    %976 = vector.multi_reduction <add>, %975, %cst_322 [1] : vector<16x8xf32> to vector<16xf32>
    %977 = vector.shape_cast %976 : vector<16xf32> to vector<16x1xf32>
    %978 = tpu.reciprocal %977 {approx = true} : vector<16x1xf32> -> vector<16x1xf32>
    %979 = vector.broadcast %978 : vector<16x1xf32> to vector<16x8xf32>
    %980 = arith.mulf %975, %979 : vector<16x8xf32>
    %981 = arith.truncf %980 : vector<16x8xf32> to vector<16x8xbf16>
    %982 = vector.extract_strided_slice %890 {offsets = [0, 24], sizes = [8, 8], strides = [1, 1]} : vector<8x32xf32> to vector<8x8xf32>
    %983 = arith.truncf %982 : vector<8x8xf32> to vector<8x8xbf16>
    %cst_323 = arith.constant dense<0.000000e+00> : vector<16x8xf32>
    %984 = tpu.matmul %981, %983, %cst_323 {dimension_numbers = #tpu.dot_dimension_numbers<[1], [0], [0], [1], [0, 0, 1, 1], [], []>} : vector<16x8xbf16>, vector<8x8xbf16>, vector<16x8xf32> -> vector<16x8xf32>
    %985 = tpu.concatenate %915, %938, %961, %984 in 1 : vector<16x8xf32>, vector<16x8xf32>, vector<16x8xf32>, vector<16x8xf32> -> vector<16x32xf32>
    %986 = tpu.concatenate %887, %985 in 0 : vector<16x32xf32>, vector<16x32xf32> -> vector<32x32xf32>
    %987 = arith.truncf %986 : vector<32x32xf32> to vector<32x32xbf16>
    %cst_324 = arith.constant dense<0.000000e+00> : vector<32x32xf32>
    %988 = tpu.matmul %987, %771, %cst_324 {dimension_numbers = #tpu.dot_dimension_numbers<[1], [0], [0], [1], [0, 0, 1, 1], [], []>} : vector<32x32xbf16>, vector<32x32xbf16>, vector<32x32xf32> -> vector<32x32xf32>
    %c3_325 = arith.constant 3 : index
    %c0_326 = arith.constant 0 : index
    %c0_327 = arith.constant 0 : index
    %989 = vector.load %arg12[%c3_325, %c0_326, %c0_327] : memref<4x1x32xf32, #tpu.memory_space<vmem>>, vector<1x1x32xf32>
    %990 = vector.shape_cast %989 : vector<1x1x32xf32> to vector<1x32xf32>
    %991 = vector.broadcast %990 : vector<1x32xf32> to vector<32x32xf32>
    %992 = arith.addf %988, %991 : vector<32x32xf32>
    %993 = arith.addf %509, %992 : vector<32x32xf32>
    %c3_328 = arith.constant 3 : index
    %c0_329 = arith.constant 0 : index
    %c0_330 = arith.constant 0 : index
    %994 = vector.load %arg17[%c3_328, %c0_329, %c0_330] : memref<6x1x32xf32, #tpu.memory_space<vmem>>, vector<1x1x32xf32>
    %995 = vector.shape_cast %994 : vector<1x1x32xf32> to vector<1x32xf32>
    %c3_331 = arith.constant 3 : index
    %c0_332 = arith.constant 0 : index
    %c0_333 = arith.constant 0 : index
    %996 = vector.load %arg18[%c3_331, %c0_332, %c0_333] : memref<6x1x32xf32, #tpu.memory_space<vmem>>, vector<1x1x32xf32>
    %997 = vector.shape_cast %996 : vector<1x1x32xf32> to vector<1x32xf32>
    %cst_334 = arith.constant dense<0.000000e+00> : vector<32xf32>
    %998 = vector.multi_reduction <add>, %993, %cst_334 [1] : vector<32x32xf32> to vector<32xf32>
    %999 = vector.shape_cast %998 : vector<32xf32> to vector<32x1xf32>
    %cst_335 = arith.constant 3.200000e+01 : f32
    %1000 = vector.broadcast %cst_335 : f32 to vector<32x1xf32>
    %1001 = arith.divf %999, %1000 : vector<32x1xf32>
    %1002 = vector.broadcast %1001 : vector<32x1xf32> to vector<32x32xf32>
    %1003 = arith.subf %993, %1002 : vector<32x32xf32>
    %1004 = arith.mulf %1003, %1003 : vector<32x32xf32>
    %cst_336 = arith.constant dense<0.000000e+00> : vector<32xf32>
    %1005 = vector.multi_reduction <add>, %1004, %cst_336 [1] : vector<32x32xf32> to vector<32xf32>
    %1006 = vector.shape_cast %1005 : vector<32xf32> to vector<32x1xf32>
    %cst_337 = arith.constant 3.100000e+01 : f32
    %1007 = vector.broadcast %cst_337 : f32 to vector<32x1xf32>
    %1008 = arith.divf %1006, %1007 : vector<32x1xf32>
    %1009 = vector.broadcast %995 : vector<1x32xf32> to vector<32x32xf32>
    %1010 = arith.mulf %1009, %1003 : vector<32x32xf32>
    %1011 = math.sqrt %1008 : vector<32x1xf32>
    %cst_338 = arith.constant 9.99999997E-7 : f32
    %1012 = vector.broadcast %cst_338 : f32 to vector<32x1xf32>
    %1013 = arith.addf %1011, %1012 : vector<32x1xf32>
    %1014 = vector.broadcast %1013 : vector<32x1xf32> to vector<32x32xf32>
    %1015 = arith.divf %1010, %1014 : vector<32x32xf32>
    %1016 = vector.broadcast %997 : vector<1x32xf32> to vector<32x32xf32>
    %1017 = arith.addf %1015, %1016 : vector<32x32xf32>
    %c0_339 = arith.constant 0 : index
    %c0_340 = arith.constant 0 : index
    %c0_341 = arith.constant 0 : index
    %1018 = vector.load %arg13[%c0_339, %c0_340, %c0_341] : memref<2x32x64xbf16, #tpu.memory_space<vmem>>, vector<1x32x64xbf16>
    %1019 = vector.shape_cast %1018 : vector<1x32x64xbf16> to vector<32x64xbf16>
    %1020 = arith.truncf %763 : vector<16x32xf32> to vector<16x32xbf16>
    %cst_342 = arith.constant dense<0.000000e+00> : vector<16x64xf32>
    %1021 = tpu.matmul %1020, %1019, %cst_342 {dimension_numbers = #tpu.dot_dimension_numbers<[1], [0], [0], [1], [0, 0, 1, 1], [], []>} : vector<16x32xbf16>, vector<32x64xbf16>, vector<16x64xf32> -> vector<16x64xf32>
    %c0_343 = arith.constant 0 : index
    %c0_344 = arith.constant 0 : index
    %c0_345 = arith.constant 0 : index
    %1022 = vector.load %arg14[%c0_343, %c0_344, %c0_345] : memref<2x1x64xf32, #tpu.memory_space<vmem>>, vector<1x1x64xf32>
    %1023 = vector.shape_cast %1022 : vector<1x1x64xf32> to vector<1x64xf32>
    %1024 = vector.broadcast %1023 : vector<1x64xf32> to vector<16x64xf32>
    %1025 = arith.addf %1021, %1024 : vector<16x64xf32>
    %cst_346 = arith.constant 0.000000e+00 : f32
    %1026 = vector.broadcast %cst_346 : f32 to vector<16x64xf32>
    %1027 = arith.maximumf %1025, %1026 : vector<16x64xf32>
    %c0_347 = arith.constant 0 : index
    %c0_348 = arith.constant 0 : index
    %c0_349 = arith.constant 0 : index
    %1028 = vector.load %arg15[%c0_347, %c0_348, %c0_349] : memref<2x64x32xbf16, #tpu.memory_space<vmem>>, vector<1x64x32xbf16>
    %1029 = vector.shape_cast %1028 : vector<1x64x32xbf16> to vector<64x32xbf16>
    %1030 = arith.truncf %1027 : vector<16x64xf32> to vector<16x64xbf16>
    %cst_350 = arith.constant dense<0.000000e+00> : vector<16x32xf32>
    %1031 = tpu.matmul %1030, %1029, %cst_350 {dimension_numbers = #tpu.dot_dimension_numbers<[1], [0], [0], [1], [0, 0, 1, 1], [], []>} : vector<16x64xbf16>, vector<64x32xbf16>, vector<16x32xf32> -> vector<16x32xf32>
    %c0_351 = arith.constant 0 : index
    %c0_352 = arith.constant 0 : index
    %c0_353 = arith.constant 0 : index
    %1032 = vector.load %arg16[%c0_351, %c0_352, %c0_353] : memref<2x1x32xf32, #tpu.memory_space<vmem>>, vector<1x1x32xf32>
    %1033 = vector.shape_cast %1032 : vector<1x1x32xf32> to vector<1x32xf32>
    %1034 = vector.broadcast %1033 : vector<1x32xf32> to vector<16x32xf32>
    %1035 = arith.addf %1031, %1034 : vector<16x32xf32>
    %1036 = arith.addf %763, %1035 : vector<16x32xf32>
    %c4 = arith.constant 4 : index
    %c0_354 = arith.constant 0 : index
    %c0_355 = arith.constant 0 : index
    %1037 = vector.load %arg17[%c4, %c0_354, %c0_355] : memref<6x1x32xf32, #tpu.memory_space<vmem>>, vector<1x1x32xf32>
    %1038 = vector.shape_cast %1037 : vector<1x1x32xf32> to vector<1x32xf32>
    %c4_356 = arith.constant 4 : index
    %c0_357 = arith.constant 0 : index
    %c0_358 = arith.constant 0 : index
    %1039 = vector.load %arg18[%c4_356, %c0_357, %c0_358] : memref<6x1x32xf32, #tpu.memory_space<vmem>>, vector<1x1x32xf32>
    %1040 = vector.shape_cast %1039 : vector<1x1x32xf32> to vector<1x32xf32>
    %cst_359 = arith.constant dense<0.000000e+00> : vector<16xf32>
    %1041 = vector.multi_reduction <add>, %1036, %cst_359 [1] : vector<16x32xf32> to vector<16xf32>
    %1042 = vector.shape_cast %1041 : vector<16xf32> to vector<16x1xf32>
    %cst_360 = arith.constant 3.200000e+01 : f32
    %1043 = vector.broadcast %cst_360 : f32 to vector<16x1xf32>
    %1044 = arith.divf %1042, %1043 : vector<16x1xf32>
    %1045 = vector.broadcast %1044 : vector<16x1xf32> to vector<16x32xf32>
    %1046 = arith.subf %1036, %1045 : vector<16x32xf32>
    %1047 = arith.mulf %1046, %1046 : vector<16x32xf32>
    %cst_361 = arith.constant dense<0.000000e+00> : vector<16xf32>
    %1048 = vector.multi_reduction <add>, %1047, %cst_361 [1] : vector<16x32xf32> to vector<16xf32>
    %1049 = vector.shape_cast %1048 : vector<16xf32> to vector<16x1xf32>
    %cst_362 = arith.constant 3.100000e+01 : f32
    %1050 = vector.broadcast %cst_362 : f32 to vector<16x1xf32>
    %1051 = arith.divf %1049, %1050 : vector<16x1xf32>
    %1052 = vector.broadcast %1038 : vector<1x32xf32> to vector<16x32xf32>
    %1053 = arith.mulf %1052, %1046 : vector<16x32xf32>
    %1054 = math.sqrt %1051 : vector<16x1xf32>
    %cst_363 = arith.constant 9.99999997E-7 : f32
    %1055 = vector.broadcast %cst_363 : f32 to vector<16x1xf32>
    %1056 = arith.addf %1054, %1055 : vector<16x1xf32>
    %1057 = vector.broadcast %1056 : vector<16x1xf32> to vector<16x32xf32>
    %1058 = arith.divf %1053, %1057 : vector<16x32xf32>
    %1059 = vector.broadcast %1040 : vector<1x32xf32> to vector<16x32xf32>
    %1060 = arith.addf %1058, %1059 : vector<16x32xf32>
    %c0_364 = arith.constant 0 : index
    %c0_365 = arith.constant 0 : index
    %1061 = vector.load %arg19[%c0_364, %c0_365] : memref<16x32xf32, #tpu.memory_space<vmem>>, vector<16x32xf32>
    tpu.vector_store %arg19[%c0_364, %c0_365], %1060 {strides = array<i32>} : memref<16x32xf32, #tpu.memory_space<vmem>>, vector<16x32xf32>,
    %c1_366 = arith.constant 1 : index
    %c0_367 = arith.constant 0 : index
    %c0_368 = arith.constant 0 : index
    %1062 = vector.load %arg13[%c1_366, %c0_367, %c0_368] : memref<2x32x64xbf16, #tpu.memory_space<vmem>>, vector<1x32x64xbf16>
    %1063 = vector.shape_cast %1062 : vector<1x32x64xbf16> to vector<32x64xbf16>
    %1064 = arith.truncf %1017 : vector<32x32xf32> to vector<32x32xbf16>
    %cst_369 = arith.constant dense<0.000000e+00> : vector<32x64xf32>
    %1065 = tpu.matmul %1064, %1063, %cst_369 {dimension_numbers = #tpu.dot_dimension_numbers<[1], [0], [0], [1], [0, 0, 1, 1], [], []>} : vector<32x32xbf16>, vector<32x64xbf16>, vector<32x64xf32> -> vector<32x64xf32>
    %c1_370 = arith.constant 1 : index
    %c0_371 = arith.constant 0 : index
    %c0_372 = arith.constant 0 : index
    %1066 = vector.load %arg14[%c1_370, %c0_371, %c0_372] : memref<2x1x64xf32, #tpu.memory_space<vmem>>, vector<1x1x64xf32>
    %1067 = vector.shape_cast %1066 : vector<1x1x64xf32> to vector<1x64xf32>
    %1068 = vector.broadcast %1067 : vector<1x64xf32> to vector<32x64xf32>
    %1069 = arith.addf %1065, %1068 : vector<32x64xf32>
    %cst_373 = arith.constant 0.000000e+00 : f32
    %1070 = vector.broadcast %cst_373 : f32 to vector<32x64xf32>
    %1071 = arith.maximumf %1069, %1070 : vector<32x64xf32>
    %c1_374 = arith.constant 1 : index
    %c0_375 = arith.constant 0 : index
    %c0_376 = arith.constant 0 : index
    %1072 = vector.load %arg15[%c1_374, %c0_375, %c0_376] : memref<2x64x32xbf16, #tpu.memory_space<vmem>>, vector<1x64x32xbf16>
    %1073 = vector.shape_cast %1072 : vector<1x64x32xbf16> to vector<64x32xbf16>
    %1074 = arith.truncf %1071 : vector<32x64xf32> to vector<32x64xbf16>
    %cst_377 = arith.constant dense<0.000000e+00> : vector<32x32xf32>
    %1075 = tpu.matmul %1074, %1073, %cst_377 {dimension_numbers = #tpu.dot_dimension_numbers<[1], [0], [0], [1], [0, 0, 1, 1], [], []>} : vector<32x64xbf16>, vector<64x32xbf16>, vector<32x32xf32> -> vector<32x32xf32>
    %c1_378 = arith.constant 1 : index
    %c0_379 = arith.constant 0 : index
    %c0_380 = arith.constant 0 : index
    %1076 = vector.load %arg16[%c1_378, %c0_379, %c0_380] : memref<2x1x32xf32, #tpu.memory_space<vmem>>, vector<1x1x32xf32>
    %1077 = vector.shape_cast %1076 : vector<1x1x32xf32> to vector<1x32xf32>
    %1078 = vector.broadcast %1077 : vector<1x32xf32> to vector<32x32xf32>
    %1079 = arith.addf %1075, %1078 : vector<32x32xf32>
    %1080 = arith.addf %1017, %1079 : vector<32x32xf32>
    %c5 = arith.constant 5 : index
    %c0_381 = arith.constant 0 : index
    %c0_382 = arith.constant 0 : index
    %1081 = vector.load %arg17[%c5, %c0_381, %c0_382] : memref<6x1x32xf32, #tpu.memory_space<vmem>>, vector<1x1x32xf32>
    %1082 = vector.shape_cast %1081 : vector<1x1x32xf32> to vector<1x32xf32>
    %c5_383 = arith.constant 5 : index
    %c0_384 = arith.constant 0 : index
    %c0_385 = arith.constant 0 : index
    %1083 = vector.load %arg18[%c5_383, %c0_384, %c0_385] : memref<6x1x32xf32, #tpu.memory_space<vmem>>, vector<1x1x32xf32>
    %1084 = vector.shape_cast %1083 : vector<1x1x32xf32> to vector<1x32xf32>
    %cst_386 = arith.constant dense<0.000000e+00> : vector<32xf32>
    %1085 = vector.multi_reduction <add>, %1080, %cst_386 [1] : vector<32x32xf32> to vector<32xf32>
    %1086 = vector.shape_cast %1085 : vector<32xf32> to vector<32x1xf32>
    %cst_387 = arith.constant 3.200000e+01 : f32
    %1087 = vector.broadcast %cst_387 : f32 to vector<32x1xf32>
    %1088 = arith.divf %1086, %1087 : vector<32x1xf32>
    %1089 = vector.broadcast %1088 : vector<32x1xf32> to vector<32x32xf32>
    %1090 = arith.subf %1080, %1089 : vector<32x32xf32>
    %1091 = arith.mulf %1090, %1090 : vector<32x32xf32>
    %cst_388 = arith.constant dense<0.000000e+00> : vector<32xf32>
    %1092 = vector.multi_reduction <add>, %1091, %cst_388 [1] : vector<32x32xf32> to vector<32xf32>
    %1093 = vector.shape_cast %1092 : vector<32xf32> to vector<32x1xf32>
    %cst_389 = arith.constant 3.100000e+01 : f32
    %1094 = vector.broadcast %cst_389 : f32 to vector<32x1xf32>
    %1095 = arith.divf %1093, %1094 : vector<32x1xf32>
    %1096 = vector.broadcast %1082 : vector<1x32xf32> to vector<32x32xf32>
    %1097 = arith.mulf %1096, %1090 : vector<32x32xf32>
    %1098 = math.sqrt %1095 : vector<32x1xf32>
    %cst_390 = arith.constant 9.99999997E-7 : f32
    %1099 = vector.broadcast %cst_390 : f32 to vector<32x1xf32>
    %1100 = arith.addf %1098, %1099 : vector<32x1xf32>
    %1101 = vector.broadcast %1100 : vector<32x1xf32> to vector<32x32xf32>
    %1102 = arith.divf %1097, %1101 : vector<32x32xf32>
    %1103 = vector.broadcast %1084 : vector<1x32xf32> to vector<32x32xf32>
    %1104 = arith.addf %1102, %1103 : vector<32x32xf32>
    %c0_391 = arith.constant 0 : index
    %c0_392 = arith.constant 0 : index
    %1105 = vector.load %arg20[%c0_391, %c0_392] : memref<32x32xf32, #tpu.memory_space<vmem>>, vector<32x32xf32>
    tpu.vector_store %arg20[%c0_391, %c0_392], %1104 {strides = array<i32>} : memref<32x32xf32, #tpu.memory_space<vmem>>, vector<32x32xf32>,
    return
  }
  func.func @transform_0(%arg0: i32) -> (i32, i32) {
    %c0_i32 = arith.constant 0 : i32
    %c0_i32_0 = arith.constant 0 : i32
    %c0_i32_1 = arith.constant 0 : i32
    return %c0_i32, %c0_i32_0 : i32, i32
  }
  func.func @transform_1(%arg0: i32) -> (i32, i32) {
    %c0_i32 = arith.constant 0 : i32
    %c0_i32_0 = arith.constant 0 : i32
    %c0_i32_1 = arith.constant 0 : i32
    return %c0_i32, %c0_i32_0 : i32, i32
  }
  func.func @transform_2(%arg0: i32) -> (i32, i32, i32) {
    %c0_i32 = arith.constant 0 : i32
    %c0_i32_0 = arith.constant 0 : i32
    %c0_i32_1 = arith.constant 0 : i32
    %c0_i32_2 = arith.constant 0 : i32
    return %c0_i32, %c0_i32_0, %c0_i32_1 : i32, i32, i32
  }
  func.func @transform_3(%arg0: i32) -> (i32, i32, i32) {
    %c0_i32 = arith.constant 0 : i32
    %c0_i32_0 = arith.constant 0 : i32
    %c0_i32_1 = arith.constant 0 : i32
    %c0_i32_2 = arith.constant 0 : i32
    return %c0_i32, %c0_i32_0, %c0_i32_1 : i32, i32, i32
  }
  func.func @transform_4(%arg0: i32) -> (i32, i32, i32) {
    %c0_i32 = arith.constant 0 : i32
    %c0_i32_0 = arith.constant 0 : i32
    %c0_i32_1 = arith.constant 0 : i32
    %c0_i32_2 = arith.constant 0 : i32
    return %c0_i32, %c0_i32_0, %c0_i32_1 : i32, i32, i32
  }
  func.func @transform_5(%arg0: i32) -> (i32, i32, i32) {
    %c0_i32 = arith.constant 0 : i32
    %c0_i32_0 = arith.constant 0 : i32
    %c0_i32_1 = arith.constant 0 : i32
    %c0_i32_2 = arith.constant 0 : i32
    return %c0_i32, %c0_i32_0, %c0_i32_1 : i32, i32, i32
  }
  func.func @transform_6(%arg0: i32) -> (i32, i32, i32) {
    %c0_i32 = arith.constant 0 : i32
    %c0_i32_0 = arith.constant 0 : i32
    %c0_i32_1 = arith.constant 0 : i32
    %c0_i32_2 = arith.constant 0 : i32
    return %c0_i32, %c0_i32_0, %c0_i32_1 : i32, i32, i32
  }
  func.func @transform_7(%arg0: i32) -> (i32, i32, i32) {
    %c0_i32 = arith.constant 0 : i32
    %c0_i32_0 = arith.constant 0 : i32
    %c0_i32_1 = arith.constant 0 : i32
    %c0_i32_2 = arith.constant 0 : i32
    return %c0_i32, %c0_i32_0, %c0_i32_1 : i32, i32, i32
  }
  func.func @transform_8(%arg0: i32) -> (i32, i32, i32) {
    %c0_i32 = arith.constant 0 : i32
    %c0_i32_0 = arith.constant 0 : i32
    %c0_i32_1 = arith.constant 0 : i32
    %c0_i32_2 = arith.constant 0 : i32
    return %c0_i32, %c0_i32_0, %c0_i32_1 : i32, i32, i32
  }
  func.func @transform_9(%arg0: i32) -> (i32, i32, i32) {
    %c0_i32 = arith.constant 0 : i32
    %c0_i32_0 = arith.constant 0 : i32
    %c0_i32_1 = arith.constant 0 : i32
    %c0_i32_2 = arith.constant 0 : i32
    return %c0_i32, %c0_i32_0, %c0_i32_1 : i32, i32, i32
  }
  func.func @transform_10(%arg0: i32) -> (i32, i32, i32) {
    %c0_i32 = arith.constant 0 : i32
    %c0_i32_0 = arith.constant 0 : i32
    %c0_i32_1 = arith.constant 0 : i32
    %c0_i32_2 = arith.constant 0 : i32
    return %c0_i32, %c0_i32_0, %c0_i32_1 : i32, i32, i32
  }
  func.func @transform_11(%arg0: i32) -> (i32, i32, i32) {
    %c0_i32 = arith.constant 0 : i32
    %c0_i32_0 = arith.constant 0 : i32
    %c0_i32_1 = arith.constant 0 : i32
    %c0_i32_2 = arith.constant 0 : i32
    return %c0_i32, %c0_i32_0, %c0_i32_1 : i32, i32, i32
  }
  func.func @transform_12(%arg0: i32) -> (i32, i32, i32) {
    %c0_i32 = arith.constant 0 : i32
    %c0_i32_0 = arith.constant 0 : i32
    %c0_i32_1 = arith.constant 0 : i32
    %c0_i32_2 = arith.constant 0 : i32
    return %c0_i32, %c0_i32_0, %c0_i32_1 : i32, i32, i32
  }
  func.func @transform_13(%arg0: i32) -> (i32, i32, i32) {
    %c0_i32 = arith.constant 0 : i32
    %c0_i32_0 = arith.constant 0 : i32
    %c0_i32_1 = arith.constant 0 : i32
    %c0_i32_2 = arith.constant 0 : i32
    return %c0_i32, %c0_i32_0, %c0_i32_1 : i32, i32, i32
  }
  func.func @transform_14(%arg0: i32) -> (i32, i32, i32) {
    %c0_i32 = arith.constant 0 : i32
    %c0_i32_0 = arith.constant 0 : i32
    %c0_i32_1 = arith.constant 0 : i32
    %c0_i32_2 = arith.constant 0 : i32
    return %c0_i32, %c0_i32_0, %c0_i32_1 : i32, i32, i32
  }
  func.func @transform_15(%arg0: i32) -> (i32, i32, i32) {
    %c0_i32 = arith.constant 0 : i32
    %c0_i32_0 = arith.constant 0 : i32
    %c0_i32_1 = arith.constant 0 : i32
    %c0_i32_2 = arith.constant 0 : i32
    return %c0_i32, %c0_i32_0, %c0_i32_1 : i32, i32, i32
  }
  func.func @transform_16(%arg0: i32) -> (i32, i32, i32) {
    %c0_i32 = arith.constant 0 : i32
    %c0_i32_0 = arith.constant 0 : i32
    %c0_i32_1 = arith.constant 0 : i32
    %c0_i32_2 = arith.constant 0 : i32
    return %c0_i32, %c0_i32_0, %c0_i32_1 : i32, i32, i32
  }
  func.func @transform_17(%arg0: i32) -> (i32, i32, i32) {
    %c0_i32 = arith.constant 0 : i32
    %c0_i32_0 = arith.constant 0 : i32
    %c0_i32_1 = arith.constant 0 : i32
    %c0_i32_2 = arith.constant 0 : i32
    return %c0_i32, %c0_i32_0, %c0_i32_1 : i32, i32, i32
  }
  func.func @transform_18(%arg0: i32) -> (i32, i32) {
    %c0_i32 = arith.constant 0 : i32
    %c0_i32_0 = arith.constant 0 : i32
    %c0_i32_1 = arith.constant 0 : i32
    return %c0_i32, %c0_i32_0 : i32, i32
  }
  func.func @transform_19(%arg0: i32) -> (i32, i32) {
    %c0_i32 = arith.constant 0 : i32
    %c0_i32_0 = arith.constant 0 : i32
    %c0_i32_1 = arith.constant 0 : i32
    return %c0_i32, %c0_i32_0 : i32, i32
  }
}

</mosaic_0001>

<bundles_post_ra>
// kernel: tpu_custom_call.1
= control target key start
LH: loop header
LB: loop body
LE: loop exit
PB: predicated region body
PF: predicated region fallthrough
CT: control target
= control target key end

     0   :  { %s6930_s0 = inlined_call_operand.hbm [shape: f32[16,32], index: 0, kind: input, shape index: {}]   ;;  %s6931_s1 = inlined_call_operand.vmem [shape: f32[32,32], index: 1, kind: input, shape index: {}]   ;;  %s6932_s2 = inlined_call_operand.hbm [shape: f32[2,1,8], index: 2, kind: input, shape index: {}]   ;;  %s6933_s3 = inlined_call_operand.hbm [shape: f32[2,1,16], index: 3, kind: input, shape index: {}]   ;;  %s6934_s4 = inlined_call_operand.vmem [shape: bf16[4,32,32], index: 4, kind: input, shape index: {}]   ;;  %s6935_s5 = inlined_call_operand.hbm [shape: bf16[4,32,32], index: 5, kind: input, shape index: {}]   ;;  %s6936_s6 = inlined_call_operand.hbm [shape: bf16[4,32,32], index: 6, kind: input, shape index: {}]   ;;  %s6937_s7 = inlined_call_operand.hbm [shape: bf16[4,32,32], index: 7, kind: input, shape index: {}]   ;;  %s6938_s8 = inlined_call_operand.hbm [shape: f32[4,1,32], index: 8, kind: input, shape index: {}]   ;;  %s6939_s9 = inlined_call_operand.hbm [shape: f32[4,1,32], index: 9, kind: input, shape index: {}]   ;;  %s6940_s10 = inlined_call_operand.hbm [shape: f32[4,1,32], index: 10, kind: input, shape index: {}]   ;;  %s6941_s11 = inlined_call_operand.hbm [shape: f32[4,1,32], index: 11, kind: input, shape index: {}]   ;;  %s6942_s12 = inlined_call_operand.hbm [shape: bf16[2,32,64], index: 12, kind: input, shape index: {}]   ;;  %s6943_s13 = inlined_call_operand.hbm [shape: f32[2,1,64], index: 13, kind: input, shape index: {}]   ;;  %s6944_s14 = inlined_call_operand.vmem [shape: bf16[2,64,32], index: 14, kind: input, shape index: {}]   ;;  %s6945_s15 = inlined_call_operand.hbm [shape: f32[2,1,32], index: 15, kind: input, shape index: {}]   ;;  %s6946_s16 = inlined_call_operand.vmem [shape: f32[6,1,32], index: 16, kind: input, shape index: {}]   ;;  %s6947_s17 = inlined_call_operand.vmem [shape: f32[6,1,32], index: 17, kind: input, shape index: {}]   ;;  %s6948_s18 = inlined_call_operand.hbm [shape: f32[16,32], index: 18, kind: output, shape index: {0}]   ;;  %s6949_s19 = inlined_call_operand.hbm [shape: f32[32,32], index: 19, kind: output, shape index: {1}]  }
   0x1   :  { %6951 = sst [smem:[#allocation35_spill]] %s6930_s0 }
   0x2   :  { %6952 = sst [smem:[#allocation36_spill]] %s6931_s1 }
   0x3   :  { %6953 = sst [smem:[#allocation37_spill]] %s6932_s2 }
   0x4   :  { %6954 = sst [smem:[#allocation38_spill]] %s6933_s3 }
   0x5   :  { %25 = vsyncpa [#allocation3], 0 }
   0x6   :  { %26 = vsyncpa [#allocation6], 0 }
   0x7   :  { %27 = vsyncpa [#allocation9], 0 }
   0x8   :  { %28 = vsyncpa [#allocation12], 0 }
   0x9   :  { %29 = vsyncpa [#allocation15], 0 }
   0xa   :  { %30 = vsyncpa [#allocation18], 0 }
   0xb   :  { %31 = vsyncpa [#allocation21], 0 }
   0xc   :  { %32 = vsyncpa [#allocation4], 0  ;;  %s6955_s20 = sld [smem:[#allocation37_spill]] }
  0x12   :  { %s53_s21 = sshll.u32 %s6955_s20, 4  ;;  %s54_s21 = int_to_ptr.hbm [resolvable:$true] %s53_s21 }
  0x13   :  { %33 = vsyncpa [#allocation25], 0  ;;  %s5416_s1 = smov [#allocation5]   ;;  %s81_s24 = sshll.u32 %s6935_s5, 4  ;;  %s82_s24 = int_to_ptr.hbm [resolvable:$true] %s81_s24 }
  0x14   :  { %s55_s22 = sshll.u32 %s5416_s1, 4  ;;  %s5417_s25 = smov 16   ;;  %s56_s22 = int_to_ptr.vmem [resolvable:$true] %s55_s22 }
  0x15   :  { %s5418_s3 = smov 1   ;;  %s5419_s26 = smov [#allocation8]  }
  0x16   :  { %61 = dma.hbm_to_vmem [thread:$0]  %s54_s21, 32, %s56_s22, [#allocation6], %s5417_s25, %s5417_s25, %s5418_s3  }
  0x17   :  { %s83_s27 = sshll.u32 %s5419_s26, 4  ;;  %s5420_s28 = smov 64   ;;  %s84_s27 = int_to_ptr.vmem [resolvable:$true] %s83_s27 }
  0x18   :  { %s5421_s29 = smov 4   ;;  %s107_s5 = sshll.u32 %s6937_s7, 4  ;;  %s108_s5 = int_to_ptr.hbm [resolvable:$true] %s107_s5 }
  0x19   :  { %89 = dma.hbm_to_vmem [thread:$0]  %s82_s24, 1024, %s84_s27, [#allocation9], %s5420_s28, %s5420_s28, %s5421_s29  }
  0x1a   :  { %s5422_s20 = smov [#allocation11]   ;;  %s133_s22 = sshll.u32 %s6939_s9, 4  ;;  %s134_s22 = int_to_ptr.hbm [resolvable:$true] %s133_s22 }
  0x1b   :  { %s109_s1 = sshll.u32 %s5422_s20, 4  ;;  %s5423_s23 = smov [#allocation14]   ;;  %s110_s1 = int_to_ptr.vmem [resolvable:$true] %s109_s1 }
  0x1c   :  { %115 = dma.hbm_to_vmem [thread:$0]  %s108_s5, 1024, %s110_s1, [#allocation12], %s5420_s28, %s5420_s28, %s5421_s29  }
  0x1d   :  { %s135_s26 = sshll.u32 %s5423_s23, 4  ;;  %s159_s0 = sshll.u32 %s6941_s11, 4  ;;  %s136_s26 = int_to_ptr.vmem [resolvable:$true] %s135_s26  ;;  %s160_s0 = int_to_ptr.hbm [resolvable:$true] %s159_s0 }
  0x1e   :  { %141 = dma.hbm_to_vmem [thread:$0]  %s134_s22, 64, %s136_s26, [#allocation15], %s5417_s25, %s5417_s25, %s5418_s3  }
  0x1f   :  { %s185_s9 = sshll.u32 %s6943_s13, 4  ;;  %s5424_s20 = smov [#allocation17]   ;;  %s186_s9 = int_to_ptr.hbm [resolvable:$true] %s185_s9 }
  0x20   :  { %s161_s2 = sshll.u32 %s5424_s20, 4  ;;  %s5425_s5 = smov [#allocation20]   ;;  %s162_s2 = int_to_ptr.vmem [resolvable:$true] %s161_s2 }
  0x21   :  { %167 = dma.hbm_to_vmem [thread:$0]  %s160_s0, 64, %s162_s2, [#allocation18], %s5417_s25, %s5417_s25, %s5418_s3  }
  0x22   :  { %s187_s11 = sshll.u32 %s5425_s5, 4  ;;  %s6956_s23 = sld [smem:[#allocation35_spill]]  ;;  %s188_s11 = int_to_ptr.vmem [resolvable:$true] %s187_s11 }
  0x23   :  { %193 = dma.hbm_to_vmem [thread:$0]  %s186_s9, 32, %s188_s11, [#allocation21], %s5417_s25, %s5417_s25, %s5418_s3  }
  0x24   :  { %s5426_s13 = smov [#allocation2]   ;;  %s6957_s7 = sld [smem:[#allocation38_spill]] }
  0x25   :  { %s40_s22 = sshll.u32 %s5426_s13, 4  ;;  %s5427_s0 = smov 128   ;;  %s41_s22 = int_to_ptr.vmem [resolvable:$true] %s40_s22 }
  0x26   :  { %s5428_s20 = smov 8   ;;  %s5429_s2 = smov [#allocation7]  }
  0x27   :  { %s68_s5 = sshll.u32 %s5429_s2, 4  ;;  %s94_s9 = sshll.u32 %s6936_s6, 4  ;;  %s69_s5 = int_to_ptr.vmem [resolvable:$true] %s68_s5  ;;  %s95_s9 = int_to_ptr.hbm [resolvable:$true] %s94_s9 }
  0x28   :  { %s38_s24 = sshll.u32 %s6956_s23, 4  ;;  %s120_s13 = sshll.u32 %s6938_s8, 4  ;;  %s39_s24 = int_to_ptr.hbm [resolvable:$true] %s38_s24  ;;  %s121_s13 = int_to_ptr.hbm [resolvable:$true] %s120_s13 }
  0x29   :  { %46 = dma.hbm_to_vmem [thread:$0]  %s39_s24, 256, %s41_s22, [#allocation3], %s5427_s0, %s5427_s0, %s5428_s20  }
  0x2a   :  { %s66_s30 = sshll.u32 %s6957_s7, 4  ;;  %s5430_s26 = smov [#allocation10]   ;;  %s67_s30 = int_to_ptr.hbm [resolvable:$true] %s66_s30 }
  0x2b   :  { %74 = dma.hbm_to_vmem [thread:$0]  %s67_s30, 32, %s69_s5, [#allocation6], %s5417_s25, %s5417_s25, %s5418_s3  }
  0x2c   :  { %s96_s27 = sshll.u32 %s5430_s26, 4  ;;  %s5431_s24 = smov [#allocation13]   ;;  %s97_s27 = int_to_ptr.vmem [resolvable:$true] %s96_s27 }
  0x2d   :  { %102 = dma.hbm_to_vmem [thread:$0]  %s95_s9, 1024, %s97_s27, [#allocation9], %s5420_s28, %s5420_s28, %s5421_s29  }
  0x2e   :  { %s122_s6 = sshll.u32 %s5431_s24, 4  ;;  %s146_s2 = sshll.u32 %s6940_s10, 4  ;;  %s123_s6 = int_to_ptr.vmem [resolvable:$true] %s122_s6  ;;  %s147_s2 = int_to_ptr.hbm [resolvable:$true] %s146_s2 }
  0x2f   :  { %128 = dma.hbm_to_vmem [thread:$0]  %s121_s13, 64, %s123_s6, [#allocation12], %s5417_s25, %s5417_s25, %s5418_s3  }
  0x30   :  { %s172_s5 = sshll.u32 %s6942_s12, 4  ;;  %s5432_s1 = smov [#allocation16]   ;;  %s173_s5 = int_to_ptr.hbm [resolvable:$true] %s172_s5 }
  0x31   :  { %s148_s21 = sshll.u32 %s5432_s1, 4  ;;  %s5433_s9 = smov [#allocation19]   ;;  %s149_s21 = int_to_ptr.vmem [resolvable:$true] %s148_s21 }
  0x32   :  { %154 = dma.hbm_to_vmem [thread:$0]  %s147_s2, 64, %s149_s21, [#allocation15], %s5417_s25, %s5417_s25, %s5418_s3  }
  0x33   :  { %s174_s10 = sshll.u32 %s5433_s9, 4  ;;  %s200_s26 = sshll.u32 %s6945_s15, 4  ;;  %s175_s10 = int_to_ptr.vmem [resolvable:$true] %s174_s10  ;;  %s201_s26 = int_to_ptr.hbm [resolvable:$true] %s200_s26 }
  0x34   :  { %180 = dma.hbm_to_vmem [thread:$0]  %s173_s5, 512, %s175_s10, [#allocation18], %s5420_s28, %s5420_s28, %s5421_s29  }
  0x35   :  { %s5434_s12 = smov [#allocation22]  }
  0x36   :  { %s202_s13 = sshll.u32 %s5434_s12, 4  ;;  %s203_s13 = int_to_ptr.vmem [resolvable:$true] %s202_s13 }
  0x37   :  { %208 = dma.hbm_to_vmem [thread:$0]  %s201_s26, 32, %s203_s13, [#allocation21], %s5417_s25, %s5417_s25, %s5418_s3  }
  0x38   :  { %5398 = dma.done.wait [#allocation3], 256  }
  0x39   :  { %5399 = vsyncadd [#allocation3], 4294967040 }
  0x3a   :  { %5400 = dma.done.wait [#allocation6], 64  }
  0x3b   :  { %5401 = vsyncadd [#allocation6], 4294967232 }
  0x3c   :  { %5402 = dma.done.wait [#allocation9], 2048  }
  0x3d   :  { %5403 = vsyncadd [#allocation9], 4294965248 }
  0x3e   :  { %5404 = dma.done.wait [#allocation12], 1088  }
  0x3f   :  { %5405 = vsyncadd [#allocation12], 4294966208 }
  0x40   :  { %5406 = dma.done.wait [#allocation15], 128  }
  0x41   :  { %5407 = vsyncadd [#allocation15], 4294967168 }
  0x42   :  { %5408 = dma.done.wait [#allocation18], 576  }
  0x43   :  { %5409 = vsyncadd [#allocation18], 4294966720 }
  0x44   :  { %5410 = dma.done.wait [#allocation21], 64  }
  0x45   :  { %5411 = vsyncadd [#allocation21], 4294967232  ;;  %v4564_v0 = vld [vmem:[%s6934_s4 + $0x8] sm:$0xff]  ;;  %v4566_v1 = vld [vmem:[#allocation8 + $0x8] sm:$0xff]  ;;  %vm305_vm0 = vcmask 261120   ;;  %vm386_vm1 = vcmask 64512  }
  0x46   :  { %v4563_v2 = vld [vmem:[%s6934_s4] sm:$0xff]  ;;  %v4565_v3 = vld [vmem:[#allocation8] sm:$0xff]  ;;  %315 = vmatpush.bf16.msra.mxu0 %v4564_v0  ;;  %345 = vmatpush.bf16.msra.mxu1 %v4566_v1  ;;  %v267_v5 = vld [vmem:[#allocation2 + $0x8] sm:$0xff]  ;;  %s5435_s27 = smov 112   ;;  %s5436_s24 = smov 120   ;;  %vm427_vm2 = vcmask 1043456  }
  0x47   :  { %v266_v4 = vld [vmem:[#allocation2] sm:$0xff]  ;;  %v4724_v7 = vld [vmem:[#allocation13] ss:$0 sm:$0xff]  ;;  %v4725_v8 = vld [vmem:[#allocation14] ss:$0 sm:$0xff]  ;;  %s5437_s6 = smov 104  }
  0x48   :  { %v288_v6 = vpack.c.bf16 %v267_v5, %v266_v4  ;;  %v4568_v29 = vld [vmem:[#allocation10 + $0x8] sm:$0xff]  ;;  %v4567_v30 = vld [vmem:[#allocation10] sm:$0xff]  ;;  %v4726_v40 = vld [vmem:[#allocation5] ss:$0 sm:$0xff]  ;;  %s6958_s2 = sld [smem:[#allocation36_spill]]  ;;  %s5438_s12 = smov 24  }
  0x49   :  { %375 = vmatpush.bf16.msra.mxu2 %v4568_v29  ;;  %v5661_v58 = vld [vmem:[#allocation16] ss:$0 sm:$0xff]  ;;  %vm634_vm3 = vcmask 130048   ;;  %vm636_vm4 = vcmask 195584   ;;  %s4226_s8 = sshll.u32 %s6948_s18, 4  ;;  %s4239_s9 = sshll.u32 %s6949_s19, 4  ;;  %s4227_s8 = int_to_ptr.hbm [resolvable:$true] %s4226_s8  ;;  %s4240_s9 = int_to_ptr.hbm [resolvable:$true] %s4239_s9 }
  0x4a   :  { %316 = vmatpush.bf16.msra.mxu0 %v4563_v2  ;;  %346 = vmatpush.bf16.msra.mxu1 %v4565_v3 }
  0x4d   :  { %4271 = vmatmul.msk.bf16.vlgmr.msra.gmra.mxu0 %vm305_vm0, %v288_v6  ;;  %4280 = vmatmul.msk.bf16.vlgmr.msra.gmra.mxu1 %vm305_vm0, %v288_v6 }
  0x4e   :  { %376 = vmatpush.bf16.msra.mxu2 %v4567_v30 }
  0x51   :  { %4289 = vmatmul.msk.bf16.vlgmr.msra.gmra.mxu2 %vm305_vm0, %v288_v6  ;;  %v4727_v6 = vld [vmem:[#allocation5 + $0x1] ss:$0 sm:$0xff] }
  0xca   :  { %v318_v9 = vpop.f32.mrf.mxu0  ;;  %v348_v10 = vpop.f32.mrf.mxu1 }
  0xcb   :  { %v319_v11 = vadd.f32 %v4724_v7, %v318_v9  ;;  %v349_v12 = vadd.f32 %v4725_v8, %v348_v10 }
  0xcd   :  { %v384_v13 = vpack.c.bf16 %v319_v11, %v319_v11  ;;  %v385_v14 = vpack.c.bf16 %v349_v12, %v349_v12 }
  0xcf   :  { %507 = vrot.lane.b32.xlu1 %v385_v14, %s5435_s27  ;;  %448 = vrot.lane.b32.xlu0 %v385_v14, %s5436_s24  ;;  %v391_v15 = vsel %vm386_vm1, %v385_v14, 0 }
  0xd0   :  { %505 = vrot.lane.b32.xlu2 %v384_v13, %s5435_s27  ;;  %400 = vmatpush.bf16.xpose.msra.mxu3 %v391_v15 }
  0xd2   :  { %v320_v16 = vpop.f32.mrf.mxu0  ;;  %v350_v17 = vpop.f32.mrf.mxu1 }
  0xd3   :  { %v321_v18 = vadd.f32 %v4724_v7, %v320_v16  ;;  %v351_v19 = vadd.f32 %v4725_v8, %v350_v17 }
  0xd4   :  { %v378_v62 = vpop.f32.mrf.mxu2 }
  0xd5   :  { %v640_v20 = vpack.c.bf16 %v321_v18, %v321_v18  ;;  %v641_v21 = vpack.c.bf16 %v351_v19, %v351_v19  ;;  %v379_v63 = vadd.f32 %v5661_v58, %v378_v62 }
  0xd7   :  { %565 = vrot.lane.b32.xlu1 %v385_v14, %s5437_s6  ;;  %445 = vrot.lane.b32.xlu0 %v384_v13, %s5436_s24  ;;  %v646_v28 = vsel %vm386_vm1, %v641_v21, 0  ;;  %v423_v4 = vpack.c.bf16 %v379_v63, %v379_v63 }
  0xd8   :  { %563 = vrot.lane.b32.xlu2 %v384_v13, %s5437_s6  ;;  %4290 = vmatmul.msk.bf16.vlgmr.msra.gmra.mxu3 %vm386_vm1, %v384_v13 }
  0xd9   :  { %v429_v9 = vsel %vm427_vm2, %v423_v4, 0 }
  0xda   :  { %438 = vmatpush.bf16.msrb.mxu0 %v429_v9 }
  0xdf   :  { %699 = vrot.lane.b32.xlu1 %v640_v20, %s5436_s24  ;;  %702 = vrot.lane.b32.xlu0 %v641_v21, %s5436_s24 }
  0xe0   :  { %761 = vrot.lane.b32.xlu2 %v641_v21, %s5435_s27 }
  0xe7   :  { %759 = vrot.lane.b32.xlu1 %v640_v20, %s5435_s27  ;;  %819 = vrot.lane.b32.xlu0 %v641_v21, %s5437_s6 }
  0xe8   :  { %817 = vrot.lane.b32.xlu2 %v640_v20, %s5437_s6 }
 0x12a   :  { %v506_v22 = vpop.permute.xlu2 %505 }
 0x132   :  { %v564_v23 = vpop.permute.xlu2 %563 }
 0x13a   :  { %v762_v31 = vpop.permute.xlu2 %761 }
 0x13b   :  { %v767_v34 = vsel %vm386_vm1, %v762_v31, 0 }
 0x141   :  { %v508_v24 = vpop.permute.xlu1 %507  ;;  %v449_v25 = vpop.permute.xlu0 %448 }
 0x142   :  { %v454_v26 = vsel %vm386_vm1, %v449_v25, 0  ;;  %v513_v27 = vsel %vm386_vm1, %v508_v24, 0  ;;  %v818_v48 = vpop.permute.xlu2 %817 }
 0x143   :  { %463 = vmatpush.bf16.xpose.msrb.mxu1 %v454_v26  ;;  %522 = vmatpush.bf16.xpose.msrb.mxu3 %v513_v27 }
 0x149   :  { %v566_v32 = vpop.permute.xlu1 %565  ;;  %v446_v33 = vpop.permute.xlu0 %445 }
 0x14a   :  { %v571_v35 = vsel %vm386_vm1, %v566_v32, 0  ;;  %4292 = vmatmul.msk.bf16.vlgmr.msrb.gmra.mxu1 %vm386_vm1, %v446_v33  ;;  %4294 = vmatmul.msk.bf16.vlgmr.msrb.gmra.mxu3 %vm386_vm1, %v506_v22 }
 0x14b   :  { %655 = vmatpush.bf16.xpose.msra.mxu3 %v646_v28  ;;  %580 = vmatpush.bf16.xpose.msra.mxu1 %v571_v35 }
 0x151   :  { %v703_v36 = vpop.permute.xlu0 %702  ;;  %v700_v44 = vpop.permute.xlu1 %699 }
 0x152   :  { %v708_v37 = vsel %vm386_vm1, %v703_v36, 0 }
 0x153   :  { %776 = vmatpush.bf16.xpose.msrb.mxu3 %v767_v34  ;;  %717 = vmatpush.bf16.xpose.msrb.mxu1 %v708_v37 }
 0x159   :  { %v820_v38 = vpop.permute.xlu0 %819  ;;  %v760_v47 = vpop.permute.xlu1 %759 }
 0x15a   :  { %v825_v39 = vsel %vm386_vm1, %v820_v38, 0  ;;  %4296 = vmatmul.msk.bf16.vlgmr.msra.gmra.mxu1 %vm386_vm1, %v564_v23  ;;  %4298 = vmatmul.msk.bf16.vlgmr.msra.gmra.mxu3 %vm386_vm1, %v640_v20 }
 0x15b   :  { %v402_v41 = vpop.f32.mrf.mxu3  ;;  %834 = vmatpush.bf16.xpose.msra.mxu1 %v825_v39 }
 0x15c   :  { %v406_v42 = vmul.f32 0.35355338, %v402_v41 }
 0x15e   :  { %v410_v43 = vadd.f32 %v4726_v40, %v406_v42 }
 0x160   :  { %v411_v45 = vsel %vm386_vm1, %v410_v43, -inf }
 0x161   :  { %412 = vmax.xlane.f32.xlu1 %v411_v45 }
 0x163   :  { %v404_v46 = vpop.f32.mrf.mxu3 }
 0x16a   :  { %4300 = vmatmul.msk.bf16.vlgmr.msrb.gmra.mxu1 %vm386_vm1, %v700_v44  ;;  %4302 = vmatmul.msk.bf16.vlgmr.msrb.gmra.mxu3 %vm386_vm1, %v760_v47  ;;  %v380_v47 = vpop.f32.mrf.mxu2 }
 0x17a   :  { %4304 = vmatmul.msk.bf16.vlgmr.msra.gmra.mxu1 %vm386_vm1, %v818_v48 }
 0x1c7   :  { %v465_v49 = vpop.f32.mrf.mxu1 }
 0x1c8   :  { %v469_v50 = vmul.f32 0.35355338, %v465_v49 }
 0x1ca   :  { %v470_v51 = vadd.f32 %v4726_v40, %v469_v50  ;;  %v381_v50 = vadd.f32 %v5661_v58, %v380_v47  ;;  %v4572_v47 = vld [vmem:[%s6934_s4 + $0x18] sm:$0xff] }
 0x1cc   :  { %v471_v52 = vsel %vm386_vm1, %v470_v51, -inf }
 0x1cd   :  { %472 = vmax.xlane.f32.xlu0 %v471_v52  ;;  %v524_v53 = vpop.f32.mrf.mxu3 }
 0x1ce   :  { %v528_v54 = vmul.f32 0.35355338, %v524_v53  ;;  %v678_v53 = vpack.c.bf16 %v381_v50, %v381_v50 }
 0x1cf   :  { %v467_v55 = vpop.f32.mrf.mxu1 }
 0x1d0   :  { %v529_v56 = vadd.f32 %v4726_v40, %v528_v54  ;;  %v683_v58 = vsel %vm427_vm2, %v678_v53, 0 }
 0x1d2   :  { %v530_v57 = vsel %vm386_vm1, %v529_v56, -inf }
 0x1d3   :  { %531 = vmax.xlane.f32.xlu2 %v530_v57 }
 0x1d4   :  { %v413_v59 = vpop.xlane.xlu1 %412 }
 0x1d5   :  { %v414_v60 = vsub.f32 %v410_v43, %v413_v59  ;;  %v526_v61 = vpop.f32.mrf.mxu3 }
 0x1d7   :  { %v415_v0 = vmul.f32 1.442695, %v414_v60  ;;  %v582_v1 = vpop.f32.mrf.mxu1 }
 0x1d8   :  { %v586_v2 = vmul.f32 0.35355338, %v582_v1 }
 0x1d9   :  { %4760 = vpow2.f32 %v415_v0 }
 0x1da   :  { %v587_v3 = vadd.f32 %v4726_v40, %v586_v2 }
 0x1dc   :  { %v588_v5 = vsel %vm386_vm1, %v587_v3, -inf }
 0x1dd   :  { %589 = vmax.xlane.f32.xlu2 %v588_v5  ;;  %v657_v7 = vpop.f32.mrf.mxu3 }
 0x1de   :  { %v661_v8 = vmul.f32 0.35355338, %v657_v7 }
 0x1df   :  { %v584_v10 = vpop.f32.mrf.mxu1  ;;  %v4761_v12 = vpop.eup %4760 }
 0x1e0   :  { %v665_v11 = vadd.f32 %v4727_v6, %v661_v8  ;;  %v417_v14 = vsel %vm386_vm1, %v4761_v12, 0.0 }
 0x1e2   :  { %v666_v13 = vsel %vm386_vm1, %v665_v11, -inf }
 0x1e3   :  { %667 = vmax.xlane.f32.xlu1 %v666_v13 }
 0x1e5   :  { %418 = vadd.xlane.f32.xlu2 %v417_v14  ;;  %v659_v15 = vpop.f32.mrf.mxu3 }
 0x1e7   :  { %v719_v16 = vpop.f32.mrf.mxu1 }
 0x1e8   :  { %v723_v17 = vmul.f32 0.35355338, %v719_v16 }
 0x1ea   :  { %v724_v18 = vadd.f32 %v4727_v6, %v723_v17 }
 0x1ec   :  { %v725_v19 = vsel %vm386_vm1, %v724_v18, -inf }
 0x1ed   :  { %726 = vmax.xlane.f32.xlu0 %v725_v19  ;;  %v778_v20 = vpop.f32.mrf.mxu3 }
 0x1ee   :  { %v782_v21 = vmul.f32 0.35355338, %v778_v20 }
 0x1ef   :  { %v721_v22 = vpop.f32.mrf.mxu1 }
 0x1f0   :  { %v783_v23 = vadd.f32 %v4727_v6, %v782_v21 }
 0x1f2   :  { %v784_v24 = vsel %vm386_vm1, %v783_v23, -inf }
 0x1f3   :  { %785 = vmax.xlane.f32.xlu1 %v784_v24 }
 0x1f5   :  { %v780_v25 = vpop.f32.mrf.mxu3 }
 0x1f7   :  { %v836_v26 = vpop.f32.mrf.mxu1 }
 0x1f8   :  { %v840_v28 = vmul.f32 0.35355338, %v836_v26 }
 0x1fa   :  { %v5673_v29 = vadd.f32 %v4727_v6, %v840_v28 }
 0x1fc   :  { %v842_v30 = vsel %vm386_vm1, %v5673_v29, -inf }
 0x1fd   :  { %542 = vrot.lane.b32.xlu2 %v423_v4, %s5435_s27 }
 0x1ff   :  { %v838_v27 = vpop.f32.mrf.mxu1 }
 0x200   :  { %v4574_v27 = vld [vmem:[#allocation8 + $0x18] sm:$0xff] }
 0x201   :  { %484 = vrot.lane.b32.xlu0 %v423_v4, %s5436_s24  ;;  %1115 = vmatpush.bf16.msrb.mxu1 %v4574_v27  ;;  %v4576_v27 = vld [vmem:[#allocation10 + $0x18] sm:$0xff] }
 0x20c   :  { %600 = vrot.lane.b32.xlu1 %v423_v4, %s5437_s6 }
 0x226   :  { %843 = vmax.xlane.f32.xlu2 %v842_v30 }
 0x240   :  { %v473_v31 = vpop.xlane.xlu0 %472 }
 0x241   :  { %v474_v32 = vsub.f32 %v470_v51, %v473_v31 }
 0x243   :  { %v475_v33 = vmul.f32 1.442695, %v474_v32 }
 0x245   :  { %4762 = vpow2.f32 %v475_v33  ;;  %v268_v33 = vld [vmem:[%s6958_s2] sm:$0xff] }
 0x246   :  { %v532_v34 = vpop.xlane.xlu2 %531 }
 0x247   :  { %v533_v35 = vsub.f32 %v529_v56, %v532_v34  ;;  %v269_v34 = vld [vmem:[%s6958_s2 + $0x8] sm:$0xff] }
 0x249   :  { %v534_v36 = vmul.f32 1.442695, %v533_v35  ;;  %v5725_v35 = vpack.c.bf16 %v269_v34, %v268_v33 }
 0x24b   :  { %v5677_v37 = vpop.eup %4762  ;;  %4764 = vpow2.f32 %v534_v36 }
 0x24c   :  { %v477_v38 = vsel %vm386_vm1, %v5677_v37, 0.0 }
 0x24d   :  { %478 = vadd.xlane.f32.xlu0 %v477_v38 }
 0x250   :  { %v590_v39 = vpop.xlane.xlu2 %589 }
 0x251   :  { %v5681_v40 = vpop.eup %4764  ;;  %v591_v41 = vsub.f32 %v587_v3, %v590_v39 }
 0x252   :  { %v536_v42 = vsel %vm386_vm1, %v5681_v40, 0.0 }
 0x253   :  { %v592_v43 = vmul.f32 1.442695, %v591_v41  ;;  %537 = vadd.xlane.f32.xlu2 %v536_v42 }
 0x255   :  { %4766 = vpow2.f32 %v592_v43 }
 0x256   :  { %v668_v44 = vpop.xlane.xlu1 %667 }
 0x257   :  { %v669_v45 = vsub.f32 %v665_v11, %v668_v44 }
 0x258   :  { %v419_v46 = vpop.xlane.xlu2 %418 }
 0x259   :  { %v670_v48 = vmul.f32 1.442695, %v669_v45  ;;  %4768 = vrcp.f32 %v419_v46 }
 0x25b   :  { %v5685_v49 = vpop.eup %4766  ;;  %4770 = vpow2.f32 %v670_v48 }
 0x25c   :  { %v594_v51 = vsel %vm386_vm1, %v5685_v49, 0.0 }
 0x25d   :  { %595 = vadd.xlane.f32.xlu1 %v594_v51 }
 0x25f   :  { %v4769_v52 = vpop.eup %4768 }
 0x260   :  { %v727_v54 = vpop.xlane.xlu0 %726  ;;  %v543_v55 = vpop.permute.xlu2 %542  ;;  %v421_v56 = vmul.f32 %v4769_v52, %v4761_v12  ;;  %v4571_v52 = vld [vmem:[%s6934_s4 + $0x10] sm:$0xff] }
 0x261   :  { %v5690_v57 = vpop.eup %4770  ;;  %v728_v59 = vsub.f32 %v724_v18, %v727_v54  ;;  %v548_v60 = vsel %vm427_vm2, %v543_v55, 0  ;;  %v270_v55 = vld [vmem:[%s6958_s2 + $0x10] sm:$0xff] }
 0x262   :  { %557 = vmatpush.bf16.msra.mxu0 %v548_v60  ;;  %v422_v61 = vpack.c.bf16 %v421_v56, %v421_v56  ;;  %v672_v63 = vsel %vm386_vm1, %v5690_v57, 0.0  ;;  %v271_v56 = vld [vmem:[%s6958_s2 + $0x18] sm:$0xff] }
 0x263   :  { %v729_v62 = vmul.f32 1.442695, %v728_v59 }
 0x264   :  { %4291 = vmatmul.msk.bf16.vlgmr.msrb.gmra.mxu0 %vm386_vm1, %v422_v61 }
 0x265   :  { %4772 = vpow2.f32 %v729_v62  ;;  %673 = vadd.xlane.f32.xlu1 %v672_v63 }
 0x266   :  { %692 = vmatpush.bf16.msrb.mxu0 %v683_v58  ;;  %v786_v0 = vpop.xlane.xlu1 %785 }
 0x267   :  { %v787_v1 = vsub.f32 %v783_v23, %v786_v0 }
 0x269   :  { %v788_v2 = vmul.f32 1.442695, %v787_v1 }
 0x26b   :  { %v4773_v3 = vpop.eup %4772  ;;  %4774 = vpow2.f32 %v788_v2  ;;  %738 = vrot.lane.b32.xlu2 %v678_v53, %s5436_s24 }
 0x26c   :  { %v731_v4 = vsel %vm386_vm1, %v4773_v3, 0.0 }
 0x26d   :  { %732 = vadd.xlane.f32.xlu0 %v731_v4 }
 0x271   :  { %v5699_v5 = vpop.eup %4774 }
 0x272   :  { %v790_v8 = vsel %vm386_vm1, %v5699_v5, 0.0 }
 0x273   :  { %v485_v6 = vpop.permute.xlu0 %484 }
 0x274   :  { %v490_v7 = vsel %vm427_vm2, %v485_v6, 0 }
 0x275   :  { %499 = vmatpush.bf16.msrb.mxu2 %v490_v7  ;;  %791 = vadd.xlane.f32.xlu0 %v790_v8 }
 0x27e   :  { %796 = vrot.lane.b32.xlu1 %v678_v53, %s5435_s27  ;;  %v601_v9 = vpop.permute.xlu1 %600 }
 0x27f   :  { %v606_v10 = vsel %vm427_vm2, %v601_v9, 0 }
 0x280   :  { %615 = vmatpush.bf16.msra.mxu2 %v606_v10 }
 0x289   :  { %854 = vrot.lane.b32.xlu0 %v678_v53, %s5437_s6 }
 0x299   :  { %v844_v11 = vpop.xlane.xlu2 %843 }
 0x29a   :  { %v845_v12 = vsub.f32 %v5673_v29, %v844_v11  ;;  %v4573_v29 = vld [vmem:[#allocation8 + $0x10] sm:$0xff] }
 0x29b   :  { %1116 = vmatpush.bf16.msrb.mxu1 %v4573_v29 }
 0x29c   :  { %v846_v13 = vmul.f32 1.442695, %v845_v12 }
 0x29e   :  { %4776 = vpow2.f32 %v846_v13  ;;  %4337 = vmatmul.msk.bf16.vlgmr.msrb.gmra.mxu1 %vm305_vm0, %v5725_v35  ;;  %v4570_v13 = vld [vmem:[#allocation11 + $0x8] sm:$0xff] }
 0x29f   :  { %916 = vmatpush.bf16.msra.mxu3 %v4570_v13 }
 0x2a4   :  { %v5708_v14 = vpop.eup %4776 }
 0x2a5   :  { %v848_v15 = vsel %vm386_vm1, %v5708_v14, 0.0 }
 0x2a6   :  { %849 = vadd.xlane.f32.xlu2 %v848_v15 }
 0x2c0   :  { %v479_v16 = vpop.xlane.xlu0 %478 }
 0x2c1   :  { %4778 = vrcp.f32 %v479_v16 }
 0x2c6   :  { %v538_v17 = vpop.xlane.xlu2 %537 }
 0x2c7   :  { %v4779_v18 = vpop.eup %4778  ;;  %4780 = vrcp.f32 %v538_v17 }
 0x2c8   :  { %v481_v19 = vmul.f32 %v4779_v18, %v5677_v37 }
 0x2ca   :  { %v482_v20 = vpack.c.bf16 %v481_v19, %v481_v19 }
 0x2cc   :  { %4293 = vmatmul.msk.bf16.vlgmr.msrb.gmra.mxu2 %vm386_vm1, %v482_v20  ;;  %v4730_v20 = vld [vmem:[#allocation13 + $0x1] ss:$0 sm:$0xff] }
 0x2cd   :  { %v4781_v21 = vpop.eup %4780 }
 0x2ce   :  { %v540_v22 = vmul.f32 %v4781_v21, %v5681_v40  ;;  %v739_v23 = vpop.permute.xlu2 %738  ;;  %v4569_v21 = vld [vmem:[#allocation11] sm:$0xff] }
 0x2cf   :  { %v744_v24 = vsel %vm427_vm2, %v739_v23, 0  ;;  %917 = vmatpush.bf16.msra.mxu3 %v4569_v21 }
 0x2d0   :  { %v541_v25 = vpack.c.bf16 %v540_v22, %v540_v22  ;;  %753 = vmatpush.bf16.msrb.mxu2 %v744_v24  ;;  %v596_v26 = vpop.xlane.xlu1 %595 }
 0x2d1   :  { %4782 = vrcp.f32 %v596_v26 }
 0x2d2   :  { %4295 = vmatmul.msk.bf16.vlgmr.msra.gmra.mxu0 %vm386_vm1, %v541_v25 }
 0x2d7   :  { %v4783_v28 = vpop.eup %4782 }
 0x2d8   :  { %v598_v30 = vmul.f32 %v4783_v28, %v5685_v49  ;;  %v674_v31 = vpop.xlane.xlu1 %673  ;;  %v4575_v28 = vld [vmem:[#allocation10 + $0x10] sm:$0xff] }
 0x2d9   :  { %4784 = vrcp.f32 %v674_v31 }
 0x2da   :  { %v599_v32 = vpack.c.bf16 %v598_v30, %v598_v30 }
 0x2dc   :  { %4297 = vmatmul.msk.bf16.vlgmr.msra.gmra.mxu2 %vm386_vm1, %v599_v32 }
 0x2df   :  { %v4785_v36 = vpop.eup %4784 }
 0x2e0   :  { %v676_v37 = vmul.f32 %v4785_v36, %v5690_v57  ;;  %v733_v38 = vpop.xlane.xlu0 %732  ;;  %v5752_v57 = vpack.c.bf16 %v271_v56, %v270_v55 }
 0x2e1   :  { %4786 = vrcp.f32 %v733_v38  ;;  %v5730_v39 = vpop.f32.mrf.mxu0 }
 0x2e2   :  { %v677_v40 = vpack.c.bf16 %v676_v37, %v676_v37  ;;  %4338 = vmatmul.msk.bf16.gmra.mxu1 %vm305_vm0, %v5752_v57 }
 0x2e4   :  { %4299 = vmatmul.msk.bf16.vlgmr.msrb.gmra.mxu0 %vm386_vm1, %v677_v40 }
 0x2e7   :  { %v4787_v41 = vpop.eup %4786 }
 0x2e8   :  { %v735_v42 = vmul.f32 %v4787_v41, %v4773_v3  ;;  %v792_v43 = vpop.xlane.xlu0 %791  ;;  %v4729_v3 = vld [vmem:[#allocation14 + $0x1] ss:$0 sm:$0xff] }
 0x2e9   :  { %4788 = vrcp.f32 %v792_v43  ;;  %v442_v44 = vpop.f32.mrf.mxu0 }
 0x2ea   :  { %v736_v45 = vpack.c.bf16 %v735_v42, %v735_v42 }
 0x2ec   :  { %4301 = vmatmul.msk.bf16.vlgmr.msrb.gmra.mxu2 %vm386_vm1, %v736_v45 }
 0x2ef   :  { %v4789_v46 = vpop.eup %4788 }
 0x2f0   :  { %v794_v48 = vmul.f32 %v4789_v46, %v5699_v5  ;;  %v797_v49 = vpop.permute.xlu1 %796 }
 0x2f1   :  { %v802_v50 = vsel %vm427_vm2, %v797_v49, 0 }
 0x2f2   :  { %v795_v51 = vpack.c.bf16 %v794_v48, %v794_v48  ;;  %811 = vmatpush.bf16.msra.mxu0 %v802_v50 }
 0x2f5   :  { %4303 = vmatmul.msk.bf16.vlgmr.msra.gmra.mxu0 %vm386_vm1, %v795_v51 }
 0x2f6   :  { %1079 = vmatpush.bf16.msrb.mxu0 %v4572_v47 }
 0x2fa   :  { %1080 = vmatpush.bf16.msrb.mxu0 %v4571_v52 }
 0x2fb   :  { %v855_v53 = vpop.permute.xlu0 %854 }
 0x2fc   :  { %v860_v54 = vsel %vm427_vm2, %v855_v53, 0 }
 0x2fd   :  { %869 = vmatpush.bf16.msra.mxu2 %v860_v54 }
 0x301   :  { %1151 = vmatpush.bf16.msrb.mxu2 %v4576_v27 }
 0x305   :  { %4327 = vmatmul.msk.bf16.vlgmr.msrb.gmra.mxu0 %vm305_vm0, %v5725_v35  ;;  %1152 = vmatpush.bf16.msrb.mxu2 %v4575_v28 }
 0x315   :  { %4328 = vmatmul.msk.bf16.gmra.mxu0 %vm305_vm0, %v5752_v57 }
 0x319   :  { %v850_v59 = vpop.xlane.xlu2 %849 }
 0x31a   :  { %4790 = vrcp.f32 %v850_v59 }
 0x31b   :  { %v1118_v2 = vpop.f32.mrf.mxu1 }
 0x31c   :  { %v1119_v6 = vadd.f32 %v4729_v3, %v1118_v2 }
 0x320   :  { %v4791_v60 = vpop.eup %4790 }
 0x321   :  { %v852_v61 = vmul.f32 %v4791_v60, %v5708_v14 }
 0x323   :  { %v853_v62 = vpack.c.bf16 %v852_v61, %v852_v61  ;;  %v1120_v7 = vpop.f32.mrf.mxu1 }
 0x324   :  { %v1121_v8 = vadd.f32 %v4729_v3, %v1120_v7 }
 0x325   :  { %4305 = vmatmul.msk.bf16.vlgmr.msra.gmra.mxu2 %vm386_vm1, %v853_v62 }
 0x326   :  { %v1166_v9 = vpack.c.bf16 %v1121_v8, %v1119_v6 }
 0x328   :  { %1239 = vrot.lane.b32.xlu1 %v1166_v9, %s5436_s24  ;;  %v1171_v23 = vsel %vm386_vm1, %v1166_v9, 0 }
 0x329   :  { %1180 = vmatpush.bf16.xpose.msrb.mxu3 %v1171_v23 }
 0x335   :  { %4347 = vmatmul.msk.bf16.vlgmr.msrb.gmra.mxu2 %vm305_vm0, %v5725_v35 }
 0x345   :  { %4348 = vmatmul.msk.bf16.gmra.mxu2 %vm305_vm0, %v5752_v57 }
 0x34f   :  { %v501_v58 = vpop.f32.mrf.mxu2  ;;  %v559_v63 = vpop.f32.mrf.mxu0 }
 0x357   :  { %v503_v0 = vpop.f32.mrf.mxu2  ;;  %v561_v1 = vpop.f32.mrf.mxu0 }
 0x35f   :  { %v617_v4 = vpop.f32.mrf.mxu2  ;;  %v1123_v30 = vpop.f32.mrf.mxu1 }
 0x360   :  { %v1124_v34 = vadd.f32 %v4729_v3, %v1123_v30 }
 0x361   :  { %v5760_v5 = vpop.f32.mrf.mxu0 }
 0x367   :  { %v619_v10 = vpop.f32.mrf.mxu2  ;;  %v1125_v37 = vpop.f32.mrf.mxu1 }
 0x368   :  { %v1126_v41 = vadd.f32 %v4729_v3, %v1125_v37  ;;  %v5805_v3 = vld [vmem:[#allocation16 + $0x1] ss:$0 sm:$0xff] }
 0x369   :  { %v696_v11 = vpop.f32.mrf.mxu0 }
 0x36a   :  { %v1484_v43 = vpack.c.bf16 %v1126_v41, %v1124_v34 }
 0x36c   :  { %v1489_v0 = vsel %vm386_vm1, %v1484_v43, 0 }
 0x36f   :  { %v755_v12 = vpop.f32.mrf.mxu2 }
 0x370   :  { %v4634_v14 = vpack.i.bf16 %v755_v12, %v501_v58 }
 0x372   :  { %4635 = vrot.lane.b32.xlu2 %v4634_v14, %s5428_s20  ;;  %v813_v15 = vpop.f32.mrf.mxu0 }
 0x373   :  { %v4639_v16 = vpack.i.bf16 %v813_v15, %v559_v63 }
 0x375   :  { %4640 = vrot.lane.b32.xlu0 %v4639_v16, %s5417_s25 }
 0x377   :  { %v757_v17 = vpop.f32.mrf.mxu2 }
 0x37a   :  { %v815_v18 = vpop.f32.mrf.mxu0 }
 0x382   :  { %v1082_v19 = vpop.f32.mrf.mxu0 }
 0x383   :  { %v1083_v22 = vadd.f32 %v4730_v20, %v1082_v19  ;;  %v4732_v19 = vld [vmem:[#allocation7] ss:$0 sm:$0xff] }
 0x38a   :  { %v1084_v24 = vpop.f32.mrf.mxu0 }
 0x38b   :  { %v1085_v25 = vadd.f32 %v4730_v20, %v1084_v24 }
 0x38d   :  { %v5766_v26 = vpack.c.bf16 %v1085_v25, %v1083_v22 }
 0x38f   :  { %1236 = vrot.lane.b32.xlu1 %v5766_v26, %s5436_s24  ;;  %1309 = vrot.lane.b32.xlu2 %v5766_v26, %s5435_s27 }
 0x392   :  { %v1087_v29 = vpop.f32.mrf.mxu0 }
 0x393   :  { %v1088_v33 = vadd.f32 %v4730_v20, %v1087_v29 }
 0x397   :  { %1380 = vrot.lane.b32.xlu1 %v5766_v26, %s5437_s6  ;;  %1557 = vrot.lane.b32.xlu2 %v1484_v43, %s5436_s24 }
 0x39a   :  { %v1089_v36 = vpop.f32.mrf.mxu0  ;;  %v1240_v35 = vpop.permute.xlu1 %1239 }
 0x39b   :  { %v1090_v40 = vadd.f32 %v4730_v20, %v1089_v36  ;;  %v1245_v44 = vsel %vm386_vm1, %v1240_v35, 0 }
 0x39c   :  { %1254 = vmatpush.bf16.xpose.msra.mxu0 %v1245_v44 }
 0x39d   :  { %v5777_v42 = vpack.c.bf16 %v1090_v40, %v1088_v33 }
 0x39f   :  { %1554 = vrot.lane.b32.xlu1 %v5777_v42, %s5436_s24  ;;  %1627 = vrot.lane.b32.xlu2 %v5777_v42, %s5435_s27 }
 0x3a7   :  { %1698 = vrot.lane.b32.xlu1 %v5777_v42, %s5437_s6 }
 0x3a8   :  { %v871_v31 = vpop.f32.mrf.mxu2 }
 0x3a9   :  { %v4644_v32 = vpack.i.bf16 %v871_v31, %v617_v4 }
 0x3ab   :  { %4645 = vrot.lane.b32.xlu0 %v4644_v32, %s5438_s12 }
 0x3b0   :  { %v873_v38 = vpop.f32.mrf.mxu2 }
 0x3b3   :  { %1311 = vrot.lane.b32.xlu0 %v1166_v9, %s5435_s27 }
 0x3b8   :  { %v1154_v1 = vpop.f32.mrf.mxu2 }
 0x3b9   :  { %v1155_v7 = vadd.f32 %v5805_v3, %v1154_v1 }
 0x3bb   :  { %1382 = vrot.lane.b32.xlu0 %v1166_v9, %s5437_s6 }
 0x3c0   :  { %v1156_v8 = vpop.f32.mrf.mxu2 }
 0x3c1   :  { %v1157_v9 = vadd.f32 %v5805_v3, %v1156_v8 }
 0x3c3   :  { %1629 = vrot.lane.b32.xlu0 %v1484_v43, %s5435_s27  ;;  %v5812_v10 = vpack.c.bf16 %v1157_v9, %v1155_v7 }
 0x3c5   :  { %1289 = vrot.lane.b32.xlu1 %v5812_v10, %s5436_s24 }
 0x3c8   :  { %v5835_v28 = vpop.f32.mrf.mxu2 }
 0x3cb   :  { %1700 = vrot.lane.b32.xlu0 %v1484_v43, %s5437_s6 }
 0x3cc   :  { %v4636_v47 = vpop.permute.xlu2 %4635 }
 0x3cd   :  { %v4638_v48 = vunpack.i.h.bf16 %v4636_v47  ;;  %v4637_v49 = vunpack.i.l.bf16 %v4636_v47 }
 0x3cf   :  { %v633_v53 = vsel %vm386_vm1, %v5730_v39, %v4637_v49  ;;  %v887_v54 = vsel %vm386_vm1, %v5760_v5, %v4638_v48 }
 0x3d0   :  { %v5839_v30 = vpop.f32.mrf.mxu2 }
 0x3e7   :  { %v4641_v46 = vpop.permute.xlu0 %4640 }
 0x3e8   :  { %v4643_v50 = vunpack.i.h.bf16 %v4641_v46  ;;  %v4642_v51 = vunpack.i.l.bf16 %v4641_v46 }
 0x3e9   :  { %v1310_v58 = vpop.permute.xlu2 %1309 }
 0x3ea   :  { %v888_v57 = vsel %vm634_vm3, %v887_v54, %v4643_v50  ;;  %v635_v59 = vsel %vm634_vm3, %v633_v53, %v4642_v51  ;;  %v4734_v51 = vld [vmem:[#allocation7 + $0x1] ss:$0 sm:$0xff] }
 0x3f1   :  { %v1558_v2 = vpop.permute.xlu2 %1557 }
 0x3f2   :  { %v1563_v5 = vsel %vm386_vm1, %v1558_v2, 0 }
 0x3f9   :  { %v1628_v17 = vpop.permute.xlu2 %1627 }
 0x401   :  { %v1237_v45 = vpop.permute.xlu1 %1236 }
 0x402   :  { %4351 = vmatmul.msk.bf16.vlgmr.msra.gmra.mxu0 %vm386_vm1, %v1237_v45 }
 0x409   :  { %v1381_v11 = vpop.permute.xlu1 %1380 }
 0x411   :  { %v1555_v16 = vpop.permute.xlu1 %1554 }
 0x419   :  { %v1699_v18 = vpop.permute.xlu1 %1698 }
 0x41d   :  { %v4646_v52 = vpop.permute.xlu0 %4645 }
 0x41e   :  { %v4648_v55 = vunpack.i.h.bf16 %v4646_v52  ;;  %v4647_v56 = vunpack.i.l.bf16 %v4646_v52 }
 0x420   :  { %v637_v60 = vsel %vm636_vm4, %v635_v59, %v4647_v56  ;;  %v889_v61 = vsel %vm636_vm4, %v888_v57, %v4648_v55 }
 0x421   :  { %v890_v62 = vpack.c.bf16 %v889_v61, %v637_v60 }
 0x423   :  { %4314 = vmatmul.msk.bf16.vlgmr.msra.gmra.mxu3 %vm305_vm0, %v890_v62 }
 0x424   :  { %1228 = vmatpush.bf16.msra.mxu3 %v5812_v10 }
 0x425   :  { %v1312_v63 = vpop.permute.xlu0 %1311 }
 0x426   :  { %v1317_v39 = vsel %vm386_vm1, %v1312_v63, 0 }
 0x427   :  { %1326 = vmatpush.bf16.xpose.msra.mxu2 %v1317_v39 }
 0x42d   :  { %v1383_v4 = vpop.permute.xlu0 %1382 }
 0x42e   :  { %v1388_v6 = vsel %vm386_vm1, %v1383_v4, 0  ;;  %4353 = vmatmul.msk.bf16.vlgmr.msra.gmra.mxu2 %vm386_vm1, %v1310_v58 }
 0x42f   :  { %1498 = vmatpush.bf16.xpose.msrb.mxu2 %v1489_v0  ;;  %1397 = vmatpush.bf16.xpose.msrb.mxu0 %v1388_v6 }
 0x433   :  { %4349 = vmatmul.msk.bf16.vlgmr.msrb.gmra.mxu3 %vm386_vm1, %v5766_v26 }
 0x435   :  { %v1630_v12 = vpop.permute.xlu0 %1629 }
 0x436   :  { %4355 = vmatmul.msk.bf16.vlgmr.msrb.gmra.mxu0 %vm386_vm1, %v1381_v11  ;;  %v1635_v13 = vsel %vm386_vm1, %v1630_v12, 0 }
 0x437   :  { %1572 = vmatpush.bf16.xpose.msra.mxu0 %v1563_v5  ;;  %1644 = vmatpush.bf16.xpose.msra.mxu2 %v1635_v13  ;;  %v1290_v58 = vpop.permute.xlu1 %1289 }
 0x438   :  { %1302 = vmatpush.bf16.msra.mxu1 %v1290_v58 }
 0x43d   :  { %v1701_v14 = vpop.permute.xlu0 %1700 }
 0x43e   :  { %4357 = vmatmul.msk.bf16.vlgmr.msrb.gmra.mxu2 %vm386_vm1, %v5777_v42  ;;  %v1706_v15 = vsel %vm386_vm1, %v1701_v14, 0 }
 0x43f   :  { %1715 = vmatpush.bf16.xpose.msrb.mxu0 %v1706_v15 }
 0x446   :  { %4359 = vmatmul.msk.bf16.vlgmr.msra.gmra.mxu0 %vm386_vm1, %v1555_v16 }
 0x44e   :  { %4361 = vmatmul.msk.bf16.vlgmr.msra.gmra.mxu2 %vm386_vm1, %v1628_v17 }
 0x456   :  { %4363 = vmatmul.msk.bf16.vlgmr.msrb.gmra.mxu0 %vm386_vm1, %v1699_v18 }
 0x47f   :  { %v1256_v20 = vpop.f32.mrf.mxu0 }
 0x480   :  { %v1261_v21 = vmul.f32 0.35355338, %v1256_v20 }
 0x482   :  { %v5827_v22 = vadd.f32 %v4732_v19, %v1261_v21 }
 0x484   :  { %v1265_v23 = vsel %vm634_vm3, %v5827_v22, -inf }
 0x485   :  { %1266 = vmax.xlane.f32.xlu1 %v1265_v23 }
 0x487   :  { %v1258_v24 = vpop.f32.mrf.mxu0 }
 0x488   :  { %v1262_v25 = vmul.f32 0.35355338, %v1258_v24 }
 0x48a   :  { %v5831_v26 = vadd.f32 %v4732_v19, %v1262_v25 }
 0x48c   :  { %v1268_v27 = vsel %vm634_vm3, %v5831_v26, -inf }
 0x48d   :  { %1269 = vmax.xlane.f32.xlu2 %v1268_v27 }
 0x4a6   :  { %v5837_v29 = vpop.f32.mrf.mxu3 }
 0x4ae   :  { %v5841_v31 = vpop.f32.mrf.mxu3 }
 0x4b1   :  { %v1328_v32 = vpop.f32.mrf.mxu2 }
 0x4b2   :  { %v1333_v33 = vmul.f32 0.35355338, %v1328_v32 }
 0x4b3   :  { %v1399_v34 = vpop.f32.mrf.mxu0 }
 0x4b4   :  { %v5843_v36 = vadd.f32 %v4732_v19, %v1333_v33  ;;  %v1404_v35 = vmul.f32 0.35355338, %v1399_v34 }
 0x4b6   :  { %v1182_v37 = vpop.f32.mrf.mxu3  ;;  %v1337_v38 = vsel %vm634_vm3, %v5843_v36, -inf  ;;  %v5855_v50 = vadd.f32 %v4732_v19, %v1404_v35 }
 0x4b7   :  { %v1187_v40 = vmul.f32 0.35355338, %v1182_v37  ;;  %1338 = vmax.xlane.f32.xlu0 %v1337_v38 }
 0x4b8   :  { %v1408_v57 = vsel %vm634_vm3, %v5855_v50, -inf }
 0x4b9   :  { %v1330_v41 = vpop.f32.mrf.mxu2  ;;  %v5847_v42 = vadd.f32 %v4732_v19, %v1187_v40 }
 0x4ba   :  { %v1334_v43 = vmul.f32 0.35355338, %v1330_v41 }
 0x4bb   :  { %v1401_v44 = vpop.f32.mrf.mxu0  ;;  %v1194_v45 = vsel %vm634_vm3, %v5847_v42, -inf }
 0x4bc   :  { %1195 = vmax.xlane.f32.xlu2 %v1194_v45  ;;  %v5851_v46 = vadd.f32 %v4732_v19, %v1334_v43  ;;  %v1405_v55 = vmul.f32 0.35355338, %v1401_v44 }
 0x4be   :  { %v1184_v47 = vpop.f32.mrf.mxu3  ;;  %v1340_v48 = vsel %vm634_vm3, %v5851_v46, -inf  ;;  %v5867_v62 = vadd.f32 %v4732_v19, %v1405_v55 }
 0x4bf   :  { %v1188_v49 = vmul.f32 0.35355338, %v1184_v47  ;;  %1341 = vmax.xlane.f32.xlu1 %v1340_v48 }
 0x4c0   :  { %v1411_v2 = vsel %vm634_vm3, %v5867_v62, -inf }
 0x4c1   :  { %v1500_v52 = vpop.f32.mrf.mxu2  ;;  %v5857_v53 = vadd.f32 %v4732_v19, %v1188_v49 }
 0x4c2   :  { %v1505_v54 = vmul.f32 0.35355338, %v1500_v52 }
 0x4c3   :  { %v1574_v56 = vpop.f32.mrf.mxu0  ;;  %v1197_v59 = vsel %vm634_vm3, %v5857_v53, -inf }
 0x4c4   :  { %1409 = vmax.xlane.f32.xlu2 %v1408_v57  ;;  %1198 = vmax.xlane.f32.xlu0 %v1197_v59  ;;  %v5863_v60 = vadd.f32 %v4734_v51, %v1505_v54  ;;  %v1579_v63 = vmul.f32 0.35355338, %v1574_v56 }
 0x4c6   :  { %v1512_v61 = vsel %vm634_vm3, %v5863_v60, -inf  ;;  %v5873_v6 = vadd.f32 %v4734_v51, %v1579_v63 }
 0x4c7   :  { %1513 = vmax.xlane.f32.xlu1 %v1512_v61 }
 0x4c8   :  { %v1583_v12 = vsel %vm634_vm3, %v5873_v6, -inf }
 0x4c9   :  { %v1502_v39 = vpop.f32.mrf.mxu2 }
 0x4ca   :  { %v1506_v0 = vmul.f32 0.35355338, %v1502_v39 }
 0x4cb   :  { %v1576_v1 = vpop.f32.mrf.mxu0 }
 0x4cc   :  { %v1580_v4 = vmul.f32 0.35355338, %v1576_v1  ;;  %1412 = vmax.xlane.f32.xlu0 %v1411_v2  ;;  %v5871_v5 = vadd.f32 %v4734_v51, %v1506_v0 }
 0x4ce   :  { %v1515_v7 = vsel %vm634_vm3, %v5871_v5, -inf  ;;  %v5877_v8 = vadd.f32 %v4734_v51, %v1580_v4 }
 0x4cf   :  { %1516 = vmax.xlane.f32.xlu2 %v1515_v7 }
 0x4d0   :  { %v1586_v9 = vsel %vm634_vm3, %v5877_v8, -inf }
 0x4d1   :  { %v1646_v11 = vpop.f32.mrf.mxu2  ;;  %1587 = vmax.xlane.f32.xlu1 %v1586_v9  ;;  %v1160_v9 = vadd.f32 %v5805_v3, %v5835_v28 }
 0x4d2   :  { %v1651_v13 = vmul.f32 0.35355338, %v1646_v11  ;;  %v1162_v11 = vadd.f32 %v5805_v3, %v5839_v30 }
 0x4d3   :  { %v1717_v14 = vpop.f32.mrf.mxu0 }
 0x4d4   :  { %1584 = vmax.xlane.f32.xlu0 %v1583_v12  ;;  %v5883_v15 = vadd.f32 %v4734_v51, %v1651_v13  ;;  %v1722_v20 = vmul.f32 0.35355338, %v1717_v14  ;;  %v5938_v12 = vpack.c.bf16 %v1162_v11, %v1160_v9 }
 0x4d6   :  { %v1655_v16 = vsel %vm634_vm3, %v5883_v15, -inf  ;;  %v5895_v32 = vadd.f32 %v4734_v51, %v1722_v20 }
 0x4d7   :  { %1656 = vmax.xlane.f32.xlu2 %v1655_v16 }
 0x4d8   :  { %v1726_v33 = vsel %vm634_vm3, %v5895_v32, -inf }
 0x4d9   :  { %v1648_v17 = vpop.f32.mrf.mxu2 }
 0x4da   :  { %v1652_v18 = vmul.f32 0.35355338, %v1648_v17 }
 0x4db   :  { %v1719_v19 = vpop.f32.mrf.mxu0 }
 0x4dc   :  { %v1723_v21 = vmul.f32 0.35355338, %v1719_v19  ;;  %v5887_v23 = vadd.f32 %v4734_v51, %v1652_v18 }
 0x4de   :  { %v1658_v24 = vsel %vm634_vm3, %v5887_v23, -inf  ;;  %v5891_v25 = vadd.f32 %v4734_v51, %v1723_v21 }
 0x4df   :  { %1659 = vmax.xlane.f32.xlu0 %v1658_v24 }
 0x4e0   :  { %v1729_v27 = vsel %vm634_vm3, %v5891_v25, -inf }
 0x4e1   :  { %1730 = vmax.xlane.f32.xlu1 %v1729_v27 }
 0x4e7   :  { %1727 = vmax.xlane.f32.xlu0 %v1726_v33 }
 0x4f8   :  { %v1267_v34 = vpop.xlane.xlu1 %1266 }
 0x4f9   :  { %v1271_v37 = vsub.f32 %v5827_v22, %v1267_v34 }
 0x4fb   :  { %v1273_v38 = vmul.f32 1.442695, %v1271_v37 }
 0x4fd   :  { %4792 = vpow2.f32 %v1273_v38 }
 0x500   :  { %v1270_v40 = vpop.xlane.xlu2 %1269 }
 0x501   :  { %v1272_v41 = vsub.f32 %v5831_v26, %v1270_v40 }
 0x503   :  { %v5901_v43 = vpop.eup %4792  ;;  %v1275_v35 = vmul.f32 1.442695, %v1272_v41 }
 0x504   :  { %v1277_v44 = vsel %vm634_vm3, %v5901_v43, 0.0 }
 0x505   :  { %4794 = vpow2.f32 %v1275_v35  ;;  %1278 = vadd.xlane.f32.xlu2 %v1277_v44 }
 0x50b   :  { %v5905_v45 = vpop.eup %4794 }
 0x50c   :  { %v1280_v47 = vsel %vm634_vm3, %v5905_v45, 0.0 }
 0x50d   :  { %1281 = vadd.xlane.f32.xlu0 %v1280_v47 }
 0x52a   :  { %v1339_v22 = vpop.xlane.xlu0 %1338 }
 0x52b   :  { %v1343_v48 = vsub.f32 %v5843_v36, %v1339_v22 }
 0x52d   :  { %v1345_v49 = vmul.f32 1.442695, %v1343_v48 }
 0x52f   :  { %4796 = vpow2.f32 %v1345_v49  ;;  %v1196_v26 = vpop.xlane.xlu2 %1195 }
 0x530   :  { %v1200_v51 = vsub.f32 %v5847_v42, %v1196_v26 }
 0x532   :  { %v1202_v52 = vmul.f32 1.442695, %v1200_v51  ;;  %v1342_v54 = vpop.xlane.xlu1 %1341 }
 0x533   :  { %v1344_v55 = vsub.f32 %v5851_v46, %v1342_v54 }
 0x534   :  { %4798 = vpow2.f32 %v1202_v52 }
 0x535   :  { %v5912_v56 = vpop.eup %4796  ;;  %v1347_v57 = vmul.f32 1.442695, %v1344_v55 }
 0x536   :  { %v1349_v59 = vsel %vm634_vm3, %v5912_v56, 0.0 }
 0x537   :  { %4800 = vpow2.f32 %v1347_v57  ;;  %1350 = vadd.xlane.f32.xlu2 %v1349_v59  ;;  %v1410_v61 = vpop.xlane.xlu2 %1409  ;;  %v1199_v36 = vpop.xlane.xlu0 %1198 }
 0x538   :  { %v1414_v58 = vsub.f32 %v5855_v50, %v1410_v61  ;;  %v1201_v39 = vsub.f32 %v5857_v53, %v1199_v36 }
 0x53a   :  { %v5917_v63 = vpop.eup %4798  ;;  %v1416_v42 = vmul.f32 1.442695, %v1414_v58  ;;  %v1204_v1 = vmul.f32 1.442695, %v1201_v39  ;;  %v1514_v16 = vpop.xlane.xlu1 %1513 }
 0x53b   :  { %v1206_v46 = vsel %vm634_vm3, %v5917_v63, 0.0  ;;  %v1518_v18 = vsub.f32 %v5863_v60, %v1514_v16 }
 0x53c   :  { %4802 = vpow2.f32 %v1416_v42  ;;  %1207 = vadd.xlane.f32.xlu1 %v1206_v46 }
 0x53d   :  { %v5922_v0 = vpop.eup %4800  ;;  %4804 = vpow2.f32 %v1204_v1  ;;  %v1520_v19 = vmul.f32 1.442695, %v1518_v18 }
 0x53e   :  { %v1352_v2 = vsel %vm634_vm3, %v5922_v0, 0.0 }
 0x53f   :  { %1353 = vadd.xlane.f32.xlu0 %v1352_v2  ;;  %v1413_v13 = vpop.xlane.xlu0 %1412 }
 0x540   :  { %v1415_v28 = vsub.f32 %v5867_v62, %v1413_v13 }
 0x542   :  { %v5926_v4 = vpop.eup %4802  ;;  %v1517_v17 = vpop.xlane.xlu2 %1516  ;;  %v1418_v30 = vmul.f32 1.442695, %v1415_v28 }
 0x543   :  { %v1420_v50 = vsel %vm634_vm3, %v5926_v4, 0.0  ;;  %v5930_v53 = vpop.eup %4804  ;;  %v1519_v21 = vsub.f32 %v5871_v5, %v1517_v17 }
 0x544   :  { %1421 = vadd.xlane.f32.xlu2 %v1420_v50  ;;  %v1209_v7 = vsel %vm634_vm3, %v5930_v53, 0.0  ;;  %v1588_v20 = vpop.xlane.xlu1 %1587  ;;  %4806 = vpow2.f32 %v1418_v30 }
 0x545   :  { %4808 = vpow2.f32 %v1520_v19  ;;  %v1590_v27 = vsub.f32 %v5877_v8, %v1588_v20  ;;  %v1522_v33 = vmul.f32 1.442695, %v1519_v21 }
 0x547   :  { %v1585_v14 = vpop.xlane.xlu0 %1584  ;;  %v1593_v37 = vmul.f32 1.442695, %v1590_v27  ;;  %4810 = vpow2.f32 %v1522_v33 }
 0x548   :  { %v1589_v62 = vsub.f32 %v5873_v6, %v1585_v14 }
 0x549   :  { %4812 = vpow2.f32 %v1593_v37 }
 0x54a   :  { %v1657_v24 = vpop.xlane.xlu2 %1656  ;;  %v5950_v34 = vpop.eup %4806  ;;  %v1591_v41 = vmul.f32 1.442695, %v1589_v62 }
 0x54b   :  { %v5953_v38 = vpop.eup %4808  ;;  %v1661_v60 = vsub.f32 %v5883_v15, %v1657_v24  ;;  %v1423_v5 = vsel %vm634_vm3, %v5950_v34, 0.0 }
 0x54c   :  { %1210 = vadd.xlane.f32.xlu2 %v1209_v7  ;;  %v1524_v8 = vsel %vm634_vm3, %v5953_v38, 0.0 }
 0x54d   :  { %v1663_v35 = vmul.f32 1.442695, %v1661_v60  ;;  %v5960_v6 = vpop.eup %4810 }
 0x54e   :  { %v1527_v48 = vsel %vm634_vm3, %v5960_v6, 0.0 }
 0x54f   :  { %v5963_v47 = vpop.eup %4812 }
 0x550   :  { %v1598_v51 = vsel %vm634_vm3, %v5963_v47, 0.0 }
 0x552   :  { %v1660_v3 = vpop.xlane.xlu0 %1659 }
 0x553   :  { %1431 = vrot.lane.b32.xlu0 %v5812_v10, %s5437_s6  ;;  %v1662_v15 = vsub.f32 %v5887_v23, %v1660_v3 }
 0x554   :  { %v1731_v23 = vpop.xlane.xlu1 %1730 }
 0x555   :  { %1607 = vrot.lane.b32.xlu1 %v5938_v12, %s5436_s24  ;;  %v1665_v26 = vmul.f32 1.442695, %v1662_v15  ;;  %v1733_v36 = vsub.f32 %v5891_v25, %v1731_v23 }
 0x564   :  { %1360 = vrot.lane.b32.xlu2 %v5812_v10, %s5435_s27  ;;  %v1728_v10 = vpop.xlane.xlu0 %1727 }
 0x565   :  { %v1732_v22 = vsub.f32 %v5895_v32, %v1728_v10 }
 0x567   :  { %v1734_v54 = vmul.f32 1.442695, %v1732_v22 }
 0x578   :  { %v1279_v40 = vpop.xlane.xlu2 %1278 }
 0x579   :  { %4814 = vrcp.f32 %v1279_v40 }
 0x57d   :  { %1424 = vadd.xlane.f32.xlu0 %v1423_v5 }
 0x57f   :  { %1525 = vadd.xlane.f32.xlu1 %v1524_v8  ;;  %v4815_v49 = vpop.eup %4814 }
 0x580   :  { %v1282_v44 = vpop.xlane.xlu0 %1281  ;;  %v1285_v57 = vmul.f32 %v4815_v49, %v5901_v43  ;;  %v1736_v43 = vmul.f32 1.442695, %v1733_v36 }
 0x581   :  { %4816 = vrcp.f32 %v1282_v44 }
 0x582   :  { %4818 = vpow2.f32 %v1591_v41 }
 0x583   :  { %4820 = vpow2.f32 %v1663_v35 }
 0x584   :  { %4822 = vpow2.f32 %v1665_v26 }
 0x585   :  { %1528 = vadd.xlane.f32.xlu0 %v1527_v48  ;;  %4824 = vpow2.f32 %v1734_v54 }
 0x586   :  { %4826 = vpow2.f32 %v1736_v43 }
 0x587   :  { %v4817_v52 = vpop.eup %4816  ;;  %1599 = vadd.xlane.f32.xlu1 %v1598_v51 }
 0x588   :  { %v5970_v55 = vpop.eup %4818  ;;  %v1286_v59 = vmul.f32 %v4817_v52, %v5905_v45 }
 0x589   :  { %v5974_v32 = vpop.eup %4820  ;;  %v1595_v42 = vsel %vm634_vm3, %v5970_v55, 0.0 }
 0x58a   :  { %v1287_v61 = vpack.c.bf16 %v1286_v59, %v1285_v57  ;;  %v1667_v58 = vsel %vm634_vm3, %v5974_v32, 0.0  ;;  %v5982_v39 = vpop.eup %4822 }
 0x58b   :  { %v5984_v45 = vpop.eup %4824  ;;  %v1670_v25 = vsel %vm634_vm3, %v5982_v39, 0.0 }
 0x58c   :  { %4352 = vmatmul.msk.bf16.vlgmr.msra.gmra.mxu1 %vm634_vm3, %v1287_v61  ;;  %v1738_v46 = vsel %vm634_vm3, %v5984_v45, 0.0  ;;  %v5990_v1 = vpop.eup %4826 }
 0x58d   :  { %1668 = vadd.xlane.f32.xlu0 %v1667_v58  ;;  %1596 = vadd.xlane.f32.xlu2 %v1595_v42  ;;  %v1741_v2 = vsel %vm634_vm3, %v5990_v1, 0.0 }
 0x595   :  { %1671 = vadd.xlane.f32.xlu2 %v1670_v25  ;;  %1739 = vadd.xlane.f32.xlu0 %v1738_v46 }
 0x59d   :  { %1742 = vadd.xlane.f32.xlu2 %v1741_v2 }
 0x5a0   :  { %1749 = vrot.lane.b32.xlu1 %v5938_v12, %s5437_s6 }
 0x5a9   :  { %1678 = vrot.lane.b32.xlu0 %v5938_v12, %s5435_s27 }
 0x5aa   :  { %v1351_v50 = vpop.xlane.xlu2 %1350 }
 0x5af   :  { %v1208_v9 = vpop.xlane.xlu1 %1207 }
 0x5b0   :  { %4828 = vrcp.f32 %v1208_v9 }
 0x5b2   :  { %v1354_v11 = vpop.xlane.xlu0 %1353 }
 0x5b6   :  { %v4829_v14 = vpop.eup %4828 }
 0x5b7   :  { %v1422_v7 = vpop.xlane.xlu2 %1421  ;;  %v1214_v28 = vmul.f32 %v4829_v14, %v5917_v63 }
 0x5bf   :  { %v1211_v13 = vpop.xlane.xlu2 %1210 }
 0x5c0   :  { %4830 = vrcp.f32 %v1211_v13 }
 0x5c1   :  { %4832 = vrcp.f32 %v1354_v11 }
 0x5c2   :  { %4834 = vrcp.f32 %v1351_v50 }
 0x5c3   :  { %4836 = vrcp.f32 %v1422_v7 }
 0x5c5   :  { %v1432_v16 = vpop.permute.xlu0 %1431 }
 0x5c6   :  { %v4831_v17 = vpop.eup %4830  ;;  %1444 = vmatpush.bf16.msrb.mxu1 %v1432_v16 }
 0x5c7   :  { %v1215_v18 = vmul.f32 %v4831_v17, %v5930_v53  ;;  %v1608_v3 = vpop.permute.xlu1 %1607  ;;  %v1361_v30 = vpop.permute.xlu2 %1360 }
 0x5c8   :  { %1373 = vmatpush.bf16.msrb.mxu3 %v1361_v30  ;;  %v4833_v20 = vpop.eup %4832 }
 0x5c9   :  { %v1216_v19 = vpack.c.bf16 %v1215_v18, %v1214_v28  ;;  %v4835_v21 = vpop.eup %4834  ;;  %v1358_v24 = vmul.f32 %v4833_v20, %v5922_v0 }
 0x5ca   :  { %1620 = vmatpush.bf16.msra.mxu1 %v1608_v3  ;;  %v1357_v27 = vmul.f32 %v4835_v21, %v5912_v56  ;;  %v4837_v10 = vpop.eup %4836  ;;  %v4578_v21 = vld [vmem:[#allocation11 + $0x18] sm:$0xff] }
 0x5cb   :  { %4350 = vmatmul.msk.bf16.vlgmr.msra.gmra.mxu3 %vm634_vm3, %v1216_v19  ;;  %v1428_v62 = vmul.f32 %v4837_v10, %v5926_v4  ;;  %1830 = vmatpush.bf16.msrb.mxu2 %v4578_v21  ;;  %v4577_v10 = vld [vmem:[#allocation11 + $0x10] sm:$0xff] }
 0x5cc   :  { %1546 = vmatpush.bf16.msra.mxu3 %v5938_v12  ;;  %v1359_v63 = vpack.c.bf16 %v1358_v24, %v1357_v27  ;;  %v4733_v24 = vld [vmem:[#allocation17] ss:$0 sm:$0xff] }
 0x5cd   :  { %v920_v27 = vadd.f32 %v4733_v24, %v5837_v29 }
 0x5cf   :  { %1831 = vmatpush.bf16.msrb.mxu2 %v4577_v10 }
 0x5db   :  { %4354 = vmatmul.msk.bf16.vlgmr.msrb.gmra.mxu3 %vm634_vm3, %v1359_v63  ;;  %v5028_v63 = vld [vmem:[#allocation2] sm:$0xff] }
 0x5f0   :  { %v1425_v53 = vpop.xlane.xlu0 %1424 }
 0x5f1   :  { %4838 = vrcp.f32 %v1425_v53  ;;  %v6027_v53 = vadd.f32 %v5028_v63, %v920_v27 }
 0x5f2   :  { %v1526_v33 = vpop.xlane.xlu1 %1525 }
 0x5f3   :  { %4840 = vrcp.f32 %v1526_v33  ;;  %v928_v33 = vsel %vm305_vm0, %v6027_v53, 0.0 }
 0x5f7   :  { %v4839_v37 = vpop.eup %4838 }
 0x5f8   :  { %v1429_v12 = vmul.f32 %v4839_v37, %v5950_v34  ;;  %v1529_v60 = vpop.xlane.xlu0 %1528 }
 0x5f9   :  { %4842 = vrcp.f32 %v1529_v60  ;;  %v4841_v56 = vpop.eup %4840 }
 0x5fa   :  { %v1430_v40 = vpack.c.bf16 %v1429_v12, %v1428_v62  ;;  %v1600_v0 = vpop.xlane.xlu1 %1599  ;;  %v1532_v41 = vmul.f32 %v4841_v56, %v5953_v38 }
 0x5fb   :  { %4844 = vrcp.f32 %v1600_v0 }
 0x5fc   :  { %4356 = vmatmul.msk.bf16.vlgmr.msrb.gmra.mxu1 %vm634_vm3, %v1430_v40 }
 0x5ff   :  { %v4843_v5 = vpop.eup %4842 }
 0x600   :  { %v1533_v8 = vmul.f32 %v4843_v5, %v5960_v6  ;;  %v1597_v35 = vpop.xlane.xlu2 %1596  ;;  %v1669_v15 = vpop.xlane.xlu0 %1668 }
 0x601   :  { %4846 = vrcp.f32 %v1597_v35  ;;  %v4845_v4 = vpop.eup %4844 }
 0x602   :  { %v1534_v44 = vpack.c.bf16 %v1533_v8, %v1532_v41  ;;  %v1604_v22 = vmul.f32 %v4845_v4, %v5963_v47 }
 0x604   :  { %4358 = vmatmul.msk.bf16.vlgmr.msra.gmra.mxu3 %vm634_vm3, %v1534_v44 }
 0x607   :  { %v4847_v34 = vpop.eup %4846 }
 0x608   :  { %v1603_v48 = vmul.f32 %v4847_v34, %v5970_v55  ;;  %v1672_v49 = vpop.xlane.xlu2 %1671  ;;  %v1740_v52 = vpop.xlane.xlu0 %1739 }
 0x609   :  { %v1304_v26 = vpop.f32.mrf.mxu1  ;;  %4848 = vrcp.f32 %v1740_v52 }
 0x60a   :  { %v1605_v51 = vpack.c.bf16 %v1604_v22, %v1603_v48  ;;  %4850 = vrcp.f32 %v1672_v49 }
 0x60c   :  { %4360 = vmatmul.msk.bf16.vlgmr.msra.gmra.mxu1 %vm634_vm3, %v1605_v51 }
 0x60f   :  { %v4849_v47 = vpop.eup %4848 }
 0x610   :  { %v1743_v38 = vpop.xlane.xlu2 %1742  ;;  %v4851_v57 = vpop.eup %4850  ;;  %v1746_v61 = vmul.f32 %v4849_v47, %v5984_v45 }
 0x611   :  { %4852 = vrcp.f32 %v1743_v38  ;;  %v1306_v6 = vpop.f32.mrf.mxu1  ;;  %v1676_v58 = vmul.f32 %v4851_v57, %v5982_v39 }
 0x612   :  { %4854 = vrcp.f32 %v1669_v15  ;;  %v1750_v54 = vpop.permute.xlu1 %1749  ;;  %v4649_v23 = vpack.i.bf16 %v1306_v6, %v1304_v26 }
 0x613   :  { %1762 = vmatpush.bf16.msrb.mxu1 %v1750_v54 }
 0x614   :  { %4650 = vrot.lane.b32.xlu2 %v4649_v23, %s5428_s20 }
 0x617   :  { %v4853_v55 = vpop.eup %4852 }
 0x618   :  { %v4855_v59 = vpop.eup %4854  ;;  %v1747_v36 = vmul.f32 %v4853_v55, %v5990_v1 }
 0x619   :  { %v1675_v43 = vmul.f32 %v4855_v59, %v5974_v32 }
 0x61a   :  { %v1748_v42 = vpack.c.bf16 %v1747_v36, %v1746_v61 }
 0x61b   :  { %v1679_v25 = vpop.permute.xlu0 %1678  ;;  %v1677_v46 = vpack.c.bf16 %v1676_v58, %v1675_v43  ;;  %v4736_v58 = vld [vmem:[#allocation17 + $0x1] ss:$0 sm:$0xff] }
 0x61c   :  { %1691 = vmatpush.bf16.msrb.mxu3 %v1679_v25  ;;  %4364 = vmatmul.msk.bf16.vlgmr.msrb.gmra.mxu1 %vm634_vm3, %v1748_v42  ;;  %v5029_v25 = vld [vmem:[%s6958_s2] sm:$0xff] }
 0x61f   :  { %4362 = vmatmul.msk.bf16.vlgmr.msrb.gmra.mxu3 %vm634_vm3, %v1677_v46 }
 0x64e   :  { %v1230_v2 = vpop.f32.mrf.mxu3 }
 0x656   :  { %v1232_v50 = vpop.f32.mrf.mxu3 }
 0x65e   :  { %v1375_v7 = vpop.f32.mrf.mxu3 }
 0x666   :  { %v1377_v9 = vpop.f32.mrf.mxu3 }
 0x667   :  { %v4654_v11 = vpack.i.bf16 %v1377_v9, %v1375_v7 }
 0x669   :  { %4655 = vrot.lane.b32.xlu1 %v4654_v11, %s5417_s25  ;;  %v5030_v11 = vld [vmem:[#allocation2 + $0x8] sm:$0xff] }
 0x66e   :  { %v4651_v62 = vpop.permute.xlu2 %4650 }
 0x66f   :  { %v4653_v12 = vunpack.i.h.bf16 %v4651_v62  ;;  %v4652_v60 = vunpack.i.l.bf16 %v4651_v62 }
 0x671   :  { %v1476_v5 = vsel %vm386_vm1, %v1232_v50, %v4653_v12  ;;  %v1475_v29 = vsel %vm386_vm1, %v1230_v2, %v4652_v60  ;;  %v922_v2 = vadd.f32 %v4733_v24, %v5841_v31 }
 0x679   :  { %v1446_v45 = vpop.f32.mrf.mxu1 }
 0x681   :  { %v1448_v1 = vpop.f32.mrf.mxu1 }
 0x682   :  { %v4659_v39 = vpack.i.bf16 %v1448_v1, %v1446_v45  ;;  %v925_v45 = vadd.f32 %v5030_v11, %v922_v2  ;;  %v5031_v1 = vld [vmem:[%s6958_s2 + $0x8] sm:$0xff] }
 0x684   :  { %4660 = vrot.lane.b32.xlu1 %v4659_v39, %s5438_s12 }
 0x687   :  { %v1548_v13 = vpop.f32.mrf.mxu3 }
 0x689   :  { %v1622_v32 = vpop.f32.mrf.mxu1 }
 0x68f   :  { %v1550_v28 = vpop.f32.mrf.mxu3 }
 0x691   :  { %v1624_v14 = vpop.f32.mrf.mxu1 }
 0x692   :  { %v4664_v16 = vpack.i.bf16 %v1624_v14, %v1622_v32  ;;  %v5439_v14 = vmov 32.0  }
 0x693   :  { %4856 = vrcp.f32 %v5439_v14 }
 0x694   :  { %4665 = vrot.lane.b32.xlu0 %v4664_v16, %s5428_s20 }
 0x699   :  { %v1764_v17 = vpop.f32.mrf.mxu1  ;;  %v4857_v31 = vpop.eup %4856 }
 0x69a   :  { %v935_v16 = vmul.f32 32.0, %v4857_v31  ;;  %vm939_vm5 = vweird.f32 %v4857_v31 }
 0x6a1   :  { %v1766_v18 = vpop.f32.mrf.mxu1 }
 0x6a2   :  { %v4674_v3 = vpack.i.bf16 %v1766_v18, %v1764_v17  ;;  %v1693_v30 = vpop.f32.mrf.mxu3  ;;  %v936_v17 = vsub.f32 1.0, %v935_v16 }
 0x6a4   :  { %4675 = vrot.lane.b32.xlu2 %v4674_v3, %s5438_s12 }
 0x6aa   :  { %v1695_v19 = vpop.f32.mrf.mxu3 }
 0x6ab   :  { %v4669_v20 = vpack.i.bf16 %v1695_v19, %v1693_v30  ;;  %v5032_v19 = vld [vmem:[%s6958_s2 + $0x10] sm:$0xff] }
 0x6ad   :  { %4670 = vrot.lane.b32.xlu1 %v4669_v20, %s5417_s25 }
 0x6cd   :  { %929 = vadd.xlane.f32.xlu2 %v928_v33 }
 0x6db   :  { %v4656_v37 = vpop.permute.xlu1 %4655 }
 0x6dc   :  { %v4658_v40 = vunpack.i.h.bf16 %v4656_v37  ;;  %v4657_v0 = vunpack.i.l.bf16 %v4656_v37  ;;  %v5033_v37 = vld [vmem:[%s6958_s2 + $0x18] sm:$0xff] }
 0x6de   :  { %v1478_v35 = vsel %vm634_vm3, %v1476_v5, %v4658_v40  ;;  %v1477_v44 = vsel %vm634_vm3, %v1475_v29, %v4657_v0 }
 0x6f6   :  { %v4661_v56 = vpop.permute.xlu1 %4660 }
 0x6f7   :  { %v4663_v41 = vunpack.i.h.bf16 %v4661_v56  ;;  %v4662_v8 = vunpack.i.l.bf16 %v4661_v56 }
 0x6f9   :  { %v1480_v15 = vsel %vm636_vm4, %v1478_v35, %v4663_v41  ;;  %v1479_v4 = vsel %vm636_vm4, %v1477_v44, %v4662_v8 }
 0x6fa   :  { %v1799_v34 = vpack.c.bf16 %v1480_v15, %v1479_v4 }
 0x6fc   :  { %4373 = vmatmul.msk.bf16.vlgmr.msrb.gmra.mxu2 %vm305_vm0, %v1799_v34 }
 0x6fe   :  { %v4676_v26 = vpop.permute.xlu2 %4675 }
 0x6ff   :  { %v4678_v6 = vunpack.i.h.bf16 %v4676_v26  ;;  %v4677_v54 = vunpack.i.l.bf16 %v4676_v26 }
 0x706   :  { %v4666_v22 = vpop.permute.xlu0 %4665 }
 0x707   :  { %v4668_v48 = vunpack.i.h.bf16 %v4666_v22  ;;  %v4667_v49 = vunpack.i.l.bf16 %v4666_v22 }
 0x709   :  { %v1794_v23 = vsel %vm386_vm1, %v1550_v28, %v4668_v48  ;;  %v1793_v47 = vsel %vm386_vm1, %v1548_v13, %v4667_v49  ;;  %v931_v13 = vsel %vm305_vm0, %v925_v45, 0.0  ;;  %v937_v28 = vmul.f32 %v4857_v31, %v936_v17 }
 0x70b   :  { %v938_v30 = vadd.f32 %v4857_v31, %v937_v28 }
 0x70d   :  { %v6059_v24 = vsel %vm939_vm5, %v4857_v31, %v938_v30 }
 0x71f   :  { %v4671_v51 = vpop.permute.xlu1 %4670 }
 0x720   :  { %v4673_v52 = vunpack.i.h.bf16 %v4671_v51  ;;  %v4672_v38 = vunpack.i.l.bf16 %v4671_v51 }
 0x722   :  { %v1795_v57 = vsel %vm634_vm3, %v1793_v47, %v4672_v38  ;;  %v1796_v55 = vsel %vm634_vm3, %v1794_v23, %v4673_v52 }
 0x723   :  { %v1797_v59 = vsel %vm636_vm4, %v1795_v57, %v4677_v54  ;;  %v1798_v61 = vsel %vm636_vm4, %v1796_v55, %v4678_v6 }
 0x724   :  { %v1800_v36 = vpack.c.bf16 %v1798_v61, %v1797_v59  ;;  %v5440_v61 = vmov 31.0  }
 0x725   :  { %4858 = vrcp.f32 %v5440_v61 }
 0x726   :  { %4374 = vmatmul.msk.bf16.gmra.mxu2 %vm305_vm0, %v1800_v36 }
 0x72b   :  { %v4859_v36 = vpop.eup %4858 }
 0x72c   :  { %vm958_vm6 = vweird.f32 %v4859_v36 }
 0x740   :  { %v930_v27 = vpop.xlane.xlu2 %929 }
 0x741   :  { %v941_v33 = vmul.f32 %v6059_v24, %v930_v27 }
 0x743   :  { %v6066_v12 = vsub.f32 %v6027_v53, %v941_v33 }
 0x745   :  { %v945_v40 = vmul.f32 %v6066_v12, %v6066_v12 }
 0x747   :  { %v947_v0 = vsel %vm305_vm0, %v945_v40, 0.0  ;;  %v4580_v40 = vld [vmem:[%s6934_s4 + $0x28] sm:$0xff] }
 0x748   :  { %2064 = vmatpush.bf16.msra.mxu3 %v4580_v40 }
 0x77f   :  { %v1833_v42 = vpop.f32.mrf.mxu2 }
 0x780   :  { %v1834_v43 = vadd.f32 %v4736_v58, %v1833_v42 }
 0x782   :  { %v1843_v46 = vadd.f32 %v5029_v25, %v1834_v43 }
 0x784   :  { %v1851_v50 = vsel %vm305_vm0, %v1843_v46, 0.0 }
 0x785   :  { %1852 = vadd.xlane.f32.xlu0 %v1851_v50 }
 0x787   :  { %v1835_v7 = vpop.f32.mrf.mxu2 }
 0x788   :  { %v1836_v9 = vadd.f32 %v4736_v58, %v1835_v7 }
 0x78a   :  { %v1844_v39 = vadd.f32 %v5031_v1, %v1836_v9 }
 0x78c   :  { %v1854_v32 = vsel %vm305_vm0, %v1844_v39, 0.0 }
 0x78d   :  { %1855 = vadd.xlane.f32.xlu1 %v1854_v32  ;;  %932 = vadd.xlane.f32.xlu0 %v931_v13 }
 0x7a9   :  { %v1838_v18 = vpop.f32.mrf.mxu2 }
 0x7aa   :  { %v1839_v3 = vadd.f32 %v4736_v58, %v1838_v18 }
 0x7ac   :  { %v1845_v20 = vadd.f32 %v5032_v19, %v1839_v3 }
 0x7ae   :  { %v1857_v21 = vsel %vm305_vm0, %v1845_v20, 0.0 }
 0x7af   :  { %1858 = vadd.xlane.f32.xlu2 %v1857_v21 }
 0x7b1   :  { %v1840_v63 = vpop.f32.mrf.mxu2 }
 0x7b2   :  { %v1841_v10 = vadd.f32 %v4736_v58, %v1840_v63  ;;  %v954_v58 = vmul.f32 31.0, %v4859_v36 }
 0x7b4   :  { %v1846_v62 = vadd.f32 %v5033_v37, %v1841_v10  ;;  %v955_v42 = vsub.f32 1.0, %v954_v58 }
 0x7b6   :  { %v1860_v60 = vsel %vm305_vm0, %v1846_v62, 0.0  ;;  %v956_v43 = vmul.f32 %v4859_v36, %v955_v42 }
 0x7b7   :  { %1861 = vadd.xlane.f32.xlu1 %v1860_v60 }
 0x7b8   :  { %v957_v25 = vadd.f32 %v4859_v36, %v956_v43 }
 0x7bf   :  { %948 = vadd.xlane.f32.xlu1 %v947_v0  ;;  %v4582_v0 = vld [vmem:[#allocation8 + $0x28] sm:$0xff] }
 0x7c0   :  { %2103 = vmatpush.bf16.msra.mxu0 %v4582_v0 }
 0x7f8   :  { %v1853_v56 = vpop.xlane.xlu0 %1852 }
 0x7f9   :  { %v1863_v5 = vmul.f32 %v1853_v56, %v6059_v24  ;;  %v4584_v56 = vld [vmem:[#allocation10 + $0x28] sm:$0xff] }
 0x7fa   :  { %2139 = vmatpush.bf16.msra.mxu1 %v4584_v56 }
 0x7fb   :  { %v6073_v29 = vsub.f32 %v1843_v46, %v1863_v5  ;;  %v6102_v46 = vsel %vm958_vm6, %v4859_v36, %v957_v25 }
 0x7fd   :  { %v1871_v41 = vmul.f32 %v6073_v29, %v6073_v29 }
 0x7ff   :  { %v1875_v53 = vsel %vm305_vm0, %v1871_v41, 0.0 }
 0x800   :  { %v1856_v8 = vpop.xlane.xlu1 %1855  ;;  %1876 = vadd.xlane.f32.xlu0 %v1875_v53  ;;  %v933_v35 = vpop.xlane.xlu0 %932 }
 0x801   :  { %v1864_v44 = vmul.f32 %v1856_v8, %v6059_v24  ;;  %v942_v15 = vmul.f32 %v6059_v24, %v933_v35 }
 0x803   :  { %v6080_v4 = vsub.f32 %v1844_v39, %v1864_v44  ;;  %v6082_v34 = vsub.f32 %v925_v45, %v942_v15 }
 0x805   :  { %v946_v22 = vmul.f32 %v6082_v34, %v6082_v34  ;;  %v1872_v48 = vmul.f32 %v6080_v4, %v6080_v4 }
 0x807   :  { %v950_v49 = vsel %vm305_vm0, %v946_v22, 0.0  ;;  %v1878_v26 = vsel %vm305_vm0, %v1872_v48, 0.0  ;;  %v4579_v48 = vld [vmem:[%s6934_s4 + $0x20] sm:$0xff] }
 0x808   :  { %951 = vadd.xlane.f32.xlu0 %v950_v49  ;;  %1879 = vadd.xlane.f32.xlu2 %v1878_v26  ;;  %v4581_v49 = vld [vmem:[#allocation8 + $0x20] sm:$0xff] }
 0x809   :  { %v4583_v26 = vld [vmem:[#allocation10 + $0x20] sm:$0xff]  ;;  %2065 = vmatpush.bf16.msra.mxu3 %v4579_v48  ;;  %2104 = vmatpush.bf16.msra.mxu0 %v4581_v49 }
 0x80a   :  { %2140 = vmatpush.bf16.msra.mxu1 %v4583_v26 }
 0x822   :  { %v1859_v51 = vpop.xlane.xlu2 %1858 }
 0x823   :  { %v1865_v52 = vmul.f32 %v1859_v51, %v6059_v24 }
 0x825   :  { %v6091_v38 = vsub.f32 %v1845_v20, %v1865_v52 }
 0x827   :  { %v1873_v6 = vmul.f32 %v6091_v38, %v6091_v38 }
 0x829   :  { %v1881_v54 = vsel %vm305_vm0, %v1873_v6, 0.0 }
 0x82a   :  { %v1862_v23 = vpop.xlane.xlu1 %1861  ;;  %1882 = vadd.xlane.f32.xlu2 %v1881_v54 }
 0x82b   :  { %v1866_v47 = vmul.f32 %v1862_v23, %v6059_v24 }
 0x82d   :  { %v6097_v57 = vsub.f32 %v1846_v62, %v1866_v47 }
 0x82f   :  { %v1874_v55 = vmul.f32 %v6097_v57, %v6097_v57 }
 0x831   :  { %v1884_v59 = vsel %vm305_vm0, %v1874_v55, 0.0 }
 0x832   :  { %1885 = vadd.xlane.f32.xlu1 %v1884_v59  ;;  %v949_v2 = vpop.xlane.xlu1 %948 }
 0x833   :  { %v960_v50 = vmul.f32 %v6102_v46, %v949_v2 }
 0x835   :  { %4860 = vrsqrt.f32 %v960_v50  ;;  %vm974_vm7 = vcmp.eq.f32.partialorder %v960_v50, inf  ;;  %v977_v16 = vand.u32 2147483648, %v960_v50  ;;  %vm976_vm8 = vcmp.eq.f32.partialorder %v960_v50, 0.0 }
 0x83b   :  { %v4861_v7 = vpop.eup %4860 }
 0x83c   :  { %v968_v9 = vmul.f32 %v4861_v7, %v960_v50 }
 0x83e   :  { %v969_v11 = vmul.f32 %v4861_v7, %v968_v9 }
 0x840   :  { %v970_v45 = vmul.f32 0.5, %v969_v11 }
 0x842   :  { %v971_v1 = vsub.f32 1.5, %v970_v45 }
 0x844   :  { %v972_v39 = vmul.f32 %v4861_v7, %v971_v1 }
 0x846   :  { %v973_v13 = vmul.f32 %v972_v39, %v960_v50 }
 0x848   :  { %v975_v31 = vsel %vm974_vm7, %v960_v50, %v973_v13 }
 0x849   :  { %v978_v17 = vsel %vm976_vm8, %v977_v16, %v975_v31  ;;  %v4735_v16 = vld [vmem:[%s6946_s16] ss:$0 sm:$0xff] }
 0x84a   :  { %v6108_v21 = vadd.f32 1e-06, %v978_v17 }
 0x84c   :  { %vm998_vm5 = vweird.f32 %v6108_v21  ;;  %v1002_v17 = vand.u32 2147483647, %v6108_v21 }
 0x84e   :  { %vm1003_vm8 = vcmp.eq.f32.partialorder %v1002_v17, 8.507059e+37 }
 0x873   :  { %v1877_v32 = vpop.xlane.xlu0 %1876 }
 0x874   :  { %v1887_v14 = vmul.f32 %v1877_v32, %v6102_v46 }
 0x876   :  { %4862 = vrsqrt.f32 %v1887_v14  ;;  %vm1905_vm9 = vcmp.eq.f32.partialorder %v1887_v14, inf  ;;  %v1908_v35 = vand.u32 2147483648, %v1887_v14  ;;  %vm1907_vm10 = vcmp.eq.f32.partialorder %v1887_v14, 0.0 }
 0x87b   :  { %v952_v28 = vpop.xlane.xlu0 %951  ;;  %v1880_v18 = vpop.xlane.xlu2 %1879 }
 0x87c   :  { %v4863_v3 = vpop.eup %4862  ;;  %v961_v30 = vmul.f32 %v6102_v46, %v952_v28  ;;  %v1888_v19 = vmul.f32 %v1880_v18, %v6102_v46 }
 0x87d   :  { %v1899_v20 = vmul.f32 %v4863_v3, %v1887_v14 }
 0x87e   :  { %4864 = vrsqrt.f32 %v961_v30  ;;  %vm986_vm11 = vcmp.eq.f32.partialorder %v961_v30, inf  ;;  %v989_v58 = vand.u32 2147483648, %v961_v30  ;;  %vm988_vm12 = vcmp.eq.f32.partialorder %v961_v30, 0.0 }
 0x87f   :  { %v1900_v27 = vmul.f32 %v4863_v3, %v1899_v20  ;;  %4866 = vrsqrt.f32 %v1888_v19  ;;  %vm1917_vm13 = vcmp.eq.f32.partialorder %v1888_v19, inf  ;;  %v1920_v25 = vand.u32 2147483648, %v1888_v19 }
 0x880   :  { %4868 = vrcp.f32 %v6108_v21  ;;  %vm1919_vm14 = vcmp.eq.f32.partialorder %v1888_v19, 0.0 }
 0x881   :  { %v1901_v63 = vmul.f32 0.5, %v1900_v27 }
 0x883   :  { %v1902_v33 = vsub.f32 1.5, %v1901_v63 }
 0x884   :  { %v4865_v10 = vpop.eup %4864 }
 0x885   :  { %v4867_v37 = vpop.eup %4866  ;;  %v1903_v62 = vmul.f32 %v4863_v3, %v1902_v33  ;;  %v980_v60 = vmul.f32 %v4865_v10, %v961_v30 }
 0x886   :  { %v1911_v5 = vmul.f32 %v4867_v37, %v1888_v19  ;;  %v6114_v8 = vpop.eup %4868 }
 0x887   :  { %v1904_v41 = vmul.f32 %v1903_v62, %v1887_v14  ;;  %v981_v53 = vmul.f32 %v4865_v10, %v980_v60  ;;  %v994_v23 = vmul.f32 %v6114_v8, %v6108_v21  ;;  %vm999_vm15 = vweird.f32 %v6114_v8  ;;  %v6145_v62 = vld [vmem:[%s6946_s16 + $0x1] ss:$0 sm:$0xff] }
 0x888   :  { %v1912_v44 = vmul.f32 %v4867_v37, %v1911_v5  ;;  %vm6133_vm6 = vmor %vm998_vm5, %vm999_vm15  ;;  %v1894_v49 = vmul.f32 %v6145_v62, %v6073_v29  ;;  %v1895_v26 = vmul.f32 %v6145_v62, %v6080_v4  ;;  %v4738_v4 = vld [vmem:[%s6947_s17] ss:$0 sm:$0xff] }
 0x889   :  { %v1906_v15 = vsel %vm1905_vm9, %v1887_v14, %v1904_v41  ;;  %v982_v22 = vmul.f32 0.5, %v981_v53  ;;  %v995_v36 = vsub.f32 1.0, %v994_v23  ;;  %v1004_v14 = vand.u32 2147483648, %v6108_v21 }
 0x88a   :  { %v1909_v51 = vsel %vm1907_vm10, %v1908_v35, %v1906_v15  ;;  %v1913_v52 = vmul.f32 0.5, %v1912_v44 }
 0x88b   :  { %v1946_v6 = vadd.f32 1e-06, %v1909_v51  ;;  %v983_v54 = vsub.f32 1.5, %v982_v22  ;;  %v996_v45 = vmul.f32 %v6114_v8, %v995_v36  ;;  %v1005_v63 = vor.u32 1.1754944e-38, %v1004_v14 }
 0x88c   :  { %v1914_v47 = vsub.f32 1.5, %v1913_v52  ;;  %v966_v52 = vmul.f32 %v4735_v16, %v6082_v34 }
 0x88d   :  { %4870 = vrcp.f32 %v1946_v6  ;;  %v984_v55 = vmul.f32 %v4865_v10, %v983_v54  ;;  %v997_v13 = vadd.f32 %v6114_v8, %v996_v45  ;;  %v1959_v18 = vand.u32 2147483647, %v1946_v6 }
 0x88e   :  { %v1915_v59 = vmul.f32 %v4867_v37, %v1914_v47  ;;  %v1961_v20 = vand.u32 2147483648, %v1946_v6  ;;  %v965_v10 = vmul.f32 %v4735_v16, %v6066_v12  ;;  %vm1955_vm9 = vweird.f32 %v1946_v6 }
 0x88f   :  { %v985_v61 = vmul.f32 %v984_v55, %v961_v30 }
 0x890   :  { %v1916_v42 = vmul.f32 %v1915_v59, %v1888_v19  ;;  %v1962_v53 = vor.u32 1.1754944e-38, %v1961_v20 }
 0x891   :  { %v987_v43 = vsel %vm986_vm11, %v961_v30, %v985_v61  ;;  %v1001_v30 = vsel %vm6133_vm6, %v6114_v8, %v997_v13  ;;  %vm6154_vm11 = vcmp.eq.f32.partialorder %v1959_v18, 8.507059e+37 }
 0x892   :  { %v990_v2 = vsel %vm988_vm12, %v989_v58, %v987_v43  ;;  %v1918_v50 = vsel %vm1917_vm13, %v1888_v19, %v1916_v42  ;;  %v1006_v40 = vsel %vm1003_vm8, %v1005_v63, %v1001_v30  ;;  %v6184_v58 = vld [vmem:[%s6947_s17 + $0x1] ss:$0 sm:$0xff] }
 0x893   :  { %v4871_v7 = vpop.eup %4870  ;;  %v992_v9 = vadd.f32 1e-06, %v990_v2  ;;  %v1921_v11 = vsel %vm1919_vm14, %v1920_v25, %v1918_v50  ;;  %v1007_v47 = vmul.f32 %v1006_v40, %v965_v10 }
 0x894   :  { %v6122_v1 = vadd.f32 1e-06, %v1921_v11  ;;  %v1951_v39 = vmul.f32 %v4871_v7, %v1946_v6  ;;  %vm1956_vm7 = vweird.f32 %v4871_v7 }
 0x895   :  { %4872 = vrcp.f32 %v992_v9  ;;  %vm6150_vm10 = vmor %vm1955_vm9, %vm1956_vm7  ;;  %v1017_v5 = vand.u32 2147483647, %v992_v9  ;;  %v1019_v35 = vand.u32 2147483648, %v992_v9  ;;  %vm1013_vm14 = vweird.f32 %v992_v9 }
 0x896   :  { %4874 = vrcp.f32 %v6122_v1  ;;  %v1952_v32 = vsub.f32 1.0, %v1951_v39  ;;  %v1976_v44 = vand.u32 2147483648, %v6122_v1  ;;  %v1974_v48 = vand.u32 2147483647, %v6122_v1 }
 0x897   :  { %vm1970_vm5 = vweird.f32 %v6122_v1  ;;  %vm1018_vm6 = vcmp.eq.f32.partialorder %v1017_v5, 8.507059e+37  ;;  %v1020_v29 = vor.u32 1.1754944e-38, %v1019_v35  ;;  %v6188_v11 = vadd.f32 %v4738_v4, %v1007_v47 }
 0x898   :  { %v1953_v31 = vmul.f32 %v4871_v7, %v1952_v32  ;;  %v1977_v55 = vor.u32 1.1754944e-38, %v1976_v44  ;;  %vm1975_vm8 = vcmp.eq.f32.partialorder %v1974_v48, 8.507059e+37 }
 0x89a   :  { %v1954_v19 = vadd.f32 %v4871_v7, %v1953_v31 }
 0x89b   :  { %v4873_v3 = vpop.eup %4872 }
 0x89c   :  { %v4875_v27 = vpop.eup %4874  ;;  %v1009_v33 = vmul.f32 %v4873_v3, %v992_v9  ;;  %v1958_v41 = vsel %vm6150_vm10, %v4871_v7, %v1954_v19  ;;  %vm1014_vm12 = vweird.f32 %v4873_v3 }
 0x89d   :  { %v1883_v37 = vpop.xlane.xlu2 %1882  ;;  %v1966_v21 = vmul.f32 %v4875_v27, %v6122_v1  ;;  %vm1971_vm13 = vweird.f32 %v4875_v27  ;;  %v1963_v51 = vsel %vm6154_vm11, %v1962_v53, %v1958_v41  ;;  %vm6170_vm15 = vmor %vm1013_vm14, %vm1014_vm12 }
 0x89e   :  { %v6148_v60 = vmul.f32 %v1883_v37, %v6102_v46  ;;  %v1010_v0 = vsub.f32 1.0, %v1009_v33  ;;  %vm1972_vm7 = vmor %vm1970_vm5, %vm1971_vm13  ;;  %v1964_v61 = vmul.f32 %v1963_v51, %v1894_v49 }
 0x89f   :  { %v1967_v8 = vsub.f32 1.0, %v1966_v21 }
 0x8a0   :  { %4876 = vrsqrt.f32 %v6148_v60  ;;  %v1011_v15 = vmul.f32 %v4873_v3, %v1010_v0  ;;  %v6193_v39 = vadd.f32 %v6184_v58, %v1964_v61  ;;  %vm1929_vm9 = vcmp.eq.f32.partialorder %v6148_v60, inf }
 0x8a1   :  { %v1968_v22 = vmul.f32 %v4875_v27, %v1967_v8  ;;  %v1932_v19 = vand.u32 2147483648, %v6148_v60  ;;  %vm1931_vm10 = vcmp.eq.f32.partialorder %v6148_v60, 0.0 }
 0x8a2   :  { %v1012_v6 = vadd.f32 %v4873_v3, %v1011_v15 }
 0x8a3   :  { %v1969_v23 = vadd.f32 %v4875_v27, %v1968_v22 }
 0x8a4   :  { %v1016_v34 = vsel %vm6170_vm15, %v4873_v3, %v1012_v6 }
 0x8a5   :  { %v1886_v59 = vpop.xlane.xlu1 %1885  ;;  %v1973_v36 = vsel %vm1972_vm7, %v4875_v27, %v1969_v23  ;;  %v1021_v25 = vsel %vm1018_vm6, %v1020_v29, %v1016_v34  ;;  %v1896_v23 = vmul.f32 %v6145_v62, %v6091_v38 }
 0x8a6   :  { %v4877_v42 = vpop.eup %4876  ;;  %v1890_v43 = vmul.f32 %v1886_v59, %v6102_v46  ;;  %v1978_v2 = vsel %vm1975_vm8, %v1977_v55, %v1973_v36  ;;  %v1022_v7 = vmul.f32 %v1021_v25, %v966_v52  ;;  %v4740_v25 = vld [vmem:[#allocation14 + $0x2] ss:$0 sm:$0xff] }
 0x8a7   :  { %v1923_v50 = vmul.f32 %v4877_v42, %v6148_v60  ;;  %v1979_v9 = vmul.f32 %v1978_v2, %v1895_v26  ;;  %v4741_v2 = vld [vmem:[#allocation16 + $0x2] ss:$0 sm:$0xff] }
 0x8a8   :  { %4878 = vrsqrt.f32 %v1890_v43  ;;  %v6190_v1 = vadd.f32 %v4738_v4, %v1022_v7  ;;  %vm1941_vm11 = vcmp.eq.f32.partialorder %v1890_v43, inf  ;;  %v1944_v40 = vand.u32 2147483648, %v1890_v43 }
 0x8a9   :  { %v1924_v45 = vmul.f32 %v4877_v42, %v1923_v50  ;;  %v6196_v32 = vadd.f32 %v6184_v58, %v1979_v9  ;;  %vm1943_vm12 = vcmp.eq.f32.partialorder %v1890_v43, 0.0  ;;  %v1897_v4 = vmul.f32 %v6145_v62, %v6097_v57 }
 0x8aa   :  { %v6200_v14 = vpack.c.bf16 %v6190_v1, %v6188_v11 }
 0x8ab   :  { %v1925_v13 = vmul.f32 0.5, %v1924_v45  ;;  %v6204_v31 = vpack.c.bf16 %v6196_v32, %v6193_v39 }
 0x8ac   :  { %4389 = vmatmul.msk.bf16.vlgmr.msra.gmra.mxu3 %vm305_vm0, %v6200_v14 }
 0x8ad   :  { %v1926_v16 = vsub.f32 1.5, %v1925_v13  ;;  %4398 = vmatmul.msk.bf16.vlgmr.msra.gmra.mxu0 %vm305_vm0, %v6204_v31  ;;  %4408 = vmatmul.msk.bf16.vlgmr.msra.gmra.mxu1 %vm305_vm0, %v6204_v31 }
 0x8ae   :  { %v4879_v17 = vpop.eup %4878 }
 0x8af   :  { %v1927_v28 = vmul.f32 %v4877_v42, %v1926_v16  ;;  %v1935_v18 = vmul.f32 %v4879_v17, %v1890_v43 }
 0x8b1   :  { %v1928_v3 = vmul.f32 %v1927_v28, %v6148_v60  ;;  %v1936_v30 = vmul.f32 %v4879_v17, %v1935_v18 }
 0x8b3   :  { %v1930_v20 = vsel %vm1929_vm9, %v6148_v60, %v1928_v3  ;;  %v1937_v27 = vmul.f32 0.5, %v1936_v30 }
 0x8b4   :  { %v1933_v63 = vsel %vm1931_vm10, %v1932_v19, %v1930_v20 }
 0x8b5   :  { %v1948_v33 = vadd.f32 1e-06, %v1933_v63  ;;  %v1938_v10 = vsub.f32 1.5, %v1937_v27 }
 0x8b7   :  { %4880 = vrcp.f32 %v1948_v33  ;;  %v1939_v37 = vmul.f32 %v4879_v17, %v1938_v10  ;;  %v1991_v44 = vand.u32 2147483648, %v1948_v33  ;;  %vm1985_vm14 = vweird.f32 %v1948_v33 }
 0x8b8   :  { %v1989_v15 = vand.u32 2147483647, %v1948_v33 }
 0x8b9   :  { %v1940_v21 = vmul.f32 %v1939_v37, %v1890_v43  ;;  %v1992_v26 = vor.u32 1.1754944e-38, %v1991_v44 }
 0x8ba   :  { %vm1990_vm5 = vcmp.eq.f32.partialorder %v1989_v15, 8.507059e+37 }
 0x8bb   :  { %v1942_v0 = vsel %vm1941_vm11, %v1890_v43, %v1940_v21  ;;  %v4742_v43 = vld [vmem:[#allocation13 + $0x2] ss:$0 sm:$0xff] }
 0x8bc   :  { %v1945_v56 = vsel %vm1943_vm12, %v1944_v40, %v1942_v0 }
 0x8bd   :  { %v4881_v12 = vpop.eup %4880  ;;  %v1949_v5 = vadd.f32 1e-06, %v1945_v56 }
 0x8be   :  { %v1981_v41 = vmul.f32 %v4881_v12, %v1948_v33  ;;  %vm1986_vm13 = vweird.f32 %v4881_v12 }
 0x8bf   :  { %4882 = vrcp.f32 %v1949_v5  ;;  %vm1987_vm15 = vmor %vm1985_vm14, %vm1986_vm13  ;;  %v2006_v51 = vand.u32 2147483648, %v1949_v5  ;;  %v2004_v6 = vand.u32 2147483647, %v1949_v5  ;;  %vm2000_vm7 = vweird.f32 %v1949_v5 }
 0x8c0   :  { %v1982_v53 = vsub.f32 1.0, %v1981_v41 }
 0x8c1   :  { %v2007_v29 = vor.u32 1.1754944e-38, %v2006_v51  ;;  %vm2005_vm9 = vcmp.eq.f32.partialorder %v2004_v6, 8.507059e+37 }
 0x8c2   :  { %v1983_v8 = vmul.f32 %v4881_v12, %v1982_v53 }
 0x8c4   :  { %v1984_v35 = vadd.f32 %v4881_v12, %v1983_v8 }
 0x8c5   :  { %v4883_v60 = vpop.eup %4882 }
 0x8c6   :  { %v1996_v22 = vmul.f32 %v4883_v60, %v1949_v5  ;;  %v1988_v48 = vsel %vm1987_vm15, %v4881_v12, %v1984_v35  ;;  %vm2001_vm6 = vweird.f32 %v4883_v60 }
 0x8c7   :  { %v1993_v54 = vsel %vm1990_vm5, %v1992_v26, %v1988_v48  ;;  %vm2002_vm8 = vmor %vm2000_vm7, %vm2001_vm6 }
 0x8c8   :  { %v1997_v49 = vsub.f32 1.0, %v1996_v22  ;;  %v1994_v55 = vmul.f32 %v1993_v54, %v1896_v23 }
 0x8ca   :  { %v1998_v52 = vmul.f32 %v4883_v60, %v1997_v49  ;;  %v6222_v36 = vadd.f32 %v6184_v58, %v1994_v55 }
 0x8cc   :  { %v1999_v47 = vadd.f32 %v4883_v60, %v1998_v52  ;;  %v5034_v52 = vld [vmem:[#allocation7] ss:$0 sm:$0xff] }
 0x8ce   :  { %v2003_v59 = vsel %vm2002_vm8, %v4883_v60, %v1999_v47 }
 0x8cf   :  { %v2008_v34 = vsel %vm2005_vm9, %v2007_v29, %v2003_v59 }
 0x8d0   :  { %v2009_v61 = vmul.f32 %v2008_v34, %v1897_v4  ;;  %v4590_v34 = vld [vmem:[#allocation8 + $0x38] sm:$0xff] }
 0x8d2   :  { %v6225_v42 = vadd.f32 %v6184_v58, %v2009_v61 }
 0x8d4   :  { %v6229_v38 = vpack.c.bf16 %v6225_v42, %v6222_v36 }
 0x8d6   :  { %4399 = vmatmul.msk.bf16.gmra.mxu0 %vm305_vm0, %v6229_v38  ;;  %4409 = vmatmul.msk.bf16.gmra.mxu1 %vm305_vm0, %v6229_v38 }
 0x92a   :  { %v2106_v57 = vpop.f32.mrf.mxu0  ;;  %v2142_v62 = vpop.f32.mrf.mxu1 }
 0x92b   :  { %v2107_v58 = vadd.f32 %v4740_v25, %v2106_v57  ;;  %v2143_v17 = vadd.f32 %v4741_v2, %v2142_v62 }
 0x92f   :  { %v2067_v50 = vpop.f32.mrf.mxu3 }
 0x930   :  { %v2068_v7 = vadd.f32 %v4742_v43, %v2067_v50 }
 0x932   :  { %v2108_v9 = vpop.f32.mrf.mxu0  ;;  %v2152_v45 = vpack.c.bf16 %v2068_v7, %v2068_v7  ;;  %v2144_v16 = vpop.f32.mrf.mxu1 }
 0x933   :  { %v2109_v13 = vadd.f32 %v4740_v25, %v2108_v9  ;;  %v2145_v28 = vadd.f32 %v4741_v2, %v2144_v16 }
 0x934   :  { %2205 = vrot.lane.b32.xlu2 %v2152_v45, %s5436_s24 }
 0x935   :  { %v2153_v18 = vpack.c.bf16 %v2109_v13, %v2107_v58  ;;  %v6236_v3 = vpack.c.bf16 %v2145_v28, %v2143_v17 }
 0x937   :  { %2265 = vrot.lane.b32.xlu1 %v2153_v18, %s5435_s27  ;;  %2208 = vrot.lane.b32.xlu0 %v2153_v18, %s5436_s24  ;;  %v2158_v30 = vsel %vm386_vm1, %v2153_v18, 0  ;;  %v2069_v19 = vpop.f32.mrf.mxu3 }
 0x938   :  { %2198 = vmatpush.bf16.msra.mxu2 %v6236_v3  ;;  %2167 = vmatpush.bf16.xpose.msrb.mxu3 %v2158_v30  ;;  %v2070_v20 = vadd.f32 %v4742_v43, %v2069_v19  ;;  %v4589_v43 = vld [vmem:[#allocation8 + $0x30] sm:$0xff] }
 0x93a   :  { %v2390_v27 = vpack.c.bf16 %v2070_v20, %v2070_v20 }
 0x93c   :  { %2263 = vrot.lane.b32.xlu2 %v2152_v45, %s5435_s27 }
 0x93f   :  { %2321 = vrot.lane.b32.xlu0 %v2153_v18, %s5437_s6  ;;  %4410 = vmatmul.msk.bf16.vlgmr.msrb.gmra.mxu3 %vm386_vm1, %v2152_v45 }
 0x944   :  { %2443 = vrot.lane.b32.xlu2 %v2390_v27, %s5436_s24 }
 0x947   :  { %2319 = vrot.lane.b32.xlu0 %v2152_v45, %s5437_s6 }
 0x94c   :  { %2501 = vrot.lane.b32.xlu2 %v2390_v27, %s5435_s27 }
 0x953   :  { %v2111_v63 = vpop.f32.mrf.mxu0  ;;  %v2147_v33 = vpop.f32.mrf.mxu1 }
 0x954   :  { %v2148_v10 = vadd.f32 %v4741_v2, %v2147_v33  ;;  %v2112_v40 = vadd.f32 %v4740_v25, %v2111_v63  ;;  %v5035_v63 = vld [vmem:[#allocation7 + $0x1] ss:$0 sm:$0xff] }
 0x95b   :  { %v2113_v37 = vpop.f32.mrf.mxu0  ;;  %v2149_v21 = vpop.f32.mrf.mxu1 }
 0x95c   :  { %v2114_v0 = vadd.f32 %v4740_v25, %v2113_v37  ;;  %v2150_v56 = vadd.f32 %v4741_v2, %v2149_v21 }
 0x95e   :  { %v2391_v12 = vpack.c.bf16 %v2114_v0, %v2112_v40  ;;  %v6248_v5 = vpack.c.bf16 %v2150_v56, %v2148_v10 }
 0x960   :  { %2503 = vrot.lane.b32.xlu0 %v2391_v12, %s5435_s27  ;;  %2446 = vrot.lane.b32.xlu1 %v2391_v12, %s5436_s24  ;;  %v2396_v44 = vsel %vm386_vm1, %v2391_v12, 0 }
 0x968   :  { %2557 = vrot.lane.b32.xlu0 %v2390_v27, %s5437_s6  ;;  %2559 = vrot.lane.b32.xlu1 %v2391_v12, %s5437_s6 }
 0x98e   :  { %v2206_v41 = vpop.permute.xlu2 %2205 }
 0x996   :  { %v2264_v15 = vpop.permute.xlu2 %2263 }
 0x99e   :  { %v2444_v47 = vpop.permute.xlu2 %2443 }
 0x9a6   :  { %v2502_v61 = vpop.permute.xlu2 %2501 }
 0x9a9   :  { %v2266_v53 = vpop.permute.xlu1 %2265  ;;  %v2209_v8 = vpop.permute.xlu0 %2208 }
 0x9aa   :  { %v2271_v35 = vsel %vm386_vm1, %v2266_v53, 0  ;;  %v2214_v60 = vsel %vm386_vm1, %v2209_v8, 0 }
 0x9ab   :  { %2223 = vmatpush.bf16.xpose.msra.mxu3 %v2214_v60  ;;  %2280 = vmatpush.bf16.xpose.msrb.mxu1 %v2271_v35 }
 0x9b1   :  { %v2322_v22 = vpop.permute.xlu0 %2321 }
 0x9b2   :  { %v2327_v48 = vsel %vm386_vm1, %v2322_v22, 0  ;;  %4412 = vmatmul.msk.bf16.vlgmr.msra.gmra.mxu3 %vm386_vm1, %v2206_v41  ;;  %4414 = vmatmul.msk.bf16.vlgmr.msrb.gmra.mxu1 %vm386_vm1, %v2264_v15 }
 0x9b3   :  { %2405 = vmatpush.bf16.xpose.msra.mxu1 %v2396_v44  ;;  %2336 = vmatpush.bf16.xpose.msrb.mxu3 %v2327_v48  ;;  %v4586_v48 = vld [vmem:[#allocation11 + $0x28] sm:$0xff] }
 0x9b9   :  { %v2320_v49 = vpop.permute.xlu0 %2319 }
 0x9c2   :  { %v2169_v26 = vpop.f32.mrf.mxu3  ;;  %4416 = vmatmul.msk.bf16.vlgmr.msrb.gmra.mxu3 %vm386_vm1, %v2320_v49  ;;  %4418 = vmatmul.msk.bf16.vlgmr.msra.gmra.mxu1 %vm386_vm1, %v2390_v27 }
 0x9c3   :  { %v2173_v51 = vmul.f32 0.35355338, %v2169_v26 }
 0x9c5   :  { %v2174_v6 = vadd.f32 %v5034_v52, %v2173_v51  ;;  %v4585_v51 = vld [vmem:[#allocation11 + $0x20] sm:$0xff] }
 0x9c7   :  { %v2175_v54 = vsel %vm634_vm3, %v2174_v6, -inf }
 0x9c8   :  { %2176 = vmax.xlane.f32.xlu1 %v2175_v54 }
 0x9ca   :  { %v2171_v23 = vpop.f32.mrf.mxu3 }
 0x9d2   :  { %v2504_v29 = vpop.permute.xlu0 %2503  ;;  %v2447_v4 = vpop.permute.xlu1 %2446 }
 0x9d3   :  { %v2509_v55 = vsel %vm386_vm1, %v2504_v29, 0  ;;  %v2452_v59 = vsel %vm386_vm1, %v2447_v4, 0 }
 0x9d4   :  { %2461 = vmatpush.bf16.xpose.msra.mxu3 %v2452_v59  ;;  %2518 = vmatpush.bf16.xpose.msrb.mxu1 %v2509_v55  ;;  %v6298_v55 = vld [vmem:[#allocation14 + $0x3] ss:$0 sm:$0xff] }
 0x9da   :  { %v2560_v57 = vpop.permute.xlu1 %2559  ;;  %v2558_v25 = vpop.permute.xlu0 %2557 }
 0x9db   :  { %v2565_v62 = vsel %vm386_vm1, %v2560_v57, 0  ;;  %4420 = vmatmul.msk.bf16.vlgmr.msra.gmra.mxu3 %vm386_vm1, %v2444_v47  ;;  %4422 = vmatmul.msk.bf16.vlgmr.msrb.gmra.mxu1 %vm386_vm1, %v2502_v61 }
 0x9dc   :  { %2574 = vmatpush.bf16.xpose.msrb.mxu3 %v2565_v62  ;;  %2655 = vmatpush.bf16.msra.mxu1 %v4586_v48 }
 0x9e0   :  { %2656 = vmatpush.bf16.msra.mxu1 %v4585_v51 }
 0x9e4   :  { %2834 = vmatpush.bf16.msra.mxu3 %v4590_v34 }
 0x9e8   :  { %2835 = vmatpush.bf16.msra.mxu3 %v4589_v43 }
 0x9eb   :  { %4424 = vmatmul.msk.bf16.vlgmr.msrb.gmra.mxu3 %vm386_vm1, %v2558_v25 }
 0x9fb   :  { %4459 = vmatmul.msk.bf16.vlgmr.msra.gmra.mxu3 %vm305_vm0, %v6200_v14 }
 0xa2f   :  { %v2282_v2 = vpop.f32.mrf.mxu1 }
 0xa30   :  { %v2286_v50 = vmul.f32 0.35355338, %v2282_v2 }
 0xa32   :  { %v6271_v7 = vadd.f32 %v5034_v52, %v2286_v50 }
 0xa34   :  { %v2288_v9 = vsel %vm634_vm3, %v6271_v7, -inf }
 0xa35   :  { %v2225_v58 = vpop.f32.mrf.mxu3  ;;  %2289 = vmax.xlane.f32.xlu0 %v2288_v9 }
 0xa36   :  { %v2229_v45 = vmul.f32 0.35355338, %v2225_v58 }
 0xa37   :  { %v2284_v13 = vpop.f32.mrf.mxu1 }
 0xa38   :  { %v2230_v16 = vadd.f32 %v5034_v52, %v2229_v45 }
 0xa3a   :  { %v2231_v17 = vsel %vm634_vm3, %v2230_v16, -inf }
 0xa3b   :  { %v2177_v28 = vpop.xlane.xlu1 %2176  ;;  %2232 = vmax.xlane.f32.xlu2 %v2231_v17 }
 0xa3c   :  { %v2178_v18 = vsub.f32 %v2174_v6, %v2177_v28 }
 0xa3d   :  { %v2227_v30 = vpop.f32.mrf.mxu3 }
 0xa3e   :  { %v2179_v19 = vmul.f32 1.442695, %v2178_v18 }
 0xa3f   :  { %v2407_v20 = vpop.f32.mrf.mxu1 }
 0xa40   :  { %v2411_v27 = vmul.f32 0.35355338, %v2407_v20  ;;  %4884 = vpow2.f32 %v2179_v19 }
 0xa42   :  { %v2412_v33 = vadd.f32 %v5035_v63, %v2411_v27 }
 0xa44   :  { %v2413_v10 = vsel %vm634_vm3, %v2412_v33, -inf }
 0xa45   :  { %v2338_v37 = vpop.f32.mrf.mxu3  ;;  %2414 = vmax.xlane.f32.xlu2 %v2413_v10 }
 0xa46   :  { %v2342_v21 = vmul.f32 0.35355338, %v2338_v37  ;;  %v6277_v56 = vpop.eup %4884 }
 0xa47   :  { %v2409_v40 = vpop.f32.mrf.mxu1  ;;  %v2181_v41 = vsel %vm634_vm3, %v6277_v56, 0.0 }
 0xa48   :  { %v2343_v0 = vadd.f32 %v5034_v52, %v2342_v21 }
 0xa4a   :  { %v2344_v12 = vsel %vm634_vm3, %v2343_v0, -inf }
 0xa4b   :  { %2345 = vmax.xlane.f32.xlu1 %v2344_v12 }
 0xa4d   :  { %v2340_v53 = vpop.f32.mrf.mxu3  ;;  %2182 = vadd.xlane.f32.xlu2 %v2181_v41 }
 0xa58   :  { %v2520_v8 = vpop.f32.mrf.mxu1 }
 0xa59   :  { %v2524_v35 = vmul.f32 0.35355338, %v2520_v8 }
 0xa5b   :  { %v6282_v60 = vadd.f32 %v5035_v63, %v2524_v35 }
 0xa5d   :  { %v2526_v44 = vsel %vm634_vm3, %v6282_v60, -inf }
 0xa5e   :  { %v2463_v15 = vpop.f32.mrf.mxu3  ;;  %2527 = vmax.xlane.f32.xlu1 %v2526_v44 }
 0xa5f   :  { %v2467_v22 = vmul.f32 0.35355338, %v2463_v15 }
 0xa60   :  { %v2522_v49 = vpop.f32.mrf.mxu1 }
 0xa61   :  { %v6286_v26 = vadd.f32 %v5035_v63, %v2467_v22 }
 0xa63   :  { %v2469_v52 = vsel %vm634_vm3, %v6286_v26, -inf }
 0xa64   :  { %2470 = vmax.xlane.f32.xlu0 %v2469_v52 }
 0xa65   :  { %2300 = vrot.lane.b32.xlu2 %v6236_v3, %s5435_s27 }
 0xa66   :  { %v2465_v6 = vpop.f32.mrf.mxu3 }
 0xa6e   :  { %v2576_v54 = vpop.f32.mrf.mxu3 }
 0xa6f   :  { %v2580_v23 = vmul.f32 0.35355338, %v2576_v54 }
 0xa71   :  { %v6292_v47 = vadd.f32 %v5035_v63, %v2580_v23 }
 0xa73   :  { %v2582_v29 = vsel %vm634_vm3, %v6292_v47, -inf }
 0xa74   :  { %2583 = vmax.xlane.f32.xlu0 %v2582_v29 }
 0xa76   :  { %v2578_v4 = vpop.f32.mrf.mxu3 }
 0xa77   :  { %2356 = vrot.lane.b32.xlu1 %v6236_v3, %s5437_s6 }
 0xa7e   :  { %v2837_v59 = vpop.f32.mrf.mxu3 }
 0xa7f   :  { %v2838_v34 = vadd.f32 %v6298_v55, %v2837_v59 }
 0xa81   :  { %v6301_v61 = vpack.c.bf16 %v2838_v34, %v2838_v34 }
 0xa83   :  { %v2879_v57 = vsel %vm386_vm1, %v6301_v61, 0 }
 0xa84   :  { %2888 = vmatpush.bf16.xpose.msrb.mxu1 %v2879_v57 }
 0xa88   :  { %2244 = vrot.lane.b32.xlu0 %v6236_v3, %s5436_s24 }
 0xaa8   :  { %v2290_v62 = vpop.xlane.xlu0 %2289 }
 0xaa9   :  { %v2291_v43 = vsub.f32 %v6271_v7, %v2290_v62 }
 0xaab   :  { %v2292_v25 = vmul.f32 1.442695, %v2291_v43 }
 0xaad   :  { %4886 = vpow2.f32 %v2292_v25 }
 0xaae   :  { %v2233_v2 = vpop.xlane.xlu2 %2232 }
 0xaaf   :  { %v2234_v50 = vsub.f32 %v2230_v16, %v2233_v2 }
 0xab1   :  { %v2235_v9 = vmul.f32 1.442695, %v2234_v50 }
 0xab3   :  { %v6308_v58 = vpop.eup %4886  ;;  %4888 = vpow2.f32 %v2235_v9 }
 0xab4   :  { %v2294_v45 = vsel %vm634_vm3, %v6308_v58, 0.0 }
 0xab5   :  { %2295 = vadd.xlane.f32.xlu2 %v2294_v45 }
 0xab8   :  { %v2415_v13 = vpop.xlane.xlu2 %2414 }
 0xab9   :  { %v6312_v17 = vpop.eup %4888  ;;  %v2416_v28 = vsub.f32 %v2412_v33, %v2415_v13 }
 0xaba   :  { %v2237_v3 = vsel %vm634_vm3, %v6312_v17, 0.0 }
 0xabb   :  { %v2417_v7 = vmul.f32 1.442695, %v2416_v28  ;;  %2238 = vadd.xlane.f32.xlu1 %v2237_v3 }
 0xabd   :  { %4890 = vpow2.f32 %v2417_v7 }
 0xabe   :  { %v2346_v18 = vpop.xlane.xlu1 %2345 }
 0xabf   :  { %v2347_v16 = vsub.f32 %v2343_v0, %v2346_v18 }
 0xac0   :  { %v2183_v30 = vpop.xlane.xlu2 %2182 }
 0xac1   :  { %v2348_v19 = vmul.f32 1.442695, %v2347_v16  ;;  %4892 = vrcp.f32 %v2183_v30 }
 0xac3   :  { %v4891_v20 = vpop.eup %4890  ;;  %4894 = vpow2.f32 %v2348_v19 }
 0xac4   :  { %v2419_v27 = vsel %vm634_vm3, %v4891_v20, 0.0 }
 0xac5   :  { %2420 = vadd.xlane.f32.xlu1 %v2419_v27  ;;  %v4588_v27 = vld [vmem:[%s6934_s4 + $0x38] sm:$0xff] }
 0xac7   :  { %v4893_v63 = vpop.eup %4892 }
 0xac8   :  { %v2185_v10 = vmul.f32 %v4893_v63, %v6277_v56  ;;  %v2301_v33 = vpop.permute.xlu2 %2300  ;;  %v4592_v63 = vld [vmem:[#allocation10 + $0x38] sm:$0xff] }
 0xac9   :  { %v4895_v37 = vpop.eup %4894  ;;  %2313 = vmatpush.bf16.msrb.mxu2 %v2301_v33 }
 0xaca   :  { %v2186_v21 = vpack.c.bf16 %v2185_v10, %v2185_v10  ;;  %v2350_v40 = vsel %vm634_vm3, %v4895_v37, 0.0 }
 0xacc   :  { %4411 = vmatmul.msk.bf16.vlgmr.msra.gmra.mxu2 %vm634_vm3, %v2186_v21  ;;  %v4591_v21 = vld [vmem:[#allocation10 + $0x30] sm:$0xff] }
 0xacd   :  { %2436 = vmatpush.bf16.msra.mxu2 %v6248_v5  ;;  %2351 = vadd.xlane.f32.xlu1 %v2350_v40 }
 0xad1   :  { %v2528_v0 = vpop.xlane.xlu1 %2527 }
 0xad2   :  { %v2529_v12 = vsub.f32 %v6282_v60, %v2528_v0 }
 0xad4   :  { %v2530_v41 = vmul.f32 1.442695, %v2529_v12 }
 0xad6   :  { %4896 = vpow2.f32 %v2530_v41 }
 0xad7   :  { %v2471_v53 = vpop.xlane.xlu0 %2470 }
 0xad8   :  { %v2472_v8 = vsub.f32 %v6286_v26, %v2471_v53 }
 0xada   :  { %v2473_v56 = vmul.f32 1.442695, %v2472_v8 }
 0xadc   :  { %v4897_v35 = vpop.eup %4896  ;;  %4898 = vpow2.f32 %v2473_v56 }
 0xadd   :  { %v2532_v44 = vsel %vm634_vm3, %v4897_v35, 0.0 }
 0xade   :  { %2533 = vadd.xlane.f32.xlu2 %v2532_v44 }
 0xae2   :  { %v4899_v15 = vpop.eup %4898 }
 0xae3   :  { %v2475_v22 = vsel %vm634_vm3, %v4899_v15, 0.0 }
 0xae4   :  { %2476 = vadd.xlane.f32.xlu0 %v2475_v22 }
 0xae6   :  { %2482 = vrot.lane.b32.xlu1 %v6248_v5, %s5436_s24 }
 0xae7   :  { %v2584_v48 = vpop.xlane.xlu0 %2583 }
 0xae8   :  { %v2585_v26 = vsub.f32 %v6292_v47, %v2584_v48 }
 0xae9   :  { %v2357_v49 = vpop.permute.xlu1 %2356 }
 0xaea   :  { %v2586_v51 = vmul.f32 1.442695, %v2585_v26 }
 0xaec   :  { %4900 = vpow2.f32 %v2586_v51 }
 0xaf2   :  { %v4901_v52 = vpop.eup %4900 }
 0xaf3   :  { %v2588_v6 = vsel %vm634_vm3, %v4901_v52, 0.0 }
 0xaf6   :  { %2594 = vrot.lane.b32.xlu2 %v6248_v5, %s5437_s6 }
 0xaf8   :  { %2538 = vrot.lane.b32.xlu0 %v6248_v5, %s5435_s27 }
 0xafa   :  { %v2245_v60 = vpop.permute.xlu0 %2244 }
 0xafb   :  { %2257 = vmatpush.bf16.msrb.mxu0 %v2245_v60 }
 0xafe   :  { %2947 = vrot.lane.b32.xlu2 %v6301_v61, %s5436_s24 }
 0xaff   :  { %2369 = vmatpush.bf16.msra.mxu0 %v2357_v49 }
 0xb10   :  { %2589 = vadd.xlane.f32.xlu1 %v2588_v6 }
 0xb28   :  { %v2296_v54 = vpop.xlane.xlu2 %2295 }
 0xb29   :  { %4902 = vrcp.f32 %v2296_v54  ;;  %v4744_v54 = vld [vmem:[#allocation13 + $0x3] ss:$0 sm:$0xff] }
 0xb2e   :  { %v2239_v23 = vpop.xlane.xlu1 %2238 }
 0xb2f   :  { %v4903_v29 = vpop.eup %4902  ;;  %4904 = vrcp.f32 %v2239_v23 }
 0xb30   :  { %v2298_v5 = vmul.f32 %v4903_v29, %v6308_v58 }
 0xb32   :  { %v2299_v4 = vpack.c.bf16 %v2298_v5, %v2298_v5 }
 0xb34   :  { %4415 = vmatmul.msk.bf16.vlgmr.msrb.gmra.mxu2 %vm634_vm3, %v2299_v4 }
 0xb35   :  { %v4905_v47 = vpop.eup %4904 }
 0xb36   :  { %v2241_v59 = vmul.f32 %v4905_v47, %v6312_v17 }
 0xb38   :  { %v2242_v34 = vpack.c.bf16 %v2241_v59, %v2241_v59  ;;  %v2421_v57 = vpop.xlane.xlu1 %2420 }
 0xb39   :  { %4906 = vrcp.f32 %v2421_v57 }
 0xb3a   :  { %4413 = vmatmul.msk.bf16.vlgmr.msrb.gmra.mxu0 %vm634_vm3, %v2242_v34  ;;  %v2839_v34 = vpop.f32.mrf.mxu3 }
 0xb3b   :  { %v2840_v57 = vadd.f32 %v6298_v55, %v2839_v34 }
 0xb3f   :  { %v4907_v62 = vpop.eup %4906 }
 0xb40   :  { %v2423_v43 = vmul.f32 %v4907_v62, %v4891_v20  ;;  %v2352_v25 = vpop.xlane.xlu1 %2351 }
 0xb41   :  { %4908 = vrcp.f32 %v2352_v25  ;;  %v3196_v25 = vpack.c.bf16 %v2840_v57, %v2840_v57 }
 0xb42   :  { %v2424_v2 = vpack.c.bf16 %v2423_v43, %v2423_v43 }
 0xb44   :  { %4419 = vmatmul.msk.bf16.vlgmr.msra.gmra.mxu2 %vm634_vm3, %v2424_v2 }
 0xb47   :  { %v4909_v50 = vpop.eup %4908 }
 0xb48   :  { %v2354_v9 = vmul.f32 %v4909_v50, %v4895_v37  ;;  %v4587_v37 = vld [vmem:[%s6934_s4 + $0x30] sm:$0xff]  ;;  %v6378_v50 = vld [vmem:[#allocation16 + $0x3] ss:$0 sm:$0xff] }
 0xb4a   :  { %v2355_v58 = vpack.c.bf16 %v2354_v9, %v2354_v9 }
 0xb4c   :  { %4417 = vmatmul.msk.bf16.vlgmr.msra.gmra.mxu0 %vm634_vm3, %v2355_v58 }
 0xb4f   :  { %v6341_v45 = vpop.f32.mrf.mxu2 }
 0xb51   :  { %v2534_v13 = vpop.xlane.xlu2 %2533 }
 0xb57   :  { %v2202_v17 = vpop.f32.mrf.mxu2  ;;  %v2477_v28 = vpop.xlane.xlu0 %2476 }
 0xb58   :  { %4910 = vrcp.f32 %v2477_v28  ;;  %v2483_v3 = vpop.permute.xlu1 %2482 }
 0xb59   :  { %2495 = vmatpush.bf16.msrb.mxu0 %v2483_v3  ;;  %v2595_v7 = vpop.permute.xlu2 %2594  ;;  %4912 = vrcp.f32 %v2534_v13 }
 0xb5d   :  { %2607 = vmatpush.bf16.msra.mxu0 %v2595_v7 }
 0xb5e   :  { %v4911_v18 = vpop.eup %4910 }
 0xb5f   :  { %v2479_v16 = vmul.f32 %v4911_v18, %v4899_v15  ;;  %v4913_v19 = vpop.eup %4912 }
 0xb60   :  { %v2536_v20 = vmul.f32 %v4913_v19, %v4897_v35 }
 0xb61   :  { %v2480_v30 = vpack.c.bf16 %v2479_v16, %v2479_v16  ;;  %v2948_v41 = vpop.permute.xlu2 %2947 }
 0xb62   :  { %v2537_v33 = vpack.c.bf16 %v2536_v20, %v2536_v20  ;;  %v2953_v8 = vsel %vm386_vm1, %v2948_v41, 0  ;;  %v3201_v20 = vsel %vm386_vm1, %v3196_v25, 0 }
 0xb63   :  { %4421 = vmatmul.msk.bf16.vlgmr.msrb.gmra.mxu0 %vm634_vm3, %v2480_v30 }
 0xb64   :  { %2865 = vmatpush.bf16.msrb.mxu0 %v4592_v63 }
 0xb68   :  { %2866 = vmatpush.bf16.msrb.mxu0 %v4591_v21 }
 0xb6a   :  { %v2539_v10 = vpop.permute.xlu0 %2538 }
 0xb6b   :  { %2551 = vmatpush.bf16.msrb.mxu2 %v2539_v10 }
 0xb6e   :  { %4423 = vmatmul.msk.bf16.vlgmr.msrb.gmra.mxu2 %vm634_vm3, %v2537_v33 }
 0xb6f   :  { %2798 = vmatpush.bf16.msra.mxu2 %v4588_v27 }
 0xb73   :  { %2799 = vmatpush.bf16.msra.mxu2 %v4587_v37 }
 0xb7e   :  { %4449 = vmatmul.msk.bf16.vlgmr.msra.gmra.mxu2 %vm305_vm0, %v6204_v31 }
 0xb83   :  { %v2590_v40 = vpop.xlane.xlu1 %2589 }
 0xb84   :  { %4914 = vrcp.f32 %v2590_v40 }
 0xb8a   :  { %v4915_v0 = vpop.eup %4914 }
 0xb8b   :  { %v2592_v12 = vmul.f32 %v4915_v0, %v4901_v52 }
 0xb8d   :  { %v2593_v53 = vpack.c.bf16 %v2592_v12, %v2592_v12 }
 0xb8e   :  { %4450 = vmatmul.msk.bf16.gmra.mxu2 %vm305_vm0, %v6229_v38 }
 0xb8f   :  { %4425 = vmatmul.msk.bf16.vlgmr.msra.gmra.mxu0 %vm634_vm3, %v2593_v53 }
 0xb90   :  { %2962 = vmatpush.bf16.xpose.msra.mxu0 %v2953_v8 }
 0xb9f   :  { %4468 = vmatmul.msk.bf16.vlgmr.msrb.gmra.mxu0 %vm305_vm0, %v6200_v14 }
 0xbb7   :  { %v2259_v56 = vpop.f32.mrf.mxu0  ;;  %v2315_v35 = vpop.f32.mrf.mxu2 }
 0xbbf   :  { %v2261_v31 = vpop.f32.mrf.mxu0  ;;  %v2317_v44 = vpop.f32.mrf.mxu2 }
 0xbc7   :  { %v6359_v15 = vpop.f32.mrf.mxu2 }
 0xbc9   :  { %v2371_v22 = vpop.f32.mrf.mxu0 }
 0xbcf   :  { %v2440_v48 = vpop.f32.mrf.mxu2 }
 0xbd1   :  { %v2373_v60 = vpop.f32.mrf.mxu0 }
 0xbe0   :  { %v2497_v49 = vpop.f32.mrf.mxu0 }
 0xbe1   :  { %v4679_v26 = vpack.i.bf16 %v2497_v49, %v2259_v56 }
 0xbe3   :  { %4680 = vrot.lane.b32.xlu0 %v4679_v26, %s5428_s20 }
 0xbe8   :  { %v2499_v38 = vpop.f32.mrf.mxu0 }
 0xbf1   :  { %v2553_v51 = vpop.f32.mrf.mxu2 }
 0xbf2   :  { %v4684_v52 = vpack.i.bf16 %v2553_v51, %v2315_v35 }
 0xbf4   :  { %4685 = vrot.lane.b32.xlu0 %v4684_v52, %s5417_s25 }
 0xbf9   :  { %v2555_v6 = vpop.f32.mrf.mxu2 }
 0xbfc   :  { %3021 = vrot.lane.b32.xlu0 %v6301_v61, %s5435_s27 }
 0xc01   :  { %v2801_v14 = vpop.f32.mrf.mxu2 }
 0xc02   :  { %v2802_v29 = vadd.f32 %v4744_v54, %v2801_v14 }
 0xc09   :  { %v2803_v23 = vpop.f32.mrf.mxu2 }
 0xc0a   :  { %v2804_v5 = vadd.f32 %v4744_v54, %v2803_v23 }
 0xc0c   :  { %v6365_v4 = vpack.c.bf16 %v2804_v5, %v2802_v29  ;;  %v2609_v47 = vpop.f32.mrf.mxu0 }
 0xc0d   :  { %v4689_v59 = vpack.i.bf16 %v2609_v47, %v2371_v22 }
 0xc0e   :  { %3019 = vrot.lane.b32.xlu0 %v6365_v4, %s5435_s27  ;;  %2944 = vrot.lane.b32.xlu2 %v6365_v4, %s5436_s24 }
 0xc0f   :  { %4690 = vrot.lane.b32.xlu1 %v4689_v59, %s5438_s12 }
 0xc11   :  { %v2806_v62 = vpop.f32.mrf.mxu2 }
 0xc12   :  { %v2807_v9 = vadd.f32 %v4744_v54, %v2806_v62 }
 0xc14   :  { %v2611_v43 = vpop.f32.mrf.mxu0 }
 0xc16   :  { %3092 = vrot.lane.b32.xlu0 %v6365_v4, %s5437_s6  ;;  %3094 = vrot.lane.b32.xlu2 %v6301_v61, %s5437_s6 }
 0xc17   :  { %3269 = vrot.lane.b32.xlu1 %v3196_v25, %s5436_s24 }
 0xc19   :  { %v2808_v2 = vpop.f32.mrf.mxu2 }
 0xc1a   :  { %v2809_v58 = vadd.f32 %v4744_v54, %v2808_v2 }
 0xc1c   :  { %v3195_v13 = vpack.c.bf16 %v2809_v58, %v2807_v9  ;;  %v2868_v17 = vpop.f32.mrf.mxu0 }
 0xc1d   :  { %v2869_v55 = vadd.f32 %v6378_v50, %v2868_v17 }
 0xc1e   :  { %3266 = vrot.lane.b32.xlu0 %v3195_v13, %s5436_s24  ;;  %3343 = vrot.lane.b32.xlu2 %v3196_v25, %s5435_s27 }
 0xc1f   :  { %v6383_v28 = vpack.c.bf16 %v2869_v55, %v2869_v55  ;;  %3341 = vrot.lane.b32.xlu1 %v3195_v13, %s5435_s27 }
 0xc21   :  { %v2927_v61 = vsel %vm427_vm2, %v6383_v28, 0 }
 0xc22   :  { %2936 = vmatpush.bf16.msrb.mxu3 %v2927_v61 }
 0xc24   :  { %v6420_v29 = vpop.f32.mrf.mxu0 }
 0xc26   :  { %3414 = vrot.lane.b32.xlu0 %v3195_v13, %s5437_s6  ;;  %3416 = vrot.lane.b32.xlu2 %v3196_v25, %s5437_s6 }
 0xc27   :  { %3070 = vrot.lane.b32.xlu1 %v6383_v28, %s5435_s27 }
 0xc2e   :  { %2997 = vrot.lane.b32.xlu0 %v6383_v28, %s5436_s24 }
 0xc55   :  { %v4681_v3 = vpop.permute.xlu0 %4680 }
 0xc56   :  { %v4683_v63 = vunpack.i.h.bf16 %v4681_v3  ;;  %v4682_v10 = vunpack.i.l.bf16 %v4681_v3 }
 0xc58   :  { %v2387_v41 = vsel %vm386_vm1, %v6341_v45, %v4682_v10  ;;  %v2625_v53 = vsel %vm386_vm1, %v6359_v15, %v4683_v63 }
 0xc66   :  { %v4686_v7 = vpop.permute.xlu0 %4685 }
 0xc67   :  { %v4688_v37 = vunpack.i.h.bf16 %v4686_v7  ;;  %v4687_v21 = vunpack.i.l.bf16 %v4686_v7 }
 0xc68   :  { %v2945_v18 = vpop.permute.xlu2 %2944 }
 0xc69   :  { %4471 = vmatmul.msk.bf16.vlgmr.msra.gmra.mxu0 %vm386_vm1, %v2945_v18  ;;  %v2626_v35 = vsel %vm634_vm3, %v2625_v53, %v4688_v37  ;;  %v2388_v31 = vsel %vm634_vm3, %v2387_v41, %v4687_v21 }
 0xc6e   :  { %v3022_v16 = vpop.permute.xlu0 %3021 }
 0xc6f   :  { %v3027_v30 = vsel %vm386_vm1, %v3022_v16, 0 }
 0xc70   :  { %3036 = vmatpush.bf16.xpose.msrb.mxu2 %v3027_v30  ;;  %v3095_v19 = vpop.permute.xlu2 %3094 }
 0xc71   :  { %v3100_v27 = vsel %vm386_vm1, %v3095_v19, 0 }
 0xc72   :  { %3109 = vmatpush.bf16.xpose.msrb.mxu0 %v3100_v27 }
 0xc78   :  { %3210 = vmatpush.bf16.xpose.msra.mxu2 %v3201_v20  ;;  %v3344_v33 = vpop.permute.xlu2 %3343 }
 0xc79   :  { %v3349_v0 = vsel %vm386_vm1, %v3344_v33, 0  ;;  %v5037_v33 = vld [vmem:[#allocation5 + $0x1] ss:$0 sm:$0xff] }
 0xc80   :  { %v3020_v40 = vpop.permute.xlu0 %3019  ;;  %v3417_v60 = vpop.permute.xlu2 %3416 }
 0xc81   :  { %v4691_v12 = vpop.permute.xlu1 %4690  ;;  %4473 = vmatmul.msk.bf16.vlgmr.msrb.gmra.mxu2 %vm386_vm1, %v3020_v40  ;;  %v3422_v26 = vsel %vm386_vm1, %v3417_v60, 0 }
 0xc82   :  { %v4693_v8 = vunpack.i.h.bf16 %v4691_v12  ;;  %v4692_v56 = vunpack.i.l.bf16 %v4691_v12  ;;  %3358 = vmatpush.bf16.xpose.msrb.mxu2 %v3349_v0 }
 0xc84   :  { %v2627_v44 = vsel %vm636_vm4, %v2626_v35, %v4693_v8  ;;  %v2389_v22 = vsel %vm636_vm4, %v2388_v31, %v4692_v56 }
 0xc85   :  { %v2628_v48 = vpack.c.bf16 %v2627_v44, %v2389_v22 }
 0xc87   :  { %4434 = vmatmul.msk.bf16.vlgmr.msra.gmra.mxu1 %vm305_vm0, %v2628_v48 }
 0xc88   :  { %v3093_v49 = vpop.permute.xlu0 %3092 }
 0xc89   :  { %v3270_v45 = vpop.permute.xlu1 %3269  ;;  %4475 = vmatmul.msk.bf16.vlgmr.msrb.gmra.mxu0 %vm386_vm1, %v3093_v49 }
 0xc8a   :  { %v3275_v15 = vsel %vm386_vm1, %v3270_v45, 0 }
 0xc8b   :  { %3284 = vmatpush.bf16.xpose.msra.mxu0 %v3275_v15 }
 0xc90   :  { %v3267_v38 = vpop.permute.xlu0 %3266 }
 0xc91   :  { %v3342_v51 = vpop.permute.xlu1 %3341  ;;  %4477 = vmatmul.msk.bf16.vlgmr.msra.gmra.mxu2 %vm386_vm1, %v3195_v13  ;;  %v6432_v13 = vld [vmem:[#allocation17 + $0x2] ss:$0 sm:$0xff] }
 0xc93   :  { %3431 = vmatpush.bf16.xpose.msrb.mxu0 %v3422_v26 }
 0xc97   :  { %4469 = vmatmul.msk.bf16.vlgmr.msrb.gmra.mxu1 %vm386_vm1, %v6365_v4  ;;  %v5036_v4 = vld [vmem:[#allocation5] ss:$0 sm:$0xff] }
 0xc98   :  { %v3415_v52 = vpop.permute.xlu0 %3414 }
 0xc99   :  { %v3071_v6 = vpop.permute.xlu1 %3070  ;;  %4479 = vmatmul.msk.bf16.vlgmr.msra.gmra.mxu0 %vm386_vm1, %v3267_v38 }
 0xc9a   :  { %v3076_v14 = vsel %vm427_vm2, %v3071_v6, 0 }
 0xc9b   :  { %3085 = vmatpush.bf16.msra.mxu3 %v3076_v14 }
 0xca0   :  { %v2998_v54 = vpop.permute.xlu0 %2997 }
 0xca1   :  { %v3003_v23 = vsel %vm427_vm2, %v2998_v54, 0  ;;  %4481 = vmatmul.msk.bf16.vlgmr.msrb.gmra.mxu2 %vm386_vm1, %v3342_v51 }
 0xca2   :  { %3012 = vmatpush.bf16.msra.mxu1 %v3003_v23 }
 0xca9   :  { %4483 = vmatmul.msk.bf16.vlgmr.msrb.gmra.mxu0 %vm386_vm1, %v3415_v52 }
 0xce6   :  { %v2964_v5 = vpop.f32.mrf.mxu0 }
 0xce7   :  { %v2969_v47 = vmul.f32 0.35355338, %v2964_v5 }
 0xce9   :  { %v6422_v59 = vadd.f32 %v5036_v4, %v2969_v47 }
 0xceb   :  { %v2973_v34 = vsel %vm386_vm1, %v6422_v59, -inf }
 0xcec   :  { %2974 = vmax.xlane.f32.xlu0 %v2973_v34 }
 0xcee   :  { %v2966_v57 = vpop.f32.mrf.mxu0 }
 0xcef   :  { %v2970_v21 = vmul.f32 0.35355338, %v2966_v57 }
 0xcf1   :  { %v6449_v12 = vadd.f32 %v5036_v4, %v2970_v21 }
 0xcf3   :  { %v2976_v44 = vsel %vm386_vm1, %v6449_v12, -inf }
 0xd04   :  { %v6426_v62 = vpop.f32.mrf.mxu1  ;;  %v3038_v43 = vpop.f32.mrf.mxu2 }
 0xd05   :  { %v3043_v25 = vmul.f32 0.35355338, %v3038_v43 }
 0xd06   :  { %v3111_v2 = vpop.f32.mrf.mxu0 }
 0xd07   :  { %v6428_v9 = vadd.f32 %v5036_v4, %v3043_v25  ;;  %v3116_v22 = vmul.f32 0.35355338, %v3111_v2 }
 0xd09   :  { %v3047_v58 = vsel %vm386_vm1, %v6428_v9, -inf  ;;  %v6461_v26 = vadd.f32 %v5036_v4, %v3116_v22 }
 0xd0a   :  { %3048 = vmax.xlane.f32.xlu2 %v3047_v58 }
 0xd0b   :  { %v3120_v14 = vsel %vm386_vm1, %v6461_v26, -inf }
 0xd0c   :  { %v2660_v17 = vpop.f32.mrf.mxu1  ;;  %v3040_v55 = vpop.f32.mrf.mxu2 }
 0xd0d   :  { %v6435_v61 = vadd.f32 %v6432_v13, %v2660_v17  ;;  %v3044_v3 = vmul.f32 0.35355338, %v3040_v55 }
 0xd0e   :  { %v3113_v7 = vpop.f32.mrf.mxu0 }
 0xd0f   :  { %v6437_v18 = vadd.f32 %v5036_v4, %v3044_v3  ;;  %v3117_v48 = vmul.f32 0.35355338, %v3113_v7 }
 0xd11   :  { %v3050_v16 = vsel %vm386_vm1, %v6437_v18, -inf  ;;  %v6463_v38 = vadd.f32 %v5036_v4, %v3117_v48 }
 0xd12   :  { %3051 = vmax.xlane.f32.xlu0 %v3050_v16 }
 0xd13   :  { %v3123_v54 = vsel %vm386_vm1, %v6463_v38, -inf }
 0xd14   :  { %v2890_v30 = vpop.f32.mrf.mxu1  ;;  %v3212_v19 = vpop.f32.mrf.mxu2 }
 0xd15   :  { %v2895_v20 = vmul.f32 0.35355338, %v2890_v30  ;;  %v3217_v27 = vmul.f32 0.35355338, %v3212_v19 }
 0xd16   :  { %v3286_v63 = vpop.f32.mrf.mxu0 }
 0xd17   :  { %v6441_v10 = vadd.f32 %v5036_v4, %v2895_v20  ;;  %v6443_v37 = vadd.f32 %v5037_v33, %v3217_v27  ;;  %v3291_v52 = vmul.f32 0.35355338, %v3286_v63 }
 0xd19   :  { %v2899_v40 = vsel %vm386_vm1, %v6441_v10, -inf  ;;  %v3221_v0 = vsel %vm386_vm1, %v6443_v37, -inf  ;;  %v6469_v23 = vadd.f32 %v5037_v33, %v3291_v52 }
 0xd1a   :  { %2900 = vmax.xlane.f32.xlu1 %v2899_v40  ;;  %3222 = vmax.xlane.f32.xlu0 %v3221_v0 }
 0xd1c   :  { %v2892_v41 = vpop.f32.mrf.mxu1  ;;  %v3214_v53 = vpop.f32.mrf.mxu2 }
 0xd1d   :  { %v2896_v8 = vmul.f32 0.35355338, %v2892_v41  ;;  %v3218_v6 = vmul.f32 0.35355338, %v3214_v53 }
 0xd1e   :  { %v3288_v56 = vpop.f32.mrf.mxu0 }
 0xd1f   :  { %v6451_v35 = vadd.f32 %v5036_v4, %v2896_v8  ;;  %v3292_v31 = vmul.f32 0.35355338, %v3288_v56  ;;  %v6471_v5 = vadd.f32 %v5037_v33, %v3218_v6  ;;  %v3295_v4 = vsel %vm386_vm1, %v6469_v23, -inf }
 0xd21   :  { %v6455_v60 = vadd.f32 %v5037_v33, %v3292_v31  ;;  %v2902_v49 = vsel %vm386_vm1, %v6451_v35, -inf  ;;  %v3224_v58 = vsel %vm386_vm1, %v6471_v5, -inf }
 0xd22   :  { %2903 = vmax.xlane.f32.xlu2 %v2902_v49  ;;  %2977 = vmax.xlane.f32.xlu1 %v2976_v44 }
 0xd23   :  { %v3298_v45 = vsel %vm386_vm1, %v6455_v60, -inf }
 0xd24   :  { %3299 = vmax.xlane.f32.xlu0 %v3298_v45  ;;  %v3360_v15 = vpop.f32.mrf.mxu2 }
 0xd25   :  { %v3365_v43 = vmul.f32 0.35355338, %v3360_v15 }
 0xd26   :  { %v3433_v51 = vpop.f32.mrf.mxu0 }
 0xd27   :  { %v6481_v55 = vadd.f32 %v5037_v33, %v3365_v43  ;;  %v3438_v7 = vmul.f32 0.35355338, %v3433_v51 }
 0xd29   :  { %v3369_v16 = vsel %vm386_vm1, %v6481_v55, -inf  ;;  %v6489_v19 = vadd.f32 %v5037_v33, %v3438_v7 }
 0xd2a   :  { %3121 = vmax.xlane.f32.xlu1 %v3120_v14  ;;  %3124 = vmax.xlane.f32.xlu2 %v3123_v54 }
 0xd2b   :  { %v3442_v20 = vsel %vm386_vm1, %v6489_v19, -inf }
 0xd2c   :  { %v3362_v47 = vpop.f32.mrf.mxu2 }
 0xd2d   :  { %v3366_v25 = vmul.f32 0.35355338, %v3362_v47 }
 0xd2e   :  { %v3435_v34 = vpop.f32.mrf.mxu0 }
 0xd2f   :  { %v3439_v57 = vmul.f32 0.35355338, %v3435_v34  ;;  %v6483_v3 = vadd.f32 %v5037_v33, %v3366_v25 }
 0xd31   :  { %v6475_v2 = vadd.f32 %v5037_v33, %v3439_v57  ;;  %v3372_v30 = vsel %vm386_vm1, %v6483_v3, -inf }
 0xd32   :  { %3225 = vmax.xlane.f32.xlu1 %v3224_v58  ;;  %3296 = vmax.xlane.f32.xlu2 %v3295_v4 }
 0xd33   :  { %v3445_v17 = vsel %vm386_vm1, %v6475_v2, -inf }
 0xd34   :  { %3446 = vmax.xlane.f32.xlu0 %v3445_v17 }
 0xd3a   :  { %3370 = vmax.xlane.f32.xlu1 %v3369_v16  ;;  %3373 = vmax.xlane.f32.xlu2 %v3372_v30 }
 0xd42   :  { %3443 = vmax.xlane.f32.xlu2 %v3442_v20 }
 0xd5f   :  { %v2975_v27 = vpop.xlane.xlu0 %2974 }
 0xd60   :  { %v2979_v63 = vsub.f32 %v6422_v59, %v2975_v27 }
 0xd62   :  { %v2981_v21 = vmul.f32 1.442695, %v2979_v63 }
 0xd64   :  { %4916 = vpow2.f32 %v2981_v21 }
 0xd6a   :  { %v6494_v40 = vpop.eup %4916 }
 0xd6b   :  { %v2985_v0 = vsel %vm386_vm1, %v6494_v40, 0.0 }
 0xd6c   :  { %2986 = vadd.xlane.f32.xlu1 %v2985_v0 }
 0xd7d   :  { %v3049_v41 = vpop.xlane.xlu2 %3048 }
 0xd7e   :  { %v3053_v53 = vsub.f32 %v6428_v9, %v3049_v41 }
 0xd80   :  { %v3055_v33 = vmul.f32 1.442695, %v3053_v53 }
 0xd82   :  { %4918 = vpow2.f32 %v3055_v33 }
 0xd85   :  { %v3052_v22 = vpop.xlane.xlu0 %3051 }
 0xd86   :  { %v3054_v51 = vsub.f32 %v6437_v18, %v3052_v22 }
 0xd88   :  { %v6499_v8 = vpop.eup %4918 }
 0xd89   :  { %v3059_v56 = vsel %vm386_vm1, %v6499_v8, 0.0 }
 0xd8a   :  { %3060 = vadd.xlane.f32.xlu1 %v3059_v56 }
 0xd8d   :  { %v2901_v59 = vpop.xlane.xlu1 %2900  ;;  %v3223_v54 = vpop.xlane.xlu0 %3222 }
 0xd8e   :  { %v2905_v31 = vsub.f32 %v6441_v10, %v2901_v59  ;;  %v3057_v10 = vmul.f32 1.442695, %v3054_v51 }
 0xd90   :  { %v2907_v44 = vmul.f32 1.442695, %v2905_v31 }
 0xd92   :  { %4920 = vpow2.f32 %v2907_v44 }
 0xd95   :  { %v2978_v48 = vpop.xlane.xlu1 %2977  ;;  %v2904_v49 = vpop.xlane.xlu2 %2903 }
 0xd96   :  { %v2980_v45 = vsub.f32 %v6449_v12, %v2978_v48  ;;  %v2906_v9 = vsub.f32 %v6451_v35, %v2904_v49  ;;  %v3227_v35 = vsub.f32 %v6443_v37, %v3223_v54 }
 0xd97   :  { %v3300_v31 = vpop.xlane.xlu0 %3299 }
 0xd98   :  { %v6506_v15 = vpop.eup %4920  ;;  %v2983_v52 = vmul.f32 1.442695, %v2980_v45  ;;  %v2909_v6 = vmul.f32 1.442695, %v2906_v9  ;;  %v3229_v58 = vmul.f32 1.442695, %v3227_v35  ;;  %v3302_v22 = vsub.f32 %v6455_v60, %v3300_v31 }
 0xd99   :  { %v2911_v14 = vsel %vm386_vm1, %v6506_v15, 0.0 }
 0xd9a   :  { %4922 = vpow2.f32 %v2983_v52  ;;  %2912 = vadd.xlane.f32.xlu0 %v2911_v14 }
 0xd9b   :  { %4924 = vpow2.f32 %v2909_v6 }
 0xd9c   :  { %4926 = vpow2.f32 %v3057_v10 }
 0xd9d   :  { %v3122_v47 = vpop.xlane.xlu1 %3121  ;;  %v3125_v25 = vpop.xlane.xlu2 %3124 }
 0xd9e   :  { %v3126_v34 = vsub.f32 %v6461_v26, %v3122_v47  ;;  %v3127_v37 = vsub.f32 %v6463_v38, %v3125_v25 }
 0xda0   :  { %v6512_v12 = vpop.eup %4922  ;;  %v3128_v57 = vmul.f32 1.442695, %v3126_v34  ;;  %v3130_v20 = vmul.f32 1.442695, %v3127_v37 }
 0xda1   :  { %v6515_v18 = vpop.eup %4924  ;;  %v2988_v4 = vsel %vm386_vm1, %v6512_v12, 0.0 }
 0xda2   :  { %4928 = vpow2.f32 %v3128_v57  ;;  %2989 = vadd.xlane.f32.xlu2 %v2988_v4  ;;  %v2914_v43 = vsel %vm386_vm1, %v6515_v18, 0.0  ;;  %v6521_v26 = vpop.eup %4926 }
 0xda3   :  { %2915 = vadd.xlane.f32.xlu1 %v2914_v43  ;;  %4930 = vpow2.f32 %v3229_v58  ;;  %v3062_v7 = vsel %vm386_vm1, %v6521_v26, 0.0 }
 0xda4   :  { %4932 = vpow2.f32 %v3130_v20 }
 0xda5   :  { %v3226_v30 = vpop.xlane.xlu1 %3225  ;;  %v3297_v27 = vpop.xlane.xlu2 %3296 }
 0xda6   :  { %v3301_v21 = vsub.f32 %v6469_v23, %v3297_v27  ;;  %v2871_v23 = vadd.f32 %v6378_v50, %v6420_v29  ;;  %v3228_v51 = vsub.f32 %v6471_v5, %v3226_v30 }
 0xda7   :  { %v3447_v6 = vpop.xlane.xlu0 %3446 }
 0xda8   :  { %v6523_v17 = vpop.eup %4928  ;;  %v3303_v0 = vmul.f32 1.442695, %v3301_v21  ;;  %v6549_v49 = vpack.c.bf16 %v2871_v23, %v2871_v23  ;;  %v3231_v60 = vmul.f32 1.442695, %v3228_v51  ;;  %v3449_v10 = vsub.f32 %v6475_v2, %v3447_v6 }
 0xda9   :  { %v3132_v16 = vsel %vm386_vm1, %v6523_v17, 0.0  ;;  %v6530_v63 = vpop.eup %4930 }
 0xdaa   :  { %3063 = vadd.xlane.f32.xlu2 %v3062_v7  ;;  %v3233_v38 = vsel %vm386_vm1, %v6530_v63, 0.0  ;;  %v6537_v53 = vpop.eup %4932  ;;  %4934 = vpow2.f32 %v3303_v0 }
 0xdab   :  { %3133 = vadd.xlane.f32.xlu1 %v3132_v16  ;;  %v3135_v56 = vsel %vm386_vm1, %v6537_v53, 0.0 }
 0xdad   :  { %v3371_v41 = vpop.xlane.xlu1 %3370  ;;  %v3374_v59 = vpop.xlane.xlu2 %3373 }
 0xdae   :  { %3143 = vrot.lane.b32.xlu0 %v6383_v28, %s5437_s6  ;;  %v3375_v33 = vsub.f32 %v6481_v55, %v3371_v41  ;;  %v3305_v55 = vmul.f32 1.442695, %v3302_v22  ;;  %v3376_v2 = vsub.f32 %v6483_v3, %v3374_v59 }
 0xdb0   :  { %v3377_v28 = vmul.f32 1.442695, %v3375_v33  ;;  %v6542_v44 = vpop.eup %4934  ;;  %v3379_v4 = vmul.f32 1.442695, %v3376_v2 }
 0xdb1   :  { %v3307_v48 = vsel %vm386_vm1, %v6542_v44, 0.0 }
 0xdb2   :  { %3234 = vadd.xlane.f32.xlu2 %v3233_v38  ;;  %4936 = vpow2.f32 %v3377_v28 }
 0xdb3   :  { %4938 = vpow2.f32 %v3305_v55 }
 0xdb4   :  { %4940 = vpow2.f32 %v3231_v60 }
 0xdb5   :  { %v3444_v45 = vpop.xlane.xlu2 %3443 }
 0xdb6   :  { %v3448_v50 = vsub.f32 %v6489_v19, %v3444_v45  ;;  %v3452_v19 = vmul.f32 1.442695, %v3449_v10 }
 0xdb8   :  { %v6553_v9 = vpop.eup %4936  ;;  %v3450_v52 = vmul.f32 1.442695, %v3448_v50 }
 0xdb9   :  { %v3381_v29 = vsel %vm386_vm1, %v6553_v9, 0.0  ;;  %v6559_v14 = vpop.eup %4938 }
 0xdba   :  { %3136 = vadd.xlane.f32.xlu2 %v3135_v56  ;;  %4942 = vpow2.f32 %v3450_v52  ;;  %v3310_v54 = vsel %vm386_vm1, %v6559_v14, 0.0  ;;  %v6564_v5 = vpop.eup %4940 }
 0xdbb   :  { %v3236_v34 = vsel %vm386_vm1, %v6564_v5, 0.0  ;;  %4944 = vpow2.f32 %v3452_v19 }
 0xdbc   :  { %4946 = vpow2.f32 %v3379_v4 }
 0xdc0   :  { %v6566_v47 = vpop.eup %4942 }
 0xdc1   :  { %v3454_v35 = vsel %vm386_vm1, %v6566_v47, 0.0  ;;  %v6573_v57 = vpop.eup %4944 }
 0xdc2   :  { %3308 = vadd.xlane.f32.xlu2 %v3307_v48  ;;  %v3457_v43 = vsel %vm386_vm1, %v6573_v57, 0.0  ;;  %v6577_v25 = vpop.eup %4946  ;;  %v3249_v48 = vsel %vm427_vm2, %v6549_v49, 0 }
 0xdc3   :  { %v3384_v58 = vsel %vm386_vm1, %v6577_v25, 0.0 }
 0xdc4   :  { %3319 = vrot.lane.b32.xlu1 %v6549_v49, %s5436_s24  ;;  %s5441_s24 = smov [#allocation23]  }
 0xdca   :  { %3382 = vadd.xlane.f32.xlu2 %v3381_v29 }
 0xdd2   :  { %3311 = vadd.xlane.f32.xlu2 %v3310_v54 }
 0xdd8   :  { %3237 = vadd.xlane.f32.xlu0 %v3236_v34 }
 0xdda   :  { %3455 = vadd.xlane.f32.xlu2 %v3454_v35 }
 0xddf   :  { %v2987_v3 = vpop.xlane.xlu1 %2986 }
 0xde0   :  { %4948 = vrcp.f32 %v2987_v3 }
 0xde2   :  { %3458 = vadd.xlane.f32.xlu2 %v3457_v43 }
 0xde6   :  { %v4949_v20 = vpop.eup %4948 }
 0xde7   :  { %v2993_v0 = vmul.f32 %v4949_v20, %v6494_v40 }
 0xdec   :  { %3465 = vrot.lane.b32.xlu0 %v6549_v49, %s5437_s6  ;;  %s4224_s6 = sshll.u32 %s5441_s24, 4  ;;  %s4225_s6 = int_to_ptr.vmem [resolvable:$true] %s4224_s6 }
 0xdee   :  { %3385 = vadd.xlane.f32.xlu1 %v3384_v58 }
 0xdfa   :  { %3392 = vrot.lane.b32.xlu2 %v6549_v49, %s5435_s27 }
 0xdfd   :  { %v3061_v37 = vpop.xlane.xlu1 %3060 }
 0xe0d   :  { %v2913_v7 = vpop.xlane.xlu0 %2912 }
 0xe0e   :  { %4950 = vrcp.f32 %v2913_v7 }
 0xe14   :  { %v4951_v27 = vpop.eup %4950 }
 0xe15   :  { %v2990_v16 = vpop.xlane.xlu2 %2989  ;;  %v2919_v56 = vmul.f32 %v4951_v27, %v6506_v15 }
 0xe16   :  { %v2916_v30 = vpop.xlane.xlu1 %2915  ;;  %4952 = vrcp.f32 %v2990_v16 }
 0xe17   :  { %4954 = vrcp.f32 %v2916_v30 }
 0xe1c   :  { %v4953_v21 = vpop.eup %4952 }
 0xe1d   :  { %v4955_v38 = vpop.eup %4954  ;;  %v2994_v41 = vmul.f32 %v4953_v21, %v6512_v12  ;;  %v3064_v33 = vpop.xlane.xlu2 %3063 }
 0xe1e   :  { %v2920_v59 = vmul.f32 %v4955_v38, %v6515_v18  ;;  %4956 = vrcp.f32 %v3064_v33  ;;  %v3134_v12 = vpop.xlane.xlu1 %3133 }
 0xe1f   :  { %v2995_v28 = vpack.c.bf16 %v2994_v41, %v2993_v0  ;;  %4958 = vrcp.f32 %v3061_v37 }
 0xe20   :  { %v2921_v31 = vpack.c.bf16 %v2920_v59, %v2919_v56  ;;  %v3144_v23 = vpop.permute.xlu0 %3143  ;;  %4960 = vrcp.f32 %v3134_v12 }
 0xe21   :  { %v3149_v22 = vsel %vm427_vm2, %v3144_v23, 0  ;;  %4472 = vmatmul.msk.bf16.vlgmr.msra.gmra.mxu1 %vm386_vm1, %v2995_v28 }
 0xe22   :  { %4470 = vmatmul.msk.bf16.vlgmr.msrb.gmra.mxu3 %vm386_vm1, %v2921_v31  ;;  %3158 = vmatpush.bf16.msrb.mxu1 %v3149_v22 }
 0xe23   :  { %3258 = vmatpush.bf16.msrb.mxu3 %v3249_v48 }
 0xe24   :  { %v4957_v15 = vpop.eup %4956 }
 0xe25   :  { %v3235_v40 = vpop.xlane.xlu2 %3234  ;;  %v4959_v18 = vpop.eup %4958  ;;  %v3068_v55 = vmul.f32 %v4957_v15, %v6521_v26 }
 0xe26   :  { %v3067_v51 = vmul.f32 %v4959_v18, %v6499_v8  ;;  %v4961_v29 = vpop.eup %4960 }
 0xe27   :  { %v3140_v60 = vmul.f32 %v4961_v29, %v6523_v17 }
 0xe28   :  { %v3069_v50 = vpack.c.bf16 %v3068_v55, %v3067_v51 }
 0xe2d   :  { %v3137_v45 = vpop.xlane.xlu2 %3136 }
 0xe2e   :  { %4962 = vrcp.f32 %v3137_v45 }
 0xe32   :  { %4474 = vmatmul.msk.bf16.vlgmr.msra.gmra.mxu3 %vm386_vm1, %v3069_v50 }
 0xe34   :  { %v4963_v49 = vpop.eup %4962 }
 0xe35   :  { %v3141_v52 = vmul.f32 %v4963_v49, %v6537_v53  ;;  %v3309_v6 = vpop.xlane.xlu2 %3308  ;;  %v2659_v49 = vadd.f32 %v6432_v13, %v6426_v62  ;;  %v4593_v62 = vld [vmem:[#allocation11 + $0x30] sm:$0xff] }
 0xe36   :  { %v3320_v10 = vpop.permute.xlu1 %3319  ;;  %4964 = vrcp.f32 %v3309_v6 }
 0xe37   :  { %v3142_v54 = vpack.c.bf16 %v3141_v52, %v3140_v60  ;;  %v3325_v19 = vsel %vm427_vm2, %v3320_v10, 0  ;;  %v6622_v60 = vadd.f32 %v2659_v49, %v6188_v11 }
 0xe38   :  { %3334 = vmatpush.bf16.msra.mxu1 %v3325_v19 }
 0xe39   :  { %4476 = vmatmul.msk.bf16.vlgmr.msrb.gmra.mxu1 %vm386_vm1, %v3142_v54  ;;  %v2669_v54 = vsel %vm305_vm0, %v6622_v60, 0.0 }
 0xe3c   :  { %v4965_v34 = vpop.eup %4964 }
 0xe3d   :  { %v3383_v26 = vpop.xlane.xlu2 %3382  ;;  %v3315_v17 = vmul.f32 %v4965_v34, %v6542_v44  ;;  %v4594_v34 = vld [vmem:[#allocation11 + $0x38] sm:$0xff] }
 0xe3e   :  { %3548 = vmatpush.bf16.msra.mxu2 %v4594_v34 }
 0xe42   :  { %3549 = vmatpush.bf16.msra.mxu2 %v4593_v62 }
 0xe45   :  { %v3312_v8 = vpop.xlane.xlu2 %3311 }
 0xe46   :  { %4966 = vrcp.f32 %v3312_v8 }
 0xe47   :  { %4968 = vrcp.f32 %v3235_v40 }
 0xe4b   :  { %v3238_v35 = vpop.xlane.xlu0 %3237 }
 0xe4c   :  { %v4967_v2 = vpop.eup %4966  ;;  %4970 = vrcp.f32 %v3238_v35 }
 0xe4d   :  { %v3316_v53 = vmul.f32 %v4967_v2, %v6559_v14  ;;  %v3456_v4 = vpop.xlane.xlu2 %3455  ;;  %v4969_v58 = vpop.eup %4968 }
 0xe4e   :  { %v3241_v37 = vmul.f32 %v4969_v58, %v6530_v63  ;;  %4972 = vrcp.f32 %v3456_v4 }
 0xe4f   :  { %v3317_v43 = vpack.c.bf16 %v3316_v53, %v3315_v17 }
 0xe51   :  { %4480 = vmatmul.msk.bf16.vlgmr.msra.gmra.mxu1 %vm386_vm1, %v3317_v43 }
 0xe52   :  { %v4971_v3 = vpop.eup %4970 }
 0xe53   :  { %v3242_v7 = vmul.f32 %v4971_v3, %v6564_v5 }
 0xe54   :  { %v4973_v20 = vpop.eup %4972 }
 0xe55   :  { %v3243_v16 = vpack.c.bf16 %v3242_v7, %v3241_v37  ;;  %v3459_v30 = vpop.xlane.xlu2 %3458  ;;  %v3462_v0 = vmul.f32 %v4973_v20, %v6566_v47 }
 0xe56   :  { %4974 = vrcp.f32 %v3459_v30 }
 0xe57   :  { %4478 = vmatmul.msk.bf16.vlgmr.msrb.gmra.mxu3 %vm386_vm1, %v3243_v16  ;;  %4976 = vrcp.f32 %v3383_v26 }
 0xe5c   :  { %v4975_v44 = vpop.eup %4974 }
 0xe5d   :  { %v3463_v14 = vmul.f32 %v4975_v44, %v6573_v57  ;;  %v3393_v27 = vpop.permute.xlu2 %3392  ;;  %v4977_v33 = vpop.eup %4976 }
 0xe5e   :  { %v3398_v21 = vsel %vm427_vm2, %v3393_v27, 0  ;;  %v3466_v38 = vpop.permute.xlu0 %3465  ;;  %v3389_v57 = vmul.f32 %v4977_v33, %v6553_v9 }
 0xe5f   :  { %v3471_v63 = vsel %vm427_vm2, %v3466_v38, 0  ;;  %3407 = vmatpush.bf16.msra.mxu3 %v3398_v21  ;;  %v3464_v5 = vpack.c.bf16 %v3463_v14, %v3462_v0 }
 0xe60   :  { %3480 = vmatpush.bf16.msrb.mxu1 %v3471_v63 }
 0xe61   :  { %v3386_v41 = vpop.xlane.xlu1 %3385 }
 0xe62   :  { %4978 = vrcp.f32 %v3386_v41 }
 0xe63   :  { %4484 = vmatmul.msk.bf16.vlgmr.msrb.gmra.mxu1 %vm386_vm1, %v3464_v5 }
 0xe68   :  { %v4979_v56 = vpop.eup %4978 }
 0xe69   :  { %v3390_v59 = vmul.f32 %v4979_v56, %v6577_v25 }
 0xe6b   :  { %v3391_v28 = vpack.c.bf16 %v3390_v59, %v3389_v57 }
 0xe6d   :  { %4482 = vmatmul.msk.bf16.vlgmr.msra.gmra.mxu3 %vm386_vm1, %v3391_v28 }
 0xe9e   :  { %v3014_v47 = vpop.f32.mrf.mxu1 }
 0xea5   :  { %v2938_v31 = vpop.f32.mrf.mxu3 }
 0xea6   :  { %v3016_v23 = vpop.f32.mrf.mxu1 }
 0xea7   :  { %v4694_v22 = vpack.i.bf16 %v3016_v23, %v3014_v47 }
 0xea9   :  { %4695 = vrot.lane.b32.xlu0 %v4694_v22, %s5428_s20  ;;  %v4748_v22 = vld [vmem:[#allocation17 + $0x3] ss:$0 sm:$0xff] }
 0xead   :  { %v2940_v48 = vpop.f32.mrf.mxu3 }
 0xeb5   :  { %v3087_v40 = vpop.f32.mrf.mxu3 }
 0xeb6   :  { %v3160_v15 = vpop.f32.mrf.mxu1 }
 0xebd   :  { %v3089_v12 = vpop.f32.mrf.mxu3 }
 0xebe   :  { %v4699_v18 = vpack.i.bf16 %v3089_v12, %v3087_v40  ;;  %v3162_v55 = vpop.f32.mrf.mxu1 }
 0xebf   :  { %v4704_v45 = vpack.i.bf16 %v3162_v55, %v3160_v15  ;;  %v2664_v55 = vadd.f32 %v6435_v61, %v6190_v1 }
 0xec0   :  { %4700 = vrot.lane.b32.xlu2 %v4699_v18, %s5417_s25 }
 0xec1   :  { %4705 = vrot.lane.b32.xlu1 %v4704_v45, %s5438_s12 }
 0xece   :  { %v3336_v9 = vpop.f32.mrf.mxu1 }
 0xed6   :  { %v3338_v25 = vpop.f32.mrf.mxu1 }
 0xed7   :  { %v4709_v51 = vpack.i.bf16 %v3338_v25, %v3336_v9 }
 0xed9   :  { %4710 = vrot.lane.b32.xlu0 %v4709_v51, %s5428_s20  ;;  %v2672_v51 = vsel %vm305_vm0, %v2664_v55, 0.0 }
 0xeda   :  { %v3260_v50 = vpop.f32.mrf.mxu3 }
 0xee0   :  { %v3482_v29 = vpop.f32.mrf.mxu1 }
 0xee2   :  { %v3262_v52 = vpop.f32.mrf.mxu3 }
 0xee8   :  { %v3484_v6 = vpop.f32.mrf.mxu1 }
 0xee9   :  { %v4719_v10 = vpack.i.bf16 %v3484_v6, %v3482_v29 }
 0xeeb   :  { %2670 = vadd.xlane.f32.xlu1 %v2669_v54  ;;  %4720 = vrot.lane.b32.xlu0 %v4719_v10, %s5438_s12 }
 0xef0   :  { %v3409_v19 = vpop.f32.mrf.mxu3 }
 0xef8   :  { %v3411_v26 = vpop.f32.mrf.mxu3 }
 0xef9   :  { %v4714_v8 = vpack.i.bf16 %v3411_v26, %v3409_v19 }
 0xefb   :  { %4715 = vrot.lane.b32.xlu2 %v4714_v8, %s5417_s25 }
 0xf1a   :  { %v4701_v2 = vpop.permute.xlu2 %4700 }
 0xf1b   :  { %v4696_v11 = vpop.permute.xlu0 %4695  ;;  %v4703_v4 = vunpack.i.h.bf16 %v4701_v2  ;;  %v4702_v43 = vunpack.i.l.bf16 %v4701_v2 }
 0xf1c   :  { %v4698_v13 = vunpack.i.h.bf16 %v4696_v11  ;;  %v4697_v35 = vunpack.i.l.bf16 %v4696_v11 }
 0xf1e   :  { %v3190_v17 = vsel %vm386_vm1, %v2940_v48, %v4698_v13  ;;  %v3189_v53 = vsel %vm386_vm1, %v2938_v31, %v4697_v35 }
 0xf1f   :  { %v3191_v7 = vsel %vm634_vm3, %v3189_v53, %v4702_v43  ;;  %v3192_v16 = vsel %vm634_vm3, %v3190_v17, %v4703_v4 }
 0xf33   :  { %v4706_v58 = vpop.permute.xlu1 %4705 }
 0xf34   :  { %v4708_v3 = vunpack.i.h.bf16 %v4706_v58  ;;  %v4707_v37 = vunpack.i.l.bf16 %v4706_v58 }
 0xf36   :  { %v3193_v30 = vsel %vm636_vm4, %v3191_v7, %v4707_v37  ;;  %v3194_v20 = vsel %vm636_vm4, %v3192_v16, %v4708_v3 }
 0xf37   :  { %v3517_v44 = vpack.c.bf16 %v3194_v20, %v3193_v30 }
 0xf39   :  { %4493 = vmatmul.msk.bf16.vlgmr.msra.gmra.mxu2 %vm305_vm0, %v3517_v44 }
 0xf4b   :  { %v4711_v14 = vpop.permute.xlu0 %4710 }
 0xf4c   :  { %v4713_v21 = vunpack.i.h.bf16 %v4711_v14  ;;  %v4712_v38 = vunpack.i.l.bf16 %v4711_v14 }
 0xf4e   :  { %v3512_v41 = vsel %vm386_vm1, %v3262_v52, %v4713_v21  ;;  %v3511_v33 = vsel %vm386_vm1, %v3260_v50, %v4712_v38 }
 0xf55   :  { %v4716_v27 = vpop.permute.xlu2 %4715 }
 0xf56   :  { %v4718_v0 = vunpack.i.h.bf16 %v4716_v27  ;;  %v4717_v63 = vunpack.i.l.bf16 %v4716_v27 }
 0xf58   :  { %v3514_v59 = vsel %vm634_vm3, %v3512_v41, %v4718_v0  ;;  %v3513_v28 = vsel %vm634_vm3, %v3511_v33, %v4717_v63 }
 0xf5d   :  { %v4721_v5 = vpop.permute.xlu0 %4720 }
 0xf5e   :  { %v4723_v56 = vunpack.i.h.bf16 %v4721_v5  ;;  %v4722_v57 = vunpack.i.l.bf16 %v4721_v5  ;;  %v2671_v52 = vpop.xlane.xlu1 %2670 }
 0xf5f   :  { %v2675_v1 = vmul.f32 %v2671_v52, %v6059_v24  ;;  %v4596_v52 = vld [vmem:[#allocation19 + $0x8] sm:$0xff] }
 0xf60   :  { %v3515_v47 = vsel %vm636_vm4, %v3513_v28, %v4722_v57  ;;  %v3516_v31 = vsel %vm636_vm4, %v3514_v59, %v4723_v56  ;;  %3765 = vmatpush.bf16.msrb.mxu3 %v4596_v52 }
 0xf61   :  { %v3518_v23 = vpack.c.bf16 %v3516_v31, %v3515_v47  ;;  %v6654_v10 = vsub.f32 %v6622_v60, %v2675_v1 }
 0xf63   :  { %4494 = vmatmul.msk.bf16.gmra.mxu2 %vm305_vm0, %v3518_v23  ;;  %v2679_v19 = vmul.f32 %v6654_v10, %v6654_v10 }
 0xfbc   :  { %v3551_v48 = vpop.f32.mrf.mxu2 }
 0xfbd   :  { %v3552_v40 = vadd.f32 %v4748_v22, %v3551_v48 }
 0xfbf   :  { %v3561_v15 = vadd.f32 %v3552_v40, %v6193_v39 }
 0xfc1   :  { %v3569_v12 = vsel %vm305_vm0, %v3561_v15, 0.0 }
 0xfc2   :  { %3570 = vadd.xlane.f32.xlu2 %v3569_v12 }
 0xfc4   :  { %v3553_v18 = vpop.f32.mrf.mxu2 }
 0xfc5   :  { %v3554_v45 = vadd.f32 %v4748_v22, %v3553_v18 }
 0xfc7   :  { %v3562_v9 = vadd.f32 %v3554_v45, %v6196_v32 }
 0xfc9   :  { %v3572_v25 = vsel %vm305_vm0, %v3562_v9, 0.0 }
 0xfca   :  { %3573 = vadd.xlane.f32.xlu0 %v3572_v25  ;;  %2673 = vadd.xlane.f32.xlu2 %v2672_v51 }
 0xfe6   :  { %v3556_v50 = vpop.f32.mrf.mxu2 }
 0xfe7   :  { %v3557_v29 = vadd.f32 %v4748_v22, %v3556_v50 }
 0xfe9   :  { %v3563_v39 = vadd.f32 %v3557_v29, %v6222_v36  ;;  %v2681_v36 = vsel %vm305_vm0, %v2679_v19, 0.0 }
 0xfeb   :  { %v3575_v49 = vsel %vm305_vm0, %v3563_v39, 0.0 }
 0xfec   :  { %3576 = vadd.xlane.f32.xlu0 %v3575_v49 }
 0xfee   :  { %v3558_v6 = vpop.f32.mrf.mxu2 }
 0xfef   :  { %v3559_v61 = vadd.f32 %v4748_v22, %v3558_v6  ;;  %v4602_v6 = vld [vmem:[#allocation19 + $0x18] sm:$0xff] }
 0xff0   :  { %3960 = vmatpush.bf16.msra.mxu1 %v4602_v6 }
 0xff1   :  { %v3564_v32 = vadd.f32 %v3559_v61, %v6225_v42 }
 0xff3   :  { %v3578_v54 = vsel %vm305_vm0, %v3564_v32, 0.0 }
 0xff4   :  { %3579 = vadd.xlane.f32.xlu2 %v3578_v54 }
 0xffc   :  { %2682 = vadd.xlane.f32.xlu2 %v2681_v36 }
0x1035   :  { %v3571_v26 = vpop.xlane.xlu2 %3570 }
0x1036   :  { %v3581_v8 = vmul.f32 %v3571_v26, %v6059_v24 }
0x1038   :  { %v6661_v34 = vsub.f32 %v3561_v15, %v3581_v8 }
0x103a   :  { %v3589_v42 = vmul.f32 %v6661_v34, %v6661_v34 }
0x103c   :  { %v3593_v60 = vsel %vm305_vm0, %v3589_v42, 0.0  ;;  %v4595_v42 = vld [vmem:[#allocation19] sm:$0xff] }
0x103d   :  { %v3574_v62 = vpop.xlane.xlu0 %3573  ;;  %3594 = vadd.xlane.f32.xlu1 %v3593_v60  ;;  %v2674_v11 = vpop.xlane.xlu2 %2673  ;;  %v4601_v60 = vld [vmem:[#allocation19 + $0x10] sm:$0xff]  ;;  %3766 = vmatpush.bf16.msrb.mxu3 %v4595_v42 }
0x103e   :  { %v3582_v13 = vmul.f32 %v3574_v62, %v6059_v24  ;;  %v2676_v35 = vmul.f32 %v2674_v11, %v6059_v24  ;;  %3961 = vmatpush.bf16.msra.mxu1 %v4601_v60 }
0x1040   :  { %v6668_v2 = vsub.f32 %v3562_v9, %v3582_v13  ;;  %v6670_v17 = vsub.f32 %v2664_v55, %v2676_v35 }
0x1042   :  { %v3590_v53 = vmul.f32 %v6668_v2, %v6668_v2  ;;  %v2680_v4 = vmul.f32 %v6670_v17, %v6670_v17 }
0x1044   :  { %v3596_v43 = vsel %vm305_vm0, %v3590_v53, 0.0  ;;  %v2684_v58 = vsel %vm305_vm0, %v2680_v4, 0.0 }
0x1045   :  { %3597 = vadd.xlane.f32.xlu0 %v3596_v43  ;;  %2685 = vadd.xlane.f32.xlu1 %v2684_v58 }
0x105f   :  { %v3577_v3 = vpop.xlane.xlu0 %3576 }
0x1060   :  { %v3583_v37 = vmul.f32 %v3577_v3, %v6059_v24 }
0x1062   :  { %v6679_v7 = vsub.f32 %v3563_v39, %v3583_v37 }
0x1064   :  { %v3591_v16 = vmul.f32 %v6679_v7, %v6679_v7 }
0x1066   :  { %v3599_v30 = vsel %vm305_vm0, %v3591_v16, 0.0 }
0x1067   :  { %3600 = vadd.xlane.f32.xlu0 %v3599_v30  ;;  %v3580_v20 = vpop.xlane.xlu2 %3579 }
0x1068   :  { %v3584_v44 = vmul.f32 %v3580_v20, %v6059_v24 }
0x106a   :  { %v6685_v14 = vsub.f32 %v3564_v32, %v3584_v44 }
0x106c   :  { %v3592_v27 = vmul.f32 %v6685_v14, %v6685_v14 }
0x106e   :  { %v3602_v21 = vsel %vm305_vm0, %v3592_v27, 0.0 }
0x106f   :  { %3603 = vadd.xlane.f32.xlu2 %v3602_v21  ;;  %v2683_v38 = vpop.xlane.xlu2 %2682 }
0x1070   :  { %v2687_v0 = vmul.f32 %v2683_v38, %v6102_v46 }
0x1072   :  { %4980 = vrsqrt.f32 %v2687_v0  ;;  %vm2701_vm1 = vcmp.eq.f32.partialorder %v2687_v0, inf  ;;  %v2704_v23 = vand.u32 2147483648, %v2687_v0  ;;  %vm2703_vm2 = vcmp.eq.f32.partialorder %v2687_v0, 0.0 }
0x1078   :  { %v4981_v63 = vpop.eup %4980 }
0x1079   :  { %v2695_v5 = vmul.f32 %v4981_v63, %v2687_v0 }
0x107b   :  { %v2696_v41 = vmul.f32 %v4981_v63, %v2695_v5 }
0x107d   :  { %v2697_v33 = vmul.f32 0.5, %v2696_v41 }
0x107f   :  { %v2698_v56 = vsub.f32 1.5, %v2697_v33 }
0x1081   :  { %v2699_v57 = vmul.f32 %v4981_v63, %v2698_v56 }
0x1083   :  { %v2700_v28 = vmul.f32 %v2699_v57, %v2687_v0 }
0x1085   :  { %v2702_v31 = vsel %vm2701_vm1, %v2687_v0, %v2700_v28  ;;  %v4747_v28 = vld [vmem:[%s6946_s16 + $0x2] ss:$0 sm:$0xff] }
0x1086   :  { %v2705_v22 = vsel %vm2703_vm2, %v2704_v23, %v2702_v31 }
0x1087   :  { %v6694_v45 = vadd.f32 1e-06, %v2705_v22 }
0x1089   :  { %vm2725_vm15 = vweird.f32 %v6694_v45 }
0x10b0   :  { %v3595_v59 = vpop.xlane.xlu1 %3594 }
0x10b1   :  { %v3605_v47 = vmul.f32 %v3595_v59, %v6102_v46  ;;  %v2731_v59 = vand.u32 2147483648, %v6694_v45 }
0x10b3   :  { %4982 = vrsqrt.f32 %v3605_v47  ;;  %vm3623_vm3 = vcmp.eq.f32.partialorder %v3605_v47, inf  ;;  %v3626_v19 = vand.u32 2147483648, %v3605_v47  ;;  %vm3625_vm4 = vcmp.eq.f32.partialorder %v3605_v47, 0.0 }
0x10b8   :  { %v3598_v48 = vpop.xlane.xlu0 %3597  ;;  %v2686_v40 = vpop.xlane.xlu1 %2685 }
0x10b9   :  { %v4983_v15 = vpop.eup %4982  ;;  %v3606_v12 = vmul.f32 %v3598_v48, %v6102_v46  ;;  %v2688_v18 = vmul.f32 %v2686_v40, %v6102_v46 }
0x10ba   :  { %v3617_v55 = vmul.f32 %v4983_v15, %v3605_v47 }
0x10bb   :  { %4984 = vrsqrt.f32 %v3606_v12  ;;  %vm3635_vm10 = vcmp.eq.f32.partialorder %v3606_v12, inf  ;;  %v3638_v16 = vand.u32 2147483648, %v3606_v12  ;;  %vm3637_vm11 = vcmp.eq.f32.partialorder %v3606_v12, 0.0 }
0x10bc   :  { %v3618_v9 = vmul.f32 %v4983_v15, %v3617_v55  ;;  %4986 = vrsqrt.f32 %v2688_v18  ;;  %vm2713_vm12 = vcmp.eq.f32.partialorder %v2688_v18, inf  ;;  %v2716_v44 = vand.u32 2147483648, %v2688_v18 }
0x10bd   :  { %4988 = vrcp.f32 %v6694_v45  ;;  %vm2715_vm13 = vcmp.eq.f32.partialorder %v2688_v18, 0.0  ;;  %v2732_v55 = vor.u32 1.1754944e-38, %v2731_v59 }
0x10be   :  { %v3619_v25 = vmul.f32 0.5, %v3618_v9 }
0x10c0   :  { %v3620_v51 = vsub.f32 1.5, %v3619_v25  ;;  %v2692_v25 = vmul.f32 %v4747_v28, %v6654_v10 }
0x10c1   :  { %v4985_v50 = vpop.eup %4984 }
0x10c2   :  { %v4987_v29 = vpop.eup %4986  ;;  %v3621_v39 = vmul.f32 %v4983_v15, %v3620_v51  ;;  %v3629_v49 = vmul.f32 %v4985_v50, %v3606_v12 }
0x10c3   :  { %v2707_v1 = vmul.f32 %v4987_v29, %v2688_v18  ;;  %v6697_v54 = vpop.eup %4988 }
0x10c4   :  { %v3622_v61 = vmul.f32 %v3621_v39, %v3605_v47  ;;  %v3630_v32 = vmul.f32 %v4985_v50, %v3629_v49  ;;  %v2721_v53 = vmul.f32 %v6697_v54, %v6694_v45  ;;  %vm2726_vm14 = vweird.f32 %v6697_v54 }
0x10c5   :  { %v2708_v36 = vmul.f32 %v4987_v29, %v2707_v1  ;;  %vm6713_vm5 = vmor %vm2725_vm15, %vm2726_vm14 }
0x10c6   :  { %v3624_v26 = vsel %vm3623_vm3, %v3605_v47, %v3622_v61  ;;  %v3631_v8 = vmul.f32 0.5, %v3630_v32  ;;  %v2722_v37 = vsub.f32 1.0, %v2721_v53  ;;  %v2729_v47 = vand.u32 2147483647, %v6694_v45 }
0x10c7   :  { %v3627_v62 = vsel %vm3625_vm4, %v3626_v19, %v3624_v26  ;;  %v2709_v11 = vmul.f32 0.5, %v2708_v36 }
0x10c8   :  { %v3664_v13 = vadd.f32 1e-06, %v3627_v62  ;;  %v3632_v35 = vsub.f32 1.5, %v3631_v8  ;;  %v2723_v5 = vmul.f32 %v6697_v54, %v2722_v37  ;;  %vm2730_vm7 = vcmp.eq.f32.partialorder %v2729_v47, 8.507059e+37 }
0x10c9   :  { %v2710_v4 = vsub.f32 1.5, %v2709_v11  ;;  %v2693_v11 = vmul.f32 %v4747_v28, %v6670_v17 }
0x10ca   :  { %4990 = vrcp.f32 %v3664_v13  ;;  %v3633_v43 = vmul.f32 %v4985_v50, %v3632_v35  ;;  %v2724_v56 = vadd.f32 %v6697_v54, %v2723_v5  ;;  %v3677_v22 = vand.u32 2147483647, %v3664_v13  ;;  %v6725_v50 = vld [vmem:[%s6946_s16 + $0x3] ss:$0 sm:$0xff] }
0x10cb   :  { %v2711_v58 = vmul.f32 %v4987_v29, %v2710_v4  ;;  %vm3673_vm8 = vweird.f32 %v3664_v13  ;;  %v3612_v42 = vmul.f32 %v6725_v50, %v6661_v34  ;;  %v3613_v60 = vmul.f32 %v6725_v50, %v6668_v2  ;;  %v4750_v2 = vld [vmem:[%s6947_s17 + $0x2] ss:$0 sm:$0xff] }
0x10cc   :  { %v3634_v3 = vmul.f32 %v3633_v43, %v3606_v12  ;;  %v2728_v40 = vsel %vm6713_vm5, %v6697_v54, %v2724_v56  ;;  %vm6734_vm1 = vcmp.eq.f32.partialorder %v3677_v22, 8.507059e+37  ;;  %v3614_v53 = vmul.f32 %v6725_v50, %v6679_v7 }
0x10cd   :  { %v2712_v30 = vmul.f32 %v2711_v58, %v2688_v18  ;;  %v2733_v39 = vsel %vm2730_vm7, %v2732_v55, %v2728_v40 }
0x10ce   :  { %v3636_v20 = vsel %vm3635_vm10, %v3606_v12, %v3634_v3  ;;  %v3679_v12 = vand.u32 2147483648, %v3664_v13  ;;  %v2734_v4 = vmul.f32 %v2733_v39, %v2692_v25 }
0x10cf   :  { %v3639_v27 = vsel %vm3637_vm11, %v3638_v16, %v3636_v20  ;;  %v2714_v21 = vsel %vm2713_vm12, %v2688_v18, %v2712_v30  ;;  %v6763_v16 = vld [vmem:[%s6947_s17 + $0x3] ss:$0 sm:$0xff] }
0x10d0   :  { %v4991_v38 = vpop.eup %4990  ;;  %v3665_v0 = vadd.f32 1e-06, %v3639_v27  ;;  %v2717_v63 = vsel %vm2715_vm13, %v2716_v44, %v2714_v21  ;;  %v3680_v61 = vor.u32 1.1754944e-38, %v3679_v12 }
0x10d1   :  { %v6702_v41 = vadd.f32 1e-06, %v2717_v63  ;;  %v3669_v33 = vmul.f32 %v4991_v38, %v3664_v13  ;;  %vm3674_vm6 = vweird.f32 %v4991_v38  ;;  %v6767_v63 = vadd.f32 %v4750_v2, %v2734_v4 }
0x10d2   :  { %4992 = vrcp.f32 %v3665_v0  ;;  %vm6730_vm9 = vmor %vm3673_vm8, %vm3674_vm6  ;;  %v3692_v32 = vand.u32 2147483647, %v3665_v0  ;;  %v3694_v19 = vand.u32 2147483648, %v3665_v0  ;;  %vm3688_vm4 = vweird.f32 %v3665_v0 }
0x10d3   :  { %4994 = vrcp.f32 %v6702_v41  ;;  %v3670_v57 = vsub.f32 1.0, %v3669_v33  ;;  %v2746_v54 = vand.u32 2147483648, %v6702_v41  ;;  %v2744_v26 = vand.u32 2147483647, %v6702_v41 }
0x10d4   :  { %vm2740_vm10 = vweird.f32 %v6702_v41  ;;  %vm3693_vm13 = vcmp.eq.f32.partialorder %v3692_v32, 8.507059e+37  ;;  %v3695_v43 = vor.u32 1.1754944e-38, %v3694_v19 }
0x10d5   :  { %v3671_v31 = vmul.f32 %v4991_v38, %v3670_v57  ;;  %v2747_v34 = vor.u32 1.1754944e-38, %v2746_v54  ;;  %vm2745_vm14 = vcmp.eq.f32.partialorder %v2744_v26, 8.507059e+37 }
0x10d7   :  { %v3672_v15 = vadd.f32 %v4991_v38, %v3671_v31 }
0x10d8   :  { %v4993_v48 = vpop.eup %4992 }
0x10d9   :  { %v4995_v18 = vpop.eup %4994  ;;  %v3684_v9 = vmul.f32 %v4993_v48, %v3665_v0  ;;  %v3676_v1 = vsel %vm6730_vm9, %v4991_v38, %v3672_v15  ;;  %vm3689_vm2 = vweird.f32 %v4993_v48 }
0x10da   :  { %v3601_v45 = vpop.xlane.xlu0 %3600  ;;  %v2736_v51 = vmul.f32 %v4995_v18, %v6702_v41  ;;  %vm2741_vm3 = vweird.f32 %v4995_v18  ;;  %v3681_v62 = vsel %vm6734_vm1, %v3680_v61, %v3676_v1  ;;  %vm6751_vm11 = vmor %vm3688_vm4, %vm3689_vm2 }
0x10db   :  { %v6728_v29 = vmul.f32 %v3601_v45, %v6102_v46  ;;  %v3685_v52 = vsub.f32 1.0, %v3684_v9  ;;  %vm2742_vm12 = vmor %vm2740_vm10, %vm2741_vm3  ;;  %v3682_v17 = vmul.f32 %v3681_v62, %v3612_v42 }
0x10dc   :  { %v2737_v6 = vsub.f32 1.0, %v2736_v51 }
0x10dd   :  { %4996 = vrsqrt.f32 %v6728_v29  ;;  %v3686_v8 = vmul.f32 %v4993_v48, %v3685_v52  ;;  %v6772_v33 = vadd.f32 %v6763_v16, %v3682_v17  ;;  %vm3647_vm15 = vcmp.eq.f32.partialorder %v6728_v29, inf }
0x10de   :  { %v2738_v36 = vmul.f32 %v4995_v18, %v2737_v6  ;;  %v3650_v15 = vand.u32 2147483648, %v6728_v29  ;;  %vm3649_vm5 = vcmp.eq.f32.partialorder %v6728_v29, 0.0 }
0x10df   :  { %v3687_v35 = vadd.f32 %v4993_v48, %v3686_v8 }
0x10e0   :  { %v2739_v13 = vadd.f32 %v4995_v18, %v2738_v36 }
0x10e1   :  { %v3691_v37 = vsel %vm6751_vm11, %v4993_v48, %v3687_v35 }
0x10e2   :  { %v3604_v58 = vpop.xlane.xlu2 %3603  ;;  %v2743_v3 = vsel %vm2742_vm12, %v4995_v18, %v2739_v13  ;;  %v3696_v27 = vsel %vm3693_vm13, %v3695_v43, %v3691_v37  ;;  %vm3812_vm12 = vcmask 523264  }
0x10e3   :  { %v4997_v30 = vpop.eup %4996  ;;  %v3608_v20 = vmul.f32 %v3604_v58, %v6102_v46  ;;  %v2748_v44 = vsel %vm2745_vm14, %v2747_v34, %v2743_v3  ;;  %v3697_v0 = vmul.f32 %v3696_v27, %v3613_v60  ;;  %v4603_v27 = vld [vmem:[%s6944_s14 + $0x20] sm:$0xff] }
0x10e4   :  { %v3641_v21 = vmul.f32 %v4997_v30, %v6728_v29  ;;  %v2749_v38 = vmul.f32 %v2748_v44, %v2693_v11  ;;  %v4599_v44 = vld [vmem:[%s6944_s14 + $0x10] sm:$0xff] }
0x10e5   :  { %4998 = vrsqrt.f32 %v3608_v20  ;;  %v6775_v56 = vadd.f32 %v6763_v16, %v3697_v0  ;;  %vm3659_vm6 = vcmp.eq.f32.partialorder %v3608_v20, inf  ;;  %v3662_v39 = vand.u32 2147483648, %v3608_v20 }
0x10e6   :  { %v3642_v5 = vmul.f32 %v4997_v30, %v3641_v21  ;;  %v6769_v41 = vadd.f32 %v4750_v2, %v2749_v38  ;;  %vm3661_vm7 = vcmp.eq.f32.partialorder %v3608_v20, 0.0  ;;  %v3615_v2 = vmul.f32 %v6725_v50, %v6685_v14  ;;  %v4606_v14 = vld [vmem:[%s6944_s14 + $0x38] sm:$0xff]  ;;  %v4605_v50 = vld [vmem:[%s6944_s14 + $0x30] sm:$0xff]  ;;  %v4598_v21 = vld [vmem:[%s6944_s14 + $0x8] sm:$0xff] }
0x10e7   :  { %v3929_v28 = vpack.c.bf16 %v6775_v56, %v6772_v33  ;;  %4027 = vmatpush.bf16.msra.mxu3 %v4606_v14  ;;  %v4597_v38 = vld [vmem:[%s6944_s14] sm:$0xff] }
0x10e8   :  { %v3643_v57 = vmul.f32 0.5, %v3642_v5  ;;  %v3739_v59 = vpack.c.bf16 %v6769_v41, %v6767_v63  ;;  %v4752_v5 = vld [vmem:[#allocation20 + $0x1] ss:$0 sm:$0xff] }
0x10e9   :  { %4533 = vmatmul.msk.bf16.vlgmr.msra.gmra.mxu1 %vm305_vm0, %v3929_v28 }
0x10ea   :  { %v3644_v47 = vsub.f32 1.5, %v3643_v57  ;;  %4505 = vmatmul.msk.bf16.vlgmr.msrb.gmra.mxu3 %vm305_vm0, %v3739_v59 }
0x10eb   :  { %v4999_v31 = vpop.eup %4998  ;;  %4028 = vmatpush.bf16.msra.mxu3 %v4605_v50 }
0x10ec   :  { %v3645_v23 = vmul.f32 %v4997_v30, %v3644_v47  ;;  %v3653_v22 = vmul.f32 %v4999_v31, %v3608_v20  ;;  %v4753_v47 = vld [vmem:[#allocation20] ss:$0 sm:$0xff] }
0x10ee   :  { %v3646_v48 = vmul.f32 %v3645_v23, %v6728_v29  ;;  %v3654_v40 = vmul.f32 %v4999_v31, %v3653_v22 }
0x10f0   :  { %v3648_v12 = vsel %vm3647_vm15, %v6728_v29, %v3646_v48  ;;  %v3655_v18 = vmul.f32 0.5, %v3654_v40 }
0x10f1   :  { %v3651_v55 = vsel %vm3649_vm5, %v3650_v15, %v3648_v12 }
0x10f2   :  { %v3666_v9 = vadd.f32 1e-06, %v3651_v55  ;;  %v3656_v25 = vsub.f32 1.5, %v3655_v18 }
0x10f4   :  { %5000 = vrcp.f32 %v3666_v9  ;;  %v3657_v45 = vmul.f32 %v4999_v31, %v3656_v25  ;;  %v3709_v19 = vand.u32 2147483648, %v3666_v9  ;;  %vm3703_vm9 = vweird.f32 %v3666_v9 }
0x10f5   :  { %v3707_v36 = vand.u32 2147483647, %v3666_v9 }
0x10f6   :  { %v3658_v51 = vmul.f32 %v3657_v45, %v3608_v20  ;;  %v3710_v60 = vor.u32 1.1754944e-38, %v3709_v19  ;;  %v4755_v19 = vld [vmem:[#allocation22 + $0x1] ss:$0 sm:$0xff] }
0x10f7   :  { %vm3708_vm2 = vcmp.eq.f32.partialorder %v3707_v36, 8.507059e+37 }
0x10f8   :  { %v3660_v49 = vsel %vm3659_vm6, %v3608_v20, %v3658_v51  ;;  %v4604_v20 = vld [vmem:[%s6944_s14 + $0x28] sm:$0xff] }
0x10f9   :  { %v3663_v10 = vsel %vm3661_vm7, %v3662_v39, %v3660_v49  ;;  %4029 = vmatpush.bf16.msra.mxu3 %v4604_v20 }
0x10fa   :  { %v5001_v52 = vpop.eup %5000  ;;  %v3667_v6 = vadd.f32 1e-06, %v3663_v10 }
0x10fb   :  { %v3699_v1 = vmul.f32 %v5001_v52, %v3666_v9  ;;  %vm3704_vm8 = vweird.f32 %v5001_v52 }
0x10fc   :  { %5002 = vrcp.f32 %v3667_v6  ;;  %vm3705_vm1 = vmor %vm3703_vm9, %vm3704_vm8  ;;  %v3724_v62 = vand.u32 2147483648, %v3667_v6  ;;  %v3722_v13 = vand.u32 2147483647, %v3667_v6  ;;  %vm3718_vm4 = vweird.f32 %v3667_v6 }
0x10fd   :  { %v3700_v61 = vsub.f32 1.0, %v3699_v1  ;;  %4030 = vmatpush.bf16.msra.mxu3 %v4603_v27 }
0x10fe   :  { %v3725_v34 = vor.u32 1.1754944e-38, %v3724_v62  ;;  %vm3723_vm11 = vcmp.eq.f32.partialorder %v3722_v13, 8.507059e+37 }
0x10ff   :  { %v3701_v32 = vmul.f32 %v5001_v52, %v3700_v61 }
0x1101   :  { %v3702_v54 = vadd.f32 %v5001_v52, %v3701_v32 }
0x1102   :  { %v5003_v29 = vpop.eup %5002 }
0x1103   :  { %v3714_v26 = vmul.f32 %v5003_v29, %v3667_v6  ;;  %v3706_v8 = vsel %vm3705_vm1, %v5001_v52, %v3702_v54  ;;  %vm3719_vm3 = vweird.f32 %v5003_v29  ;;  %v4754_v6 = vld [vmem:[#allocation22] ss:$0 sm:$0xff] }
0x1104   :  { %v3711_v35 = vsel %vm3708_vm2, %v3710_v60, %v3706_v8  ;;  %vm3720_vm10 = vmor %vm3718_vm4, %vm3719_vm3 }
0x1105   :  { %v3715_v42 = vsub.f32 1.0, %v3714_v26  ;;  %v3712_v43 = vmul.f32 %v3711_v35, %v3614_v53 }
0x1107   :  { %v3716_v11 = vmul.f32 %v5003_v29, %v3715_v42  ;;  %v6793_v37 = vadd.f32 %v6763_v16, %v3712_v43 }
0x1109   :  { %v3717_v4 = vadd.f32 %v5003_v29, %v3716_v11 }
0x110b   :  { %v3721_v58 = vsel %vm3720_vm10, %v5003_v29, %v3717_v4 }
0x110c   :  { %v3726_v3 = vsel %vm3723_vm11, %v3725_v34, %v3721_v58 }
0x110d   :  { %v3727_v17 = vmul.f32 %v3726_v3, %v3615_v2 }
0x110f   :  { %v6796_v30 = vadd.f32 %v6763_v16, %v3727_v17  ;;  %v4600_v16 = vld [vmem:[%s6944_s14 + $0x18] sm:$0xff] }
0x1110   :  { %3820 = vmatpush.bf16.msra.mxu0 %v4600_v16 }
0x1111   :  { %v3930_v7 = vpack.c.bf16 %v6796_v30, %v6793_v37 }
0x1113   :  { %4534 = vmatmul.msk.bf16.gmra.mxu1 %vm305_vm0, %v3930_v7 }
0x1114   :  { %3821 = vmatpush.bf16.msra.mxu0 %v4599_v44 }
0x1118   :  { %3822 = vmatpush.bf16.msra.mxu0 %v4598_v21 }
0x111c   :  { %3823 = vmatpush.bf16.msra.mxu0 %v4597_v38 }
0x1166   :  { %v3963_v0 = vpop.f32.mrf.mxu1 }
0x1167   :  { %v3964_v59 = vadd.f32 %v4752_v5, %v3963_v0 }
0x1169   :  { %v3973_v23 = vmax.f32 %v3964_v59, 0.0 }
0x116d   :  { %v3768_v57 = vpop.f32.mrf.mxu3 }
0x116e   :  { %v3965_v28 = vpop.f32.mrf.mxu1  ;;  %v3769_v48 = vadd.f32 %v4753_v47, %v3768_v57 }
0x116f   :  { %v3966_v31 = vadd.f32 %v4752_v5, %v3965_v28 }
0x1170   :  { %v3773_v18 = vmax.f32 %v3769_v48, 0.0 }
0x1171   :  { %v3974_v22 = vmax.f32 %v3966_v31, 0.0 }
0x1173   :  { %v3986_v40 = vpack.c.bf16 %v3974_v22, %v3973_v23 }
0x1175   :  { %v3770_v15 = vpop.f32.mrf.mxu3  ;;  %4559 = vmatmul.msk.bf16.vlgmr.msra.gmra.mxu3 %vm3812_vm12, %v3986_v40 }
0x1176   :  { %v3771_v12 = vadd.f32 %v4753_v47, %v3770_v15 }
0x1178   :  { %v3774_v55 = vmax.f32 %v3771_v12, 0.0 }
0x117a   :  { %v3783_v9 = vpack.c.bf16 %v3774_v55, %v3773_v18 }
0x117c   :  { %4522 = vmatmul.msk.bf16.vlgmr.msra.gmra.mxu0 %vm3812_vm12, %v3783_v9 }
0x1190   :  { %v3968_v25 = vpop.f32.mrf.mxu1 }
0x1191   :  { %v3969_v45 = vadd.f32 %v4752_v5, %v3968_v25 }
0x1193   :  { %v3975_v49 = vmax.f32 %v3969_v45, 0.0 }
0x1198   :  { %v3970_v51 = vpop.f32.mrf.mxu1 }
0x1199   :  { %v3971_v39 = vadd.f32 %v4752_v5, %v3970_v51 }
0x119b   :  { %v3976_v10 = vmax.f32 %v3971_v39, 0.0 }
0x119d   :  { %v3987_v52 = vpack.c.bf16 %v3976_v10, %v3975_v49 }
0x119f   :  { %4560 = vmatmul.msk.bf16.gmra.mxu3 %vm3812_vm12, %v3987_v52 }
0x11f8   :  { %v4032_v61 = vpop.f32.mrf.mxu3 }
0x11f9   :  { %v3825_v1 = vpop.f32.mrf.mxu0  ;;  %v4033_v62 = vadd.f32 %v4755_v19, %v4032_v61 }
0x11fa   :  { %v3826_v32 = vadd.f32 %v4754_v6, %v3825_v1 }
0x11fb   :  { %v4042_v13 = vadd.f32 %v4033_v62, %v6772_v33 }
0x11fc   :  { %v3830_v54 = vadd.f32 %v3826_v32, %v6767_v63 }
0x11fd   :  { %v4050_v35 = vsel %vm305_vm0, %v4042_v13, 0.0 }
0x11fe   :  { %v3836_v29 = vsel %vm305_vm0, %v3830_v54, 0.0 }
0x11ff   :  { %3837 = vadd.xlane.f32.xlu1 %v3836_v29 }
0x1200   :  { %v4034_v26 = vpop.f32.mrf.mxu3 }
0x1201   :  { %v3827_v36 = vpop.f32.mrf.mxu0  ;;  %v4035_v42 = vadd.f32 %v4755_v19, %v4034_v26 }
0x1202   :  { %v3828_v8 = vadd.f32 %v4754_v6, %v3827_v36 }
0x1203   :  { %v4043_v50 = vadd.f32 %v4035_v42, %v6775_v56 }
0x1204   :  { %v3831_v60 = vadd.f32 %v3828_v8, %v6769_v41 }
0x1205   :  { %v4053_v44 = vsel %vm305_vm0, %v4043_v50, 0.0 }
0x1206   :  { %v3839_v11 = vsel %vm305_vm0, %v3831_v60, 0.0 }
0x1207   :  { %3840 = vadd.xlane.f32.xlu0 %v3839_v11 }
0x120f   :  { %4051 = vadd.xlane.f32.xlu0 %v4050_v35 }
0x1222   :  { %v4037_v63 = vpop.f32.mrf.mxu3 }
0x1223   :  { %v4038_v53 = vadd.f32 %v4755_v19, %v4037_v63 }
0x1225   :  { %v4044_v38 = vadd.f32 %v4038_v53, %v6793_v37 }
0x1227   :  { %v4056_v57 = vsel %vm305_vm0, %v4044_v38, 0.0 }
0x122a   :  { %v4039_v4 = vpop.f32.mrf.mxu3 }
0x122b   :  { %v4040_v34 = vadd.f32 %v4755_v19, %v4039_v4 }
0x122d   :  { %v4045_v2 = vadd.f32 %v4040_v34, %v6796_v30 }
0x122f   :  { %v4059_v43 = vsel %vm305_vm0, %v4045_v2, 0.0 }
0x1230   :  { %4060 = vadd.xlane.f32.xlu0 %v4059_v43 }
0x1272   :  { %v3838_v58 = vpop.xlane.xlu1 %3837 }
0x1273   :  { %v3842_v41 = vmul.f32 %v3838_v58, %v6059_v24 }
0x1275   :  { %v6837_v3 = vsub.f32 %v3830_v54, %v3842_v41 }
0x1277   :  { %v3846_v33 = vmul.f32 %v6837_v3, %v6837_v3 }
0x1279   :  { %v3848_v17 = vsel %vm305_vm0, %v3846_v33, 0.0 }
0x127a   :  { %v3841_v7 = vpop.xlane.xlu0 %3840  ;;  %3849 = vadd.xlane.f32.xlu2 %v3848_v17 }
0x127b   :  { %v3843_v14 = vmul.f32 %v3841_v7, %v6059_v24 }
0x127d   :  { %v6844_v30 = vsub.f32 %v3831_v60, %v3843_v14 }
0x127f   :  { %v3847_v16 = vmul.f32 %v6844_v30, %v6844_v30 }
0x1281   :  { %v3851_v20 = vsel %vm305_vm0, %v3847_v16, 0.0 }
0x1282   :  { %v4052_v27 = vpop.xlane.xlu0 %4051  ;;  %3852 = vadd.xlane.f32.xlu1 %v3851_v20  ;;  %4054 = vadd.xlane.f32.xlu2 %v4053_v44 }
0x1283   :  { %v4062_v21 = vmul.f32 %v4052_v27, %v6059_v24  ;;  %v4756_v27 = vld [vmem:[%s6946_s16 + $0x4] ss:$0 sm:$0xff] }
0x1285   :  { %v6852_v0 = vsub.f32 %v4042_v13, %v4062_v21 }
0x1287   :  { %v4070_v56 = vmul.f32 %v6852_v0, %v6852_v0 }
0x1289   :  { %v4074_v5 = vsel %vm305_vm0, %v4070_v56, 0.0 }
0x128a   :  { %4075 = vadd.xlane.f32.xlu2 %v4074_v5  ;;  %4057 = vadd.xlane.f32.xlu1 %v4056_v57 }
0x12a3   :  { %v4061_v59 = vpop.xlane.xlu0 %4060 }
0x12a4   :  { %v4065_v28 = vmul.f32 %v4061_v59, %v6059_v24 }
0x12a6   :  { %v6859_v47 = vsub.f32 %v4045_v2, %v4065_v28 }
0x12a8   :  { %v4073_v31 = vmul.f32 %v6859_v47, %v6859_v47 }
0x12aa   :  { %v4083_v37 = vsel %vm305_vm0, %v4073_v31, 0.0 }
0x12ab   :  { %4084 = vadd.xlane.f32.xlu2 %v4083_v37 }
0x12ed   :  { %v3850_v23 = vpop.xlane.xlu2 %3849 }
0x12ee   :  { %v3854_v22 = vmul.f32 %v3850_v23, %v6102_v46  ;;  %v3859_v23 = vmul.f32 %v4756_v27, %v6837_v3 }
0x12f0   :  { %5004 = vrsqrt.f32 %v3854_v22  ;;  %vm3868_vm13 = vcmp.eq.f32.partialorder %v3854_v22, inf  ;;  %v3871_v26 = vand.u32 2147483648, %v3854_v22  ;;  %vm3870_vm14 = vcmp.eq.f32.partialorder %v3854_v22, 0.0 }
0x12f5   :  { %v3853_v48 = vpop.xlane.xlu1 %3852  ;;  %v4055_v40 = vpop.xlane.xlu2 %4054 }
0x12f6   :  { %v5005_v15 = vpop.eup %5004  ;;  %v3855_v12 = vmul.f32 %v3853_v48, %v6102_v46  ;;  %v4063_v18 = vmul.f32 %v4055_v40, %v6059_v24  ;;  %v4758_v40 = vld [vmem:[%s6947_s17 + $0x4] ss:$0 sm:$0xff] }
0x12f7   :  { %v3862_v55 = vmul.f32 %v5005_v15, %v3854_v22 }
0x12f8   :  { %5006 = vrsqrt.f32 %v3855_v12  ;;  %v6867_v25 = vsub.f32 %v4043_v50, %v4063_v18  ;;  %vm3880_vm15 = vcmp.eq.f32.partialorder %v3855_v12, inf  ;;  %v3883_v2 = vand.u32 2147483648, %v3855_v12 }
0x12f9   :  { %v3863_v9 = vmul.f32 %v5005_v15, %v3862_v55  ;;  %vm3882_vm5 = vcmp.eq.f32.partialorder %v3855_v12, 0.0 }
0x12fa   :  { %v4071_v51 = vmul.f32 %v6867_v25, %v6867_v25 }
0x12fb   :  { %v3864_v45 = vmul.f32 0.5, %v3863_v9 }
0x12fc   :  { %v4077_v10 = vsel %vm305_vm0, %v4071_v51, 0.0 }
0x12fd   :  { %v3865_v39 = vsub.f32 1.5, %v3864_v45  ;;  %v4058_v49 = vpop.xlane.xlu1 %4057  ;;  %v4076_v52 = vpop.xlane.xlu2 %4075  ;;  %4078 = vadd.xlane.f32.xlu1 %v4077_v10  ;;  %v3860_v10 = vmul.f32 %v4756_v27, %v6844_v30  ;;  %v6895_v30 = vld [vmem:[%s6946_s16 + $0x5] ss:$0 sm:$0xff] }
0x12fe   :  { %v5007_v6 = vpop.eup %5006  ;;  %v4064_v1 = vmul.f32 %v4058_v49, %v6059_v24  ;;  %v4086_v61 = vmul.f32 %v4076_v52, %v6102_v46 }
0x12ff   :  { %v3866_v32 = vmul.f32 %v5005_v15, %v3865_v39  ;;  %v3874_v54 = vmul.f32 %v5007_v6, %v3855_v12 }
0x1300   :  { %v6874_v29 = vsub.f32 %v4044_v38, %v4064_v1  ;;  %5008 = vrsqrt.f32 %v4086_v61  ;;  %vm4104_vm6 = vcmp.eq.f32.partialorder %v4086_v61, inf  ;;  %v4107_v21 = vand.u32 2147483648, %v4086_v61 }
0x1301   :  { %v3867_v19 = vmul.f32 %v3866_v32, %v3854_v22  ;;  %v3875_v36 = vmul.f32 %v5007_v6, %v3874_v54  ;;  %vm4106_vm8 = vcmp.eq.f32.partialorder %v4086_v61, 0.0 }
0x1302   :  { %v4072_v8 = vmul.f32 %v6874_v29, %v6874_v29 }
0x1303   :  { %v3869_v42 = vsel %vm3868_vm13, %v3854_v22, %v3867_v19  ;;  %v3876_v60 = vmul.f32 0.5, %v3875_v36 }
0x1304   :  { %v3872_v62 = vsel %vm3870_vm14, %v3871_v26, %v3869_v42  ;;  %v4080_v24 = vsel %vm305_vm0, %v4072_v8, 0.0 }
0x1305   :  { %v3885_v11 = vadd.f32 1e-06, %v3872_v62  ;;  %v3877_v13 = vsub.f32 1.5, %v3876_v60  ;;  %4081 = vadd.xlane.f32.xlu0 %v4080_v24  ;;  %v4093_v24 = vmul.f32 %v6895_v30, %v6852_v0 }
0x1306   :  { %v5009_v35 = vpop.eup %5008 }
0x1307   :  { %5010 = vrcp.f32 %v3885_v11  ;;  %v3878_v63 = vmul.f32 %v5007_v6, %v3877_v13  ;;  %v4098_v53 = vmul.f32 %v5009_v35, %v4086_v61  ;;  %v3898_v44 = vand.u32 2147483648, %v3885_v11  ;;  %v6906_v13 = vld [vmem:[%s6947_s17 + $0x5] ss:$0 sm:$0xff]  ;;  %s5442_s17 = smov [#allocation24]  }
0x1308   :  { %v3896_v56 = vand.u32 2147483647, %v3885_v11  ;;  %vm3892_vm9 = vweird.f32 %v3885_v11  ;;  %s4237_s5 = sshll.u32 %s5442_s17, 4  ;;  %s4238_s5 = int_to_ptr.vmem [resolvable:$true] %s4237_s5 }
0x1309   :  { %v3879_v4 = vmul.f32 %v3878_v63, %v3855_v12  ;;  %v4099_v34 = vmul.f32 %v5009_v35, %v4098_v53  ;;  %v3899_v37 = vor.u32 1.1754944e-38, %v3898_v44 }
0x130a   :  { %vm3897_vm2 = vcmp.eq.f32.partialorder %v3896_v56, 8.507059e+37 }
0x130b   :  { %v3881_v43 = vsel %vm3880_vm15, %v3855_v12, %v3879_v4  ;;  %v4100_v58 = vmul.f32 0.5, %v4099_v34 }
0x130c   :  { %v3884_v41 = vsel %vm3882_vm5, %v3883_v2, %v3881_v43 }
0x130d   :  { %v5011_v33 = vpop.eup %5010  ;;  %v3886_v17 = vadd.f32 1e-06, %v3884_v41  ;;  %v4101_v7 = vsub.f32 1.5, %v4100_v58 }
0x130e   :  { %v3888_v14 = vmul.f32 %v5011_v33, %v3885_v11  ;;  %vm3893_vm7 = vweird.f32 %v5011_v33 }
0x130f   :  { %5012 = vrcp.f32 %v3886_v17  ;;  %v4102_v50 = vmul.f32 %v5009_v35, %v4101_v7  ;;  %vm3894_vm1 = vmor %vm3892_vm9, %vm3893_vm7  ;;  %v3913_v55 = vand.u32 2147483648, %v3886_v17  ;;  %v3911_v45 = vand.u32 2147483647, %v3886_v17 }
0x1310   :  { %v3889_v16 = vsub.f32 1.0, %v3888_v14  ;;  %vm3907_vm4 = vweird.f32 %v3886_v17 }
0x1311   :  { %v4103_v20 = vmul.f32 %v4102_v50, %v4086_v61  ;;  %v3914_v49 = vor.u32 1.1754944e-38, %v3913_v55  ;;  %vm3912_vm11 = vcmp.eq.f32.partialorder %v3911_v45, 8.507059e+37 }
0x1312   :  { %v3890_v38 = vmul.f32 %v5011_v33, %v3889_v16 }
0x1313   :  { %v4105_v5 = vsel %vm4104_vm6, %v4086_v61, %v4103_v20 }
0x1314   :  { %v4108_v57 = vsel %vm4106_vm8, %v4107_v21, %v4105_v5  ;;  %v3891_v59 = vadd.f32 %v5011_v33, %v3890_v38  ;;  %v4096_v5 = vmul.f32 %v6895_v30, %v6859_v47 }
0x1315   :  { %v5013_v28 = vpop.eup %5012  ;;  %v4145_v31 = vadd.f32 1e-06, %v4108_v57 }
0x1316   :  { %v3895_v22 = vsel %vm3894_vm1, %v5011_v33, %v3891_v59  ;;  %v3903_v48 = vmul.f32 %v5013_v28, %v3886_v17  ;;  %vm3908_vm3 = vweird.f32 %v5013_v28 }
0x1317   :  { %5014 = vrcp.f32 %v4145_v31  ;;  %v3900_v15 = vsel %vm3897_vm2, %v3899_v37, %v3895_v22  ;;  %vm3909_vm10 = vmor %vm3907_vm4, %vm3908_vm3  ;;  %v4160_v36 = vand.u32 2147483648, %v4145_v31  ;;  %v4158_v42 = vand.u32 2147483647, %v4145_v31 }
0x1318   :  { %v3901_v12 = vmul.f32 %v3900_v15, %v3859_v23  ;;  %v3904_v18 = vsub.f32 1.0, %v3903_v48  ;;  %vm4154_vm13 = vweird.f32 %v4145_v31 }
0x1319   :  { %v4161_v62 = vor.u32 1.1754944e-38, %v4160_v36  ;;  %vm4159_vm15 = vcmp.eq.f32.partialorder %v4158_v42, 8.507059e+37 }
0x131a   :  { %v3905_v9 = vmul.f32 %v5013_v28, %v3904_v18  ;;  %v3920_v51 = vadd.f32 %v4758_v40, %v3901_v12 }
0x131c   :  { %v3906_v39 = vadd.f32 %v5013_v28, %v3905_v9  ;;  %3922 = vst.msk [vmem:[#allocation23] sm:$0xff] %vm305_vm0, %v3920_v51 }
0x131d   :  { %v5015_v3 = vpop.eup %5014 }
0x131e   :  { %v4085_v52 = vpop.xlane.xlu2 %4084  ;;  %v3910_v6 = vsel %vm3909_vm10, %v5013_v28, %v3906_v39  ;;  %v4150_v1 = vmul.f32 %v5015_v3, %v4145_v31  ;;  %vm4155_vm12 = vweird.f32 %v5015_v3 }
0x131f   :  { %v4089_v61 = vmul.f32 %v4085_v52, %v6102_v46  ;;  %v3915_v32 = vsel %vm3912_vm11, %v3914_v49, %v3910_v6  ;;  %vm4156_vm14 = vmor %vm4154_vm13, %vm4155_vm12 }
0x1320   :  { %v3916_v54 = vmul.f32 %v3915_v32, %v3860_v10  ;;  %v4151_v19 = vsub.f32 1.0, %v4150_v1 }
0x1321   :  { %5016 = vrsqrt.f32 %v4089_v61  ;;  %vm4140_vm5 = vcmp.eq.f32.partialorder %v4089_v61, inf  ;;  %v4143_v33 = vand.u32 2147483648, %v4089_v61  ;;  %vm4142_vm6 = vcmp.eq.f32.partialorder %v4089_v61, 0.0 }
0x1322   :  { %v3921_v26 = vadd.f32 %v4758_v40, %v3916_v54  ;;  %v4152_v8 = vmul.f32 %v5015_v3, %v4151_v19 }
0x1324   :  { %3923 = vst.msk [vmem:[#allocation23 + $0x8] sm:$0xff] %vm305_vm0, %v3921_v26  ;;  %v4153_v60 = vadd.f32 %v5015_v3, %v4152_v8 }
0x1325   :  { %4232 = dma.vmem_to_hbm [thread:$0]  %s4225_s6, 256, %s4227_s8, [#allocation4], %s5427_s0, %s5427_s0, %s5428_s20  }
0x1326   :  { %v4157_v11 = vsel %vm4156_vm14, %v5015_v3, %v4153_v60 }
0x1327   :  { %v5017_v35 = vpop.eup %5016  ;;  %v4162_v63 = vsel %vm4159_vm15, %v4161_v62, %v4157_v11 }
0x1328   :  { %v4134_v53 = vmul.f32 %v5017_v35, %v4089_v61  ;;  %v4163_v4 = vmul.f32 %v4162_v63, %v4093_v24 }
0x132a   :  { %v4135_v34 = vmul.f32 %v5017_v35, %v4134_v53  ;;  %v4212_v2 = vadd.f32 %v6906_v13, %v4163_v4  ;;  %v4094_v4 = vmul.f32 %v6895_v30, %v6867_v25  ;;  %v4095_v25 = vmul.f32 %v6895_v30, %v6874_v29 }
0x132c   :  { %v4136_v43 = vmul.f32 0.5, %v4135_v34  ;;  %4216 = vst.msk [vmem:[#allocation24] sm:$0xff] %vm305_vm0, %v4212_v2 }
0x132e   :  { %v4137_v58 = vsub.f32 1.5, %v4136_v43 }
0x1330   :  { %v4138_v41 = vmul.f32 %v5017_v35, %v4137_v58 }
0x1332   :  { %v4139_v0 = vmul.f32 %v4138_v41, %v4089_v61 }
0x1334   :  { %v4141_v17 = vsel %vm4140_vm5, %v4089_v61, %v4139_v0 }
0x1335   :  { %v4144_v7 = vsel %vm4142_vm6, %v4143_v33, %v4141_v17 }
0x1336   :  { %v4148_v14 = vadd.f32 1e-06, %v4144_v7 }
0x1338   :  { %5018 = vrcp.f32 %v4148_v14  ;;  %v4205_v44 = vand.u32 2147483648, %v4148_v14  ;;  %v4203_v21 = vand.u32 2147483647, %v4148_v14  ;;  %vm4199_vm8 = vweird.f32 %v4148_v14 }
0x133a   :  { %v4206_v56 = vor.u32 1.1754944e-38, %v4205_v44  ;;  %vm4204_vm1 = vcmp.eq.f32.partialorder %v4203_v21, 8.507059e+37 }
0x133e   :  { %v5019_v50 = vpop.eup %5018 }
0x133f   :  { %v4195_v16 = vmul.f32 %v5019_v50, %v4148_v14  ;;  %vm4200_vm7 = vweird.f32 %v5019_v50 }
0x1340   :  { %vm4201_vm9 = vmor %vm4199_vm8, %vm4200_vm7 }
0x1341   :  { %v4196_v20 = vsub.f32 1.0, %v4195_v16 }
0x1343   :  { %v4197_v27 = vmul.f32 %v5019_v50, %v4196_v20 }
0x1345   :  { %v4198_v38 = vadd.f32 %v5019_v50, %v4197_v27 }
0x1347   :  { %v4202_v57 = vsel %vm4201_vm9, %v5019_v50, %v4198_v38 }
0x1348   :  { %v4207_v59 = vsel %vm4204_vm1, %v4206_v56, %v4202_v57 }
0x1349   :  { %v4208_v28 = vmul.f32 %v4207_v59, %v4096_v5 }
0x134b   :  { %v4215_v31 = vadd.f32 %v6906_v13, %v4208_v28 }
0x134d   :  { %4219 = vst.msk [vmem:[#allocation24 + $0x18] sm:$0xff] %vm305_vm0, %v4215_v31 }
0x1370   :  { %v4079_v37 = vpop.xlane.xlu1 %4078 }
0x1371   :  { %v4087_v23 = vmul.f32 %v4079_v37, %v6102_v46 }
0x1373   :  { %5020 = vrsqrt.f32 %v4087_v23  ;;  %vm4116_vm2 = vcmp.eq.f32.partialorder %v4087_v23, inf  ;;  %v4119_v3 = vand.u32 2147483648, %v4087_v23  ;;  %vm4118_vm3 = vcmp.eq.f32.partialorder %v4087_v23, 0.0 }
0x1378   :  { %v4082_v22 = vpop.xlane.xlu0 %4081 }
0x1379   :  { %v4088_v48 = vmul.f32 %v4082_v22, %v6102_v46  ;;  %v5021_v40 = vpop.eup %5020 }
0x137a   :  { %v4110_v15 = vmul.f32 %v5021_v40, %v4087_v23 }
0x137b   :  { %5022 = vrsqrt.f32 %v4088_v48  ;;  %vm4128_vm4 = vcmp.eq.f32.partialorder %v4088_v48, inf  ;;  %v4131_v32 = vand.u32 2147483648, %v4088_v48  ;;  %vm4130_vm10 = vcmp.eq.f32.partialorder %v4088_v48, 0.0 }
0x137c   :  { %v4111_v12 = vmul.f32 %v5021_v40, %v4110_v15 }
0x137e   :  { %v4112_v47 = vmul.f32 0.5, %v4111_v12 }
0x1380   :  { %v4113_v55 = vsub.f32 1.5, %v4112_v47 }
0x1381   :  { %v5023_v18 = vpop.eup %5022 }
0x1382   :  { %v4122_v9 = vmul.f32 %v5023_v18, %v4088_v48  ;;  %v4114_v45 = vmul.f32 %v5021_v40, %v4113_v55 }
0x1384   :  { %v4123_v51 = vmul.f32 %v5023_v18, %v4122_v9  ;;  %v4115_v39 = vmul.f32 %v4114_v45, %v4087_v23 }
0x1386   :  { %v4124_v49 = vmul.f32 0.5, %v4123_v51  ;;  %v4117_v10 = vsel %vm4116_vm2, %v4087_v23, %v4115_v39 }
0x1387   :  { %v4120_v52 = vsel %vm4118_vm3, %v4119_v3, %v4117_v10 }
0x1388   :  { %v4125_v6 = vsub.f32 1.5, %v4124_v49  ;;  %v4146_v1 = vadd.f32 1e-06, %v4120_v52 }
0x138a   :  { %v4126_v46 = vmul.f32 %v5023_v18, %v4125_v6  ;;  %5024 = vrcp.f32 %v4146_v1  ;;  %v4175_v60 = vand.u32 2147483648, %v4146_v1  ;;  %v4173_v24 = vand.u32 2147483647, %v4146_v1 }
0x138b   :  { %vm4169_vm12 = vweird.f32 %v4146_v1 }
0x138c   :  { %v4127_v61 = vmul.f32 %v4126_v46, %v4088_v48  ;;  %v4176_v63 = vor.u32 1.1754944e-38, %v4175_v60  ;;  %vm4174_vm14 = vcmp.eq.f32.partialorder %v4173_v24, 8.507059e+37 }
0x138e   :  { %v4129_v54 = vsel %vm4128_vm4, %v4088_v48, %v4127_v61 }
0x138f   :  { %v4132_v19 = vsel %vm4130_vm10, %v4131_v32, %v4129_v54 }
0x1390   :  { %v4147_v36 = vadd.f32 1e-06, %v4132_v19  ;;  %v5025_v26 = vpop.eup %5024 }
0x1391   :  { %v4165_v8 = vmul.f32 %v5025_v26, %v4146_v1  ;;  %vm4170_vm11 = vweird.f32 %v5025_v26 }
0x1392   :  { %5026 = vrcp.f32 %v4147_v36  ;;  %vm4171_vm13 = vmor %vm4169_vm12, %vm4170_vm11  ;;  %v4190_v41 = vand.u32 2147483648, %v4147_v36  ;;  %v4188_v33 = vand.u32 2147483647, %v4147_v36  ;;  %vm4184_vm5 = vweird.f32 %v4147_v36 }
0x1393   :  { %v4166_v42 = vsub.f32 1.0, %v4165_v8 }
0x1394   :  { %v4191_v14 = vor.u32 1.1754944e-38, %v4190_v41  ;;  %vm4189_vm7 = vcmp.eq.f32.partialorder %v4188_v33, 8.507059e+37 }
0x1395   :  { %v4167_v62 = vmul.f32 %v5025_v26, %v4166_v42 }
0x1397   :  { %v4168_v35 = vadd.f32 %v5025_v26, %v4167_v62 }
0x1398   :  { %v5027_v11 = vpop.eup %5026 }
0x1399   :  { %v4180_v53 = vmul.f32 %v5027_v11, %v4147_v36  ;;  %v4172_v34 = vsel %vm4171_vm13, %v5025_v26, %v4168_v35  ;;  %vm4185_vm15 = vweird.f32 %v5027_v11 }
0x139a   :  { %v4177_v2 = vsel %vm4174_vm14, %v4176_v63, %v4172_v34  ;;  %vm4186_vm6 = vmor %vm4184_vm5, %vm4185_vm15 }
0x139b   :  { %v4181_v43 = vsub.f32 1.0, %v4180_v53  ;;  %v4178_v58 = vmul.f32 %v4177_v2, %v4094_v4 }
0x139d   :  { %v4182_v0 = vmul.f32 %v5027_v11, %v4181_v43  ;;  %v4213_v17 = vadd.f32 %v6906_v13, %v4178_v58 }
0x139f   :  { %v4183_v7 = vadd.f32 %v5027_v11, %v4182_v0  ;;  %4217 = vst.msk [vmem:[#allocation24 + $0x8] sm:$0xff] %vm305_vm0, %v4213_v17 }
0x13a1   :  { %v4187_v50 = vsel %vm4186_vm6, %v5027_v11, %v4183_v7 }
0x13a2   :  { %v4192_v16 = vsel %vm4189_vm7, %v4191_v14, %v4187_v50 }
0x13a3   :  { %v4193_v20 = vmul.f32 %v4192_v16, %v4095_v25 }
0x13a5   :  { %v4214_v44 = vadd.f32 %v6906_v13, %v4193_v20 }
0x13a7   :  { %4218 = vst.msk [vmem:[#allocation24 + $0x10] sm:$0xff] %vm305_vm0, %v4214_v44 }
0x13a8   :  { %4245 = dma.vmem_to_hbm [thread:$0]  %s4238_s5, 512, %s4240_s9, [#allocation25], %s5427_s0, %s5427_s0, %s5428_s20  }
0x13a9   :  { %5412 = dma.done.wait [#allocation4], 256  }
0x13aa   :  { %5413 = vsyncadd [#allocation4], 4294967040 }
0x13ab   :  { %5414 = dma.done.wait [#allocation25], 512  }
0x13ac   :  { %5415 = vsyncadd [#allocation25], 4294966784 }
0x13ad   :  { %4254 = vsyncpa [#allocation3], 1 }
0x13ae   :  { %4255 = vsyncpa [#allocation6], 1 }
0x13af   :  { %4256 = vsyncpa [#allocation9], 1 }
0x13b0   :  { %4257 = vsyncpa [#allocation12], 1 }
0x13b1   :  { %4258 = vsyncpa [#allocation15], 1 }
0x13b2   :  { %4259 = vsyncpa [#allocation18], 1 }
0x13b3   :  { %4260 = vsyncpa [#allocation21], 1 }
0x13b4   :  { %4261 = vsyncpa [#allocation4], 1 }
0x13b5   :  { %4262 = vsyncpa [#allocation25], 1 }

</bundles_post_ra>
